<compile_context>
chip_gen: v7x
topology: tpu7x:2x2x1
jax: 0.10.0
libtpu: 0.0.40
codegen_flags: <defaults>
</compile_context>

<pallas_src>
import functools

import jax
import jax.numpy as jnp
from jax.experimental import pallas as pl
from jax.experimental.pallas import tpu as pltpu

_H1 = 1024    # first hidden width
_H2 = 2048    # second hidden width
_H3 = 1024    # third hidden width
_LANE = 128   # lane width / output-padding granule


def _round_up(x, m):
    return (x + m - 1) // m * m


def _decoder_kernel(x_ref,
                    w1_ref, b1_ref,
                    w2_ref, b2_ref,
                    w3_ref, b3_ref,
                    w4_ref, b4_ref,
                    o_ref):
    """Fused forward for one batch tile; all weights are VMEM-resident."""
    x = x_ref[...].astype(jnp.bfloat16)

    # Layer 1: Linear(2*n_in, 1024) (+ folded BN1) + ReLU.
    h1 = jnp.dot(x, w1_ref[...], preferred_element_type=jnp.float32)
    h1 = jnp.maximum(h1 + b1_ref[...], 0.0).astype(jnp.bfloat16)

    # Layer 2: Linear(1024, 2048) (+ folded BN2) + ReLU.
    h2 = jnp.dot(h1, w2_ref[...], preferred_element_type=jnp.float32)
    h2 = jnp.maximum(h2 + b2_ref[...], 0.0).astype(jnp.bfloat16)

    # Layer 3: Linear(2048, 1024) + ReLU.  Dropout is identity in eval mode.
    h3 = jnp.dot(h2, w3_ref[...], preferred_element_type=jnp.float32)
    h3 = jnp.maximum(h3 + b3_ref[...], 0.0).astype(jnp.bfloat16)

    # Layer 4: Linear(1024, n_output_padded) + Softmax(dim=1).
    # Padded output columns carry a -1e30 bias, so exp() == 0 and the
    # softmax over the valid columns is unaffected.
    logits = jnp.dot(h3, w4_ref[...], preferred_element_type=jnp.float32)
    logits = logits + b4_ref[...]
    m = jnp.max(logits, axis=1, keepdims=True)
    e = jnp.exp(logits - m)
    denom = jnp.sum(e, axis=1, keepdims=True)
    # approx=True reciprocal is a possible further (epilogue-only) micro-win;
    # kept exact to preserve the 1e-4 matched-reference tolerance.
    o_ref[...] = (e * pl.reciprocal(denom, approx=False)).astype(o_ref.dtype)


def prepare_params(params, eps=1e-5):
    """One-time operand prep:
      * fold eval-mode BatchNorm into the adjacent Linear
        (w' = w*scale, b' = b*scale + shift),
      * cast weight matrices to bfloat16 (biases stay float32),
      * pad w4/b4 columns to a multiple of 128 lanes (padded bias = -1e30 so
        the in-kernel softmax ignores padded columns).
    """
    def fold(w, b, gamma, beta, rmean, rvar):
        scale = gamma * jax.lax.rsqrt(rvar + eps)
        shift = beta - rmean * scale
        return w * scale[None, :], b * scale + shift

    w1, b1 = fold(params["w1"], params["b1"], params["bn1_gamma"],
                  params["bn1_beta"], params["bn1_mean"], params["bn1_var"])
    w2, b2 = fold(params["w2"], params["b2"], params["bn2_gamma"],
                  params["bn2_beta"], params["bn2_mean"], params["bn2_var"])

    w4 = params["w4"].astype(jnp.float32)
    b4 = params["b4"].astype(jnp.float32)
    n_out = w4.shape[1]
    n_out_pad = _round_up(n_out, _LANE)
    if n_out_pad != n_out:
        w4 = jnp.pad(w4, ((0, 0), (0, n_out_pad - n_out)))
        b4 = jnp.pad(b4, (0, n_out_pad - n_out), constant_values=-1e30)

    return dict(
        w1=w1.astype(jnp.bfloat16), b1=b1[None, :].astype(jnp.float32),
        w2=w2.astype(jnp.bfloat16), b2=b2[None, :].astype(jnp.float32),
        w3=params["w3"].astype(jnp.bfloat16),
        b3=params["b3"][None, :].astype(jnp.float32),
        w4=w4.astype(jnp.bfloat16),
        b4=b4[None, :].astype(jnp.float32),
    )


@functools.partial(jax.jit, static_argnames=("n_output",))
def decoder_forward(inp, icd_version, prep, *, n_output):
    """Concat glue + batch-tiled pallas_call with resident weights."""
    x = jnp.concatenate([inp, icd_version], axis=1).astype(jnp.float32)
    B, d_in = x.shape
    n_out_pad = prep["w4"].shape[1]

    # Batch tiling (single 'parallel' grid axis):
    #  * B <= 128: one tile, padded up to a sublane multiple.
    #  * 128 < B <= 512: TB=128 -> >=2 tiles (keeps both v7x TCs busy).
    #  * B > 512: TB=256 (fills the 256-wide MXU on v6e/v7x).
    if B <= 128:
        TB = _round_up(max(B, 8), 8)
    elif B <= 512:
        TB = 128
    else:
        TB = 256
    B_pad = _round_up(B, TB)
    if B_pad != B:
        x = jnp.pad(x, ((0, B_pad - B), (0, 0)))
    grid = (B_pad // TB,)

    operands = (x, prep["w1"], prep["b1"], prep["w2"], prep["b2"],
                prep["w3"], prep["b3"], prep["w4"], prep["b4"])

    # All weights/biases use constant index_maps -> their blocks never change
    # across the batch grid, so they are DMA'd from HBM once per call.
    in_specs = [
        pl.BlockSpec((TB, d_in), lambda i: (i, 0)),            # x (batch tile)
        pl.BlockSpec((d_in, _H1), lambda i: (0, 0)),           # w1 (resident)
        pl.BlockSpec((1, _H1), lambda i: (0, 0)),              # b1
        pl.BlockSpec((_H1, _H2), lambda i: (0, 0)),            # w2 (resident)
        pl.BlockSpec((1, _H2), lambda i: (0, 0)),              # b2
        pl.BlockSpec((_H2, _H3), lambda i: (0, 0)),            # w3 (resident)
        pl.BlockSpec((1, _H3), lambda i: (0, 0)),              # b3
        pl.BlockSpec((_H3, n_out_pad), lambda i: (0, 0)),      # w4 (resident)
        pl.BlockSpec((1, n_out_pad), lambda i: (0, 0)),        # b4
    ]
    out_specs = pl.BlockSpec((TB, n_out_pad), lambda i: (i, 0))

    flops = 2 * B_pad * (d_in * _H1 + _H1 * _H2 + _H2 * _H3 + _H3 * n_out_pad)
    bytes_accessed = sum(int(op.size) * op.dtype.itemsize for op in operands)
    bytes_accessed += B_pad * n_out_pad * 4
    cost = pl.CostEstimate(flops=int(flops),
                           transcendentals=int(B_pad * n_out_pad),
                           bytes_accessed=int(bytes_accessed))

    # Generation-aware VMEM limit: ~3/4 of physical per-core VMEM
    # (v7x: 64 MiB -> 48 MiB; v6e/v5e: 128 MiB -> 96 MiB).
    try:
        vmem_cap = int(pltpu.get_tpu_info().vmem_capacity_bytes)
    except Exception:
        vmem_cap = 64 * 1024 * 1024
    vmem_limit = min(96 * 1024 * 1024, (vmem_cap * 3) // 4)

    out = pl.pallas_call(
        _decoder_kernel,
        out_shape=jax.ShapeDtypeStruct((B_pad, n_out_pad), jnp.float32),
        grid_spec=pltpu.PrefetchScalarGridSpec(
            num_scalar_prefetch=0,
            grid=grid,
            in_specs=in_specs,
            out_specs=out_specs,
        ),
        compiler_params=pltpu.CompilerParams(
            dimension_semantics=("parallel",),
            vmem_limit_bytes=int(vmem_limit)),
        cost_estimate=cost,
    )(*operands)

    return out[:B, :n_output]


def init_params(key, n_input, n_output):
    """Deterministic synthetic parameters matching the PyTorch module shapes.

    PyTorch Linear weights are (out, in); stored pre-transposed as (in, out)
    for the kernel's x @ W convention.
    """
    keys = jax.random.split(key, 12)
    d_in = 2 * n_input

    def lin(kw, kb, fan_in, fan_out):
        bound = 1.0 / jnp.sqrt(fan_in)
        w = jax.random.uniform(kw, (fan_in, fan_out), jnp.float32, -bound, bound)
        b = jax.random.uniform(kb, (fan_out,), jnp.float32, -bound, bound)
        return w, b

    w1, b1 = lin(keys[0], keys[1], d_in, _H1)
    w2, b2 = lin(keys[2], keys[3], _H1, _H2)
    w3, b3 = lin(keys[4], keys[5], _H2, _H3)
    w4, b4 = lin(keys[6], keys[7], _H3, n_output)

    return dict(
        w1=w1, b1=b1, w2=w2, b2=b2, w3=w3, b3=b3, w4=w4, b4=b4,
        bn1_gamma=1.0 + 0.1 * jax.random.normal(keys[8], (_H1,), jnp.float32),
        bn1_beta=0.1 * jax.random.normal(keys[9], (_H1,), jnp.float32),
        bn1_mean=jnp.zeros((_H1,), jnp.float32),
        bn1_var=jnp.ones((_H1,), jnp.float32),
        bn2_gamma=1.0 + 0.1 * jax.random.normal(keys[10], (_H2,), jnp.float32),
        bn2_beta=0.1 * jax.random.normal(keys[11], (_H2,), jnp.float32),
        bn2_mean=jnp.zeros((_H2,), jnp.float32),
        bn2_var=jnp.ones((_H2,), jnp.float32),
    )


def _reference_forward_f32(inp, icd_version, params):
    """Full-precision pure-JAX mirror of the PyTorch module (eval mode)."""
    eps = 1e-5
    x = jnp.concatenate([inp, icd_version], axis=1)
    h = x @ params["w1"] + params["b1"]
    h = (h - params["bn1_mean"]) / jnp.sqrt(params["bn1_var"] + eps)
    h = h * params["bn1_gamma"] + params["bn1_beta"]
    h = jnp.maximum(h, 0.0)
    h = h @ params["w2"] + params["b2"]
    h = (h - params["bn2_mean"]) / jnp.sqrt(params["bn2_var"] + eps)
    h = h * params["bn2_gamma"] + params["bn2_beta"]
    h = jnp.maximum(h, 0.0)
    h = jnp.maximum(h @ params["w3"] + params["b3"], 0.0)
    logits = h @ params["w4"] + params["b4"]
    return jax.nn.softmax(logits, axis=1)


def _reference_forward_matched(inp, icd_version, prep, n_output):
    """Same math/precision as the kernel (folded BN, bf16 weights & dot LHS)."""
    x = jnp.concatenate([inp, icd_version], axis=1).astype(jnp.bfloat16)
    h1 = jnp.dot(x, prep["w1"], preferred_element_type=jnp.float32) + prep["b1"]
    h1 = jnp.maximum(h1, 0.0).astype(jnp.bfloat16)
    h2 = jnp.dot(h1, prep["w2"], preferred_element_type=jnp.float32) + prep["b2"]
    h2 = jnp.maximum(h2, 0.0).astype(jnp.bfloat16)
    h3 = jnp.dot(h2, prep["w3"], preferred_element_type=jnp.float32) + prep["b3"]
    h3 = jnp.maximum(h3, 0.0).astype(jnp.bfloat16)
    logits = jnp.dot(h3, prep["w4"], preferred_element_type=jnp.float32) + prep["b4"]
    return jax.nn.softmax(logits, axis=1)[:, :n_output]


if __name__ == "__main__":
    key = jax.random.PRNGKey(0)
    k_x, k_icd, k_p, k_p2 = jax.random.split(key, 4)

    # Test 1: lane-aligned output (n_output = 128).
    n_input = 64      # concat gives 2*n_input = 128 features (lane-aligned)
    n_output = 128
    batch = 8

    inp = jax.random.normal(k_x, (batch, n_input), jnp.float32)
    icd_version = jax.random.normal(k_icd, (batch, n_input), jnp.float32)
    params = init_params(k_p, n_input, n_output)
    prep = prepare_params(params)

    out = decoder_forward(inp, icd_version, prep, n_output=n_output)
    out = jax.block_until_ready(out)

    assert out.shape == (batch, n_output)
    assert jnp.allclose(jnp.sum(out, axis=1), 1.0, atol=1e-5)

    # Exact-math check: same folded-BN + bf16-weight formulation as the kernel.
    ref_matched = _reference_forward_matched(inp, icd_version, prep, n_output)
    assert jnp.allclose(out, ref_matched, atol=1e-4, rtol=1e-4)

    # Fidelity to the full-precision (PyTorch-equivalent) eval forward.
    ref_f32 = _reference_forward_f32(inp, icd_version, params)
    assert jnp.allclose(out, ref_f32, atol=2e-3)

    # Test 2: non-lane-aligned output (n_output = 100) exercises the padded
    # w4/b4 path (-1e30 padded bias, output sliced after the call).
    n_output2 = 100
    params2 = init_params(k_p2, n_input, n_output2)
    prep2 = prepare_params(params2)
    out2 = decoder_forward(inp, icd_version, prep2, n_output=n_output2)
    out2 = jax.block_until_ready(out2)

    assert out2.shape == (batch, n_output2)
    assert jnp.allclose(jnp.sum(out2, axis=1), 1.0, atol=1e-5)
    ref2_matched = _reference_forward_matched(inp, icd_version, prep2, n_output2)
    assert jnp.allclose(out2, ref2_matched, atol=1e-4, rtol=1e-4)

    print("KERNEL_OK")
</pallas_src>

<mosaic_0001>
module attributes {stable_mosaic.version = 11 : i64} {
  func.func @_decoder_kernel(%arg0: i32, %arg1: memref<8x128xf32, #tpu.memory_space<vmem>>, %arg2: memref<128x1024xbf16, #tpu.memory_space<vmem>>, %arg3: memref<1x1024xf32, #tpu.memory_space<vmem>>, %arg4: memref<1024x2048xbf16, #tpu.memory_space<vmem>>, %arg5: memref<1x2048xf32, #tpu.memory_space<vmem>>, %arg6: memref<2048x1024xbf16, #tpu.memory_space<vmem>>, %arg7: memref<1x1024xf32, #tpu.memory_space<vmem>>, %arg8: memref<1024x128xbf16, #tpu.memory_space<vmem>>, %arg9: memref<1x128xf32, #tpu.memory_space<vmem>>, %arg10: memref<8x128xf32, #tpu.memory_space<vmem>>) attributes {dimension_semantics = [#tpu.dimension_semantics<parallel>], iteration_bounds = array<i64: 1>, scalar_prefetch = 0 : i64, scratch_operands = 0 : i64, tpu.core_type = #tpu.core_type<tc>, window_params = [{transform_indices = @transform_0, window_bounds = array<i64: 8, 128>}, {pipeline_mode = #tpu.pipeline_mode<synchronous>, transform_indices = @transform_1, window_bounds = array<i64: 128, 1024>}, {pipeline_mode = #tpu.pipeline_mode<synchronous>, transform_indices = @transform_2, window_bounds = array<i64: 1, 1024>}, {pipeline_mode = #tpu.pipeline_mode<synchronous>, transform_indices = @transform_3, window_bounds = array<i64: 1024, 2048>}, {pipeline_mode = #tpu.pipeline_mode<synchronous>, transform_indices = @transform_4, window_bounds = array<i64: 1, 2048>}, {pipeline_mode = #tpu.pipeline_mode<synchronous>, transform_indices = @transform_5, window_bounds = array<i64: 2048, 1024>}, {pipeline_mode = #tpu.pipeline_mode<synchronous>, transform_indices = @transform_6, window_bounds = array<i64: 1, 1024>}, {pipeline_mode = #tpu.pipeline_mode<synchronous>, transform_indices = @transform_7, window_bounds = array<i64: 1024, 128>}, {pipeline_mode = #tpu.pipeline_mode<synchronous>, transform_indices = @transform_8, window_bounds = array<i64: 1, 128>}, {transform_indices = @transform_9, window_bounds = array<i64: 8, 128>}]} {
    %c0 = arith.constant 0 : index
    %c0_0 = arith.constant 0 : index
    %0 = vector.load %arg1[%c0, %c0_0] : memref<8x128xf32, #tpu.memory_space<vmem>>, vector<8x128xf32>
    %1 = arith.truncf %0 : vector<8x128xf32> to vector<8x128xbf16>
    %c0_1 = arith.constant 0 : index
    %c0_2 = arith.constant 0 : index
    %2 = vector.load %arg2[%c0_1, %c0_2] : memref<128x1024xbf16, #tpu.memory_space<vmem>>, vector<128x1024xbf16>
    %cst = arith.constant dense<0.000000e+00> : vector<8x1024xf32>
    %3 = tpu.matmul %1, %2, %cst {dimension_numbers = #tpu.dot_dimension_numbers<[1], [0], [0], [1], [0, 0, 1, 1], [], []>} : vector<8x128xbf16>, vector<128x1024xbf16>, vector<8x1024xf32> -> vector<8x1024xf32>
    %c0_3 = arith.constant 0 : index
    %c0_4 = arith.constant 0 : index
    %4 = vector.load %arg3[%c0_3, %c0_4] : memref<1x1024xf32, #tpu.memory_space<vmem>>, vector<1x1024xf32>
    %5 = vector.broadcast %4 : vector<1x1024xf32> to vector<8x1024xf32>
    %6 = arith.addf %3, %5 : vector<8x1024xf32>
    %cst_5 = arith.constant 0.000000e+00 : f32
    %7 = vector.broadcast %cst_5 : f32 to vector<8x1024xf32>
    %8 = arith.maximumf %6, %7 : vector<8x1024xf32>
    %9 = arith.truncf %8 : vector<8x1024xf32> to vector<8x1024xbf16>
    %c0_6 = arith.constant 0 : index
    %c0_7 = arith.constant 0 : index
    %10 = vector.load %arg4[%c0_6, %c0_7] : memref<1024x2048xbf16, #tpu.memory_space<vmem>>, vector<1024x2048xbf16>
    %cst_8 = arith.constant dense<0.000000e+00> : vector<8x2048xf32>
    %11 = tpu.matmul %9, %10, %cst_8 {dimension_numbers = #tpu.dot_dimension_numbers<[1], [0], [0], [1], [0, 0, 1, 1], [], []>} : vector<8x1024xbf16>, vector<1024x2048xbf16>, vector<8x2048xf32> -> vector<8x2048xf32>
    %c0_9 = arith.constant 0 : index
    %c0_10 = arith.constant 0 : index
    %12 = vector.load %arg5[%c0_9, %c0_10] : memref<1x2048xf32, #tpu.memory_space<vmem>>, vector<1x2048xf32>
    %13 = vector.broadcast %12 : vector<1x2048xf32> to vector<8x2048xf32>
    %14 = arith.addf %11, %13 : vector<8x2048xf32>
    %cst_11 = arith.constant 0.000000e+00 : f32
    %15 = vector.broadcast %cst_11 : f32 to vector<8x2048xf32>
    %16 = arith.maximumf %14, %15 : vector<8x2048xf32>
    %17 = arith.truncf %16 : vector<8x2048xf32> to vector<8x2048xbf16>
    %c0_12 = arith.constant 0 : index
    %c0_13 = arith.constant 0 : index
    %18 = vector.load %arg6[%c0_12, %c0_13] : memref<2048x1024xbf16, #tpu.memory_space<vmem>>, vector<2048x1024xbf16>
    %cst_14 = arith.constant dense<0.000000e+00> : vector<8x1024xf32>
    %19 = tpu.matmul %17, %18, %cst_14 {dimension_numbers = #tpu.dot_dimension_numbers<[1], [0], [0], [1], [0, 0, 1, 1], [], []>} : vector<8x2048xbf16>, vector<2048x1024xbf16>, vector<8x1024xf32> -> vector<8x1024xf32>
    %c0_15 = arith.constant 0 : index
    %c0_16 = arith.constant 0 : index
    %20 = vector.load %arg7[%c0_15, %c0_16] : memref<1x1024xf32, #tpu.memory_space<vmem>>, vector<1x1024xf32>
    %21 = vector.broadcast %20 : vector<1x1024xf32> to vector<8x1024xf32>
    %22 = arith.addf %19, %21 : vector<8x1024xf32>
    %cst_17 = arith.constant 0.000000e+00 : f32
    %23 = vector.broadcast %cst_17 : f32 to vector<8x1024xf32>
    %24 = arith.maximumf %22, %23 : vector<8x1024xf32>
    %25 = arith.truncf %24 : vector<8x1024xf32> to vector<8x1024xbf16>
    %c0_18 = arith.constant 0 : index
    %c0_19 = arith.constant 0 : index
    %26 = vector.load %arg8[%c0_18, %c0_19] : memref<1024x128xbf16, #tpu.memory_space<vmem>>, vector<1024x128xbf16>
    %cst_20 = arith.constant dense<0.000000e+00> : vector<8x128xf32>
    %27 = tpu.matmul %25, %26, %cst_20 {dimension_numbers = #tpu.dot_dimension_numbers<[1], [0], [0], [1], [0, 0, 1, 1], [], []>} : vector<8x1024xbf16>, vector<1024x128xbf16>, vector<8x128xf32> -> vector<8x128xf32>
    %c0_21 = arith.constant 0 : index
    %c0_22 = arith.constant 0 : index
    %28 = vector.load %arg9[%c0_21, %c0_22] : memref<1x128xf32, #tpu.memory_space<vmem>>, vector<1x128xf32>
    %29 = vector.broadcast %28 : vector<1x128xf32> to vector<8x128xf32>
    %30 = arith.addf %27, %29 : vector<8x128xf32>
    %cst_23 = arith.constant dense<0xFF800000> : vector<8xf32>
    %31 = vector.multi_reduction <maximumf>, %30, %cst_23 [1] : vector<8x128xf32> to vector<8xf32>
    %32 = vector.shape_cast %31 : vector<8xf32> to vector<8x1xf32>
    %33 = vector.broadcast %32 : vector<8x1xf32> to vector<8x128xf32>
    %34 = arith.subf %30, %33 : vector<8x128xf32>
    %35 = math.exp %34 : vector<8x128xf32>
    %cst_24 = arith.constant dense<0.000000e+00> : vector<8xf32>
    %36 = vector.multi_reduction <add>, %35, %cst_24 [1] : vector<8x128xf32> to vector<8xf32>
    %37 = vector.shape_cast %36 : vector<8xf32> to vector<8x1xf32>
    %38 = tpu.reciprocal %37 : vector<8x1xf32> -> vector<8x1xf32>
    %39 = vector.broadcast %38 : vector<8x1xf32> to vector<8x128xf32>
    %40 = arith.mulf %35, %39 : vector<8x128xf32>
    %c0_25 = arith.constant 0 : index
    %c0_26 = arith.constant 0 : index
    %41 = vector.load %arg10[%c0_25, %c0_26] : memref<8x128xf32, #tpu.memory_space<vmem>>, vector<8x128xf32>
    tpu.vector_store %arg10[%c0_25, %c0_26], %40 {strides = array<i32>} : memref<8x128xf32, #tpu.memory_space<vmem>>, vector<8x128xf32>,
    return
  }
  func.func @transform_0(%arg0: i32) -> (i32, i32) {
    %c0_i32 = arith.constant 0 : i32
    %c0_i32_0 = arith.constant 0 : i32
    return %arg0, %c0_i32 : i32, i32
  }
  func.func @transform_1(%arg0: i32) -> (i32, i32) {
    %c0_i32 = arith.constant 0 : i32
    %c0_i32_0 = arith.constant 0 : i32
    %c0_i32_1 = arith.constant 0 : i32
    return %c0_i32, %c0_i32_0 : i32, i32
  }
  func.func @transform_2(%arg0: i32) -> (i32, i32) {
    %c0_i32 = arith.constant 0 : i32
    %c0_i32_0 = arith.constant 0 : i32
    %c0_i32_1 = arith.constant 0 : i32
    return %c0_i32, %c0_i32_0 : i32, i32
  }
  func.func @transform_3(%arg0: i32) -> (i32, i32) {
    %c0_i32 = arith.constant 0 : i32
    %c0_i32_0 = arith.constant 0 : i32
    %c0_i32_1 = arith.constant 0 : i32
    return %c0_i32, %c0_i32_0 : i32, i32
  }
  func.func @transform_4(%arg0: i32) -> (i32, i32) {
    %c0_i32 = arith.constant 0 : i32
    %c0_i32_0 = arith.constant 0 : i32
    %c0_i32_1 = arith.constant 0 : i32
    return %c0_i32, %c0_i32_0 : i32, i32
  }
  func.func @transform_5(%arg0: i32) -> (i32, i32) {
    %c0_i32 = arith.constant 0 : i32
    %c0_i32_0 = arith.constant 0 : i32
    %c0_i32_1 = arith.constant 0 : i32
    return %c0_i32, %c0_i32_0 : i32, i32
  }
  func.func @transform_6(%arg0: i32) -> (i32, i32) {
    %c0_i32 = arith.constant 0 : i32
    %c0_i32_0 = arith.constant 0 : i32
    %c0_i32_1 = arith.constant 0 : i32
    return %c0_i32, %c0_i32_0 : i32, i32
  }
  func.func @transform_7(%arg0: i32) -> (i32, i32) {
    %c0_i32 = arith.constant 0 : i32
    %c0_i32_0 = arith.constant 0 : i32
    %c0_i32_1 = arith.constant 0 : i32
    return %c0_i32, %c0_i32_0 : i32, i32
  }
  func.func @transform_8(%arg0: i32) -> (i32, i32) {
    %c0_i32 = arith.constant 0 : i32
    %c0_i32_0 = arith.constant 0 : i32
    %c0_i32_1 = arith.constant 0 : i32
    return %c0_i32, %c0_i32_0 : i32, i32
  }
  func.func @transform_9(%arg0: i32) -> (i32, i32) {
    %c0_i32 = arith.constant 0 : i32
    %c0_i32_0 = arith.constant 0 : i32
    return %arg0, %c0_i32 : i32, i32
  }
}

</mosaic_0001>

<bundles_post_ra>
// kernel: decoder_forward.1
= control target key start
LH: loop header
LB: loop body
LE: loop exit
PB: predicated region body
PF: predicated region fallthrough
CT: control target
= control target key end

     0   :  { %14 = vsyncpa [#allocation3], 0  ;;  %s19884_s0 = inlined_call_operand.vmem [shape: f32[8,128], index: 0, kind: input, shape index: {}]   ;;  %s19885_s1 = inlined_call_operand.hbm [shape: bf16[128,1024], index: 1, kind: input, shape index: {}]   ;;  %s19886_s2 = inlined_call_operand.hbm [shape: f32[1,1024], index: 2, kind: input, shape index: {}]   ;;  %s19887_s3 = inlined_call_operand.hbm [shape: bf16[1024,2048], index: 3, kind: input, shape index: {}]   ;;  %s19888_s4 = inlined_call_operand.hbm [shape: f32[1,2048], index: 4, kind: input, shape index: {}]   ;;  %s19889_s5 = inlined_call_operand.hbm [shape: bf16[2048,1024], index: 5, kind: input, shape index: {}]   ;;  %s19890_s6 = inlined_call_operand.hbm [shape: f32[1,1024], index: 6, kind: input, shape index: {}]   ;;  %s19891_s7 = inlined_call_operand.hbm [shape: bf16[1024,128], index: 7, kind: input, shape index: {}]   ;;  %s19892_s8 = inlined_call_operand.hbm [shape: f32[1,128], index: 8, kind: input, shape index: {}]   ;;  %s19893_s9 = inlined_call_operand.hbm [shape: f32[8,128], index: 9, kind: output, shape index: {}]  }
   0x1   :  { %15 = vsyncpa [#allocation6], 0 }
   0x2   :  { %16 = vsyncpa [#allocation9], 0 }
   0x3   :  { %17 = vsyncpa [#allocation12], 0 }
   0x4   :  { %18 = vsyncpa [#allocation15], 0 }
   0x5   :  { %19 = vsyncpa [#allocation4], 0  ;;  %s19330_s30 = smov [#allocation5]   ;;  %s19331_s11 = smov [#allocation8]  }
   0x6   :  { %s40_s10 = sshll.u32 %s19330_s30, 4  ;;  %s62_s12 = sshll.u32 %s19331_s11, 4  ;;  %s41_s10 = int_to_ptr.vmem [resolvable:$true] %s40_s10  ;;  %s63_s12 = int_to_ptr.vmem [resolvable:$true] %s62_s12 }
   0x7   :  { %s19120_s15 = scalar_lea.hbm %s19886_s2, 128 }
   0x8   :  { %p19121_p0 = scmp.ne.s32.totalorder %s19886_s2, %s19120_s15  ;;  %p19124_p1 = scmp.lt.u32.totalorder %s19120_s15, %s19886_s2 }
   0xa   :  { %p19126_p2 = pnand %p19124_p1, %p19121_p0 }
   0xc   :  { %19129 = shalt.err (!%p19126_p2)
}
   0xd   :  { %s19130_s20 = scalar_lea.vmem %s41_s10, 128  ;;  %p19135_p4 = scmp.lt.s32.totalorder %s41_s10, %s41_s10 }
   0xe   :  { %p19131_p3 = scmp.ne.s32.totalorder %s41_s10, %s19130_s20  ;;  %p19136_p5 = scmp.lt.s32.totalorder %s19130_s20, %s19130_s20 }
  0x10   :  { %p19137_p6 = por %p19136_p5, %p19135_p4 }
  0x12   :  { %p19138_p7 = pnand %p19137_p6, %p19131_p3 }
  0x14   :  { %19141 = shalt.err (!%p19138_p7)
}
  0x15   :  { %43 = dma.hbm_to_vmem [thread:$0]  %s19886_s2, 128, %s41_s10, [#allocation6]  }
  0x16   :  { %s19142_s25 = scalar_lea.hbm %s19888_s4, 256 }
  0x17   :  { %p19143_p8 = scmp.ne.s32.totalorder %s19888_s4, %s19142_s25  ;;  %p19146_p9 = scmp.lt.u32.totalorder %s19142_s25, %s19888_s4 }
  0x19   :  { %p19148_p10 = pnand %p19146_p9, %p19143_p8 }
  0x1b   :  { %19151 = shalt.err (!%p19148_p10)
}
  0x1c   :  { %s19152_s30 = scalar_lea.vmem %s63_s12, 256  ;;  %p19157_p12 = scmp.lt.s32.totalorder %s63_s12, %s63_s12 }
  0x1d   :  { %p19153_p11 = scmp.ne.s32.totalorder %s63_s12, %s19152_s30  ;;  %p19158_p13 = scmp.lt.s32.totalorder %s19152_s30, %s19152_s30 }
  0x1f   :  { %p19159_p0 = por %p19158_p13, %p19157_p12 }
  0x21   :  { %p19160_p1 = pnand %p19159_p0, %p19153_p11 }
  0x23   :  { %19163 = shalt.err (!%p19160_p1)
}
  0x24   :  { %65 = dma.hbm_to_vmem [thread:$0]  %s19888_s4, 256, %s63_s12, [#allocation9]  }
  0x25   :  { %s19332_s11 = smov [#allocation11]   ;;  %s19333_s14 = smov [#allocation2]  }
  0x26   :  { %s84_s13 = sshll.u32 %s19332_s11, 4  ;;  %s27_s15 = sshll.u32 %s19333_s14, 4  ;;  %s85_s13 = int_to_ptr.vmem [resolvable:$true] %s84_s13  ;;  %s19419_s15 = int_to_ptr.vmem [resolvable:$true] %s27_s15 }
  0x27   :  { %s19164_s18 = scalar_lea.hbm %s19890_s6, 128 }
  0x28   :  { %p19165_p2 = scmp.ne.s32.totalorder %s19890_s6, %s19164_s18  ;;  %p19168_p3 = scmp.lt.u32.totalorder %s19164_s18, %s19890_s6 }
  0x2a   :  { %p19170_p4 = pnand %p19168_p3, %p19165_p2 }
  0x2c   :  { %19173 = shalt.err (!%p19170_p4)
}
  0x2d   :  { %s19174_s4 = scalar_lea.vmem %s85_s13, 128  ;;  %p19179_p6 = scmp.lt.s32.totalorder %s85_s13, %s85_s13 }
  0x2e   :  { %p19175_p5 = scmp.ne.s32.totalorder %s85_s13, %s19174_s4  ;;  %p19180_p7 = scmp.lt.s32.totalorder %s19174_s4, %s19174_s4 }
  0x30   :  { %p19181_p8 = por %p19180_p7, %p19179_p6 }
  0x32   :  { %p19182_p9 = pnand %p19181_p8, %p19175_p5 }
  0x34   :  { %19185 = shalt.err (!%p19182_p9)
}
  0x35   :  { %87 = dma.hbm_to_vmem [thread:$0]  %s19890_s6, 128, %s85_s13, [#allocation12]  }
  0x36   :  { %s19186_s26 = scalar_lea.hbm %s19885_s1, 8192 }
  0x37   :  { %p19187_p10 = scmp.ne.s32.totalorder %s19885_s1, %s19186_s26  ;;  %p19190_p11 = scmp.lt.u32.totalorder %s19186_s26, %s19885_s1 }
  0x39   :  { %p19192_p12 = pnand %p19190_p11, %p19187_p10 }
  0x3b   :  { %19195 = shalt.err (!%p19192_p12)
}
  0x3c   :  { %s19196_s2 = scalar_lea.vmem %s19419_s15, 8192  ;;  %p19201_p0 = scmp.lt.s32.totalorder %s19419_s15, %s19419_s15 }
  0x3d   :  { %p19197_p13 = scmp.ne.s32.totalorder %s19419_s15, %s19196_s2  ;;  %p19202_p1 = scmp.lt.s32.totalorder %s19196_s2, %s19196_s2 }
  0x3f   :  { %p19203_p2 = por %p19202_p1, %p19201_p0 }
  0x41   :  { %p19204_p3 = pnand %p19203_p2, %p19197_p13 }
  0x43   :  { %19207 = shalt.err (!%p19204_p3)
}
  0x44   :  { %s19334_s6 = smov 512   ;;  %s19335_s10 = smov 32  }
  0x45   :  { %33 = dma.hbm_to_vmem [thread:$0]  %s19885_s1, 8192, %s19419_s15, [#allocation3], %s19334_s6, %s19334_s6, %s19335_s10  }
  0x46   :  { %s19336_s14 = smov [#allocation7]   ;;  %s19208_s19 = scalar_lea.hbm %s19887_s3, 131072 }
  0x47   :  { %s49_s16 = sshll.u32 %s19336_s14, 4  ;;  %p19209_p4 = scmp.ne.s32.totalorder %s19887_s3, %s19208_s19  ;;  %s50_s16 = int_to_ptr.vmem [resolvable:$true] %s49_s16 }
  0x48   :  { %p19212_p5 = scmp.lt.u32.totalorder %s19208_s19, %s19887_s3 }
  0x4a   :  { %p19214_p6 = pnand %p19212_p5, %p19209_p4 }
  0x4c   :  { %19217 = shalt.err (!%p19214_p6)
}
  0x4d   :  { %s19218_s12 = scalar_lea.vmem %s50_s16, 131072  ;;  %p19223_p8 = scmp.lt.s32.totalorder %s50_s16, %s50_s16 }
  0x4e   :  { %p19219_p7 = scmp.ne.s32.totalorder %s50_s16, %s19218_s12  ;;  %p19224_p9 = scmp.lt.s32.totalorder %s19218_s12, %s19218_s12 }
  0x50   :  { %p19225_p10 = por %p19224_p9, %p19223_p8 }
  0x52   :  { %p19226_p11 = pnand %p19225_p10, %p19219_p7 }
  0x54   :  { %19229 = shalt.err (!%p19226_p11)
}
  0x55   :  { %s19337_s1 = smov 1024   ;;  %s19338_s15 = smov 64  }
  0x56   :  { %55 = dma.hbm_to_vmem [thread:$0]  %s19887_s3, 131072, %s50_s16, [#allocation6], %s19337_s1, %s19337_s1, %s19338_s15  }
  0x57   :  { %s19339_s25 = smov [#allocation10]   ;;  %s19340_s27 = smov [#allocation13]  }
  0x58   :  { %s71_s26 = sshll.u32 %s19339_s25, 4  ;;  %s93_s28 = sshll.u32 %s19340_s27, 4  ;;  %s72_s26 = int_to_ptr.vmem [resolvable:$true] %s71_s26  ;;  %s94_s28 = int_to_ptr.vmem [resolvable:$true] %s93_s28 }
  0x59   :  { %s19230_s2 = scalar_lea.hbm %s19889_s5, 131072 }
  0x5a   :  { %p19231_p12 = scmp.ne.s32.totalorder %s19889_s5, %s19230_s2  ;;  %p19234_p13 = scmp.lt.u32.totalorder %s19230_s2, %s19889_s5 }
  0x5c   :  { %p19236_p0 = pnand %p19234_p13, %p19231_p12 }
  0x5e   :  { %19239 = shalt.err (!%p19236_p0)
}
  0x5f   :  { %s19240_s3 = scalar_lea.vmem %s72_s26, 131072  ;;  %p19245_p2 = scmp.lt.s32.totalorder %s72_s26, %s72_s26 }
  0x60   :  { %p19241_p1 = scmp.ne.s32.totalorder %s72_s26, %s19240_s3  ;;  %p19246_p3 = scmp.lt.s32.totalorder %s19240_s3, %s19240_s3 }
  0x62   :  { %p19247_p4 = por %p19246_p3, %p19245_p2 }
  0x64   :  { %p19248_p5 = pnand %p19247_p4, %p19241_p1 }
  0x66   :  { %19251 = shalt.err (!%p19248_p5)
}
  0x67   :  { %77 = dma.hbm_to_vmem [thread:$0]  %s19889_s5, 131072, %s72_s26, [#allocation9], %s19334_s6, %s19334_s6, %s19335_s10  }
  0x68   :  { %s19252_s21 = scalar_lea.hbm %s19891_s7, 8192 }
  0x69   :  { %p19253_p6 = scmp.ne.s32.totalorder %s19891_s7, %s19252_s21  ;;  %p19256_p7 = scmp.lt.u32.totalorder %s19252_s21, %s19891_s7 }
  0x6b   :  { %p19258_p8 = pnand %p19256_p7, %p19253_p6 }
  0x6d   :  { %19261 = shalt.err (!%p19258_p8)
}
  0x6e   :  { %s19262_s23 = scalar_lea.vmem %s94_s28, 8192  ;;  %p19267_p10 = scmp.lt.s32.totalorder %s94_s28, %s94_s28 }
  0x6f   :  { %p19263_p9 = scmp.ne.s32.totalorder %s94_s28, %s19262_s23  ;;  %p19268_p11 = scmp.lt.s32.totalorder %s19262_s23, %s19262_s23 }
  0x71   :  { %p19269_p12 = por %p19268_p11, %p19267_p10 }
  0x73   :  { %p19270_p13 = pnand %p19269_p12, %p19263_p9 }
  0x75   :  { %19273 = shalt.err (!%p19270_p13)
}
  0x76   :  { %s19341_s5 = smov 4   ;;  %s19342_s24 = smov [#allocation14]  }
  0x77   :  { %99 = dma.hbm_to_vmem [thread:$0]  %s19891_s7, 8192, %s94_s28, [#allocation12], %s19338_s15, %s19338_s15, %s19341_s5  }
  0x78   :  { %s106_s25 = sshll.u32 %s19342_s24, 4  ;;  %s19274_s29 = scalar_lea.hbm %s19892_s8, 16  ;;  %s107_s25 = int_to_ptr.vmem [resolvable:$true] %s106_s25 }
  0x79   :  { %p19275_p0 = scmp.ne.s32.totalorder %s19892_s8, %s19274_s29  ;;  %p19278_p1 = scmp.lt.u32.totalorder %s19274_s29, %s19892_s8 }
  0x7b   :  { %p19280_p2 = pnand %p19278_p1, %p19275_p0 }
  0x7d   :  { %19283 = shalt.err (!%p19280_p2)
}
  0x7e   :  { %s19284_s14 = scalar_lea.vmem %s107_s25, 16  ;;  %s19288_s7 = scalar_lea.vmem %s107_s25, 32 }
  0x7f   :  { %p19285_p3 = scmp.ne.s32.totalorder %s107_s25, %s19284_s14  ;;  %p19289_p4 = scmp.lt.s32.totalorder %s107_s25, %s107_s25 }
  0x80   :  { %p19290_p5 = scmp.lt.s32.totalorder %s19288_s7, %s19284_s14 }
  0x82   :  { %p19291_p6 = por %p19290_p5, %p19289_p4 }
  0x84   :  { %p19292_p7 = pnand %p19291_p6, %p19285_p3 }
  0x86   :  { %19295 = shalt.err (!%p19292_p7)
}
  0x87   :  { %109 = dma.hbm_to_vmem [thread:$0]  %s19892_s8, 16, %s107_s25, [#allocation15]  }
  0x88   :  { %19318 = dma.done.wait [#allocation3], 8192  }
  0x89   :  { %19319 = vsyncadd [#allocation3], 4294959104 }
  0x8a   :  { %19320 = dma.done.wait [#allocation6], 131200  }
  0x8b   :  { %19321 = vsyncadd [#allocation6], 4294836096 }
  0x8c   :  { %19322 = dma.done.wait [#allocation9], 131328  }
  0x8d   :  { %19323 = vsyncadd [#allocation9], 4294835968 }
  0x8e   :  { %19324 = dma.done.wait [#allocation12], 8320  }
  0x8f   :  { %19325 = vsyncadd [#allocation12], 4294958976 }
  0x90   :  { %19326 = dma.done.wait [#allocation15], 16  }
  0x91   :  { %19327 = vsyncadd [#allocation15], 4294967280  ;;  %v19343_v0 = vmov 0   ;;  %v137_v1 = vld [vmem:[#allocation2] sm:$0xff]  ;;  %v138_v14 = vld [vmem:[#allocation2 + $0x8] sm:$0xff] }
  0x92   :  { %595 = vmatprep.mubr.bf16.mxu0 %v19343_v0  ;;  %636 = vmatprep.mubr.bf16.mxu1 %v19343_v0  ;;  %v141_v2 = vld [vmem:[#allocation2 + $0x20] sm:$0xff]  ;;  %v142_v15 = vld [vmem:[#allocation2 + $0x28] sm:$0xff]  ;;  %v139_v58 = vld [vmem:[#allocation2 + $0x10] sm:$0xff] }
  0x93   :  { %v145_v3 = vld [vmem:[#allocation2 + $0x40] sm:$0xff]  ;;  %v16538_v4 = vcombine.high %v137_v1, %v141_v2  ;;  %v16537_v5 = vcombine.low %v137_v1, %v141_v2  ;;  %v146_v16 = vld [vmem:[#allocation2 + $0x48] sm:$0xff]  ;;  %v16540_v18 = vcombine.high %v138_v14, %v142_v15  ;;  %v16539_v19 = vcombine.low %v138_v14, %v142_v15  ;;  %v143_v59 = vld [vmem:[#allocation2 + $0x30] sm:$0xff] }
  0x94   :  { %v149_v6 = vld [vmem:[#allocation2 + $0x60] sm:$0xff]  ;;  %v150_v17 = vld [vmem:[#allocation2 + $0x68] sm:$0xff]  ;;  %v135_v62 = vld [vmem:[%s19884_s0] sm:$0xff]  ;;  %v16542_v2 = vcombine.high %v139_v58, %v143_v59  ;;  %s19344_s0 = smov [#allocation16]  }
  0x95   :  { %v16546_v7 = vcombine.high %v145_v3, %v149_v6  ;;  %v153_v8 = vld [vmem:[#allocation2 + $0x80] sm:$0xff]  ;;  %563 = vmatprep.subr.bf16.mxu0 %v16538_v4  ;;  %v16545_v10 = vcombine.low %v145_v3, %v149_v6  ;;  %v16548_v20 = vcombine.high %v146_v16, %v150_v17  ;;  %v154_v22 = vld [vmem:[#allocation2 + $0x88] sm:$0xff]  ;;  %604 = vmatprep.subr.bf16.mxu1 %v16540_v18  ;;  %v147_v4 = vld [vmem:[#allocation2 + $0x50] sm:$0xff]  ;;  %s16524_s3 = sshll.u32 %s19344_s0, 4  ;;  %s16525_s3 = int_to_ptr.vmem [resolvable:$true] %s16524_s3 }
  0x96   :  { %v157_v9 = vld [vmem:[#allocation2 + $0xa0] sm:$0xff]  ;;  %564 = vmatpush1.bf16.msra.mxu0 %v16537_v5  ;;  %v158_v23 = vld [vmem:[#allocation2 + $0xa8] sm:$0xff]  ;;  %605 = vmatpush1.bf16.msra.mxu1 %v16539_v19  ;;  %v16547_v27 = vcombine.low %v146_v16, %v150_v17  ;;  %v151_v5 = vld [vmem:[#allocation2 + $0x70] sm:$0xff]  ;;  %v19512_v6 = vpack.c.bf16 %v135_v62, %v135_v62  ;;  %s19296_s16 = scalar_lea.vmem %s16525_s3, 128  ;;  %p19301_p9 = scmp.lt.s32.totalorder %s16525_s3, %s16525_s3 }
  0x97   :  { %565 = vmatprep.subr.bf16.mxu0 %v16546_v7  ;;  %v16554_v11 = vcombine.high %v153_v8, %v157_v9  ;;  %v161_v12 = vld [vmem:[#allocation2 + $0xc0] sm:$0xff]  ;;  %v16553_v21 = vcombine.low %v153_v8, %v157_v9  ;;  %606 = vmatprep.subr.bf16.mxu1 %v16548_v20  ;;  %v16556_v28 = vcombine.high %v154_v22, %v158_v23  ;;  %v162_v30 = vld [vmem:[#allocation2 + $0xc8] sm:$0xff]  ;;  %v140_v9 = vld [vmem:[#allocation2 + $0x18] sm:$0xff]  ;;  %p19297_p8 = scmp.ne.s32.totalorder %s16525_s3, %s19296_s16  ;;  %p19302_p10 = scmp.lt.s32.totalorder %s19296_s16, %s19296_s16 }
  0x98   :  { %v165_v13 = vld [vmem:[#allocation2 + $0xe0] sm:$0xff]  ;;  %v166_v31 = vld [vmem:[#allocation2 + $0xe8] sm:$0xff]  ;;  %v16555_v35 = vcombine.low %v154_v22, %v158_v23  ;;  %v16541_v8 = vcombine.low %v139_v58, %v143_v59  ;;  %v159_v14 = vld [vmem:[#allocation2 + $0xb0] sm:$0xff]  ;;  %v16549_v16 = vcombine.low %v147_v4, %v151_v5 }
  0x99   :  { %v16562_v24 = vcombine.high %v161_v12, %v165_v13  ;;  %v169_v25 = vld [vmem:[#allocation2 + $0x100] sm:$0xff]  ;;  %v16561_v29 = vcombine.low %v161_v12, %v165_v13  ;;  %v16564_v36 = vcombine.high %v162_v30, %v166_v31  ;;  %v170_v38 = vld [vmem:[#allocation2 + $0x108] sm:$0xff]  ;;  %v16563_v43 = vcombine.low %v162_v30, %v166_v31  ;;  %v155_v13 = vld [vmem:[#allocation2 + $0x90] sm:$0xff]  ;;  %p19303_p11 = por %p19302_p10, %p19301_p9 }
  0x9a   :  { %566 = vmatpush1.bf16.msra.mxu0 %v16545_v10  ;;  %v173_v26 = vld [vmem:[#allocation2 + $0x120] sm:$0xff]  ;;  %607 = vmatpush1.bf16.msra.mxu1 %v16547_v27  ;;  %v174_v39 = vld [vmem:[#allocation2 + $0x128] sm:$0xff]  ;;  %v144_v10 = vld [vmem:[#allocation2 + $0x38] sm:$0xff]  ;;  %v16558_v19 = vcombine.high %v155_v13, %v159_v14 }
  0x9b   :  { %567 = vmatprep.subr.bf16.mxu0 %v16554_v11  ;;  %v16570_v32 = vcombine.high %v169_v25, %v173_v26  ;;  %v177_v33 = vld [vmem:[#allocation2 + $0x140] sm:$0xff]  ;;  %608 = vmatprep.subr.bf16.mxu1 %v16556_v28  ;;  %v16569_v37 = vcombine.low %v169_v25, %v173_v26  ;;  %v16572_v44 = vcombine.high %v170_v38, %v174_v39  ;;  %v178_v46 = vld [vmem:[#allocation2 + $0x148] sm:$0xff]  ;;  %v148_v17 = vld [vmem:[#allocation2 + $0x58] sm:$0xff]  ;;  %p19304_p12 = pnand %p19303_p11, %p19297_p8 }
  0x9c   :  { %v181_v34 = vld [vmem:[#allocation2 + $0x160] sm:$0xff]  ;;  %v182_v47 = vld [vmem:[#allocation2 + $0x168] sm:$0xff]  ;;  %v16571_v51 = vcombine.low %v170_v38, %v174_v39  ;;  %v16550_v11 = vcombine.high %v147_v4, %v151_v5  ;;  %v16544_v15 = vcombine.high %v140_v9, %v144_v10  ;;  %v152_v18 = vld [vmem:[#allocation2 + $0x78] sm:$0xff]  ;;  %v16543_v22 = vcombine.low %v140_v9, %v144_v10 }
  0x9d   :  { %v16578_v40 = vcombine.high %v177_v33, %v181_v34  ;;  %v185_v41 = vld [vmem:[#allocation2 + $0x180] sm:$0xff]  ;;  %v16577_v45 = vcombine.low %v177_v33, %v181_v34  ;;  %v16580_v52 = vcombine.high %v178_v46, %v182_v47  ;;  %v186_v54 = vld [vmem:[#allocation2 + $0x188] sm:$0xff]  ;;  %v16579_v57 = vcombine.low %v178_v46, %v182_v47  ;;  %v163_v20 = vld [vmem:[#allocation2 + $0xd0] sm:$0xff] }
  0x9e   :  { %568 = vmatpush1.bf16.msra.mxu0 %v16553_v21  ;;  %v189_v42 = vld [vmem:[#allocation2 + $0x1a0] sm:$0xff]  ;;  %609 = vmatpush1.bf16.msra.mxu1 %v16555_v35  ;;  %v190_v55 = vld [vmem:[#allocation2 + $0x1a8] sm:$0xff]  ;;  %v167_v21 = vld [vmem:[#allocation2 + $0xf0] sm:$0xff]  ;;  %v16552_v23 = vcombine.high %v148_v17, %v152_v18  ;;  %v16551_v30 = vcombine.low %v148_v17, %v152_v18 }
  0x9f   :  { %569 = vmatprep.subr.bf16.mxu0 %v16562_v24  ;;  %610 = vmatprep.subr.bf16.mxu1 %v16564_v36  ;;  %v16586_v48 = vcombine.high %v185_v41, %v189_v42  ;;  %v193_v49 = vld [vmem:[#allocation2 + $0x1c0] sm:$0xff]  ;;  %v16585_v53 = vcombine.low %v185_v41, %v189_v42  ;;  %v16588_v60 = vcombine.high %v186_v54, %v190_v55  ;;  %v194_v63 = vld [vmem:[#allocation2 + $0x1c8] sm:$0xff]  ;;  %v171_v25 = vld [vmem:[#allocation2 + $0x110] sm:$0xff] }
  0xa0   :  { %v197_v50 = vld [vmem:[#allocation2 + $0x1e0] sm:$0xff]  ;;  %v198_v1 = vld [vmem:[#allocation2 + $0x1e8] sm:$0xff]  ;;  %v16587_v3 = vcombine.low %v186_v54, %v190_v55  ;;  %v16557_v24 = vcombine.low %v155_v13, %v159_v14  ;;  %v175_v26 = vld [vmem:[#allocation2 + $0x130] sm:$0xff]  ;;  %v16565_v34 = vcombine.low %v163_v20, %v167_v21 }
  0xa1   :  { %v16594_v56 = vcombine.high %v193_v49, %v197_v50  ;;  %v16593_v61 = vcombine.low %v193_v49, %v197_v50  ;;  %v16596_v7 = vcombine.high %v194_v63, %v198_v1  ;;  %v16595_v12 = vcombine.low %v194_v63, %v198_v1  ;;  %v156_v27 = vld [vmem:[#allocation2 + $0x98] sm:$0xff]  ;;  %v179_v35 = vld [vmem:[#allocation2 + $0x150] sm:$0xff]  ;;  %v743_v58 = vld [vmem:[#allocation7] sm:$0xff] }
  0xa2   :  { %570 = vmatpush1.bf16.msra.mxu0 %v16561_v29  ;;  %611 = vmatpush1.bf16.msra.mxu1 %v16563_v43  ;;  %v160_v28 = vld [vmem:[#allocation2 + $0xb8] sm:$0xff]  ;;  %v16566_v29 = vcombine.high %v163_v20, %v167_v21  ;;  %v183_v36 = vld [vmem:[#allocation2 + $0x170] sm:$0xff]  ;;  %v16573_v42 = vcombine.low %v171_v25, %v175_v26  ;;  %v751_v59 = vld [vmem:[#allocation7 + $0x40] sm:$0xff] }
  0xa3   :  { %571 = vmatprep.subr.bf16.mxu0 %v16570_v32  ;;  %612 = vmatprep.subr.bf16.mxu1 %v16572_v44  ;;  %v164_v31 = vld [vmem:[#allocation2 + $0xd8] sm:$0xff]  ;;  %v16560_v33 = vcombine.high %v156_v27, %v160_v28  ;;  %v16559_v38 = vcombine.low %v156_v27, %v160_v28  ;;  %v187_v43 = vld [vmem:[#allocation2 + $0x190] sm:$0xff]  ;;  %v16581_v49 = vcombine.low %v179_v35, %v183_v36  ;;  %v767_v4 = vld [vmem:[#allocation7 + $0xc0] sm:$0xff] }
  0xa4   :  { %v168_v32 = vld [vmem:[#allocation2 + $0xf8] sm:$0xff]  ;;  %v191_v44 = vld [vmem:[#allocation2 + $0x1b0] sm:$0xff]  ;;  %v16602_v5 = vcombine.high %v743_v58, %v751_v59  ;;  %v783_v13 = vld [vmem:[#allocation7 + $0x140] sm:$0xff] }
  0xa5   :  { %v172_v39 = vld [vmem:[#allocation2 + $0x118] sm:$0xff]  ;;  %v16568_v41 = vcombine.high %v164_v31, %v168_v32  ;;  %v195_v50 = vld [vmem:[#allocation2 + $0x1d0] sm:$0xff]  ;;  %v791_v20 = vld [vmem:[#allocation7 + $0x180] sm:$0xff] }
  0xa6   :  { %572 = vmatpush1.bf16.msra.mxu0 %v16569_v37  ;;  %613 = vmatpush1.bf16.msra.mxu1 %v16571_v51  ;;  %v16574_v37 = vcombine.high %v171_v25, %v175_v26  ;;  %v180_v46 = vld [vmem:[#allocation2 + $0x158] sm:$0xff]  ;;  %v199_v51 = vld [vmem:[#allocation2 + $0x1f0] sm:$0xff]  ;;  %v799_v21 = vld [vmem:[#allocation7 + $0x1c0] sm:$0xff] }
  0xa7   :  { %573 = vmatprep.subr.bf16.mxu0 %v16578_v40  ;;  %614 = vmatprep.subr.bf16.mxu1 %v16580_v52  ;;  %v176_v40 = vld [vmem:[#allocation2 + $0x138] sm:$0xff]  ;;  %v16590_v52 = vcombine.high %v187_v43, %v191_v44  ;;  %v752_v9 = vld [vmem:[#allocation7 + $0x48] sm:$0xff]  ;;  %v807_v28 = vld [vmem:[#allocation7 + $0x200] sm:$0xff] }
  0xa8   :  { %v184_v47 = vld [vmem:[#allocation2 + $0x178] sm:$0xff]  ;;  %v768_v17 = vld [vmem:[#allocation7 + $0xc8] sm:$0xff] }
  0xa9   :  { %v188_v54 = vld [vmem:[#allocation2 + $0x198] sm:$0xff]  ;;  %v784_v25 = vld [vmem:[#allocation7 + $0x148] sm:$0xff] }
  0xaa   :  { %574 = vmatpush1.bf16.msra.mxu0 %v16577_v45  ;;  %615 = vmatpush1.bf16.msra.mxu1 %v16579_v57  ;;  %v16567_v45 = vcombine.low %v164_v31, %v168_v32  ;;  %v192_v55 = vld [vmem:[#allocation2 + $0x1b8] sm:$0xff]  ;;  %v16589_v57 = vcombine.low %v187_v43, %v191_v44  ;;  %v792_v32 = vld [vmem:[#allocation7 + $0x188] sm:$0xff]  ;;  %v839_v43 = vld [vmem:[#allocation7 + $0x300] sm:$0xff] }
  0xab   :  { %575 = vmatprep.subr.bf16.mxu0 %v16586_v48  ;;  %616 = vmatprep.subr.bf16.mxu1 %v16588_v60  ;;  %v16576_v48 = vcombine.high %v172_v39, %v176_v40  ;;  %v16598_v60 = vcombine.high %v195_v50, %v199_v51  ;;  %v196_v62 = vld [vmem:[#allocation2 + $0x1d8] sm:$0xff]  ;;  %v16592_v1 = vcombine.high %v188_v54, %v192_v55  ;;  %v847_v44 = vld [vmem:[#allocation7 + $0x340] sm:$0xff] }
  0xac   :  { %v200_v63 = vld [vmem:[#allocation2 + $0x1f8] sm:$0xff] }
  0xad   :  { %v16600_v10 = vcombine.high %v196_v62, %v200_v63 }
  0xae   :  { %576 = vmatpush1.bf16.msra.mxu0 %v16585_v53  ;;  %617 = vmatpush1.bf16.msra.mxu1 %v16587_v3  ;;  %v16575_v53 = vcombine.low %v172_v39, %v176_v40  ;;  %v759_v3 = vld [vmem:[#allocation7 + $0x80] sm:$0xff]  ;;  %v808_v40 = vld [vmem:[#allocation7 + $0x208] sm:$0xff] }
  0xaf   :  { %577 = vmatprep.subr.bf16.mxu0 %v16594_v56  ;;  %618 = vmatprep.subr.bf16.mxu1 %v16596_v7  ;;  %v16584_v56 = vcombine.high %v180_v46, %v184_v47  ;;  %v16591_v7 = vcombine.low %v188_v54, %v192_v55  ;;  %v16618_v14 = vcombine.high %v759_v3, %v767_v4 }
  0xb0   :  { %v16697_v55 = vcombine.low %v839_v43, %v847_v44 }
  0xb2   :  { %578 = vmatpush1.bf16.msra.mxu0 %v16593_v61  ;;  %619 = vmatpush1.bf16.msra.mxu1 %v16595_v12  ;;  %v16583_v61 = vcombine.low %v180_v46, %v184_v47  ;;  %v775_v12 = vld [vmem:[#allocation7 + $0x100] sm:$0xff] }
  0xb3   :  { %645 = vmatprep.subr.bf16.mxu0 %v16542_v2  ;;  %686 = vmatprep.subr.bf16.mxu1 %v16544_v15  ;;  %v16597_v2 = vcombine.low %v195_v50, %v199_v51  ;;  %v16599_v15 = vcombine.low %v196_v62, %v200_v63  ;;  %v16633_v27 = vcombine.low %v775_v12, %v783_v13 }
  0xb4   :  { %v16698_v50 = vcombine.high %v839_v43, %v847_v44 }
  0xb5   :  { %596 = vmatmul.mubr.bf16.vlgmr.msra.gmra.mrb[0].mxu0 %v19512_v6  ;;  %637 = vmatmul.mubr.bf16.vlgmr.msra.gmra.mrb[0].mxu1 %v19512_v6 }
  0xb6   :  { %646 = vmatpush1.bf16.msra.mxu0 %v16541_v8  ;;  %677 = vmatprep.mubr.bf16.mxu0 %v19343_v0  ;;  %v744_v8 = vld [vmem:[#allocation7 + $0x8] sm:$0xff] }
  0xb7   :  { %647 = vmatprep.subr.bf16.mxu0 %v16550_v11  ;;  %687 = vmatpush1.bf16.msra.mxu1 %v16543_v22  ;;  %v16601_v11 = vcombine.low %v743_v58, %v751_v59  ;;  %v16604_v18 = vcombine.high %v744_v8, %v752_v9  ;;  %v16634_v22 = vcombine.high %v775_v12, %v783_v13 }
  0xb8   :  { %718 = vmatprep.mubr.bf16.mxu1 %v19343_v0  ;;  %688 = vmatprep.subr.bf16.mxu1 %v16552_v23  ;;  %v16582_v0 = vcombine.high %v179_v35, %v183_v36  ;;  %v16603_v23 = vcombine.low %v744_v8, %v752_v9  ;;  %v16649_v35 = vcombine.low %v791_v20, %v799_v21  ;;  %v823_v36 = vld [vmem:[#allocation7 + $0x280] sm:$0xff] }
  0xba   :  { %648 = vmatpush1.bf16.msra.mxu0 %v16549_v16  ;;  %v760_v16 = vld [vmem:[#allocation7 + $0x88] sm:$0xff] }
  0xbb   :  { %649 = vmatprep.subr.bf16.mxu0 %v16558_v19  ;;  %689 = vmatpush1.bf16.msra.mxu1 %v16551_v30  ;;  %v16617_v19 = vcombine.low %v759_v3, %v767_v4  ;;  %v16620_v26 = vcombine.high %v760_v16, %v768_v17  ;;  %v16650_v30 = vcombine.high %v791_v20, %v799_v21 }
  0xbc   :  { %690 = vmatprep.subr.bf16.mxu1 %v16560_v33  ;;  %v16619_v31 = vcombine.low %v760_v16, %v768_v17  ;;  %v800_v33 = vld [vmem:[#allocation7 + $0x1c8] sm:$0xff] }
  0xbe   :  { %650 = vmatpush1.bf16.msra.mxu0 %v16557_v24  ;;  %v776_v24 = vld [vmem:[#allocation7 + $0x108] sm:$0xff] }
  0xbf   :  { %651 = vmatprep.subr.bf16.mxu0 %v16566_v29  ;;  %691 = vmatpush1.bf16.msra.mxu1 %v16559_v38  ;;  %v815_v29 = vld [vmem:[#allocation7 + $0x240] sm:$0xff]  ;;  %v16635_v39 = vcombine.low %v776_v24, %v784_v25 }
  0xc0   :  { %692 = vmatprep.subr.bf16.mxu1 %v16568_v41  ;;  %v16666_v38 = vcombine.high %v807_v28, %v815_v29  ;;  %v816_v41 = vld [vmem:[#allocation7 + $0x248] sm:$0xff] }
  0xc1   :  { %v16668_v46 = vcombine.high %v808_v40, %v816_v41  ;;  %v16667_v51 = vcombine.low %v808_v40, %v816_v41 }
  0xc2   :  { %652 = vmatpush1.bf16.msra.mxu0 %v16565_v34  ;;  %v16636_v34 = vcombine.high %v776_v24, %v784_v25 }
  0xc3   :  { %653 = vmatprep.subr.bf16.mxu0 %v16574_v37  ;;  %693 = vmatpush1.bf16.msra.mxu1 %v16567_v45  ;;  %v831_v37 = vld [vmem:[#allocation7 + $0x2c0] sm:$0xff]  ;;  %v16651_v45 = vcombine.low %v792_v32, %v800_v33 }
  0xc4   :  { %694 = vmatprep.subr.bf16.mxu1 %v16576_v48  ;;  %v16681_v47 = vcombine.low %v823_v36, %v831_v37  ;;  %v824_v48 = vld [vmem:[#allocation7 + $0x288] sm:$0xff] }
  0xc6   :  { %654 = vmatpush1.bf16.msra.mxu0 %v16573_v42  ;;  %v16665_v42 = vcombine.low %v807_v28, %v815_v29 }
  0xc7   :  { %655 = vmatprep.subr.bf16.mxu0 %v16582_v0  ;;  %695 = vmatpush1.bf16.msra.mxu1 %v16575_v53  ;;  %v16682_v0 = vcombine.high %v823_v36, %v831_v37  ;;  %v863_v53 = vld [vmem:[#allocation7 + $0x3c0] sm:$0xff] }
  0xc8   :  { %696 = vmatprep.subr.bf16.mxu1 %v16584_v56  ;;  %v840_v56 = vld [vmem:[#allocation7 + $0x308] sm:$0xff] }
  0xca   :  { %656 = vmatpush1.bf16.msra.mxu0 %v16581_v49  ;;  %v832_v49 = vld [vmem:[#allocation7 + $0x2c8] sm:$0xff] }
  0xcb   :  { %657 = vmatprep.subr.bf16.mxu0 %v16590_v52  ;;  %697 = vmatpush1.bf16.msra.mxu1 %v16583_v61  ;;  %v855_v52 = vld [vmem:[#allocation7 + $0x380] sm:$0xff]  ;;  %v16684_v54 = vcombine.high %v824_v48, %v832_v49  ;;  %v16683_v59 = vcombine.low %v824_v48, %v832_v49  ;;  %v952_v48 = vld [vmem:[#allocation7 + $0x688] sm:$0xff] }
  0xcc   :  { %698 = vmatprep.subr.bf16.mxu1 %v16592_v1  ;;  %v16714_v58 = vcombine.high %v855_v52, %v863_v53  ;;  %v879_v61 = vld [vmem:[#allocation7 + $0x440] sm:$0xff]  ;;  %v16713_v63 = vcombine.low %v855_v52, %v863_v53  ;;  %v856_v1 = vld [vmem:[#allocation7 + $0x388] sm:$0xff] }
  0xcd   :  { %v960_v49 = vld [vmem:[#allocation7 + $0x6c8] sm:$0xff]  ;;  %v983_v53 = vld [vmem:[#allocation7 + $0x780] sm:$0xff] }
  0xce   :  { %658 = vmatpush1.bf16.msra.mxu0 %v16589_v57  ;;  %v848_v57 = vld [vmem:[#allocation7 + $0x348] sm:$0xff]  ;;  %v16812_v52 = vcombine.high %v952_v48, %v960_v49 }
  0xcf   :  { %659 = vmatprep.subr.bf16.mxu0 %v16598_v60  ;;  %699 = vmatpush1.bf16.msra.mxu1 %v16591_v7  ;;  %v871_v60 = vld [vmem:[#allocation7 + $0x400] sm:$0xff]  ;;  %v16700_v62 = vcombine.high %v840_v56, %v848_v57  ;;  %v16699_v4 = vcombine.low %v840_v56, %v848_v57  ;;  %v968_v56 = vld [vmem:[#allocation7 + $0x708] sm:$0xff] }
  0xd0   :  { %700 = vmatprep.subr.bf16.mxu1 %v16600_v10  ;;  %v16730_v3 = vcombine.high %v871_v60, %v879_v61  ;;  %v895_v7 = vld [vmem:[#allocation7 + $0x4c0] sm:$0xff]  ;;  %v16729_v9 = vcombine.low %v871_v60, %v879_v61  ;;  %v872_v10 = vld [vmem:[#allocation7 + $0x408] sm:$0xff] }
  0xd1   :  { %v976_v57 = vld [vmem:[#allocation7 + $0x748] sm:$0xff]  ;;  %v999_v61 = vld [vmem:[#allocation7 + $0x800] sm:$0xff] }
  0xd2   :  { %660 = vmatpush1.bf16.msra.mxu0 %v16597_v2  ;;  %v864_v2 = vld [vmem:[#allocation7 + $0x3c8] sm:$0xff]  ;;  %v16828_v60 = vcombine.high %v968_v56, %v976_v57 }
  0xd3   :  { %6971 = vmatprep.subr.bf16.mxu0 %v16602_v5  ;;  %701 = vmatpush1.bf16.msra.mxu1 %v16599_v15  ;;  %v887_v5 = vld [vmem:[#allocation7 + $0x480] sm:$0xff]  ;;  %v16716_v8 = vcombine.high %v856_v1, %v864_v2  ;;  %v16715_v13 = vcombine.low %v856_v1, %v864_v2  ;;  %v984_v2 = vld [vmem:[#allocation7 + $0x788] sm:$0xff] }
  0xd4   :  { %7135 = vmatprep.subr.bf16.mxu1 %v16604_v18  ;;  %v16746_v12 = vcombine.high %v887_v5, %v895_v7  ;;  %v911_v15 = vld [vmem:[#allocation7 + $0x540] sm:$0xff]  ;;  %v16745_v17 = vcombine.low %v887_v5, %v895_v7  ;;  %v888_v18 = vld [vmem:[#allocation7 + $0x488] sm:$0xff] }
  0xd5   :  { %678 = vmatmul.mubr.bf16.vlgmr.msra.gmra.mrb[4].mxu0 %v19512_v6 }
  0xd6   :  { %6972 = vmatpush1.bf16.msra.mxu0 %v16601_v11  ;;  %719 = vmatmul.mubr.bf16.vlgmr.msra.gmra.mrb[4].mxu1 %v19512_v6  ;;  %v16652_v6 = vcombine.high %v792_v32, %v800_v33  ;;  %v880_v11 = vld [vmem:[#allocation7 + $0x448] sm:$0xff] }
  0xd7   :  { %6973 = vmatprep.subr.bf16.mxu0 %v16618_v14  ;;  %7136 = vmatpush1.bf16.msra.mxu1 %v16603_v23  ;;  %v903_v14 = vld [vmem:[#allocation7 + $0x500] sm:$0xff]  ;;  %v16732_v16 = vcombine.high %v872_v10, %v880_v11  ;;  %v16731_v21 = vcombine.low %v872_v10, %v880_v11 }
  0xd8   :  { %7137 = vmatprep.subr.bf16.mxu1 %v16620_v26  ;;  %v16762_v20 = vcombine.high %v903_v14, %v911_v15  ;;  %v927_v23 = vld [vmem:[#allocation7 + $0x5c0] sm:$0xff]  ;;  %v16761_v25 = vcombine.low %v903_v14, %v911_v15  ;;  %v904_v26 = vld [vmem:[#allocation7 + $0x508] sm:$0xff] }
  0xda   :  { %6974 = vmatpush1.bf16.msra.mxu0 %v16617_v19  ;;  %v896_v19 = vld [vmem:[#allocation7 + $0x4c8] sm:$0xff] }
  0xdb   :  { %6975 = vmatprep.subr.bf16.mxu0 %v16634_v22  ;;  %7138 = vmatpush1.bf16.msra.mxu1 %v16619_v31  ;;  %v919_v22 = vld [vmem:[#allocation7 + $0x580] sm:$0xff]  ;;  %v16748_v24 = vcombine.high %v888_v18, %v896_v19  ;;  %v16747_v29 = vcombine.low %v888_v18, %v896_v19 }
  0xdc   :  { %7139 = vmatprep.subr.bf16.mxu1 %v16636_v34  ;;  %v16778_v28 = vcombine.high %v919_v22, %v927_v23  ;;  %v943_v31 = vld [vmem:[#allocation7 + $0x640] sm:$0xff]  ;;  %v16777_v33 = vcombine.low %v919_v22, %v927_v23  ;;  %v920_v34 = vld [vmem:[#allocation7 + $0x588] sm:$0xff] }
  0xde   :  { %6976 = vmatpush1.bf16.msra.mxu0 %v16633_v27  ;;  %v912_v27 = vld [vmem:[#allocation7 + $0x548] sm:$0xff] }
  0xdf   :  { %6977 = vmatprep.subr.bf16.mxu0 %v16650_v30  ;;  %7140 = vmatpush1.bf16.msra.mxu1 %v16635_v39  ;;  %v935_v30 = vld [vmem:[#allocation7 + $0x600] sm:$0xff]  ;;  %v16764_v32 = vcombine.high %v904_v26, %v912_v27  ;;  %v16763_v37 = vcombine.low %v904_v26, %v912_v27 }
  0xe0   :  { %7141 = vmatprep.subr.bf16.mxu1 %v16652_v6  ;;  %v16794_v36 = vcombine.high %v935_v30, %v943_v31  ;;  %v959_v39 = vld [vmem:[#allocation7 + $0x6c0] sm:$0xff]  ;;  %v16793_v41 = vcombine.low %v935_v30, %v943_v31  ;;  %v936_v6 = vld [vmem:[#allocation7 + $0x608] sm:$0xff] }
  0xe1   :  { %v1023_v30 = vld [vmem:[#allocation7 + $0x8c0] sm:$0xff]  ;;  %v1016_v31 = vld [vmem:[#allocation7 + $0x888] sm:$0xff] }
  0xe2   :  { %6978 = vmatpush1.bf16.msra.mxu0 %v16649_v35  ;;  %v928_v35 = vld [vmem:[#allocation7 + $0x5c8] sm:$0xff] }
  0xe3   :  { %6979 = vmatprep.subr.bf16.mxu0 %v16666_v38  ;;  %7142 = vmatpush1.bf16.msra.mxu1 %v16651_v45  ;;  %v951_v38 = vld [vmem:[#allocation7 + $0x680] sm:$0xff]  ;;  %v16780_v40 = vcombine.high %v920_v34, %v928_v35  ;;  %v16779_v44 = vcombine.low %v920_v34, %v928_v35 }
  0xe4   :  { %7143 = vmatprep.subr.bf16.mxu1 %v16668_v46  ;;  %v16810_v43 = vcombine.high %v951_v38, %v959_v39  ;;  %v967_v45 = vld [vmem:[#allocation7 + $0x700] sm:$0xff] }
  0xe5   :  { %v975_v46 = vld [vmem:[#allocation7 + $0x740] sm:$0xff] }
  0xe6   :  { %6980 = vmatpush1.bf16.msra.mxu0 %v16665_v42  ;;  %v944_v42 = vld [vmem:[#allocation7 + $0x648] sm:$0xff] }
  0xe7   :  { %6981 = vmatprep.subr.bf16.mxu0 %v16682_v0  ;;  %7144 = vmatpush1.bf16.msra.mxu1 %v16667_v51  ;;  %v16796_v0 = vcombine.high %v936_v6, %v944_v42  ;;  %v16795_v51 = vcombine.low %v936_v6, %v944_v42  ;;  %v1032_v6 = vld [vmem:[#allocation7 + $0x908] sm:$0xff] }
  0xe8   :  { %7145 = vmatprep.subr.bf16.mxu1 %v16684_v54  ;;  %v991_v54 = vld [vmem:[#allocation7 + $0x7c0] sm:$0xff]  ;;  %v1040_v42 = vld [vmem:[#allocation7 + $0x948] sm:$0xff] }
  0xe9   :  { %v16841_v1 = vcombine.low %v983_v53, %v991_v54 }
  0xea   :  { %6982 = vmatpush1.bf16.msra.mxu0 %v16681_v47  ;;  %v16809_v47 = vcombine.low %v951_v38, %v959_v39  ;;  %v1031_v39 = vld [vmem:[#allocation7 + $0x900] sm:$0xff] }
  0xeb   :  { %6983 = vmatprep.subr.bf16.mxu0 %v16698_v50  ;;  %7146 = vmatpush1.bf16.msra.mxu1 %v16683_v59  ;;  %v16826_v50 = vcombine.high %v967_v45, %v975_v46  ;;  %v16811_v59 = vcombine.low %v952_v48, %v960_v49  ;;  %v16892_v49 = vcombine.high %v1032_v6, %v1040_v42 }
  0xec   :  { %7147 = vmatprep.subr.bf16.mxu1 %v16700_v62  ;;  %v1007_v62 = vld [vmem:[#allocation7 + $0x840] sm:$0xff] }
  0xed   :  { %v16857_v5 = vcombine.low %v999_v61, %v1007_v62  ;;  %v16858_v7 = vcombine.high %v999_v61, %v1007_v62  ;;  %v1064_v61 = vld [vmem:[#allocation7 + $0xa08] sm:$0xff] }
  0xee   :  { %6984 = vmatpush1.bf16.msra.mxu0 %v16697_v55  ;;  %v16825_v55 = vcombine.low %v967_v45, %v975_v46  ;;  %v1072_v62 = vld [vmem:[#allocation7 + $0xa48] sm:$0xff] }
  0xef   :  { %6985 = vmatprep.subr.bf16.mxu0 %v16714_v58  ;;  %7148 = vmatpush1.bf16.msra.mxu1 %v16699_v4  ;;  %v16842_v58 = vcombine.high %v983_v53, %v991_v54  ;;  %v1008_v4 = vld [vmem:[#allocation7 + $0x848] sm:$0xff] }
  0xf0   :  { %7149 = vmatprep.subr.bf16.mxu1 %v16716_v8  ;;  %v1056_v53 = vld [vmem:[#allocation7 + $0x9c8] sm:$0xff] }
  0xf2   :  { %6986 = vmatpush1.bf16.msra.mxu0 %v16713_v63  ;;  %v1000_v63 = vld [vmem:[#allocation7 + $0x808] sm:$0xff] }
  0xf3   :  { %6987 = vmatprep.subr.bf16.mxu0 %v16730_v3  ;;  %7150 = vmatpush1.bf16.msra.mxu1 %v16715_v13  ;;  %v992_v3 = vld [vmem:[#allocation7 + $0x7c8] sm:$0xff]  ;;  %v16859_v8 = vcombine.low %v1000_v63, %v1008_v4  ;;  %v203_v13 = vlaneseq }
  0xf4   :  { %7151 = vmatprep.subr.bf16.mxu1 %v16732_v16  ;;  %v16844_v10 = vcombine.high %v984_v2, %v992_v3  ;;  %v16843_v11 = vcombine.low %v984_v2, %v992_v3  ;;  %v19525_v16 = vld [vmem:[#allocation5] sm:$0xff]  ;;  %v16924_v3 = vcombine.high %v1064_v61, %v1072_v62 }
  0xf5   :  { %v19520_v14 = vshrl.u32 %v203_v13, 7  ;;  %v1095_v13 = vld [vmem:[#allocation7 + $0xb00] sm:$0xff] }
  0xf6   :  { %6988 = vmatpush1.bf16.msra.mxu0 %v16729_v9  ;;  %v16827_v9 = vcombine.low %v968_v56, %v976_v57  ;;  %v16891_v56 = vcombine.low %v1032_v6, %v1040_v42 }
  0xf7   :  { %6989 = vmatprep.subr.bf16.mxu0 %v16746_v12  ;;  %7152 = vmatpush1.bf16.msra.mxu1 %v16731_v21  ;;  %v16860_v12 = vcombine.high %v1000_v63, %v1008_v4  ;;  %v19523_v15 = vsub.s32 0, %v19520_v14  ;;  %v19535_v21 = vsub.s32 3, %v19520_v14  ;;  %v1079_v4 = vld [vmem:[#allocation7 + $0xa80] sm:$0xff] }
  0xf8   :  { %7153 = vmatprep.subr.bf16.mxu1 %v16748_v24 }
  0xf9   :  { %v206_v18 = vrot.slane %v19525_v16, %v19523_v15 }
  0xfa   :  { %6990 = vmatpush1.bf16.msra.mxu0 %v16745_v17  ;;  %v19528_v17 = vsub.s32 1, %v19520_v14 }
  0xfb   :  { %6991 = vmatprep.subr.bf16.mxu0 %v16762_v20  ;;  %7154 = vmatpush1.bf16.msra.mxu1 %v16747_v29 }
  0xfc   :  { %7155 = vmatprep.subr.bf16.mxu1 %v16764_v32  ;;  %v210_v19 = vrot.slane %v19525_v16, %v19528_v17  ;;  %v1024_v32 = vld [vmem:[#allocation7 + $0x8c8] sm:$0xff] }
  0xfd   :  { %v16876_v38 = vcombine.high %v1016_v31, %v1024_v32  ;;  %v16875_v46 = vcombine.low %v1016_v31, %v1024_v32 }
  0xfe   :  { %6992 = vmatpush1.bf16.msra.mxu0 %v16761_v25 }
  0xff   :  { %6993 = vmatprep.subr.bf16.mxu0 %v16778_v28  ;;  %7156 = vmatpush1.bf16.msra.mxu1 %v16763_v37  ;;  %v1015_v28 = vld [vmem:[#allocation7 + $0x880] sm:$0xff] }
 0x100   :  { %7157 = vmatprep.subr.bf16.mxu1 %v16780_v40  ;;  %v16874_v37 = vcombine.high %v1015_v28, %v1023_v30  ;;  %v16873_v45 = vcombine.low %v1015_v28, %v1023_v30  ;;  %v1112_v28 = vld [vmem:[#allocation7 + $0xb88] sm:$0xff] }
 0x102   :  { %6994 = vmatpush1.bf16.msra.mxu0 %v16777_v33  ;;  %v218_v33 = vrot.slane %v19525_v16, %v19535_v21 }
 0x103   :  { %6995 = vmatprep.subr.bf16.mxu0 %v16794_v36  ;;  %7158 = vmatpush1.bf16.msra.mxu1 %v16779_v44 }
 0x104   :  { %7159 = vmatprep.subr.bf16.mxu1 %v16796_v0 }
 0x106   :  { %6996 = vmatpush1.bf16.msra.mxu0 %v16793_v41  ;;  %v1039_v41 = vld [vmem:[#allocation7 + $0x940] sm:$0xff] }
 0x107   :  { %6997 = vmatprep.subr.bf16.mxu0 %v16810_v43  ;;  %7160 = vmatpush1.bf16.msra.mxu1 %v16795_v51  ;;  %v16890_v48 = vcombine.high %v1031_v39, %v1039_v41  ;;  %v1055_v51 = vld [vmem:[#allocation7 + $0x9c0] sm:$0xff] }
 0x108   :  { %7161 = vmatprep.subr.bf16.mxu1 %v16812_v52  ;;  %v1048_v52 = vld [vmem:[#allocation7 + $0x988] sm:$0xff] }
 0x10a   :  { %6998 = vmatpush1.bf16.msra.mxu0 %v16809_v47 }
 0x10b   :  { %6999 = vmatprep.subr.bf16.mxu0 %v16826_v50  ;;  %7162 = vmatpush1.bf16.msra.mxu1 %v16811_v59  ;;  %v1047_v50 = vld [vmem:[#allocation7 + $0x980] sm:$0xff] }
 0x10c   :  { %7163 = vmatprep.subr.bf16.mxu1 %v16828_v60  ;;  %v16906_v57 = vcombine.high %v1047_v50, %v1055_v51  ;;  %v1063_v59 = vld [vmem:[#allocation7 + $0xa00] sm:$0xff]  ;;  %v16905_v63 = vcombine.low %v1047_v50, %v1055_v51  ;;  %v1152_v50 = vld [vmem:[#allocation7 + $0xcc8] sm:$0xff] }
 0x10d   :  { %v1071_v60 = vld [vmem:[#allocation7 + $0xa40] sm:$0xff] }
 0x10e   :  { %7000 = vmatpush1.bf16.msra.mxu0 %v16825_v55  ;;  %v16889_v55 = vcombine.low %v1031_v39, %v1039_v41  ;;  %v16922_v2 = vcombine.high %v1063_v59, %v1071_v60  ;;  %v1128_v39 = vld [vmem:[#allocation7 + $0xc08] sm:$0xff] }
 0x10f   :  { %7001 = vmatprep.subr.bf16.mxu0 %v16842_v58  ;;  %7164 = vmatpush1.bf16.msra.mxu1 %v16827_v9  ;;  %v16908_v58 = vcombine.high %v1048_v52, %v1056_v53  ;;  %v16921_v9 = vcombine.low %v1063_v59, %v1071_v60  ;;  %v1167_v59 = vld [vmem:[#allocation7 + $0xd40] sm:$0xff]  ;;  %v1160_v60 = vld [vmem:[#allocation7 + $0xd08] sm:$0xff] }
 0x110   :  { %7165 = vmatprep.subr.bf16.mxu1 %v16844_v10  ;;  %v16923_v10 = vcombine.low %v1064_v61, %v1072_v62  ;;  %v1168_v61 = vld [vmem:[#allocation7 + $0xd48] sm:$0xff] }
 0x112   :  { %7002 = vmatpush1.bf16.msra.mxu0 %v16841_v1  ;;  %v16907_v1 = vcombine.low %v1048_v52, %v1056_v53 }
 0x113   :  { %7012 = vmatprep.subr.bf16.mxu0 %v16858_v7  ;;  %7166 = vmatpush1.bf16.msra.mxu1 %v16843_v11  ;;  %v1080_v7 = vld [vmem:[#allocation7 + $0xa88] sm:$0xff] }
 0x114   :  { %7176 = vmatprep.subr.bf16.mxu1 %v16860_v12 }
 0x188   :  { %v597_v20 = vpop.f32.mrb[0].mxu0  ;;  %v19541_v35 = vpop.f32.mrb[0].mxu1 }
 0x189   :  { %v598_v22 = vadd.f32 %v597_v20, %v206_v18  ;;  %v599_v23 = vpop.f32.mrb[1].mxu0  ;;  %v640_v40 = vpop.f32.mrb[1].mxu1  ;;  %v1103_v18 = vld [vmem:[#allocation7 + $0xb40] sm:$0xff]  ;;  %v1104_v20 = vld [vmem:[#allocation7 + $0xb48] sm:$0xff] }
 0x18a   :  { %v600_v24 = vadd.f32 %v599_v23, %v210_v19  ;;  %v601_v25 = vpop.f32.mrb[2].mxu0  ;;  %v641_v43 = vadd.f32 %v640_v40, %v218_v33  ;;  %v642_v44 = vpop.f32.mrb[2].mxu1  ;;  %v1096_v19 = vld [vmem:[#allocation7 + $0xb08] sm:$0xff]  ;;  %v16953_v30 = vcombine.low %v1095_v13, %v1103_v18 }
 0x18b   :  { %v727_v26 = vmax.f32 %v598_v22, 0.0  ;;  %v602_v27 = vpop.f32.mrb[3].mxu0  ;;  %v643_v0 = vpop.f32.mrb[3].mxu1  ;;  %v16956_v25 = vcombine.high %v1096_v19, %v1104_v20  ;;  %v16955_v31 = vcombine.low %v1096_v19, %v1104_v20  ;;  %v1136_v40 = vld [vmem:[#allocation7 + $0xc48] sm:$0xff]  ;;  %v1199_v19 = vld [vmem:[#allocation7 + $0xe40] sm:$0xff] }
 0x18c   :  { %v728_v29 = vmax.f32 %v600_v24, 0.0  ;;  %v730_v47 = vmax.f32 %v641_v43, 0.0  ;;  %v16954_v24 = vcombine.high %v1095_v13, %v1103_v18  ;;  %v1119_v27 = vld [vmem:[#allocation7 + $0xbc0] sm:$0xff]  ;;  %v16987_v52 = vcombine.low %v1128_v39, %v1136_v40  ;;  %v1192_v20 = vld [vmem:[#allocation7 + $0xe08] sm:$0xff] }
 0x18d   :  { %v19543_v36 = vpack.c.bf16 %v727_v26, %v727_v26  ;;  %v1111_v26 = vld [vmem:[#allocation7 + $0xb80] sm:$0xff] }
 0x18e   :  { %v19539_v34 = vpack.c.bf16 %v728_v29, %v728_v29  ;;  %v19549_v54 = vpack.c.bf16 %v730_v47, %v730_v47  ;;  %v1120_v29 = vld [vmem:[#allocation7 + $0xbc8] sm:$0xff]  ;;  %v16970_v32 = vcombine.high %v1111_v26, %v1119_v27  ;;  %v16969_v42 = vcombine.low %v1111_v26, %v1119_v27  ;;  %v1191_v18 = vld [vmem:[#allocation7 + $0xe00] sm:$0xff] }
 0x18f   :  { %v16972_v33 = vcombine.high %v1112_v28, %v1120_v29  ;;  %v16971_v43 = vcombine.low %v1112_v28, %v1120_v29  ;;  %v1207_v27 = vld [vmem:[#allocation7 + $0xe80] sm:$0xff]  ;;  %v1208_v29 = vld [vmem:[#allocation7 + $0xe88] sm:$0xff] }
 0x190   :  { %7003 = vmatprep.mubr.bf16.mxu0 %v19539_v34  ;;  %7167 = vmatprep.mubr.bf16.mxu1 %v19539_v34  ;;  %v1215_v28 = vld [vmem:[#allocation7 + $0xec0] sm:$0xff] }
 0x191   :  { %7004 = vmatmul.mubr.bf16.vlgmr.msra.gmra.mrb[8].mxu0 %v19543_v36  ;;  %7168 = vmatmul.mubr.bf16.vlgmr.msra.gmra.mrb[8].mxu1 %v19543_v36 }
 0x192   :  { %7013 = vmatpush1.bf16.msra.mxu0 %v16857_v5  ;;  %7177 = vmatpush1.bf16.msra.mxu1 %v16859_v8  ;;  %v1087_v5 = vld [vmem:[#allocation7 + $0xac0] sm:$0xff]  ;;  %v1088_v8 = vld [vmem:[#allocation7 + $0xac8] sm:$0xff] }
 0x193   :  { %7014 = vmatprep.subr.bf16.mxu0 %v16874_v37  ;;  %7178 = vmatprep.subr.bf16.mxu1 %v16876_v38  ;;  %v16938_v11 = vcombine.high %v1079_v4, %v1087_v5  ;;  %v16940_v12 = vcombine.high %v1080_v7, %v1088_v8  ;;  %v16937_v22 = vcombine.low %v1079_v4, %v1087_v5  ;;  %v1127_v37 = vld [vmem:[#allocation7 + $0xc00] sm:$0xff] }
 0x194   :  { %7044 = vmatprep.mubr.bf16.mxu0 %v19549_v54  ;;  %7208 = vmatprep.mubr.bf16.mxu1 %v19549_v54  ;;  %v16939_v23 = vcombine.low %v1080_v7, %v1088_v8  ;;  %v1135_v38 = vld [vmem:[#allocation7 + $0xc40] sm:$0xff]  ;;  %v17020_v4 = vcombine.high %v1160_v60, %v1168_v61  ;;  %v1176_v8 = vld [vmem:[#allocation7 + $0xd88] sm:$0xff] }
 0x195   :  { %v16986_v0 = vcombine.high %v1127_v37, %v1135_v38  ;;  %v16985_v51 = vcombine.low %v1127_v37, %v1135_v38  ;;  %v1175_v5 = vld [vmem:[#allocation7 + $0xd80] sm:$0xff]  ;;  %v17066_v37 = vcombine.high %v1207_v27, %v1215_v28 }
 0x196   :  { %7015 = vmatpush1.bf16.msra.mxu0 %v16873_v45  ;;  %7179 = vmatpush1.bf16.msra.mxu1 %v16875_v46  ;;  %v16988_v45 = vcombine.high %v1128_v39, %v1136_v40  ;;  %v1143_v46 = vld [vmem:[#allocation7 + $0xc80] sm:$0xff] }
 0x197   :  { %7016 = vmatprep.subr.bf16.mxu0 %v16890_v48  ;;  %7180 = vmatprep.subr.bf16.mxu1 %v16892_v49  ;;  %v1151_v48 = vld [vmem:[#allocation7 + $0xcc0] sm:$0xff]  ;;  %v1144_v49 = vld [vmem:[#allocation7 + $0xc88] sm:$0xff] }
 0x198   :  { %v1183_v7 = vld [vmem:[#allocation7 + $0xdc0] sm:$0xff] }
 0x199   :  { %v1223_v39 = vld [vmem:[#allocation7 + $0xf00] sm:$0xff] }
 0x19a   :  { %7017 = vmatpush1.bf16.msra.mxu0 %v16889_v55  ;;  %7181 = vmatpush1.bf16.msra.mxu1 %v16891_v56  ;;  %v17002_v55 = vcombine.high %v1143_v46, %v1151_v48  ;;  %v17004_v56 = vcombine.high %v1144_v49, %v1152_v50  ;;  %v1231_v40 = vld [vmem:[#allocation7 + $0xf40] sm:$0xff] }
 0x19b   :  { %7018 = vmatprep.subr.bf16.mxu0 %v16906_v57  ;;  %7182 = vmatprep.subr.bf16.mxu1 %v16908_v58  ;;  %v1159_v57 = vld [vmem:[#allocation7 + $0xd00] sm:$0xff] }
 0x19e   :  { %7019 = vmatpush1.bf16.msra.mxu0 %v16905_v63  ;;  %7183 = vmatpush1.bf16.msra.mxu1 %v16907_v1  ;;  %v17001_v1 = vcombine.low %v1143_v46, %v1151_v48 }
 0x19f   :  { %7020 = vmatprep.subr.bf16.mxu0 %v16922_v2  ;;  %7184 = vmatprep.subr.bf16.mxu1 %v16924_v3  ;;  %v17003_v2 = vcombine.low %v1144_v49, %v1152_v50  ;;  %v17018_v3 = vcombine.high %v1159_v57, %v1167_v59  ;;  %v1239_v49 = vld [vmem:[#allocation7 + $0xf80] sm:$0xff] }
 0x1a0   :  { %v1247_v50 = vld [vmem:[#allocation7 + $0xfc0] sm:$0xff] }
 0x1a2   :  { %7021 = vmatpush1.bf16.msra.mxu0 %v16921_v9  ;;  %7185 = vmatpush1.bf16.msra.mxu1 %v16923_v10  ;;  %v1184_v9 = vld [vmem:[#allocation7 + $0xdc8] sm:$0xff]  ;;  %v17017_v10 = vcombine.low %v1159_v57, %v1167_v59  ;;  %v17081_v57 = vcombine.low %v1223_v39, %v1231_v40 }
 0x1a3   :  { %7022 = vmatprep.subr.bf16.mxu0 %v16938_v11  ;;  %7186 = vmatprep.subr.bf16.mxu1 %v16940_v12  ;;  %v17019_v11 = vcombine.low %v1160_v60, %v1168_v61  ;;  %v17034_v12 = vcombine.high %v1175_v5, %v1183_v7  ;;  %v17036_v13 = vcombine.high %v1176_v8, %v1184_v9 }
 0x1a4   :  { %v17098_v60 = vcombine.high %v1239_v49, %v1247_v50 }
 0x1a6   :  { %7023 = vmatpush1.bf16.msra.mxu0 %v16937_v22  ;;  %7187 = vmatpush1.bf16.msra.mxu1 %v16939_v23  ;;  %v1200_v22 = vld [vmem:[#allocation7 + $0xe48] sm:$0xff]  ;;  %v17033_v23 = vcombine.low %v1175_v5, %v1183_v7  ;;  %v17097_v5 = vcombine.low %v1239_v49, %v1247_v50 }
 0x1a7   :  { %7024 = vmatprep.subr.bf16.mxu0 %v16954_v24  ;;  %7188 = vmatprep.subr.bf16.mxu1 %v16956_v25  ;;  %v17035_v24 = vcombine.low %v1176_v8, %v1184_v9  ;;  %v17050_v25 = vcombine.high %v1191_v18, %v1199_v19  ;;  %v17052_v26 = vcombine.high %v1192_v20, %v1200_v22  ;;  %v1271_v9 = vld [vmem:[#allocation7 + $0x1080] sm:$0xff] }
 0x1a8   :  { %v19553_v41 = vpop.f32.mrb[4].mxu0 }
 0x1a9   :  { %v19555_v6 = vpop.f32.mrb[5].mxu0  ;;  %v19557_v53 = vpop.f32.mrb[4].mxu1 }
 0x1aa   :  { %7025 = vmatpush1.bf16.msra.mxu0 %v16953_v30  ;;  %7189 = vmatpush1.bf16.msra.mxu1 %v16955_v31  ;;  %v683_v44 = vpop.f32.mrb[6].mxu0  ;;  %v19559_v58 = vpop.f32.mrb[5].mxu1  ;;  %v1216_v30 = vld [vmem:[#allocation7 + $0xec8] sm:$0xff]  ;;  %v19562_v31 = vsub.s32 2, %v19520_v14 }
 0x1ab   :  { %7026 = vmatprep.subr.bf16.mxu0 %v16970_v32  ;;  %7190 = vmatprep.subr.bf16.mxu1 %v16972_v33  ;;  %v684_v47 = vpop.f32.mrb[7].mxu0  ;;  %v724_v62 = vpop.f32.mrb[6].mxu1  ;;  %v17049_v32 = vcombine.low %v1191_v18, %v1199_v19  ;;  %v17051_v33 = vcombine.low %v1192_v20, %v1200_v22  ;;  %v17068_v38 = vcombine.high %v1208_v29, %v1216_v30  ;;  %v19565_v44 = vsub.s32 5, %v19520_v14 }
 0x1ac   :  { %v725_v63 = vpop.f32.mrb[7].mxu1  ;;  %v17067_v46 = vcombine.low %v1208_v29, %v1216_v30  ;;  %v17082_v47 = vcombine.high %v1223_v39, %v1231_v40  ;;  %v1255_v62 = vld [vmem:[#allocation7 + $0x1000] sm:$0xff]  ;;  %v1312_v39 = vld [vmem:[#allocation7 + $0x11c8] sm:$0xff] }
 0x1ad   :  { %v1263_v63 = vld [vmem:[#allocation7 + $0x1040] sm:$0xff] }
 0x1ae   :  { %7027 = vmatpush1.bf16.msra.mxu0 %v16969_v42  ;;  %7191 = vmatpush1.bf16.msra.mxu1 %v16971_v43  ;;  %v1224_v42 = vld [vmem:[#allocation7 + $0xf08] sm:$0xff]  ;;  %v17113_v19 = vcombine.low %v1255_v62, %v1263_v63 }
 0x1af   :  { %7028 = vmatprep.subr.bf16.mxu0 %v16986_v0  ;;  %7192 = vmatprep.subr.bf16.mxu1 %v16988_v45  ;;  %v1232_v43 = vld [vmem:[#allocation7 + $0xf48] sm:$0xff]  ;;  %v214_v0 = vrot.slane %v19525_v16, %v19562_v31  ;;  %v17065_v45 = vcombine.low %v1207_v27, %v1215_v28 }
 0x1b0   :  { %v17084_v48 = vcombine.high %v1224_v42, %v1232_v43  ;;  %v17083_v59 = vcombine.low %v1224_v42, %v1232_v43 }
 0x1b2   :  { %7029 = vmatpush1.bf16.msra.mxu0 %v16985_v51  ;;  %7193 = vmatpush1.bf16.msra.mxu1 %v16987_v52  ;;  %v1240_v51 = vld [vmem:[#allocation7 + $0xf88] sm:$0xff] }
 0x1b3   :  { %7030 = vmatprep.subr.bf16.mxu0 %v17002_v55  ;;  %7194 = vmatprep.subr.bf16.mxu1 %v17004_v56  ;;  %v1248_v52 = vld [vmem:[#allocation7 + $0xfc8] sm:$0xff]  ;;  %v226_v55 = vrot.slane %v19525_v16, %v19565_v44  ;;  %v639_v56 = vadd.f32 %v19541_v35, %v214_v0  ;;  %v17114_v35 = vcombine.high %v1255_v62, %v1263_v63 }
 0x1b4   :  { %v17100_v61 = vcombine.high %v1240_v51, %v1248_v52  ;;  %v17099_v7 = vcombine.low %v1240_v51, %v1248_v52 }
 0x1b6   :  { %7031 = vmatpush1.bf16.msra.mxu0 %v17001_v1  ;;  %7195 = vmatpush1.bf16.msra.mxu1 %v17003_v2  ;;  %v1256_v1 = vld [vmem:[#allocation7 + $0x1008] sm:$0xff] }
 0x1b7   :  { %7032 = vmatprep.subr.bf16.mxu0 %v17018_v3  ;;  %7196 = vmatprep.subr.bf16.mxu1 %v17020_v4  ;;  %v1264_v2 = vld [vmem:[#allocation7 + $0x1048] sm:$0xff]  ;;  %v682_v3 = vadd.f32 %v19555_v6, %v226_v55  ;;  %v729_v4 = vmax.f32 %v639_v56, 0.0  ;;  %v1335_v55 = vld [vmem:[#allocation7 + $0x1280] sm:$0xff] }
 0x1b8   :  { %v17116_v8 = vcombine.high %v1256_v1, %v1264_v2  ;;  %v17115_v6 = vcombine.low %v1256_v1, %v1264_v2  ;;  %v1343_v56 = vld [vmem:[#allocation7 + $0x12c0] sm:$0xff] }
 0x1b9   :  { %v19573_v18 = vpack.c.bf16 %v729_v4, %v729_v4  ;;  %v17194_v62 = vcombine.high %v1335_v55, %v1343_v56  ;;  %v1351_v1 = vld [vmem:[#allocation7 + $0x1300] sm:$0xff]  ;;  %v1360_v4 = vld [vmem:[#allocation7 + $0x1348] sm:$0xff] }
 0x1ba   :  { %7033 = vmatpush1.bf16.msra.mxu0 %v17017_v10  ;;  %7197 = vmatpush1.bf16.msra.mxu1 %v17019_v11  ;;  %v1279_v10 = vld [vmem:[#allocation7 + $0x10c0] sm:$0xff]  ;;  %v1272_v11 = vld [vmem:[#allocation7 + $0x1088] sm:$0xff] }
 0x1bb   :  { %7034 = vmatprep.subr.bf16.mxu0 %v17034_v12  ;;  %7198 = vmatprep.subr.bf16.mxu1 %v17036_v13  ;;  %v1280_v12 = vld [vmem:[#allocation7 + $0x10c8] sm:$0xff]  ;;  %v732_v13 = vmax.f32 %v682_v3, 0.0  ;;  %v17130_v20 = vcombine.high %v1271_v9, %v1279_v10  ;;  %v17129_v28 = vcombine.low %v1271_v9, %v1279_v10  ;;  %v1359_v2 = vld [vmem:[#allocation7 + $0x1340] sm:$0xff] }
 0x1bc   :  { %v17132_v22 = vcombine.high %v1272_v11, %v1280_v12  ;;  %v17131_v29 = vcombine.low %v1272_v11, %v1280_v12  ;;  %v1352_v3 = vld [vmem:[#allocation7 + $0x1308] sm:$0xff]  ;;  %v1367_v9 = vld [vmem:[#allocation7 + $0x1380] sm:$0xff] }
 0x1bd   :  { %v19575_v27 = vpack.c.bf16 %v732_v13, %v732_v13  ;;  %v1375_v10 = vld [vmem:[#allocation7 + $0x13c0] sm:$0xff]  ;;  %v1368_v11 = vld [vmem:[#allocation7 + $0x1388] sm:$0xff]  ;;  %v17209_v13 = vcombine.low %v1351_v1, %v1359_v2 }
 0x1be   :  { %7035 = vmatpush1.bf16.msra.mxu0 %v17033_v23  ;;  %7199 = vmatpush1.bf16.msra.mxu1 %v17035_v24  ;;  %v1287_v23 = vld [vmem:[#allocation7 + $0x1100] sm:$0xff]  ;;  %v1376_v12 = vld [vmem:[#allocation7 + $0x13c8] sm:$0xff] }
 0x1bf   :  { %7036 = vmatprep.subr.bf16.mxu0 %v17050_v25  ;;  %7200 = vmatprep.subr.bf16.mxu1 %v17052_v26  ;;  %v1295_v24 = vld [vmem:[#allocation7 + $0x1140] sm:$0xff]  ;;  %v1288_v25 = vld [vmem:[#allocation7 + $0x1108] sm:$0xff] }
 0x1c0   :  { %v1296_v26 = vld [vmem:[#allocation7 + $0x1148] sm:$0xff]  ;;  %v17146_v30 = vcombine.high %v1287_v23, %v1295_v24  ;;  %v17145_v40 = vcombine.low %v1287_v23, %v1295_v24  ;;  %v1391_v23 = vld [vmem:[#allocation7 + $0x1440] sm:$0xff] }
 0x1c1   :  { %v17147_v42 = vcombine.low %v1288_v25, %v1296_v26  ;;  %v1384_v24 = vld [vmem:[#allocation7 + $0x1408] sm:$0xff] }
 0x1c2   :  { %7037 = vmatpush1.bf16.msra.mxu0 %v17049_v32  ;;  %7201 = vmatpush1.bf16.msra.mxu1 %v17051_v33  ;;  %v17148_v32 = vcombine.high %v1288_v25, %v1296_v26  ;;  %v1303_v33 = vld [vmem:[#allocation7 + $0x1180] sm:$0xff]  ;;  %v1392_v25 = vld [vmem:[#allocation7 + $0x1448] sm:$0xff]  ;;  %v17225_v26 = vcombine.low %v1367_v9, %v1375_v10 }
 0x1c3   :  { %7038 = vmatprep.subr.bf16.mxu0 %v17066_v37  ;;  %7202 = vmatprep.subr.bf16.mxu1 %v17068_v38  ;;  %v1311_v37 = vld [vmem:[#allocation7 + $0x11c0] sm:$0xff]  ;;  %v1304_v38 = vld [vmem:[#allocation7 + $0x1188] sm:$0xff] }
 0x1c4   :  { %v17162_v43 = vcombine.high %v1303_v33, %v1311_v37  ;;  %v17164_v0 = vcombine.high %v1304_v38, %v1312_v39  ;;  %v17161_v49 = vcombine.low %v1303_v33, %v1311_v37  ;;  %v17163_v50 = vcombine.low %v1304_v38, %v1312_v39  ;;  %v1407_v33 = vld [vmem:[#allocation7 + $0x14c0] sm:$0xff]  ;;  %v1400_v37 = vld [vmem:[#allocation7 + $0x1488] sm:$0xff] }
 0x1c5   :  { %v1408_v38 = vld [vmem:[#allocation7 + $0x14c8] sm:$0xff] }
 0x1c6   :  { %7039 = vmatpush1.bf16.msra.mxu0 %v17065_v45  ;;  %7203 = vmatpush1.bf16.msra.mxu1 %v17067_v46  ;;  %v1319_v45 = vld [vmem:[#allocation7 + $0x1200] sm:$0xff] }
 0x1c7   :  { %7040 = vmatprep.subr.bf16.mxu0 %v17082_v47  ;;  %7204 = vmatprep.subr.bf16.mxu1 %v17084_v48  ;;  %v1327_v46 = vld [vmem:[#allocation7 + $0x1240] sm:$0xff]  ;;  %v1320_v47 = vld [vmem:[#allocation7 + $0x1208] sm:$0xff] }
 0x1c8   :  { %v1328_v48 = vld [vmem:[#allocation7 + $0x1248] sm:$0xff]  ;;  %v17178_v51 = vcombine.high %v1319_v45, %v1327_v46 }
 0x1c9   :  { %v17180_v52 = vcombine.high %v1320_v47, %v1328_v48 }
 0x1ca   :  { %7041 = vmatpush1.bf16.msra.mxu0 %v17081_v57  ;;  %7205 = vmatpush1.bf16.msra.mxu1 %v17083_v59  ;;  %v1336_v57 = vld [vmem:[#allocation7 + $0x1288] sm:$0xff] }
 0x1cb   :  { %7042 = vmatprep.subr.bf16.mxu0 %v17098_v60  ;;  %7206 = vmatprep.subr.bf16.mxu1 %v17100_v61  ;;  %v1344_v59 = vld [vmem:[#allocation7 + $0x12c8] sm:$0xff]  ;;  %v17177_v60 = vcombine.low %v1319_v45, %v1327_v46  ;;  %v17179_v61 = vcombine.low %v1320_v47, %v1328_v48  ;;  %v1423_v45 = vld [vmem:[#allocation7 + $0x1540] sm:$0xff] }
 0x1cc   :  { %v17196_v63 = vcombine.high %v1336_v57, %v1344_v59  ;;  %v1416_v46 = vld [vmem:[#allocation7 + $0x1508] sm:$0xff] }
 0x1cd   :  { %v1424_v47 = vld [vmem:[#allocation7 + $0x1548] sm:$0xff] }
 0x1ce   :  { %7043 = vmatpush1.bf16.msra.mxu0 %v17097_v5  ;;  %7207 = vmatpush1.bf16.msra.mxu1 %v17099_v7  ;;  %v17193_v5 = vcombine.low %v1335_v55, %v1343_v56  ;;  %v17195_v7 = vcombine.low %v1336_v57, %v1344_v59  ;;  %v1439_v55 = vld [vmem:[#allocation7 + $0x15c0] sm:$0xff]  ;;  %v1432_v56 = vld [vmem:[#allocation7 + $0x1588] sm:$0xff] }
 0x1cf   :  { %7053 = vmatprep.subr.bf16.mxu0 %v17114_v35  ;;  %7217 = vmatprep.subr.bf16.mxu1 %v17116_v8  ;;  %v17210_v35 = vcombine.high %v1351_v1, %v1359_v2  ;;  %v17212_v8 = vcombine.high %v1352_v3, %v1360_v4  ;;  %v1440_v57 = vld [vmem:[#allocation7 + $0x15c8] sm:$0xff]  ;;  %v1455_v1 = vld [vmem:[#allocation7 + $0x1640] sm:$0xff] }
 0x1d0   :  { %v1448_v2 = vld [vmem:[#allocation7 + $0x1608] sm:$0xff] }
 0x1d1   :  { %7045 = vmatmul.mubr.bf16.vlgmr.msra.gmra.mrb[8].mxu0 %v19573_v18  ;;  %7209 = vmatmul.mubr.bf16.vlgmr.msra.gmra.mrb[8].mxu1 %v19573_v18 }
 0x1d2   :  { %7054 = vmatpush1.bf16.msra.mxu0 %v17113_v19  ;;  %7218 = vmatpush1.bf16.msra.mxu1 %v17115_v6  ;;  %v17211_v19 = vcombine.low %v1352_v3, %v1360_v4  ;;  %v17226_v6 = vcombine.high %v1367_v9, %v1375_v10  ;;  %v1456_v3 = vld [vmem:[#allocation7 + $0x1648] sm:$0xff]  ;;  %v1471_v9 = vld [vmem:[#allocation7 + $0x16c0] sm:$0xff] }
 0x1d3   :  { %7055 = vmatprep.subr.bf16.mxu0 %v17130_v20  ;;  %7219 = vmatprep.subr.bf16.mxu1 %v17132_v22  ;;  %v17228_v20 = vcombine.high %v1368_v11, %v1376_v12  ;;  %v1383_v22 = vld [vmem:[#allocation7 + $0x1400] sm:$0xff]  ;;  %v1464_v10 = vld [vmem:[#allocation7 + $0x1688] sm:$0xff] }
 0x1d4   :  { %7085 = vmatprep.mubr.bf16.mxu0 %v19575_v27  ;;  %7249 = vmatprep.mubr.bf16.mxu1 %v19575_v27  ;;  %v17241_v39 = vcombine.low %v1383_v22, %v1391_v23 }
 0x1d6   :  { %7056 = vmatpush1.bf16.msra.mxu0 %v17129_v28  ;;  %7220 = vmatpush1.bf16.msra.mxu1 %v17131_v29  ;;  %v17227_v28 = vcombine.low %v1368_v11, %v1376_v12  ;;  %v17242_v29 = vcombine.high %v1383_v22, %v1391_v23  ;;  %v1472_v11 = vld [vmem:[#allocation7 + $0x16c8] sm:$0xff]  ;;  %v19582_v12 = vsub.s32 4, %v19520_v14  ;;  %v1479_v22 = vld [vmem:[#allocation7 + $0x1700] sm:$0xff] }
 0x1d7   :  { %7057 = vmatprep.subr.bf16.mxu0 %v17146_v30  ;;  %7221 = vmatprep.subr.bf16.mxu1 %v17148_v32  ;;  %v17244_v30 = vcombine.high %v1384_v24, %v1392_v25  ;;  %v1399_v32 = vld [vmem:[#allocation7 + $0x1480] sm:$0xff] }
 0x1d8   :  { %v17257_v48 = vcombine.low %v1399_v32, %v1407_v33  ;;  %v1487_v23 = vld [vmem:[#allocation7 + $0x1740] sm:$0xff] }
 0x1da   :  { %7058 = vmatpush1.bf16.msra.mxu0 %v17145_v40  ;;  %7222 = vmatpush1.bf16.msra.mxu1 %v17147_v42  ;;  %v17243_v40 = vcombine.low %v1384_v24, %v1392_v25  ;;  %v17258_v42 = vcombine.high %v1399_v32, %v1407_v33  ;;  %v1480_v24 = vld [vmem:[#allocation7 + $0x1708] sm:$0xff]  ;;  %v17338_v32 = vcombine.high %v1479_v22, %v1487_v23 }
 0x1db   :  { %7059 = vmatprep.subr.bf16.mxu0 %v17162_v43  ;;  %7223 = vmatprep.subr.bf16.mxu1 %v17164_v0  ;;  %v17260_v43 = vcombine.high %v1400_v37, %v1408_v38  ;;  %v1415_v0 = vld [vmem:[#allocation7 + $0x1500] sm:$0xff]  ;;  %v1488_v25 = vld [vmem:[#allocation7 + $0x1748] sm:$0xff] }
 0x1dc   :  { %v17273_v59 = vcombine.low %v1415_v0, %v1423_v45  ;;  %v17340_v33 = vcombine.high %v1480_v24, %v1488_v25 }
 0x1de   :  { %7060 = vmatpush1.bf16.msra.mxu0 %v17161_v49  ;;  %7224 = vmatpush1.bf16.msra.mxu1 %v17163_v50  ;;  %v17259_v49 = vcombine.low %v1400_v37, %v1408_v38  ;;  %v17274_v50 = vcombine.high %v1415_v0, %v1423_v45  ;;  %v1495_v37 = vld [vmem:[#allocation7 + $0x1780] sm:$0xff]  ;;  %v17337_v0 = vcombine.low %v1479_v22, %v1487_v23  ;;  %v1560_v22 = vld [vmem:[#allocation7 + $0x1988] sm:$0xff] }
 0x1df   :  { %7061 = vmatprep.subr.bf16.mxu0 %v17178_v51  ;;  %7225 = vmatprep.subr.bf16.mxu1 %v17180_v52  ;;  %v17276_v51 = vcombine.high %v1416_v46, %v1424_v47  ;;  %v1431_v52 = vld [vmem:[#allocation7 + $0x1580] sm:$0xff]  ;;  %v17339_v45 = vcombine.low %v1480_v24, %v1488_v25  ;;  %v1568_v23 = vld [vmem:[#allocation7 + $0x19c8] sm:$0xff] }
 0x1e0   :  { %v17289_v4 = vcombine.low %v1431_v52, %v1439_v55  ;;  %v1503_v38 = vld [vmem:[#allocation7 + $0x17c0] sm:$0xff] }
 0x1e2   :  { %7062 = vmatpush1.bf16.msra.mxu0 %v17177_v60  ;;  %7226 = vmatpush1.bf16.msra.mxu1 %v17179_v61  ;;  %v17275_v60 = vcombine.low %v1416_v46, %v1424_v47  ;;  %v17290_v61 = vcombine.high %v1431_v52, %v1439_v55  ;;  %v17354_v46 = vcombine.high %v1495_v37, %v1503_v38 }
 0x1e3   :  { %7063 = vmatprep.subr.bf16.mxu0 %v17194_v62  ;;  %7227 = vmatprep.subr.bf16.mxu1 %v17196_v63  ;;  %v17292_v62 = vcombine.high %v1432_v56, %v1440_v57  ;;  %v1447_v63 = vld [vmem:[#allocation7 + $0x1600] sm:$0xff] }
 0x1e6   :  { %7064 = vmatpush1.bf16.msra.mxu0 %v17193_v5  ;;  %7228 = vmatpush1.bf16.msra.mxu1 %v17195_v7  ;;  %v17291_v5 = vcombine.low %v1432_v56, %v1440_v57  ;;  %v17306_v7 = vcombine.high %v1447_v63, %v1455_v1 }
 0x1e7   :  { %7065 = vmatprep.subr.bf16.mxu0 %v17210_v35  ;;  %7229 = vmatprep.subr.bf16.mxu1 %v17212_v8  ;;  %v17308_v35 = vcombine.high %v1448_v2, %v1456_v3  ;;  %v1463_v8 = vld [vmem:[#allocation7 + $0x1680] sm:$0xff] }
 0x1ea   :  { %7066 = vmatpush1.bf16.msra.mxu0 %v17209_v13  ;;  %7230 = vmatpush1.bf16.msra.mxu1 %v17211_v19  ;;  %v17305_v13 = vcombine.low %v1447_v63, %v1455_v1  ;;  %v17307_v19 = vcombine.low %v1448_v2, %v1456_v3 }
 0x1eb   :  { %7067 = vmatprep.subr.bf16.mxu0 %v17226_v6  ;;  %7231 = vmatprep.subr.bf16.mxu1 %v17228_v20  ;;  %v17322_v6 = vcombine.high %v1463_v8, %v1471_v9  ;;  %v17324_v20 = vcombine.high %v1464_v10, %v1472_v11 }
 0x1ee   :  { %7068 = vmatpush1.bf16.msra.mxu0 %v17225_v26  ;;  %7232 = vmatpush1.bf16.msra.mxu1 %v17227_v28  ;;  %v19585_v26 = vsub.s32 7, %v19520_v14  ;;  %v222_v28 = vrot.slane %v19525_v16, %v19582_v12 }
 0x1ef   :  { %7069 = vmatprep.subr.bf16.mxu0 %v17242_v29  ;;  %7233 = vmatprep.subr.bf16.mxu1 %v17244_v30  ;;  %v17321_v29 = vcombine.low %v1463_v8, %v1471_v9  ;;  %v17323_v30 = vcombine.low %v1464_v10, %v1472_v11  ;;  %v1552_v8 = vld [vmem:[#allocation7 + $0x1948] sm:$0xff] }
 0x1f2   :  { %7070 = vmatpush1.bf16.msra.mxu0 %v17241_v39  ;;  %7234 = vmatpush1.bf16.msra.mxu1 %v17243_v40  ;;  %v1496_v39 = vld [vmem:[#allocation7 + $0x1788] sm:$0xff] }
 0x1f3   :  { %7071 = vmatprep.subr.bf16.mxu0 %v17258_v42  ;;  %7235 = vmatprep.subr.bf16.mxu1 %v17260_v43  ;;  %v1504_v40 = vld [vmem:[#allocation7 + $0x17c8] sm:$0xff]  ;;  %v234_v42 = vrot.slane %v19525_v16, %v19585_v26  ;;  %v680_v43 = vadd.f32 %v19553_v41, %v222_v28  ;;  %v17353_v16 = vcombine.low %v1495_v37, %v1503_v38 }
 0x1f4   :  { %v17356_v47 = vcombine.high %v1496_v39, %v1504_v40  ;;  %v17355_v56 = vcombine.low %v1496_v39, %v1504_v40  ;;  %v1584_v37 = vld [vmem:[#allocation7 + $0x1a48] sm:$0xff]  ;;  %v17419_v39 = vcombine.low %v1560_v22, %v1568_v23 }
 0x1f5   :  { %v723_v52 = vadd.f32 %v19559_v58, %v234_v42  ;;  %v731_v55 = vmax.f32 %v680_v43, 0.0  ;;  %v1591_v43 = vld [vmem:[#allocation7 + $0x1a80] sm:$0xff] }
 0x1f6   :  { %7072 = vmatpush1.bf16.msra.mxu0 %v17257_v48  ;;  %7236 = vmatpush1.bf16.msra.mxu1 %v17259_v49  ;;  %v1511_v48 = vld [vmem:[#allocation7 + $0x1800] sm:$0xff] }
 0x1f7   :  { %7073 = vmatprep.subr.bf16.mxu0 %v17274_v50  ;;  %7237 = vmatprep.subr.bf16.mxu1 %v17276_v51  ;;  %v1519_v49 = vld [vmem:[#allocation7 + $0x1840] sm:$0xff]  ;;  %v1512_v50 = vld [vmem:[#allocation7 + $0x1808] sm:$0xff]  ;;  %v734_v63 = vmax.f32 %v723_v52, 0.0  ;;  %v19593_v1 = vpack.c.bf16 %v731_v55, %v731_v55 }
 0x1f8   :  { %v1520_v51 = vld [vmem:[#allocation7 + $0x1848] sm:$0xff]  ;;  %v17370_v41 = vcombine.high %v1511_v48, %v1519_v49  ;;  %v17369_v2 = vcombine.low %v1511_v48, %v1519_v49  ;;  %v1615_v52 = vld [vmem:[#allocation7 + $0x1b40] sm:$0xff] }
 0x1f9   :  { %v17372_v57 = vcombine.high %v1512_v50, %v1520_v51  ;;  %v17371_v58 = vcombine.low %v1512_v50, %v1520_v51  ;;  %v19595_v9 = vpack.c.bf16 %v734_v63, %v734_v63  ;;  %v1607_v51 = vld [vmem:[#allocation7 + $0x1b00] sm:$0xff]  ;;  %v1608_v55 = vld [vmem:[#allocation7 + $0x1b08] sm:$0xff] }
 0x1fa   :  { %7074 = vmatpush1.bf16.msra.mxu0 %v17273_v59  ;;  %7238 = vmatpush1.bf16.msra.mxu1 %v17275_v60  ;;  %v1527_v59 = vld [vmem:[#allocation7 + $0x1880] sm:$0xff]  ;;  %v1632_v63 = vld [vmem:[#allocation7 + $0x1bc8] sm:$0xff] }
 0x1fb   :  { %7075 = vmatprep.subr.bf16.mxu0 %v17290_v61  ;;  %7239 = vmatprep.subr.bf16.mxu1 %v17292_v62  ;;  %v1535_v60 = vld [vmem:[#allocation7 + $0x18c0] sm:$0xff]  ;;  %v1528_v61 = vld [vmem:[#allocation7 + $0x1888] sm:$0xff] }
 0x1fc   :  { %v1536_v62 = vld [vmem:[#allocation7 + $0x18c8] sm:$0xff]  ;;  %v17386_v3 = vcombine.high %v1527_v59, %v1535_v60  ;;  %v17385_v10 = vcombine.low %v1527_v59, %v1535_v60  ;;  %v1623_v60 = vld [vmem:[#allocation7 + $0x1b80] sm:$0xff] }
 0x1fd   :  { %v17387_v11 = vcombine.low %v1528_v61, %v1536_v62 }
 0x1fe   :  { %7076 = vmatpush1.bf16.msra.mxu0 %v17289_v4  ;;  %7240 = vmatpush1.bf16.msra.mxu1 %v17291_v5  ;;  %v17388_v4 = vcombine.high %v1528_v61, %v1536_v62  ;;  %v1543_v5 = vld [vmem:[#allocation7 + $0x1900] sm:$0xff]  ;;  %v1624_v62 = vld [vmem:[#allocation7 + $0x1b88] sm:$0xff] }
 0x1ff   :  { %7077 = vmatprep.subr.bf16.mxu0 %v17306_v7  ;;  %7241 = vmatprep.subr.bf16.mxu1 %v17308_v35  ;;  %v1551_v7 = vld [vmem:[#allocation7 + $0x1940] sm:$0xff]  ;;  %v1544_v35 = vld [vmem:[#allocation7 + $0x1908] sm:$0xff] }
 0x200   :  { %v17401_v24 = vcombine.low %v1543_v5, %v1551_v7  ;;  %v17403_v25 = vcombine.low %v1544_v35, %v1552_v8  ;;  %v1631_v61 = vld [vmem:[#allocation7 + $0x1bc0] sm:$0xff] }
 0x202   :  { %7078 = vmatpush1.bf16.msra.mxu0 %v17305_v13  ;;  %7242 = vmatpush1.bf16.msra.mxu1 %v17307_v19  ;;  %v17402_v13 = vcombine.high %v1543_v5, %v1551_v7  ;;  %v17404_v19 = vcombine.high %v1544_v35, %v1552_v8  ;;  %v1639_v5 = vld [vmem:[#allocation7 + $0x1c00] sm:$0xff]  ;;  %v1640_v35 = vld [vmem:[#allocation7 + $0x1c08] sm:$0xff] }
 0x203   :  { %7079 = vmatprep.subr.bf16.mxu0 %v17322_v6  ;;  %7243 = vmatprep.subr.bf16.mxu1 %v17324_v20  ;;  %v1559_v6 = vld [vmem:[#allocation7 + $0x1980] sm:$0xff]  ;;  %v1648_v8 = vld [vmem:[#allocation7 + $0x1c48] sm:$0xff] }
 0x204   :  { %v1567_v20 = vld [vmem:[#allocation7 + $0x19c0] sm:$0xff] }
 0x205   :  { %v17418_v28 = vcombine.high %v1559_v6, %v1567_v20  ;;  %v17417_v38 = vcombine.low %v1559_v6, %v1567_v20  ;;  %v1647_v7 = vld [vmem:[#allocation7 + $0x1c40] sm:$0xff] }
 0x206   :  { %7080 = vmatpush1.bf16.msra.mxu0 %v17321_v29  ;;  %7244 = vmatpush1.bf16.msra.mxu1 %v17323_v30  ;;  %v17420_v29 = vcombine.high %v1560_v22, %v1568_v23  ;;  %v1575_v30 = vld [vmem:[#allocation7 + $0x1a00] sm:$0xff]  ;;  %v1656_v22 = vld [vmem:[#allocation7 + $0x1c88] sm:$0xff] }
 0x207   :  { %7081 = vmatprep.subr.bf16.mxu0 %v17338_v32  ;;  %7245 = vmatprep.subr.bf16.mxu1 %v17340_v33  ;;  %v1583_v32 = vld [vmem:[#allocation7 + $0x1a40] sm:$0xff]  ;;  %v1576_v33 = vld [vmem:[#allocation7 + $0x1a08] sm:$0xff] }
 0x208   :  { %v17434_v40 = vcombine.high %v1575_v30, %v1583_v32  ;;  %v17436_v42 = vcombine.high %v1576_v33, %v1584_v37  ;;  %v17435_v48 = vcombine.low %v1576_v33, %v1584_v37  ;;  %v1655_v6 = vld [vmem:[#allocation7 + $0x1c80] sm:$0xff]  ;;  %v1664_v23 = vld [vmem:[#allocation7 + $0x1cc8] sm:$0xff] }
 0x209   :  { %v1663_v20 = vld [vmem:[#allocation7 + $0x1cc0] sm:$0xff]  ;;  %v1672_v33 = vld [vmem:[#allocation7 + $0x1d08] sm:$0xff] }
 0x20a   :  { %7082 = vmatpush1.bf16.msra.mxu0 %v17337_v0  ;;  %7246 = vmatpush1.bf16.msra.mxu1 %v17339_v45  ;;  %v1599_v0 = vld [vmem:[#allocation7 + $0x1ac0] sm:$0xff]  ;;  %v1592_v45 = vld [vmem:[#allocation7 + $0x1a88] sm:$0xff] }
 0x20b   :  { %7083 = vmatprep.subr.bf16.mxu0 %v17354_v46  ;;  %7247 = vmatprep.subr.bf16.mxu1 %v17356_v47  ;;  %v1600_v46 = vld [vmem:[#allocation7 + $0x1ac8] sm:$0xff]  ;;  %v17433_v47 = vcombine.low %v1575_v30, %v1583_v32  ;;  %v17450_v49 = vcombine.high %v1591_v43, %v1599_v0  ;;  %v1671_v30 = vld [vmem:[#allocation7 + $0x1d00] sm:$0xff] }
 0x20c   :  { %v17452_v50 = vcombine.high %v1592_v45, %v1600_v46  ;;  %v1679_v32 = vld [vmem:[#allocation7 + $0x1d40] sm:$0xff]  ;;  %v1680_v37 = vld [vmem:[#allocation7 + $0x1d48] sm:$0xff] }
 0x20e   :  { %7084 = vmatpush1.bf16.msra.mxu0 %v17353_v16  ;;  %7248 = vmatpush1.bf16.msra.mxu1 %v17355_v56  ;;  %v1616_v16 = vld [vmem:[#allocation7 + $0x1b48] sm:$0xff]  ;;  %v17449_v56 = vcombine.low %v1591_v43, %v1599_v0  ;;  %v1687_v43 = vld [vmem:[#allocation7 + $0x1d80] sm:$0xff] }
 0x20f   :  { %7094 = vmatprep.subr.bf16.mxu0 %v17370_v41  ;;  %7258 = vmatprep.subr.bf16.mxu1 %v17372_v57  ;;  %v17451_v41 = vcombine.low %v1592_v45, %v1600_v46  ;;  %v17466_v57 = vcombine.high %v1607_v51, %v1615_v52  ;;  %v17468_v59 = vcombine.high %v1608_v55, %v1616_v16  ;;  %v1695_v0 = vld [vmem:[#allocation7 + $0x1dc0] sm:$0xff]  ;;  %v1688_v45 = vld [vmem:[#allocation7 + $0x1d88] sm:$0xff] }
 0x210   :  { %v1696_v46 = vld [vmem:[#allocation7 + $0x1dc8] sm:$0xff] }
 0x211   :  { %7086 = vmatmul.mubr.bf16.vlgmr.msra.gmra.mrb[8].mxu0 %v19593_v1  ;;  %7250 = vmatmul.mubr.bf16.vlgmr.msra.gmra.mrb[8].mxu1 %v19593_v1 }
 0x212   :  { %7095 = vmatpush1.bf16.msra.mxu0 %v17369_v2  ;;  %7259 = vmatpush1.bf16.msra.mxu1 %v17371_v58  ;;  %v17465_v2 = vcombine.low %v1607_v51, %v1615_v52  ;;  %v17467_v58 = vcombine.low %v1608_v55, %v1616_v16  ;;  %v1703_v51 = vld [vmem:[#allocation7 + $0x1e00] sm:$0xff]  ;;  %v1704_v55 = vld [vmem:[#allocation7 + $0x1e08] sm:$0xff] }
 0x213   :  { %7096 = vmatprep.subr.bf16.mxu0 %v17386_v3  ;;  %7260 = vmatprep.subr.bf16.mxu1 %v17388_v4  ;;  %v17482_v3 = vcombine.high %v1623_v60, %v1631_v61  ;;  %v17484_v4 = vcombine.high %v1624_v62, %v1632_v63  ;;  %v1711_v52 = vld [vmem:[#allocation7 + $0x1e40] sm:$0xff]  ;;  %v1712_v16 = vld [vmem:[#allocation7 + $0x1e48] sm:$0xff] }
 0x214   :  { %7126 = vmatprep.mubr.bf16.mxu0 %v19595_v9  ;;  %7290 = vmatprep.mubr.bf16.mxu1 %v19595_v9 }
 0x216   :  { %7097 = vmatpush1.bf16.msra.mxu0 %v17385_v10  ;;  %7261 = vmatpush1.bf16.msra.mxu1 %v17387_v11  ;;  %v17481_v10 = vcombine.low %v1623_v60, %v1631_v61  ;;  %v17483_v11 = vcombine.low %v1624_v62, %v1632_v63  ;;  %v1719_v60 = vld [vmem:[#allocation7 + $0x1e80] sm:$0xff]  ;;  %v1720_v62 = vld [vmem:[#allocation7 + $0x1e88] sm:$0xff] }
 0x217   :  { %7098 = vmatprep.subr.bf16.mxu0 %v17402_v13  ;;  %7262 = vmatprep.subr.bf16.mxu1 %v17404_v19  ;;  %v17498_v13 = vcombine.high %v1639_v5, %v1647_v7  ;;  %v17500_v19 = vcombine.high %v1640_v35, %v1648_v8  ;;  %v1727_v61 = vld [vmem:[#allocation7 + $0x1ec0] sm:$0xff]  ;;  %v1728_v63 = vld [vmem:[#allocation7 + $0x1ec8] sm:$0xff] }
 0x21a   :  { %7099 = vmatpush1.bf16.msra.mxu0 %v17401_v24  ;;  %7263 = vmatpush1.bf16.msra.mxu1 %v17403_v25  ;;  %v17497_v24 = vcombine.low %v1639_v5, %v1647_v7  ;;  %v17499_v25 = vcombine.low %v1640_v35, %v1648_v8  ;;  %v17580_v5 = vcombine.high %v1720_v62, %v1728_v63  ;;  %v1735_v7 = vld [vmem:[#allocation7 + $0x1f00] sm:$0xff]  ;;  %v1736_v8 = vld [vmem:[#allocation7 + $0x1f08] sm:$0xff] }
 0x21b   :  { %7100 = vmatprep.subr.bf16.mxu0 %v17418_v28  ;;  %7264 = vmatprep.subr.bf16.mxu1 %v17420_v29  ;;  %v17514_v28 = vcombine.high %v1655_v6, %v1663_v20  ;;  %v17516_v29 = vcombine.high %v1656_v22, %v1664_v23  ;;  %v1743_v35 = vld [vmem:[#allocation7 + $0x1f40] sm:$0xff] }
 0x21e   :  { %7101 = vmatpush1.bf16.msra.mxu0 %v17417_v38  ;;  %7265 = vmatpush1.bf16.msra.mxu1 %v17419_v39  ;;  %v17513_v38 = vcombine.low %v1655_v6, %v1663_v20  ;;  %v17515_v39 = vcombine.low %v1656_v22, %v1664_v23  ;;  %v17594_v20 = vcombine.high %v1735_v7, %v1743_v35  ;;  %v1751_v22 = vld [vmem:[#allocation7 + $0x1f80] sm:$0xff] }
 0x21f   :  { %7102 = vmatprep.subr.bf16.mxu0 %v17434_v40  ;;  %7266 = vmatprep.subr.bf16.mxu1 %v17436_v42  ;;  %v17530_v40 = vcombine.high %v1671_v30, %v1679_v32  ;;  %v17532_v42 = vcombine.high %v1672_v33, %v1680_v37  ;;  %v1759_v23 = vld [vmem:[#allocation7 + $0x1fc0] sm:$0xff] }
 0x222   :  { %7103 = vmatpush1.bf16.msra.mxu0 %v17433_v47  ;;  %7267 = vmatpush1.bf16.msra.mxu1 %v17435_v48  ;;  %v17529_v47 = vcombine.low %v1671_v30, %v1679_v32  ;;  %v17531_v48 = vcombine.low %v1672_v33, %v1680_v37  ;;  %v17610_v32 = vcombine.high %v1751_v22, %v1759_v23  ;;  %v745_v37 = vld [vmem:[#allocation7 + $0x10] sm:$0xff] }
 0x223   :  { %7104 = vmatprep.subr.bf16.mxu0 %v17450_v49  ;;  %7268 = vmatprep.subr.bf16.mxu1 %v17452_v50  ;;  %v17546_v49 = vcombine.high %v1687_v43, %v1695_v0  ;;  %v17548_v50 = vcombine.high %v1688_v45, %v1696_v46 }
 0x226   :  { %7105 = vmatpush1.bf16.msra.mxu0 %v17449_v56  ;;  %7269 = vmatpush1.bf16.msra.mxu1 %v17451_v41  ;;  %v17545_v56 = vcombine.low %v1687_v43, %v1695_v0  ;;  %v17547_v41 = vcombine.low %v1688_v45, %v1696_v46 }
 0x227   :  { %7106 = vmatprep.subr.bf16.mxu0 %v17466_v57  ;;  %7270 = vmatprep.subr.bf16.mxu1 %v17468_v59  ;;  %v17562_v57 = vcombine.high %v1703_v51, %v1711_v52  ;;  %v17564_v59 = vcombine.high %v1704_v55, %v1712_v16 }
 0x22a   :  { %7107 = vmatpush1.bf16.msra.mxu0 %v17465_v2  ;;  %7271 = vmatpush1.bf16.msra.mxu1 %v17467_v58  ;;  %v17561_v2 = vcombine.low %v1703_v51, %v1711_v52  ;;  %v17563_v58 = vcombine.low %v1704_v55, %v1712_v16 }
 0x22b   :  { %7108 = vmatprep.subr.bf16.mxu0 %v17482_v3  ;;  %7272 = vmatprep.subr.bf16.mxu1 %v17484_v4  ;;  %v19602_v3 = vsub.s32 6, %v19520_v14  ;;  %v17578_v4 = vcombine.high %v1719_v60, %v1727_v61 }
 0x22e   :  { %7109 = vmatpush1.bf16.msra.mxu0 %v17481_v10  ;;  %7273 = vmatpush1.bf16.msra.mxu1 %v17483_v11  ;;  %v1744_v10 = vld [vmem:[#allocation7 + $0x1f48] sm:$0xff]  ;;  %v17577_v11 = vcombine.low %v1719_v60, %v1727_v61 }
 0x22f   :  { %7110 = vmatprep.subr.bf16.mxu0 %v17498_v13  ;;  %7274 = vmatprep.subr.bf16.mxu1 %v17500_v19  ;;  %v17579_v13 = vcombine.low %v1720_v62, %v1728_v63  ;;  %v19117_v19 = vld [vmem:[#allocation5] sm:$0xff]  ;;  %v17596_v14 = vcombine.high %v1736_v8, %v1744_v10 }
 0x230   :  { %v230_v6 = vrot.slane %v19117_v19, %v19602_v3  ;;  %v810_v19 = vld [vmem:[#allocation7 + $0x218] sm:$0xff] }
 0x232   :  { %7111 = vmatpush1.bf16.msra.mxu0 %v17497_v24  ;;  %7275 = vmatpush1.bf16.msra.mxu1 %v17499_v25  ;;  %v1752_v24 = vld [vmem:[#allocation7 + $0x1f88] sm:$0xff]  ;;  %v721_v30 = vadd.f32 %v19557_v53, %v230_v6  ;;  %v762_v53 = vld [vmem:[#allocation7 + $0x98] sm:$0xff] }
 0x233   :  { %7112 = vmatprep.subr.bf16.mxu0 %v17514_v28  ;;  %7276 = vmatprep.subr.bf16.mxu1 %v17516_v29  ;;  %v1760_v25 = vld [vmem:[#allocation7 + $0x1fc8] sm:$0xff]  ;;  %v17593_v28 = vcombine.low %v1735_v7, %v1743_v35  ;;  %v17595_v29 = vcombine.low %v1736_v8, %v1744_v10  ;;  %v818_v6 = vld [vmem:[#allocation7 + $0x258] sm:$0xff] }
 0x234   :  { %v17612_v33 = vcombine.high %v1752_v24, %v1760_v25  ;;  %v17611_v43 = vcombine.low %v1752_v24, %v1760_v25  ;;  %v733_v0 = vmax.f32 %v721_v30, 0.0  ;;  %v825_v24 = vld [vmem:[#allocation7 + $0x290] sm:$0xff] }
 0x235   :  { %v833_v25 = vld [vmem:[#allocation7 + $0x2d0] sm:$0xff] }
 0x236   :  { %7113 = vmatpush1.bf16.msra.mxu0 %v17513_v38  ;;  %7277 = vmatpush1.bf16.msra.mxu1 %v17515_v39  ;;  %v753_v38 = vld [vmem:[#allocation7 + $0x50] sm:$0xff]  ;;  %v746_v39 = vld [vmem:[#allocation7 + $0x18] sm:$0xff]  ;;  %v19606_v51 = vpack.c.bf16 %v733_v0, %v733_v0 }
 0x237   :  { %7114 = vmatprep.subr.bf16.mxu0 %v17530_v40  ;;  %7278 = vmatprep.subr.bf16.mxu1 %v17532_v42  ;;  %v754_v40 = vld [vmem:[#allocation7 + $0x58] sm:$0xff]  ;;  %v17609_v42 = vcombine.low %v1751_v22, %v1759_v23  ;;  %v16606_v45 = vcombine.high %v745_v37, %v753_v38  ;;  %v16672_v23 = vcombine.high %v810_v19, %v818_v6 }
 0x238   :  { %v16608_v46 = vcombine.high %v746_v39, %v754_v40  ;;  %v16607_v52 = vcombine.low %v746_v39, %v754_v40  ;;  %v849_v39 = vld [vmem:[#allocation7 + $0x350] sm:$0xff]  ;;  %v842_v40 = vld [vmem:[#allocation7 + $0x318] sm:$0xff] }
 0x23a   :  { %7115 = vmatpush1.bf16.msra.mxu0 %v17529_v47  ;;  %7279 = vmatpush1.bf16.msra.mxu1 %v17531_v48  ;;  %v761_v47 = vld [vmem:[#allocation7 + $0x90] sm:$0xff] }
 0x23b   :  { %7116 = vmatprep.subr.bf16.mxu0 %v17546_v49  ;;  %7280 = vmatprep.subr.bf16.mxu1 %v17548_v50  ;;  %v769_v48 = vld [vmem:[#allocation7 + $0xd0] sm:$0xff]  ;;  %v770_v49 = vld [vmem:[#allocation7 + $0xd8] sm:$0xff]  ;;  %v16605_v50 = vcombine.low %v745_v37, %v753_v38 }
 0x23c   :  { %v16622_v55 = vcombine.high %v761_v47, %v769_v48  ;;  %v16624_v16 = vcombine.high %v762_v53, %v770_v49  ;;  %v16621_v60 = vcombine.low %v761_v47, %v769_v48  ;;  %v16623_v61 = vcombine.low %v762_v53, %v770_v49  ;;  %v841_v38 = vld [vmem:[#allocation7 + $0x310] sm:$0xff]  ;;  %v858_v53 = vld [vmem:[#allocation7 + $0x398] sm:$0xff] }
 0x23d   :  { %v857_v47 = vld [vmem:[#allocation7 + $0x390] sm:$0xff]  ;;  %v866_v49 = vld [vmem:[#allocation7 + $0x3d8] sm:$0xff] }
 0x23e   :  { %7117 = vmatpush1.bf16.msra.mxu0 %v17545_v56  ;;  %7281 = vmatpush1.bf16.msra.mxu1 %v17547_v41  ;;  %v777_v56 = vld [vmem:[#allocation7 + $0x110] sm:$0xff] }
 0x23f   :  { %7118 = vmatprep.subr.bf16.mxu0 %v17562_v57  ;;  %7282 = vmatprep.subr.bf16.mxu1 %v17564_v59  ;;  %v785_v41 = vld [vmem:[#allocation7 + $0x150] sm:$0xff]  ;;  %v778_v57 = vld [vmem:[#allocation7 + $0x118] sm:$0xff] }
 0x240   :  { %v786_v59 = vld [vmem:[#allocation7 + $0x158] sm:$0xff]  ;;  %v16638_v62 = vcombine.high %v777_v56, %v785_v41  ;;  %v16637_v7 = vcombine.low %v777_v56, %v785_v41  ;;  %v865_v48 = vld [vmem:[#allocation7 + $0x3d0] sm:$0xff] }
 0x241   :  { %v16640_v63 = vcombine.high %v778_v57, %v786_v59  ;;  %v16639_v35 = vcombine.low %v778_v57, %v786_v59  ;;  %v873_v56 = vld [vmem:[#allocation7 + $0x410] sm:$0xff]  ;;  %v874_v57 = vld [vmem:[#allocation7 + $0x418] sm:$0xff] }
 0x242   :  { %7119 = vmatpush1.bf16.msra.mxu0 %v17561_v2  ;;  %7283 = vmatpush1.bf16.msra.mxu1 %v17563_v58  ;;  %v793_v2 = vld [vmem:[#allocation7 + $0x190] sm:$0xff]  ;;  %v882_v59 = vld [vmem:[#allocation7 + $0x458] sm:$0xff] }
 0x243   :  { %7120 = vmatprep.subr.bf16.mxu0 %v17578_v4  ;;  %7284 = vmatprep.subr.bf16.mxu1 %v17580_v5  ;;  %v801_v58 = vld [vmem:[#allocation7 + $0x1d0] sm:$0xff]  ;;  %v794_v4 = vld [vmem:[#allocation7 + $0x198] sm:$0xff] }
 0x244   :  { %v802_v5 = vld [vmem:[#allocation7 + $0x1d8] sm:$0xff]  ;;  %v16654_v8 = vcombine.high %v793_v2, %v801_v58  ;;  %v881_v41 = vld [vmem:[#allocation7 + $0x450] sm:$0xff] }
 0x245   :  { %v16656_v10 = vcombine.high %v794_v4, %v802_v5 }
 0x246   :  { %7121 = vmatpush1.bf16.msra.mxu0 %v17577_v11  ;;  %7285 = vmatpush1.bf16.msra.mxu1 %v17579_v13  ;;  %v809_v11 = vld [vmem:[#allocation7 + $0x210] sm:$0xff] }
 0x247   :  { %7122 = vmatprep.subr.bf16.mxu0 %v17594_v20  ;;  %7286 = vmatprep.subr.bf16.mxu1 %v17596_v14  ;;  %v817_v13 = vld [vmem:[#allocation7 + $0x250] sm:$0xff]  ;;  %v16653_v20 = vcombine.low %v793_v2, %v801_v58  ;;  %v16655_v14 = vcombine.low %v794_v4, %v802_v5  ;;  %v890_v4 = vld [vmem:[#allocation7 + $0x498] sm:$0xff] }
 0x248   :  { %v16670_v22 = vcombine.high %v809_v11, %v817_v13  ;;  %v16669_v30 = vcombine.low %v809_v11, %v817_v13  ;;  %v889_v2 = vld [vmem:[#allocation7 + $0x490] sm:$0xff]  ;;  %v898_v5 = vld [vmem:[#allocation7 + $0x4d8] sm:$0xff] }
 0x249   :  { %v897_v58 = vld [vmem:[#allocation7 + $0x4d0] sm:$0xff] }
 0x24a   :  { %7123 = vmatpush1.bf16.msra.mxu0 %v17593_v28  ;;  %7287 = vmatpush1.bf16.msra.mxu1 %v17595_v29  ;;  %v826_v28 = vld [vmem:[#allocation7 + $0x298] sm:$0xff]  ;;  %v905_v11 = vld [vmem:[#allocation7 + $0x510] sm:$0xff] }
 0x24b   :  { %7124 = vmatprep.subr.bf16.mxu0 %v17610_v32  ;;  %7288 = vmatprep.subr.bf16.mxu1 %v17612_v33  ;;  %v834_v29 = vld [vmem:[#allocation7 + $0x2d8] sm:$0xff]  ;;  %v16671_v32 = vcombine.low %v810_v19, %v818_v6  ;;  %v16686_v33 = vcombine.high %v825_v24, %v833_v25  ;;  %v913_v13 = vld [vmem:[#allocation7 + $0x550] sm:$0xff] }
 0x24c   :  { %v16688_v37 = vcombine.high %v826_v28, %v834_v29  ;;  %v16687_v0 = vcombine.low %v826_v28, %v834_v29  ;;  %v906_v19 = vld [vmem:[#allocation7 + $0x518] sm:$0xff] }
 0x24d   :  { %v914_v6 = vld [vmem:[#allocation7 + $0x558] sm:$0xff] }
 0x24e   :  { %7125 = vmatpush1.bf16.msra.mxu0 %v17609_v42  ;;  %7289 = vmatpush1.bf16.msra.mxu1 %v17611_v43  ;;  %v850_v42 = vld [vmem:[#allocation7 + $0x358] sm:$0xff]  ;;  %v16685_v43 = vcombine.low %v825_v24, %v833_v25  ;;  %v921_v24 = vld [vmem:[#allocation7 + $0x590] sm:$0xff] }
 0x24f   :  { %7299 = vmatprep.subr.bf16.mxu0 %v16606_v45  ;;  %7463 = vmatprep.subr.bf16.mxu1 %v16608_v46  ;;  %v16702_v45 = vcombine.high %v841_v38, %v849_v39  ;;  %v16704_v46 = vcombine.high %v842_v40, %v850_v42  ;;  %v929_v25 = vld [vmem:[#allocation7 + $0x5d0] sm:$0xff]  ;;  %v922_v28 = vld [vmem:[#allocation7 + $0x598] sm:$0xff] }
 0x250   :  { %v930_v29 = vld [vmem:[#allocation7 + $0x5d8] sm:$0xff] }
 0x251   :  { %7127 = vmatmul.mubr.bf16.vlgmr.msra.gmra.mrb[8].mxu0 %v19606_v51  ;;  %7291 = vmatmul.mubr.bf16.vlgmr.msra.gmra.mrb[8].mxu1 %v19606_v51 }
 0x252   :  { %7300 = vmatpush1.bf16.msra.mxu0 %v16605_v50  ;;  %7331 = vmatprep.mubr.bf16.mxu0 %v19539_v34  ;;  %v16701_v50 = vcombine.low %v841_v38, %v849_v39  ;;  %v937_v38 = vld [vmem:[#allocation7 + $0x610] sm:$0xff] }
 0x253   :  { %7464 = vmatpush1.bf16.msra.mxu1 %v16607_v52  ;;  %7495 = vmatprep.mubr.bf16.mxu1 %v19539_v34  ;;  %v16703_v52 = vcombine.low %v842_v40, %v850_v42  ;;  %v945_v39 = vld [vmem:[#allocation7 + $0x650] sm:$0xff]  ;;  %v938_v40 = vld [vmem:[#allocation7 + $0x618] sm:$0xff] }
 0x254   :  { %7301 = vmatprep.subr.bf16.mxu0 %v16622_v55  ;;  %7465 = vmatprep.subr.bf16.mxu1 %v16624_v16  ;;  %v16718_v55 = vcombine.high %v857_v47, %v865_v48  ;;  %v16720_v16 = vcombine.high %v858_v53, %v866_v49  ;;  %v946_v42 = vld [vmem:[#allocation7 + $0x658] sm:$0xff] }
 0x256   :  { %7302 = vmatpush1.bf16.msra.mxu0 %v16621_v60  ;;  %v16717_v60 = vcombine.low %v857_v47, %v865_v48  ;;  %v953_v47 = vld [vmem:[#allocation7 + $0x690] sm:$0xff] }
 0x257   :  { %7466 = vmatpush1.bf16.msra.mxu1 %v16623_v61  ;;  %7303 = vmatprep.subr.bf16.mxu0 %v16638_v62  ;;  %v16719_v61 = vcombine.low %v858_v53, %v866_v49  ;;  %v16734_v62 = vcombine.high %v873_v56, %v881_v41  ;;  %v961_v48 = vld [vmem:[#allocation7 + $0x6d0] sm:$0xff]  ;;  %v954_v53 = vld [vmem:[#allocation7 + $0x698] sm:$0xff] }
 0x258   :  { %7467 = vmatprep.subr.bf16.mxu1 %v16640_v63  ;;  %v16736_v63 = vcombine.high %v874_v57, %v882_v59  ;;  %v962_v49 = vld [vmem:[#allocation7 + $0x6d8] sm:$0xff] }
 0x25a   :  { %7304 = vmatpush1.bf16.msra.mxu0 %v16637_v7  ;;  %v16733_v7 = vcombine.low %v873_v56, %v881_v41  ;;  %v969_v56 = vld [vmem:[#allocation7 + $0x710] sm:$0xff] }
 0x25b   :  { %7468 = vmatpush1.bf16.msra.mxu1 %v16639_v35  ;;  %7305 = vmatprep.subr.bf16.mxu0 %v16654_v8  ;;  %v16735_v35 = vcombine.low %v874_v57, %v882_v59  ;;  %v16750_v8 = vcombine.high %v889_v2, %v897_v58  ;;  %v977_v41 = vld [vmem:[#allocation7 + $0x750] sm:$0xff]  ;;  %v970_v57 = vld [vmem:[#allocation7 + $0x718] sm:$0xff] }
 0x25c   :  { %7469 = vmatprep.subr.bf16.mxu1 %v16656_v10  ;;  %v16752_v10 = vcombine.high %v890_v4, %v898_v5  ;;  %v978_v59 = vld [vmem:[#allocation7 + $0x758] sm:$0xff] }
 0x25e   :  { %7306 = vmatpush1.bf16.msra.mxu0 %v16653_v20  ;;  %v16749_v20 = vcombine.low %v889_v2, %v897_v58  ;;  %v985_v2 = vld [vmem:[#allocation7 + $0x790] sm:$0xff] }
 0x25f   :  { %7470 = vmatpush1.bf16.msra.mxu1 %v16655_v14  ;;  %7307 = vmatprep.subr.bf16.mxu0 %v16670_v22  ;;  %v16751_v14 = vcombine.low %v890_v4, %v898_v5  ;;  %v16766_v22 = vcombine.high %v905_v11, %v913_v13  ;;  %v993_v58 = vld [vmem:[#allocation7 + $0x7d0] sm:$0xff]  ;;  %v986_v4 = vld [vmem:[#allocation7 + $0x798] sm:$0xff] }
 0x260   :  { %7471 = vmatprep.subr.bf16.mxu1 %v16672_v23  ;;  %v16768_v23 = vcombine.high %v906_v19, %v914_v6  ;;  %v994_v5 = vld [vmem:[#allocation7 + $0x7d8] sm:$0xff] }
 0x262   :  { %7308 = vmatpush1.bf16.msra.mxu0 %v16669_v30  ;;  %v16765_v30 = vcombine.low %v905_v11, %v913_v13  ;;  %v1001_v11 = vld [vmem:[#allocation7 + $0x810] sm:$0xff] }
 0x263   :  { %7472 = vmatpush1.bf16.msra.mxu1 %v16671_v32  ;;  %7309 = vmatprep.subr.bf16.mxu0 %v16686_v33  ;;  %v16767_v32 = vcombine.low %v906_v19, %v914_v6  ;;  %v16782_v33 = vcombine.high %v921_v24, %v929_v25  ;;  %v1009_v13 = vld [vmem:[#allocation7 + $0x850] sm:$0xff]  ;;  %v1002_v19 = vld [vmem:[#allocation7 + $0x818] sm:$0xff] }
 0x264   :  { %7473 = vmatprep.subr.bf16.mxu1 %v16688_v37  ;;  %v16784_v37 = vcombine.high %v922_v28, %v930_v29  ;;  %v1010_v6 = vld [vmem:[#allocation7 + $0x858] sm:$0xff] }
 0x266   :  { %7310 = vmatpush1.bf16.msra.mxu0 %v16685_v43  ;;  %v16781_v43 = vcombine.low %v921_v24, %v929_v25  ;;  %v1017_v24 = vld [vmem:[#allocation7 + $0x890] sm:$0xff] }
 0x267   :  { %7474 = vmatpush1.bf16.msra.mxu1 %v16687_v0  ;;  %7311 = vmatprep.subr.bf16.mxu0 %v16702_v45  ;;  %v16783_v0 = vcombine.low %v922_v28, %v930_v29  ;;  %v16798_v45 = vcombine.high %v937_v38, %v945_v39  ;;  %v1025_v25 = vld [vmem:[#allocation7 + $0x8d0] sm:$0xff]  ;;  %v16861_v28 = vcombine.low %v1001_v11, %v1009_v13  ;;  %v1018_v29 = vld [vmem:[#allocation7 + $0x898] sm:$0xff] }
 0x268   :  { %7475 = vmatprep.subr.bf16.mxu1 %v16704_v46  ;;  %v16800_v46 = vcombine.high %v938_v40, %v946_v42 }
 0x26a   :  { %7312 = vmatpush1.bf16.msra.mxu0 %v16701_v50  ;;  %v16797_v50 = vcombine.low %v937_v38, %v945_v39  ;;  %v1041_v38 = vld [vmem:[#allocation7 + $0x950] sm:$0xff] }
 0x26b   :  { %7476 = vmatpush1.bf16.msra.mxu1 %v16703_v52  ;;  %7313 = vmatprep.subr.bf16.mxu0 %v16718_v55  ;;  %v16799_v52 = vcombine.low %v938_v40, %v946_v42  ;;  %v16814_v55 = vcombine.high %v953_v47, %v961_v48  ;;  %v1034_v40 = vld [vmem:[#allocation7 + $0x918] sm:$0xff] }
 0x26c   :  { %7477 = vmatprep.subr.bf16.mxu1 %v16720_v16  ;;  %v16816_v16 = vcombine.high %v954_v53, %v962_v49  ;;  %v1042_v42 = vld [vmem:[#allocation7 + $0x958] sm:$0xff] }
 0x26e   :  { %7314 = vmatpush1.bf16.msra.mxu0 %v16717_v60  ;;  %v16813_v60 = vcombine.low %v953_v47, %v961_v48  ;;  %v1049_v47 = vld [vmem:[#allocation7 + $0x990] sm:$0xff] }
 0x26f   :  { %7478 = vmatpush1.bf16.msra.mxu1 %v16719_v61  ;;  %7315 = vmatprep.subr.bf16.mxu0 %v16734_v62  ;;  %v16815_v61 = vcombine.low %v954_v53, %v962_v49  ;;  %v16830_v62 = vcombine.high %v969_v56, %v977_v41  ;;  %v1057_v48 = vld [vmem:[#allocation7 + $0x9d0] sm:$0xff]  ;;  %v1050_v53 = vld [vmem:[#allocation7 + $0x998] sm:$0xff] }
 0x270   :  { %7479 = vmatprep.subr.bf16.mxu1 %v16736_v63  ;;  %v16832_v63 = vcombine.high %v970_v57, %v978_v59  ;;  %v1058_v49 = vld [vmem:[#allocation7 + $0x9d8] sm:$0xff] }
 0x272   :  { %7316 = vmatpush1.bf16.msra.mxu0 %v16733_v7  ;;  %v16829_v7 = vcombine.low %v969_v56, %v977_v41  ;;  %v1065_v56 = vld [vmem:[#allocation7 + $0xa10] sm:$0xff] }
 0x273   :  { %7480 = vmatpush1.bf16.msra.mxu1 %v16735_v35  ;;  %7317 = vmatprep.subr.bf16.mxu0 %v16750_v8  ;;  %v16831_v35 = vcombine.low %v970_v57, %v978_v59  ;;  %v16846_v8 = vcombine.high %v985_v2, %v993_v58  ;;  %v1073_v41 = vld [vmem:[#allocation7 + $0xa50] sm:$0xff]  ;;  %v1066_v57 = vld [vmem:[#allocation7 + $0xa18] sm:$0xff] }
 0x274   :  { %7481 = vmatprep.subr.bf16.mxu1 %v16752_v10  ;;  %v16848_v10 = vcombine.high %v986_v4, %v994_v5  ;;  %v1074_v59 = vld [vmem:[#allocation7 + $0xa58] sm:$0xff] }
 0x276   :  { %7318 = vmatpush1.bf16.msra.mxu0 %v16749_v20  ;;  %v16845_v20 = vcombine.low %v985_v2, %v993_v58  ;;  %v1081_v2 = vld [vmem:[#allocation7 + $0xa90] sm:$0xff] }
 0x277   :  { %7482 = vmatpush1.bf16.msra.mxu1 %v16751_v14  ;;  %7319 = vmatprep.subr.bf16.mxu0 %v16766_v22  ;;  %v16847_v14 = vcombine.low %v986_v4, %v994_v5  ;;  %v16862_v22 = vcombine.high %v1001_v11, %v1009_v13  ;;  %v1089_v58 = vld [vmem:[#allocation7 + $0xad0] sm:$0xff]  ;;  %v1082_v4 = vld [vmem:[#allocation7 + $0xa98] sm:$0xff] }
 0x278   :  { %7483 = vmatprep.subr.bf16.mxu1 %v16768_v23  ;;  %v16864_v23 = vcombine.high %v1002_v19, %v1010_v6  ;;  %v1090_v5 = vld [vmem:[#allocation7 + $0xad8] sm:$0xff]  ;;  %v1097_v11 = vld [vmem:[#allocation7 + $0xb10] sm:$0xff] }
 0x279   :  { %v1105_v13 = vld [vmem:[#allocation7 + $0xb50] sm:$0xff] }
 0x27a   :  { %7320 = vmatpush1.bf16.msra.mxu0 %v16765_v30  ;;  %v1026_v30 = vld [vmem:[#allocation7 + $0x8d8] sm:$0xff] }
 0x27b   :  { %7484 = vmatpush1.bf16.msra.mxu1 %v16767_v32  ;;  %7321 = vmatprep.subr.bf16.mxu0 %v16782_v33  ;;  %v16863_v32 = vcombine.low %v1002_v19, %v1010_v6  ;;  %v16878_v33 = vcombine.high %v1017_v24, %v1025_v25  ;;  %v16880_v39 = vcombine.high %v1018_v29, %v1026_v30  ;;  %v1098_v19 = vld [vmem:[#allocation7 + $0xb18] sm:$0xff] }
 0x27c   :  { %7485 = vmatprep.subr.bf16.mxu1 %v16784_v37  ;;  %v1033_v37 = vld [vmem:[#allocation7 + $0x910] sm:$0xff]  ;;  %v1106_v6 = vld [vmem:[#allocation7 + $0xb58] sm:$0xff] }
 0x27e   :  { %7322 = vmatpush1.bf16.msra.mxu0 %v16781_v43  ;;  %v16877_v43 = vcombine.low %v1017_v24, %v1025_v25  ;;  %v1113_v24 = vld [vmem:[#allocation7 + $0xb90] sm:$0xff] }
 0x27f   :  { %7486 = vmatpush1.bf16.msra.mxu1 %v16783_v0  ;;  %7323 = vmatprep.subr.bf16.mxu0 %v16798_v45  ;;  %v16879_v0 = vcombine.low %v1018_v29, %v1026_v30  ;;  %v16894_v45 = vcombine.high %v1033_v37, %v1041_v38  ;;  %v1121_v25 = vld [vmem:[#allocation7 + $0xbd0] sm:$0xff]  ;;  %v1122_v29 = vld [vmem:[#allocation7 + $0xbd8] sm:$0xff]  ;;  %v16957_v30 = vcombine.low %v1097_v11, %v1105_v13 }
 0x280   :  { %7487 = vmatprep.subr.bf16.mxu1 %v16800_v46  ;;  %v16896_v46 = vcombine.high %v1034_v40, %v1042_v42 }
 0x282   :  { %7324 = vmatpush1.bf16.msra.mxu0 %v16797_v50  ;;  %v16893_v50 = vcombine.low %v1033_v37, %v1041_v38  ;;  %v1129_v38 = vld [vmem:[#allocation7 + $0xc10] sm:$0xff] }
 0x283   :  { %7488 = vmatpush1.bf16.msra.mxu1 %v16799_v52  ;;  %7325 = vmatprep.subr.bf16.mxu0 %v16814_v55  ;;  %v16895_v52 = vcombine.low %v1034_v40, %v1042_v42  ;;  %v16910_v55 = vcombine.high %v1049_v47, %v1057_v48  ;;  %v1130_v40 = vld [vmem:[#allocation7 + $0xc18] sm:$0xff] }
 0x284   :  { %7489 = vmatprep.subr.bf16.mxu1 %v16816_v16  ;;  %v16912_v16 = vcombine.high %v1050_v53, %v1058_v49  ;;  %v1138_v42 = vld [vmem:[#allocation7 + $0xc58] sm:$0xff] }
 0x286   :  { %7326 = vmatpush1.bf16.msra.mxu0 %v16813_v60  ;;  %v16909_v60 = vcombine.low %v1049_v47, %v1057_v48  ;;  %v1145_v47 = vld [vmem:[#allocation7 + $0xc90] sm:$0xff] }
 0x287   :  { %7490 = vmatpush1.bf16.msra.mxu1 %v16815_v61  ;;  %7327 = vmatprep.subr.bf16.mxu0 %v16830_v62  ;;  %v16911_v61 = vcombine.low %v1050_v53, %v1058_v49  ;;  %v16926_v62 = vcombine.high %v1065_v56, %v1073_v41  ;;  %v1153_v48 = vld [vmem:[#allocation7 + $0xcd0] sm:$0xff]  ;;  %v1146_v53 = vld [vmem:[#allocation7 + $0xc98] sm:$0xff] }
 0x288   :  { %7491 = vmatprep.subr.bf16.mxu1 %v16832_v63  ;;  %v16928_v63 = vcombine.high %v1066_v57, %v1074_v59  ;;  %v1154_v49 = vld [vmem:[#allocation7 + $0xcd8] sm:$0xff] }
 0x28a   :  { %7328 = vmatpush1.bf16.msra.mxu0 %v16829_v7  ;;  %v16925_v7 = vcombine.low %v1065_v56, %v1073_v41  ;;  %v1161_v56 = vld [vmem:[#allocation7 + $0xd10] sm:$0xff] }
 0x28b   :  { %7492 = vmatpush1.bf16.msra.mxu1 %v16831_v35  ;;  %7329 = vmatprep.subr.bf16.mxu0 %v16846_v8  ;;  %v16927_v35 = vcombine.low %v1066_v57, %v1074_v59  ;;  %v16942_v8 = vcombine.high %v1081_v2, %v1089_v58  ;;  %v1169_v41 = vld [vmem:[#allocation7 + $0xd50] sm:$0xff]  ;;  %v1162_v57 = vld [vmem:[#allocation7 + $0xd18] sm:$0xff] }
 0x28c   :  { %7493 = vmatprep.subr.bf16.mxu1 %v16848_v10  ;;  %v16944_v10 = vcombine.high %v1082_v4, %v1090_v5  ;;  %v1170_v59 = vld [vmem:[#allocation7 + $0xd58] sm:$0xff] }
 0x28e   :  { %7330 = vmatpush1.bf16.msra.mxu0 %v16845_v20  ;;  %v16941_v20 = vcombine.low %v1081_v2, %v1089_v58  ;;  %v1177_v2 = vld [vmem:[#allocation7 + $0xd90] sm:$0xff] }
 0x28f   :  { %7494 = vmatpush1.bf16.msra.mxu1 %v16847_v14  ;;  %7340 = vmatprep.subr.bf16.mxu0 %v16862_v22  ;;  %v16943_v14 = vcombine.low %v1082_v4, %v1090_v5  ;;  %v16958_v22 = vcombine.high %v1097_v11, %v1105_v13  ;;  %v1185_v58 = vld [vmem:[#allocation7 + $0xdd0] sm:$0xff]  ;;  %v1178_v4 = vld [vmem:[#allocation7 + $0xd98] sm:$0xff] }
 0x290   :  { %7504 = vmatprep.subr.bf16.mxu1 %v16864_v23  ;;  %v16960_v23 = vcombine.high %v1098_v19, %v1106_v6  ;;  %v1186_v5 = vld [vmem:[#allocation7 + $0xdd8] sm:$0xff]  ;;  %v1193_v11 = vld [vmem:[#allocation7 + $0xe10] sm:$0xff] }
 0x291   :  { %7332 = vmatmul.mubr.bf16.vlgmr.msra.gmra.mrb[12].mxu0 %v19543_v36  ;;  %v1201_v13 = vld [vmem:[#allocation7 + $0xe50] sm:$0xff] }
 0x292   :  { %7496 = vmatmul.mubr.bf16.vlgmr.msra.gmra.mrb[12].mxu1 %v19543_v36  ;;  %7341 = vmatpush1.bf16.msra.mxu0 %v16861_v28  ;;  %v1114_v28 = vld [vmem:[#allocation7 + $0xb98] sm:$0xff] }
 0x293   :  { %7372 = vmatprep.mubr.bf16.mxu0 %v19549_v54  ;;  %7505 = vmatpush1.bf16.msra.mxu1 %v16863_v32  ;;  %v16959_v32 = vcombine.low %v1098_v19, %v1106_v6  ;;  %v16976_v37 = vcombine.high %v1114_v28, %v1122_v29  ;;  %v1194_v19 = vld [vmem:[#allocation7 + $0xe18] sm:$0xff] }
 0x294   :  { %7536 = vmatprep.mubr.bf16.mxu1 %v19549_v54  ;;  %7342 = vmatprep.subr.bf16.mxu0 %v16878_v33  ;;  %v16974_v33 = vcombine.high %v1113_v24, %v1121_v25  ;;  %v1202_v6 = vld [vmem:[#allocation7 + $0xe58] sm:$0xff] }
 0x295   :  { %7506 = vmatprep.subr.bf16.mxu1 %v16880_v39  ;;  %v1137_v39 = vld [vmem:[#allocation7 + $0xc50] sm:$0xff] }
 0x296   :  { %7343 = vmatpush1.bf16.msra.mxu0 %v16877_v43  ;;  %v16973_v43 = vcombine.low %v1113_v24, %v1121_v25  ;;  %v1209_v24 = vld [vmem:[#allocation7 + $0xe90] sm:$0xff] }
 0x297   :  { %7507 = vmatpush1.bf16.msra.mxu1 %v16879_v0  ;;  %7344 = vmatprep.subr.bf16.mxu0 %v16894_v45  ;;  %v16975_v0 = vcombine.low %v1114_v28, %v1122_v29  ;;  %v16990_v45 = vcombine.high %v1129_v38, %v1137_v39  ;;  %v1217_v25 = vld [vmem:[#allocation7 + $0xed0] sm:$0xff]  ;;  %v1210_v28 = vld [vmem:[#allocation7 + $0xe98] sm:$0xff] }
 0x298   :  { %7508 = vmatprep.subr.bf16.mxu1 %v16896_v46  ;;  %v16992_v46 = vcombine.high %v1130_v40, %v1138_v42  ;;  %v1218_v29 = vld [vmem:[#allocation7 + $0xed8] sm:$0xff] }
 0x29a   :  { %7345 = vmatpush1.bf16.msra.mxu0 %v16893_v50  ;;  %v16989_v50 = vcombine.low %v1129_v38, %v1137_v39  ;;  %v1225_v38 = vld [vmem:[#allocation7 + $0xf10] sm:$0xff] }
 0x29b   :  { %7509 = vmatpush1.bf16.msra.mxu1 %v16895_v52  ;;  %7346 = vmatprep.subr.bf16.mxu0 %v16910_v55  ;;  %v16991_v52 = vcombine.low %v1130_v40, %v1138_v42  ;;  %v17006_v55 = vcombine.high %v1145_v47, %v1153_v48  ;;  %v1233_v39 = vld [vmem:[#allocation7 + $0xf50] sm:$0xff]  ;;  %v1226_v40 = vld [vmem:[#allocation7 + $0xf18] sm:$0xff] }
 0x29c   :  { %7510 = vmatprep.subr.bf16.mxu1 %v16912_v16  ;;  %v17008_v16 = vcombine.high %v1146_v53, %v1154_v49  ;;  %v1234_v42 = vld [vmem:[#allocation7 + $0xf58] sm:$0xff] }
 0x29e   :  { %7347 = vmatpush1.bf16.msra.mxu0 %v16909_v60  ;;  %v17005_v60 = vcombine.low %v1145_v47, %v1153_v48  ;;  %v1241_v47 = vld [vmem:[#allocation7 + $0xf90] sm:$0xff] }
 0x29f   :  { %7511 = vmatpush1.bf16.msra.mxu1 %v16911_v61  ;;  %7348 = vmatprep.subr.bf16.mxu0 %v16926_v62  ;;  %v17007_v61 = vcombine.low %v1146_v53, %v1154_v49  ;;  %v17022_v62 = vcombine.high %v1161_v56, %v1169_v41  ;;  %v1249_v48 = vld [vmem:[#allocation7 + $0xfd0] sm:$0xff]  ;;  %v1242_v53 = vld [vmem:[#allocation7 + $0xf98] sm:$0xff] }
 0x2a0   :  { %7512 = vmatprep.subr.bf16.mxu1 %v16928_v63  ;;  %v17024_v63 = vcombine.high %v1162_v57, %v1170_v59  ;;  %v1250_v49 = vld [vmem:[#allocation7 + $0xfd8] sm:$0xff] }
 0x2a2   :  { %7349 = vmatpush1.bf16.msra.mxu0 %v16925_v7  ;;  %v17021_v7 = vcombine.low %v1161_v56, %v1169_v41  ;;  %v1257_v56 = vld [vmem:[#allocation7 + $0x1010] sm:$0xff] }
 0x2a3   :  { %7513 = vmatpush1.bf16.msra.mxu1 %v16927_v35  ;;  %7350 = vmatprep.subr.bf16.mxu0 %v16942_v8  ;;  %v17023_v35 = vcombine.low %v1162_v57, %v1170_v59  ;;  %v17038_v8 = vcombine.high %v1177_v2, %v1185_v58  ;;  %v1265_v41 = vld [vmem:[#allocation7 + $0x1050] sm:$0xff]  ;;  %v1258_v57 = vld [vmem:[#allocation7 + $0x1018] sm:$0xff] }
 0x2a4   :  { %7514 = vmatprep.subr.bf16.mxu1 %v16944_v10  ;;  %v17040_v10 = vcombine.high %v1178_v4, %v1186_v5  ;;  %v1266_v59 = vld [vmem:[#allocation7 + $0x1058] sm:$0xff] }
 0x2a6   :  { %7351 = vmatpush1.bf16.msra.mxu0 %v16941_v20  ;;  %v17037_v20 = vcombine.low %v1177_v2, %v1185_v58  ;;  %v1273_v2 = vld [vmem:[#allocation7 + $0x1090] sm:$0xff] }
 0x2a7   :  { %7515 = vmatpush1.bf16.msra.mxu1 %v16943_v14  ;;  %7352 = vmatprep.subr.bf16.mxu0 %v16958_v22  ;;  %v17039_v14 = vcombine.low %v1178_v4, %v1186_v5  ;;  %v17054_v22 = vcombine.high %v1193_v11, %v1201_v13  ;;  %v1281_v58 = vld [vmem:[#allocation7 + $0x10d0] sm:$0xff]  ;;  %v17117_v4 = vcombine.low %v1257_v56, %v1265_v41  ;;  %v1274_v5 = vld [vmem:[#allocation7 + $0x1098] sm:$0xff] }
 0x2a8   :  { %7516 = vmatprep.subr.bf16.mxu1 %v16960_v23  ;;  %v17056_v23 = vcombine.high %v1194_v19, %v1202_v6 }
 0x2aa   :  { %7353 = vmatpush1.bf16.msra.mxu0 %v16957_v30  ;;  %v17053_v30 = vcombine.low %v1193_v11, %v1201_v13  ;;  %v1297_v11 = vld [vmem:[#allocation7 + $0x1150] sm:$0xff] }
 0x2ab   :  { %7517 = vmatpush1.bf16.msra.mxu1 %v16959_v32  ;;  %7354 = vmatprep.subr.bf16.mxu0 %v16974_v33  ;;  %v17055_v32 = vcombine.low %v1194_v19, %v1202_v6  ;;  %v17070_v33 = vcombine.high %v1209_v24, %v1217_v25  ;;  %v1290_v19 = vld [vmem:[#allocation7 + $0x1118] sm:$0xff] }
 0x2ac   :  { %7518 = vmatprep.subr.bf16.mxu1 %v16976_v37  ;;  %v17072_v37 = vcombine.high %v1210_v28, %v1218_v29  ;;  %v1298_v6 = vld [vmem:[#allocation7 + $0x1158] sm:$0xff] }
 0x2ae   :  { %7355 = vmatpush1.bf16.msra.mxu0 %v16973_v43  ;;  %v17069_v43 = vcombine.low %v1209_v24, %v1217_v25  ;;  %v1305_v24 = vld [vmem:[#allocation7 + $0x1190] sm:$0xff] }
 0x2af   :  { %7519 = vmatpush1.bf16.msra.mxu1 %v16975_v0  ;;  %7356 = vmatprep.subr.bf16.mxu0 %v16990_v45  ;;  %v17071_v0 = vcombine.low %v1210_v28, %v1218_v29  ;;  %v17086_v45 = vcombine.high %v1225_v38, %v1233_v39  ;;  %v1313_v25 = vld [vmem:[#allocation7 + $0x11d0] sm:$0xff]  ;;  %v1306_v28 = vld [vmem:[#allocation7 + $0x1198] sm:$0xff] }
 0x2b0   :  { %7520 = vmatprep.subr.bf16.mxu1 %v16992_v46  ;;  %v17088_v46 = vcombine.high %v1226_v40, %v1234_v42  ;;  %v1314_v29 = vld [vmem:[#allocation7 + $0x11d8] sm:$0xff] }
 0x2b2   :  { %7357 = vmatpush1.bf16.msra.mxu0 %v16989_v50  ;;  %v17085_v50 = vcombine.low %v1225_v38, %v1233_v39  ;;  %v1321_v38 = vld [vmem:[#allocation7 + $0x1210] sm:$0xff] }
 0x2b3   :  { %7521 = vmatpush1.bf16.msra.mxu1 %v16991_v52  ;;  %7358 = vmatprep.subr.bf16.mxu0 %v17006_v55  ;;  %v17087_v52 = vcombine.low %v1226_v40, %v1234_v42  ;;  %v17102_v55 = vcombine.high %v1241_v47, %v1249_v48  ;;  %v1329_v39 = vld [vmem:[#allocation7 + $0x1250] sm:$0xff]  ;;  %v1322_v40 = vld [vmem:[#allocation7 + $0x1218] sm:$0xff] }
 0x2b4   :  { %7522 = vmatprep.subr.bf16.mxu1 %v17008_v16  ;;  %v17104_v16 = vcombine.high %v1242_v53, %v1250_v49  ;;  %v1330_v42 = vld [vmem:[#allocation7 + $0x1258] sm:$0xff] }
 0x2b6   :  { %7359 = vmatpush1.bf16.msra.mxu0 %v17005_v60  ;;  %v17101_v60 = vcombine.low %v1241_v47, %v1249_v48  ;;  %v1337_v47 = vld [vmem:[#allocation7 + $0x1290] sm:$0xff] }
 0x2b7   :  { %7523 = vmatpush1.bf16.msra.mxu1 %v17007_v61  ;;  %7360 = vmatprep.subr.bf16.mxu0 %v17022_v62  ;;  %v17103_v61 = vcombine.low %v1242_v53, %v1250_v49  ;;  %v17118_v62 = vcombine.high %v1257_v56, %v1265_v41  ;;  %v1345_v48 = vld [vmem:[#allocation7 + $0x12d0] sm:$0xff]  ;;  %v1338_v53 = vld [vmem:[#allocation7 + $0x1298] sm:$0xff] }
 0x2b8   :  { %7524 = vmatprep.subr.bf16.mxu1 %v17024_v63  ;;  %v17120_v63 = vcombine.high %v1258_v57, %v1266_v59  ;;  %v1346_v49 = vld [vmem:[#allocation7 + $0x12d8] sm:$0xff]  ;;  %v1353_v56 = vld [vmem:[#allocation7 + $0x1310] sm:$0xff] }
 0x2b9   :  { %v1361_v41 = vld [vmem:[#allocation7 + $0x1350] sm:$0xff] }
 0x2ba   :  { %7361 = vmatpush1.bf16.msra.mxu0 %v17021_v7  ;;  %v1282_v7 = vld [vmem:[#allocation7 + $0x10d8] sm:$0xff] }
 0x2bb   :  { %7525 = vmatpush1.bf16.msra.mxu1 %v17023_v35  ;;  %7362 = vmatprep.subr.bf16.mxu0 %v17038_v8  ;;  %v17119_v35 = vcombine.low %v1258_v57, %v1266_v59  ;;  %v17134_v8 = vcombine.high %v1273_v2, %v1281_v58  ;;  %v17136_v13 = vcombine.high %v1274_v5, %v1282_v7  ;;  %v1354_v57 = vld [vmem:[#allocation7 + $0x1318] sm:$0xff] }
 0x2bc   :  { %7526 = vmatprep.subr.bf16.mxu1 %v17040_v10  ;;  %v1289_v10 = vld [vmem:[#allocation7 + $0x1110] sm:$0xff]  ;;  %v1362_v59 = vld [vmem:[#allocation7 + $0x1358] sm:$0xff] }
 0x2be   :  { %7363 = vmatpush1.bf16.msra.mxu0 %v17037_v20  ;;  %v17133_v20 = vcombine.low %v1273_v2, %v1281_v58  ;;  %v1369_v2 = vld [vmem:[#allocation7 + $0x1390] sm:$0xff] }
 0x2bf   :  { %7527 = vmatpush1.bf16.msra.mxu1 %v17039_v14  ;;  %7364 = vmatprep.subr.bf16.mxu0 %v17054_v22  ;;  %v17135_v14 = vcombine.low %v1274_v5, %v1282_v7  ;;  %v17150_v22 = vcombine.high %v1289_v10, %v1297_v11  ;;  %v1377_v58 = vld [vmem:[#allocation7 + $0x13d0] sm:$0xff]  ;;  %v1378_v5 = vld [vmem:[#allocation7 + $0x13d8] sm:$0xff]  ;;  %v17213_v7 = vcombine.low %v1353_v56, %v1361_v41 }
 0x2c0   :  { %7528 = vmatprep.subr.bf16.mxu1 %v17056_v23  ;;  %v17152_v23 = vcombine.high %v1290_v19, %v1298_v6 }
 0x2c2   :  { %7365 = vmatpush1.bf16.msra.mxu0 %v17053_v30  ;;  %v17149_v30 = vcombine.low %v1289_v10, %v1297_v11  ;;  %v1385_v11 = vld [vmem:[#allocation7 + $0x1410] sm:$0xff] }
 0x2c3   :  { %7529 = vmatpush1.bf16.msra.mxu1 %v17055_v32  ;;  %7366 = vmatprep.subr.bf16.mxu0 %v17070_v33  ;;  %v17151_v32 = vcombine.low %v1290_v19, %v1298_v6  ;;  %v17166_v33 = vcombine.high %v1305_v24, %v1313_v25  ;;  %v1386_v19 = vld [vmem:[#allocation7 + $0x1418] sm:$0xff] }
 0x2c4   :  { %7530 = vmatprep.subr.bf16.mxu1 %v17072_v37  ;;  %v17168_v37 = vcombine.high %v1306_v28, %v1314_v29  ;;  %v1394_v6 = vld [vmem:[#allocation7 + $0x1458] sm:$0xff] }
 0x2c6   :  { %7367 = vmatpush1.bf16.msra.mxu0 %v17069_v43  ;;  %v17165_v43 = vcombine.low %v1305_v24, %v1313_v25  ;;  %v1401_v24 = vld [vmem:[#allocation7 + $0x1490] sm:$0xff] }
 0x2c7   :  { %7531 = vmatpush1.bf16.msra.mxu1 %v17071_v0  ;;  %7368 = vmatprep.subr.bf16.mxu0 %v17086_v45  ;;  %v17167_v0 = vcombine.low %v1306_v28, %v1314_v29  ;;  %v17182_v45 = vcombine.high %v1321_v38, %v1329_v39  ;;  %v1409_v25 = vld [vmem:[#allocation7 + $0x14d0] sm:$0xff]  ;;  %v1402_v28 = vld [vmem:[#allocation7 + $0x1498] sm:$0xff] }
 0x2c8   :  { %7532 = vmatprep.subr.bf16.mxu1 %v17088_v46  ;;  %v17184_v46 = vcombine.high %v1322_v40, %v1330_v42  ;;  %v1410_v29 = vld [vmem:[#allocation7 + $0x14d8] sm:$0xff] }
 0x2ca   :  { %7369 = vmatpush1.bf16.msra.mxu0 %v17085_v50  ;;  %v17181_v50 = vcombine.low %v1321_v38, %v1329_v39  ;;  %v1417_v38 = vld [vmem:[#allocation7 + $0x1510] sm:$0xff] }
 0x2cb   :  { %7533 = vmatpush1.bf16.msra.mxu1 %v17087_v52  ;;  %7370 = vmatprep.subr.bf16.mxu0 %v17102_v55  ;;  %v17183_v52 = vcombine.low %v1322_v40, %v1330_v42  ;;  %v17198_v55 = vcombine.high %v1337_v47, %v1345_v48  ;;  %v1425_v39 = vld [vmem:[#allocation7 + $0x1550] sm:$0xff]  ;;  %v1418_v40 = vld [vmem:[#allocation7 + $0x1518] sm:$0xff] }
 0x2cc   :  { %7534 = vmatprep.subr.bf16.mxu1 %v17104_v16  ;;  %v17200_v16 = vcombine.high %v1338_v53, %v1346_v49  ;;  %v1426_v42 = vld [vmem:[#allocation7 + $0x1558] sm:$0xff] }
 0x2ce   :  { %7371 = vmatpush1.bf16.msra.mxu0 %v17101_v60  ;;  %v17197_v60 = vcombine.low %v1337_v47, %v1345_v48  ;;  %v1433_v47 = vld [vmem:[#allocation7 + $0x1590] sm:$0xff] }
 0x2cf   :  { %7535 = vmatpush1.bf16.msra.mxu1 %v17103_v61  ;;  %7381 = vmatprep.subr.bf16.mxu0 %v17118_v62  ;;  %v17199_v61 = vcombine.low %v1338_v53, %v1346_v49  ;;  %v17214_v62 = vcombine.high %v1353_v56, %v1361_v41  ;;  %v1441_v48 = vld [vmem:[#allocation7 + $0x15d0] sm:$0xff]  ;;  %v1434_v53 = vld [vmem:[#allocation7 + $0x1598] sm:$0xff] }
 0x2d0   :  { %7545 = vmatprep.subr.bf16.mxu1 %v17120_v63  ;;  %v17216_v63 = vcombine.high %v1354_v57, %v1362_v59  ;;  %v1442_v49 = vld [vmem:[#allocation7 + $0x15d8] sm:$0xff]  ;;  %v1449_v56 = vld [vmem:[#allocation7 + $0x1610] sm:$0xff] }
 0x2d1   :  { %7373 = vmatmul.mubr.bf16.vlgmr.msra.gmra.mrb[12].mxu0 %v19573_v18  ;;  %v1457_v41 = vld [vmem:[#allocation7 + $0x1650] sm:$0xff] }
 0x2d2   :  { %7537 = vmatmul.mubr.bf16.vlgmr.msra.gmra.mrb[12].mxu1 %v19573_v18  ;;  %7382 = vmatpush1.bf16.msra.mxu0 %v17117_v4  ;;  %v1370_v4 = vld [vmem:[#allocation7 + $0x1398] sm:$0xff] }
 0x2d3   :  { %7413 = vmatprep.mubr.bf16.mxu0 %v19575_v27  ;;  %7546 = vmatpush1.bf16.msra.mxu1 %v17119_v35  ;;  %v17215_v35 = vcombine.low %v1354_v57, %v1362_v59  ;;  %v17232_v10 = vcombine.high %v1370_v4, %v1378_v5  ;;  %v1450_v57 = vld [vmem:[#allocation7 + $0x1618] sm:$0xff] }
 0x2d4   :  { %7577 = vmatprep.mubr.bf16.mxu1 %v19575_v27  ;;  %7383 = vmatprep.subr.bf16.mxu0 %v17134_v8  ;;  %v17230_v8 = vcombine.high %v1369_v2, %v1377_v58  ;;  %v1458_v59 = vld [vmem:[#allocation7 + $0x1658] sm:$0xff] }
 0x2d5   :  { %7547 = vmatprep.subr.bf16.mxu1 %v17136_v13  ;;  %v1393_v13 = vld [vmem:[#allocation7 + $0x1450] sm:$0xff] }
 0x2d6   :  { %7384 = vmatpush1.bf16.msra.mxu0 %v17133_v20  ;;  %v17229_v20 = vcombine.low %v1369_v2, %v1377_v58  ;;  %v1465_v2 = vld [vmem:[#allocation7 + $0x1690] sm:$0xff] }
 0x2d7   :  { %7548 = vmatpush1.bf16.msra.mxu1 %v17135_v14  ;;  %7385 = vmatprep.subr.bf16.mxu0 %v17150_v22  ;;  %v17231_v14 = vcombine.low %v1370_v4, %v1378_v5  ;;  %v17246_v22 = vcombine.high %v1385_v11, %v1393_v13  ;;  %v1473_v58 = vld [vmem:[#allocation7 + $0x16d0] sm:$0xff]  ;;  %v1466_v4 = vld [vmem:[#allocation7 + $0x1698] sm:$0xff] }
 0x2d8   :  { %7549 = vmatprep.subr.bf16.mxu1 %v17152_v23  ;;  %v17248_v23 = vcombine.high %v1386_v19, %v1394_v6  ;;  %v1474_v5 = vld [vmem:[#allocation7 + $0x16d8] sm:$0xff] }
 0x2da   :  { %7386 = vmatpush1.bf16.msra.mxu0 %v17149_v30  ;;  %v17245_v30 = vcombine.low %v1385_v11, %v1393_v13  ;;  %v1481_v11 = vld [vmem:[#allocation7 + $0x1710] sm:$0xff] }
 0x2db   :  { %7550 = vmatpush1.bf16.msra.mxu1 %v17151_v32  ;;  %7387 = vmatprep.subr.bf16.mxu0 %v17166_v33  ;;  %v17247_v32 = vcombine.low %v1386_v19, %v1394_v6  ;;  %v17262_v33 = vcombine.high %v1401_v24, %v1409_v25  ;;  %v1489_v13 = vld [vmem:[#allocation7 + $0x1750] sm:$0xff]  ;;  %v1482_v19 = vld [vmem:[#allocation7 + $0x1718] sm:$0xff] }
 0x2dc   :  { %7551 = vmatprep.subr.bf16.mxu1 %v17168_v37  ;;  %v17264_v37 = vcombine.high %v1402_v28, %v1410_v29  ;;  %v1490_v6 = vld [vmem:[#allocation7 + $0x1758] sm:$0xff] }
 0x2de   :  { %7388 = vmatpush1.bf16.msra.mxu0 %v17165_v43  ;;  %v17261_v43 = vcombine.low %v1401_v24, %v1409_v25  ;;  %v1497_v24 = vld [vmem:[#allocation7 + $0x1790] sm:$0xff] }
 0x2df   :  { %7552 = vmatpush1.bf16.msra.mxu1 %v17167_v0  ;;  %7389 = vmatprep.subr.bf16.mxu0 %v17182_v45  ;;  %v17263_v0 = vcombine.low %v1402_v28, %v1410_v29  ;;  %v17278_v45 = vcombine.high %v1417_v38, %v1425_v39  ;;  %v1505_v25 = vld [vmem:[#allocation7 + $0x17d0] sm:$0xff]  ;;  %v1498_v28 = vld [vmem:[#allocation7 + $0x1798] sm:$0xff] }
 0x2e0   :  { %7553 = vmatprep.subr.bf16.mxu1 %v17184_v46  ;;  %v17280_v46 = vcombine.high %v1418_v40, %v1426_v42  ;;  %v1506_v29 = vld [vmem:[#allocation7 + $0x17d8] sm:$0xff] }
 0x2e2   :  { %7390 = vmatpush1.bf16.msra.mxu0 %v17181_v50  ;;  %v17277_v50 = vcombine.low %v1417_v38, %v1425_v39  ;;  %v1513_v38 = vld [vmem:[#allocation7 + $0x1810] sm:$0xff] }
 0x2e3   :  { %7554 = vmatpush1.bf16.msra.mxu1 %v17183_v52  ;;  %7391 = vmatprep.subr.bf16.mxu0 %v17198_v55  ;;  %v17279_v52 = vcombine.low %v1418_v40, %v1426_v42  ;;  %v17294_v55 = vcombine.high %v1433_v47, %v1441_v48  ;;  %v1521_v39 = vld [vmem:[#allocation7 + $0x1850] sm:$0xff]  ;;  %v1514_v40 = vld [vmem:[#allocation7 + $0x1818] sm:$0xff] }
 0x2e4   :  { %7555 = vmatprep.subr.bf16.mxu1 %v17200_v16  ;;  %v17296_v16 = vcombine.high %v1434_v53, %v1442_v49  ;;  %v1522_v42 = vld [vmem:[#allocation7 + $0x1858] sm:$0xff] }
 0x2e6   :  { %7392 = vmatpush1.bf16.msra.mxu0 %v17197_v60  ;;  %v17293_v60 = vcombine.low %v1433_v47, %v1441_v48  ;;  %v1529_v47 = vld [vmem:[#allocation7 + $0x1890] sm:$0xff] }
 0x2e7   :  { %7556 = vmatpush1.bf16.msra.mxu1 %v17199_v61  ;;  %7393 = vmatprep.subr.bf16.mxu0 %v17214_v62  ;;  %v17295_v61 = vcombine.low %v1434_v53, %v1442_v49  ;;  %v17310_v62 = vcombine.high %v1449_v56, %v1457_v41  ;;  %v1537_v48 = vld [vmem:[#allocation7 + $0x18d0] sm:$0xff]  ;;  %v17373_v53 = vcombine.low %v1513_v38, %v1521_v39  ;;  %v1530_v49 = vld [vmem:[#allocation7 + $0x1898] sm:$0xff] }
 0x2e8   :  { %7557 = vmatprep.subr.bf16.mxu1 %v17216_v63  ;;  %v17312_v63 = vcombine.high %v1450_v57, %v1458_v59 }
 0x2ea   :  { %7394 = vmatpush1.bf16.msra.mxu0 %v17213_v7  ;;  %v17309_v7 = vcombine.low %v1449_v56, %v1457_v41  ;;  %v1553_v56 = vld [vmem:[#allocation7 + $0x1950] sm:$0xff] }
 0x2eb   :  { %7558 = vmatpush1.bf16.msra.mxu1 %v17215_v35  ;;  %7395 = vmatprep.subr.bf16.mxu0 %v17230_v8  ;;  %v17311_v35 = vcombine.low %v1450_v57, %v1458_v59  ;;  %v17326_v8 = vcombine.high %v1465_v2, %v1473_v58  ;;  %v1546_v57 = vld [vmem:[#allocation7 + $0x1918] sm:$0xff] }
 0x2ec   :  { %7559 = vmatprep.subr.bf16.mxu1 %v17232_v10  ;;  %v17328_v10 = vcombine.high %v1466_v4, %v1474_v5  ;;  %v1554_v59 = vld [vmem:[#allocation7 + $0x1958] sm:$0xff] }
 0x2ee   :  { %7396 = vmatpush1.bf16.msra.mxu0 %v17229_v20  ;;  %v17325_v20 = vcombine.low %v1465_v2, %v1473_v58  ;;  %v1561_v2 = vld [vmem:[#allocation7 + $0x1990] sm:$0xff] }
 0x2ef   :  { %7560 = vmatpush1.bf16.msra.mxu1 %v17231_v14  ;;  %7397 = vmatprep.subr.bf16.mxu0 %v17246_v22  ;;  %v17327_v14 = vcombine.low %v1466_v4, %v1474_v5  ;;  %v17342_v22 = vcombine.high %v1481_v11, %v1489_v13  ;;  %v1569_v58 = vld [vmem:[#allocation7 + $0x19d0] sm:$0xff]  ;;  %v1562_v4 = vld [vmem:[#allocation7 + $0x1998] sm:$0xff] }
 0x2f0   :  { %7561 = vmatprep.subr.bf16.mxu1 %v17248_v23  ;;  %v17344_v23 = vcombine.high %v1482_v19, %v1490_v6  ;;  %v1570_v5 = vld [vmem:[#allocation7 + $0x19d8] sm:$0xff] }
 0x2f2   :  { %7398 = vmatpush1.bf16.msra.mxu0 %v17245_v30  ;;  %v17341_v30 = vcombine.low %v1481_v11, %v1489_v13  ;;  %v1577_v11 = vld [vmem:[#allocation7 + $0x1a10] sm:$0xff] }
 0x2f3   :  { %7562 = vmatpush1.bf16.msra.mxu1 %v17247_v32  ;;  %7399 = vmatprep.subr.bf16.mxu0 %v17262_v33  ;;  %v17343_v32 = vcombine.low %v1482_v19, %v1490_v6  ;;  %v17358_v33 = vcombine.high %v1497_v24, %v1505_v25  ;;  %v1585_v13 = vld [vmem:[#allocation7 + $0x1a50] sm:$0xff]  ;;  %v1578_v19 = vld [vmem:[#allocation7 + $0x1a18] sm:$0xff] }
 0x2f4   :  { %7563 = vmatprep.subr.bf16.mxu1 %v17264_v37  ;;  %v17360_v37 = vcombine.high %v1498_v28, %v1506_v29  ;;  %v1586_v6 = vld [vmem:[#allocation7 + $0x1a58] sm:$0xff] }
 0x2f6   :  { %7400 = vmatpush1.bf16.msra.mxu0 %v17261_v43  ;;  %v17357_v43 = vcombine.low %v1497_v24, %v1505_v25  ;;  %v1593_v24 = vld [vmem:[#allocation7 + $0x1a90] sm:$0xff] }
 0x2f7   :  { %7564 = vmatpush1.bf16.msra.mxu1 %v17263_v0  ;;  %7401 = vmatprep.subr.bf16.mxu0 %v17278_v45  ;;  %v17359_v0 = vcombine.low %v1498_v28, %v1506_v29  ;;  %v17374_v45 = vcombine.high %v1513_v38, %v1521_v39  ;;  %v1601_v25 = vld [vmem:[#allocation7 + $0x1ad0] sm:$0xff]  ;;  %v1594_v28 = vld [vmem:[#allocation7 + $0x1a98] sm:$0xff] }
 0x2f8   :  { %7565 = vmatprep.subr.bf16.mxu1 %v17280_v46  ;;  %v17376_v46 = vcombine.high %v1514_v40, %v1522_v42  ;;  %v1602_v29 = vld [vmem:[#allocation7 + $0x1ad8] sm:$0xff]  ;;  %v1609_v38 = vld [vmem:[#allocation7 + $0x1b10] sm:$0xff] }
 0x2f9   :  { %v1617_v39 = vld [vmem:[#allocation7 + $0x1b50] sm:$0xff] }
 0x2fa   :  { %7402 = vmatpush1.bf16.msra.mxu0 %v17277_v50  ;;  %v1538_v50 = vld [vmem:[#allocation7 + $0x18d8] sm:$0xff] }
 0x2fb   :  { %7566 = vmatpush1.bf16.msra.mxu1 %v17279_v52  ;;  %7403 = vmatprep.subr.bf16.mxu0 %v17294_v55  ;;  %v17375_v52 = vcombine.low %v1514_v40, %v1522_v42  ;;  %v17390_v55 = vcombine.high %v1529_v47, %v1537_v48  ;;  %v17392_v41 = vcombine.high %v1530_v49, %v1538_v50  ;;  %v1610_v40 = vld [vmem:[#allocation7 + $0x1b18] sm:$0xff] }
 0x2fc   :  { %7567 = vmatprep.subr.bf16.mxu1 %v17296_v16  ;;  %v1545_v16 = vld [vmem:[#allocation7 + $0x1910] sm:$0xff]  ;;  %v1618_v42 = vld [vmem:[#allocation7 + $0x1b58] sm:$0xff] }
 0x2fe   :  { %7404 = vmatpush1.bf16.msra.mxu0 %v17293_v60  ;;  %v17389_v60 = vcombine.low %v1529_v47, %v1537_v48  ;;  %v17472_v48 = vcombine.high %v1610_v40, %v1618_v42 }
 0x2ff   :  { %7568 = vmatpush1.bf16.msra.mxu1 %v17295_v61  ;;  %7405 = vmatprep.subr.bf16.mxu0 %v17310_v62  ;;  %v17391_v61 = vcombine.low %v1530_v49, %v1538_v50  ;;  %v17406_v62 = vcombine.high %v1545_v16, %v1553_v56  ;;  %v1633_v49 = vld [vmem:[#allocation7 + $0x1bd0] sm:$0xff] }
 0x300   :  { %7569 = vmatprep.subr.bf16.mxu1 %v17312_v63  ;;  %v17408_v63 = vcombine.high %v1546_v57, %v1554_v59 }
 0x302   :  { %7406 = vmatpush1.bf16.msra.mxu0 %v17309_v7  ;;  %v17405_v7 = vcombine.low %v1545_v16, %v1553_v56  ;;  %v1634_v16 = vld [vmem:[#allocation7 + $0x1bd8] sm:$0xff] }
 0x303   :  { %7570 = vmatpush1.bf16.msra.mxu1 %v17311_v35  ;;  %7407 = vmatprep.subr.bf16.mxu0 %v17326_v8  ;;  %v17407_v35 = vcombine.low %v1546_v57, %v1554_v59  ;;  %v17422_v8 = vcombine.high %v1561_v2, %v1569_v58  ;;  %v17469_v57 = vcombine.low %v1609_v38, %v1617_v39 }
 0x304   :  { %7571 = vmatprep.subr.bf16.mxu1 %v17328_v10  ;;  %v17424_v10 = vcombine.high %v1562_v4, %v1570_v5 }
 0x306   :  { %7408 = vmatpush1.bf16.msra.mxu0 %v17325_v20  ;;  %v17421_v20 = vcombine.low %v1561_v2, %v1569_v58  ;;  %v1641_v2 = vld [vmem:[#allocation7 + $0x1c10] sm:$0xff] }
 0x307   :  { %7572 = vmatpush1.bf16.msra.mxu1 %v17327_v14  ;;  %7409 = vmatprep.subr.bf16.mxu0 %v17342_v22  ;;  %v17423_v14 = vcombine.low %v1562_v4, %v1570_v5  ;;  %v17438_v22 = vcombine.high %v1577_v11, %v1585_v13  ;;  %v1649_v58 = vld [vmem:[#allocation7 + $0x1c50] sm:$0xff]  ;;  %v1642_v4 = vld [vmem:[#allocation7 + $0x1c18] sm:$0xff] }
 0x308   :  { %7573 = vmatprep.subr.bf16.mxu1 %v17344_v23  ;;  %v17440_v23 = vcombine.high %v1578_v19, %v1586_v6  ;;  %v1650_v5 = vld [vmem:[#allocation7 + $0x1c58] sm:$0xff] }
 0x30a   :  { %7410 = vmatpush1.bf16.msra.mxu0 %v17341_v30  ;;  %v17437_v30 = vcombine.low %v1577_v11, %v1585_v13  ;;  %v1657_v11 = vld [vmem:[#allocation7 + $0x1c90] sm:$0xff] }
 0x30b   :  { %7574 = vmatpush1.bf16.msra.mxu1 %v17343_v32  ;;  %7411 = vmatprep.subr.bf16.mxu0 %v17358_v33  ;;  %v17439_v32 = vcombine.low %v1578_v19, %v1586_v6  ;;  %v17454_v33 = vcombine.high %v1593_v24, %v1601_v25  ;;  %v1665_v13 = vld [vmem:[#allocation7 + $0x1cd0] sm:$0xff]  ;;  %v1658_v19 = vld [vmem:[#allocation7 + $0x1c98] sm:$0xff] }
 0x30c   :  { %7575 = vmatprep.subr.bf16.mxu1 %v17360_v37  ;;  %v17456_v37 = vcombine.high %v1594_v28, %v1602_v29  ;;  %v1666_v6 = vld [vmem:[#allocation7 + $0x1cd8] sm:$0xff] }
 0x30e   :  { %7412 = vmatpush1.bf16.msra.mxu0 %v17357_v43  ;;  %v17453_v43 = vcombine.low %v1593_v24, %v1601_v25  ;;  %v1673_v24 = vld [vmem:[#allocation7 + $0x1d10] sm:$0xff] }
 0x30f   :  { %7576 = vmatpush1.bf16.msra.mxu1 %v17359_v0  ;;  %7422 = vmatprep.subr.bf16.mxu0 %v17374_v45  ;;  %v17455_v0 = vcombine.low %v1594_v28, %v1602_v29  ;;  %v17470_v45 = vcombine.high %v1609_v38, %v1617_v39  ;;  %v1681_v25 = vld [vmem:[#allocation7 + $0x1d50] sm:$0xff]  ;;  %v1674_v28 = vld [vmem:[#allocation7 + $0x1d18] sm:$0xff] }
 0x310   :  { %7586 = vmatprep.subr.bf16.mxu1 %v17376_v46  ;;  %v1682_v29 = vld [vmem:[#allocation7 + $0x1d58] sm:$0xff]  ;;  %v1689_v38 = vld [vmem:[#allocation7 + $0x1d90] sm:$0xff] }
 0x311   :  { %7414 = vmatmul.mubr.bf16.vlgmr.msra.gmra.mrb[12].mxu0 %v19593_v1  ;;  %v1697_v39 = vld [vmem:[#allocation7 + $0x1dd0] sm:$0xff] }
 0x312   :  { %7578 = vmatmul.mubr.bf16.vlgmr.msra.gmra.mrb[12].mxu1 %v19593_v1  ;;  %7423 = vmatpush1.bf16.msra.mxu0 %v17373_v53  ;;  %v1625_v53 = vld [vmem:[#allocation7 + $0x1b90] sm:$0xff] }
 0x313   :  { %7454 = vmatprep.mubr.bf16.mxu0 %v19595_v9  ;;  %7587 = vmatpush1.bf16.msra.mxu1 %v17375_v52 }
 0x314   :  { %7618 = vmatprep.mubr.bf16.mxu1 %v19595_v9  ;;  %7424 = vmatprep.subr.bf16.mxu0 %v17390_v55  ;;  %v1626_v55 = vld [vmem:[#allocation7 + $0x1b98] sm:$0xff] }
 0x315   :  { %7588 = vmatprep.subr.bf16.mxu1 %v17392_v41 }
 0x316   :  { %7425 = vmatpush1.bf16.msra.mxu0 %v17389_v60 }
 0x317   :  { %7589 = vmatpush1.bf16.msra.mxu1 %v17391_v61  ;;  %7426 = vmatprep.subr.bf16.mxu0 %v17406_v62  ;;  %v17471_v61 = vcombine.low %v1610_v40, %v1618_v42  ;;  %v17486_v62 = vcombine.high %v1625_v53, %v1633_v49  ;;  %v1690_v40 = vld [vmem:[#allocation7 + $0x1d98] sm:$0xff] }
 0x318   :  { %7590 = vmatprep.subr.bf16.mxu1 %v17408_v63  ;;  %v17488_v63 = vcombine.high %v1626_v55, %v1634_v16  ;;  %v1698_v42 = vld [vmem:[#allocation7 + $0x1dd8] sm:$0xff] }
 0x31a   :  { %7427 = vmatpush1.bf16.msra.mxu0 %v17405_v7  ;;  %v17485_v7 = vcombine.low %v1625_v53, %v1633_v49  ;;  %v1705_v53 = vld [vmem:[#allocation7 + $0x1e10] sm:$0xff] }
 0x31b   :  { %7591 = vmatpush1.bf16.msra.mxu1 %v17407_v35  ;;  %7428 = vmatprep.subr.bf16.mxu0 %v17422_v8  ;;  %v17487_v35 = vcombine.low %v1626_v55, %v1634_v16  ;;  %v17502_v8 = vcombine.high %v1641_v2, %v1649_v58  ;;  %v1713_v49 = vld [vmem:[#allocation7 + $0x1e50] sm:$0xff]  ;;  %v1706_v55 = vld [vmem:[#allocation7 + $0x1e18] sm:$0xff] }
 0x31c   :  { %7592 = vmatprep.subr.bf16.mxu1 %v17424_v10  ;;  %v17504_v10 = vcombine.high %v1642_v4, %v1650_v5  ;;  %v1714_v16 = vld [vmem:[#allocation7 + $0x1e58] sm:$0xff] }
 0x31e   :  { %7429 = vmatpush1.bf16.msra.mxu0 %v17421_v20  ;;  %v17501_v20 = vcombine.low %v1641_v2, %v1649_v58  ;;  %v17565_v2 = vcombine.low %v1705_v53, %v1713_v49  ;;  %v17567_v58 = vcombine.low %v1706_v55, %v1714_v16 }
 0x31f   :  { %7593 = vmatpush1.bf16.msra.mxu1 %v17423_v14  ;;  %7430 = vmatprep.subr.bf16.mxu0 %v17438_v22  ;;  %v17503_v14 = vcombine.low %v1642_v4, %v1650_v5  ;;  %v17518_v22 = vcombine.high %v1657_v11, %v1665_v13 }
 0x320   :  { %7594 = vmatprep.subr.bf16.mxu1 %v17440_v23  ;;  %v17520_v23 = vcombine.high %v1658_v19, %v1666_v6 }
 0x322   :  { %7431 = vmatpush1.bf16.msra.mxu0 %v17437_v30  ;;  %v17517_v30 = vcombine.low %v1657_v11, %v1665_v13 }
 0x323   :  { %7595 = vmatpush1.bf16.msra.mxu1 %v17439_v32  ;;  %7432 = vmatprep.subr.bf16.mxu0 %v17454_v33  ;;  %v17519_v32 = vcombine.low %v1658_v19, %v1666_v6  ;;  %v17534_v33 = vcombine.high %v1673_v24, %v1681_v25 }
 0x324   :  { %v19624_v46 = vpop.f32.mrb[8].mxu0  ;;  %v19626_v47 = vpop.f32.mrb[8].mxu1  ;;  %7596 = vmatprep.subr.bf16.mxu1 %v17456_v37  ;;  %v17536_v37 = vcombine.high %v1674_v28, %v1682_v29 }
 0x325   :  { %v19628_v50 = vpop.f32.mrb[9].mxu0  ;;  %v19630_v52 = vpop.f32.mrb[9].mxu1 }
 0x326   :  { %v7132_v56 = vpop.f32.mrb[10].mxu0  ;;  %v7296_v41 = vpop.f32.mrb[10].mxu1  ;;  %7433 = vmatpush1.bf16.msra.mxu0 %v17453_v43  ;;  %v17533_v43 = vcombine.low %v1673_v24, %v1681_v25 }
 0x327   :  { %7597 = vmatpush1.bf16.msra.mxu1 %v17455_v0  ;;  %v7133_v59 = vpop.f32.mrb[11].mxu0  ;;  %v7297_v60 = vpop.f32.mrb[11].mxu1  ;;  %7434 = vmatprep.subr.bf16.mxu0 %v17470_v45  ;;  %v17535_v0 = vcombine.low %v1674_v28, %v1682_v29  ;;  %v17550_v45 = vcombine.high %v1689_v38, %v1697_v39  ;;  %v17549_v56 = vcombine.low %v1689_v38, %v1697_v39 }
 0x328   :  { %7598 = vmatprep.subr.bf16.mxu1 %v17472_v48  ;;  %v17552_v48 = vcombine.high %v1690_v40, %v1698_v42  ;;  %v17551_v41 = vcombine.low %v1690_v40, %v1698_v42  ;;  %v17568_v59 = vcombine.high %v1706_v55, %v1714_v16  ;;  %v1721_v60 = vld [vmem:[#allocation7 + $0x1e90] sm:$0xff]  ;;  %v779_v16 = vld [vmem:[#allocation7 + $0x120] sm:$0xff] }
 0x32a   :  { %7435 = vmatpush1.bf16.msra.mxu0 %v17469_v57  ;;  %v17566_v57 = vcombine.high %v1705_v53, %v1713_v49  ;;  %v772_v53 = vld [vmem:[#allocation7 + $0xe8] sm:$0xff] }
 0x32b   :  { %7599 = vmatpush1.bf16.msra.mxu1 %v17471_v61  ;;  %7436 = vmatprep.subr.bf16.mxu0 %v17486_v62  ;;  %v1729_v61 = vld [vmem:[#allocation7 + $0x1ed0] sm:$0xff]  ;;  %v1722_v62 = vld [vmem:[#allocation7 + $0x1e98] sm:$0xff] }
 0x32c   :  { %7600 = vmatprep.subr.bf16.mxu1 %v17488_v63  ;;  %v1730_v63 = vld [vmem:[#allocation7 + $0x1ed8] sm:$0xff]  ;;  %v17582_v4 = vcombine.high %v1721_v60, %v1729_v61  ;;  %v17581_v11 = vcombine.low %v1721_v60, %v1729_v61 }
 0x32d   :  { %v17584_v5 = vcombine.high %v1722_v62, %v1730_v63  ;;  %v17583_v13 = vcombine.low %v1722_v62, %v1730_v63 }
 0x32e   :  { %7437 = vmatpush1.bf16.msra.mxu0 %v17485_v7  ;;  %v1737_v7 = vld [vmem:[#allocation7 + $0x1f10] sm:$0xff] }
 0x32f   :  { %7601 = vmatpush1.bf16.msra.mxu1 %v17487_v35  ;;  %7438 = vmatprep.subr.bf16.mxu0 %v17502_v8  ;;  %v1745_v35 = vld [vmem:[#allocation7 + $0x1f50] sm:$0xff]  ;;  %v1738_v8 = vld [vmem:[#allocation7 + $0x1f18] sm:$0xff] }
 0x330   :  { %7602 = vmatprep.subr.bf16.mxu1 %v17504_v10  ;;  %v1746_v10 = vld [vmem:[#allocation7 + $0x1f58] sm:$0xff]  ;;  %v17598_v19 = vcombine.high %v1737_v7, %v1745_v35  ;;  %v17597_v24 = vcombine.low %v1737_v7, %v1745_v35 }
 0x331   :  { %v17600_v6 = vcombine.high %v1738_v8, %v1746_v10  ;;  %v17599_v25 = vcombine.low %v1738_v8, %v1746_v10 }
 0x332   :  { %7439 = vmatpush1.bf16.msra.mxu0 %v17501_v20  ;;  %v1753_v20 = vld [vmem:[#allocation7 + $0x1f90] sm:$0xff] }
 0x333   :  { %7603 = vmatpush1.bf16.msra.mxu1 %v17503_v14  ;;  %7440 = vmatprep.subr.bf16.mxu0 %v17518_v22  ;;  %v1761_v14 = vld [vmem:[#allocation7 + $0x1fd0] sm:$0xff]  ;;  %v1754_v22 = vld [vmem:[#allocation7 + $0x1f98] sm:$0xff] }
 0x334   :  { %7604 = vmatprep.subr.bf16.mxu1 %v17520_v23  ;;  %v1762_v23 = vld [vmem:[#allocation7 + $0x1fd8] sm:$0xff]  ;;  %v17614_v28 = vcombine.high %v1753_v20, %v1761_v14  ;;  %v17613_v38 = vcombine.low %v1753_v20, %v1761_v14 }
 0x335   :  { %v17616_v29 = vcombine.high %v1754_v22, %v1762_v23  ;;  %v17615_v39 = vcombine.low %v1754_v22, %v1762_v23 }
 0x336   :  { %7441 = vmatpush1.bf16.msra.mxu0 %v17517_v30  ;;  %v747_v30 = vld [vmem:[#allocation7 + $0x20] sm:$0xff] }
 0x337   :  { %7605 = vmatpush1.bf16.msra.mxu1 %v17519_v32  ;;  %7442 = vmatprep.subr.bf16.mxu0 %v17534_v33  ;;  %v755_v32 = vld [vmem:[#allocation7 + $0x60] sm:$0xff]  ;;  %v748_v33 = vld [vmem:[#allocation7 + $0x28] sm:$0xff] }
 0x338   :  { %7606 = vmatprep.subr.bf16.mxu1 %v17536_v37  ;;  %v756_v37 = vld [vmem:[#allocation7 + $0x68] sm:$0xff]  ;;  %v16610_v40 = vcombine.high %v747_v30, %v755_v32 }
 0x339   :  { %v16612_v42 = vcombine.high %v748_v33, %v756_v37  ;;  %v16611_v49 = vcombine.low %v748_v33, %v756_v37 }
 0x33a   :  { %7443 = vmatpush1.bf16.msra.mxu0 %v17533_v43  ;;  %v763_v43 = vld [vmem:[#allocation7 + $0xa0] sm:$0xff] }
 0x33b   :  { %7607 = vmatpush1.bf16.msra.mxu1 %v17535_v0  ;;  %7444 = vmatprep.subr.bf16.mxu0 %v17550_v45  ;;  %v771_v0 = vld [vmem:[#allocation7 + $0xe0] sm:$0xff]  ;;  %v16609_v45 = vcombine.low %v747_v30, %v755_v32 }
 0x33c   :  { %7608 = vmatprep.subr.bf16.mxu1 %v17552_v48  ;;  %v764_v48 = vld [vmem:[#allocation7 + $0xa8] sm:$0xff]  ;;  %v16626_v55 = vcombine.high %v763_v43, %v771_v0  ;;  %v16625_v60 = vcombine.low %v763_v43, %v771_v0 }
 0x33d   :  { %v16627_v61 = vcombine.low %v764_v48, %v772_v53 }
 0x33e   :  { %7445 = vmatpush1.bf16.msra.mxu0 %v17549_v56  ;;  %v787_v56 = vld [vmem:[#allocation7 + $0x160] sm:$0xff] }
 0x33f   :  { %7609 = vmatpush1.bf16.msra.mxu1 %v17551_v41  ;;  %7446 = vmatprep.subr.bf16.mxu0 %v17566_v57  ;;  %v16628_v41 = vcombine.high %v764_v48, %v772_v53  ;;  %v780_v57 = vld [vmem:[#allocation7 + $0x128] sm:$0xff]  ;;  %v16642_v62 = vcombine.high %v779_v16, %v787_v56  ;;  %v16641_v7 = vcombine.low %v779_v16, %v787_v56  ;;  %v859_v53 = vld [vmem:[#allocation7 + $0x3a0] sm:$0xff] }
 0x340   :  { %7610 = vmatprep.subr.bf16.mxu1 %v17568_v59  ;;  %v788_v59 = vld [vmem:[#allocation7 + $0x168] sm:$0xff] }
 0x341   :  { %v16644_v63 = vcombine.high %v780_v57, %v788_v59  ;;  %v16643_v35 = vcombine.low %v780_v57, %v788_v59  ;;  %v868_v16 = vld [vmem:[#allocation7 + $0x3e8] sm:$0xff] }
 0x342   :  { %7447 = vmatpush1.bf16.msra.mxu0 %v17565_v2  ;;  %v795_v2 = vld [vmem:[#allocation7 + $0x1a0] sm:$0xff] }
 0x343   :  { %7611 = vmatpush1.bf16.msra.mxu1 %v17567_v58  ;;  %7448 = vmatprep.subr.bf16.mxu0 %v17582_v4  ;;  %v803_v58 = vld [vmem:[#allocation7 + $0x1e0] sm:$0xff]  ;;  %v796_v4 = vld [vmem:[#allocation7 + $0x1a8] sm:$0xff] }
 0x344   :  { %7612 = vmatprep.subr.bf16.mxu1 %v17584_v5  ;;  %v804_v5 = vld [vmem:[#allocation7 + $0x1e8] sm:$0xff]  ;;  %v16658_v8 = vcombine.high %v795_v2, %v803_v58  ;;  %v16657_v20 = vcombine.low %v795_v2, %v803_v58 }
 0x345   :  { %v16660_v10 = vcombine.high %v796_v4, %v804_v5  ;;  %v16659_v14 = vcombine.low %v796_v4, %v804_v5 }
 0x346   :  { %7449 = vmatpush1.bf16.msra.mxu0 %v17581_v11  ;;  %v811_v11 = vld [vmem:[#allocation7 + $0x220] sm:$0xff] }
 0x347   :  { %7613 = vmatpush1.bf16.msra.mxu1 %v17583_v13  ;;  %7450 = vmatprep.subr.bf16.mxu0 %v17598_v19  ;;  %v819_v13 = vld [vmem:[#allocation7 + $0x260] sm:$0xff]  ;;  %v812_v19 = vld [vmem:[#allocation7 + $0x228] sm:$0xff] }
 0x348   :  { %7614 = vmatprep.subr.bf16.mxu1 %v17600_v6  ;;  %v820_v6 = vld [vmem:[#allocation7 + $0x268] sm:$0xff]  ;;  %v16674_v22 = vcombine.high %v811_v11, %v819_v13  ;;  %v16673_v30 = vcombine.low %v811_v11, %v819_v13 }
 0x349   :  { %v16676_v23 = vcombine.high %v812_v19, %v820_v6  ;;  %v16675_v32 = vcombine.low %v812_v19, %v820_v6 }
 0x34a   :  { %7451 = vmatpush1.bf16.msra.mxu0 %v17597_v24  ;;  %v827_v24 = vld [vmem:[#allocation7 + $0x2a0] sm:$0xff] }
 0x34b   :  { %7615 = vmatpush1.bf16.msra.mxu1 %v17599_v25  ;;  %7452 = vmatprep.subr.bf16.mxu0 %v17614_v28  ;;  %v835_v25 = vld [vmem:[#allocation7 + $0x2e0] sm:$0xff]  ;;  %v828_v28 = vld [vmem:[#allocation7 + $0x2a8] sm:$0xff] }
 0x34c   :  { %7616 = vmatprep.subr.bf16.mxu1 %v17616_v29  ;;  %v836_v29 = vld [vmem:[#allocation7 + $0x2e8] sm:$0xff]  ;;  %v16690_v33 = vcombine.high %v827_v24, %v835_v25  ;;  %v16689_v43 = vcombine.low %v827_v24, %v835_v25 }
 0x34d   :  { %v16692_v37 = vcombine.high %v828_v28, %v836_v29  ;;  %v16691_v0 = vcombine.low %v828_v28, %v836_v29 }
 0x34e   :  { %7453 = vmatpush1.bf16.msra.mxu0 %v17613_v38  ;;  %v843_v38 = vld [vmem:[#allocation7 + $0x320] sm:$0xff] }
 0x34f   :  { %7617 = vmatpush1.bf16.msra.mxu1 %v17615_v39  ;;  %7627 = vmatprep.subr.bf16.mxu0 %v16610_v40  ;;  %v851_v39 = vld [vmem:[#allocation7 + $0x360] sm:$0xff]  ;;  %v844_v40 = vld [vmem:[#allocation7 + $0x328] sm:$0xff] }
 0x350   :  { %7791 = vmatprep.subr.bf16.mxu1 %v16612_v42  ;;  %v852_v42 = vld [vmem:[#allocation7 + $0x368] sm:$0xff]  ;;  %v16705_v56 = vcombine.low %v843_v38, %v851_v39 }
 0x351   :  { %7455 = vmatmul.mubr.bf16.vlgmr.msra.gmra.mrb[12].mxu0 %v19606_v51  ;;  %v16708_v48 = vcombine.high %v844_v40, %v852_v42 }
 0x352   :  { %7619 = vmatmul.mubr.bf16.vlgmr.msra.gmra.mrb[12].mxu1 %v19606_v51  ;;  %7628 = vmatpush1.bf16.msra.mxu0 %v16609_v45  ;;  %v16706_v45 = vcombine.high %v843_v38, %v851_v39 }
 0x353   :  { %7659 = vmatprep.mubr.bf16.mxu0 %v19539_v34  ;;  %7792 = vmatpush1.bf16.msra.mxu1 %v16611_v49  ;;  %v867_v49 = vld [vmem:[#allocation7 + $0x3e0] sm:$0xff] }
 0x354   :  { %7823 = vmatprep.mubr.bf16.mxu1 %v19539_v34  ;;  %7629 = vmatprep.subr.bf16.mxu0 %v16626_v55  ;;  %v860_v55 = vld [vmem:[#allocation7 + $0x3a8] sm:$0xff]  ;;  %v16722_v57 = vcombine.high %v859_v53, %v867_v49  ;;  %v16721_v2 = vcombine.low %v859_v53, %v867_v49 }
 0x355   :  { %7793 = vmatprep.subr.bf16.mxu1 %v16628_v41  ;;  %v16707_v41 = vcombine.low %v844_v40, %v852_v42  ;;  %v16724_v59 = vcombine.high %v860_v55, %v868_v16  ;;  %v16723_v58 = vcombine.low %v860_v55, %v868_v16 }
 0x356   :  { %7630 = vmatpush1.bf16.msra.mxu0 %v16625_v60  ;;  %v875_v60 = vld [vmem:[#allocation7 + $0x420] sm:$0xff] }
 0x357   :  { %7794 = vmatpush1.bf16.msra.mxu1 %v16627_v61  ;;  %7631 = vmatprep.subr.bf16.mxu0 %v16642_v62  ;;  %v883_v61 = vld [vmem:[#allocation7 + $0x460] sm:$0xff]  ;;  %v876_v62 = vld [vmem:[#allocation7 + $0x428] sm:$0xff] }
 0x358   :  { %7795 = vmatprep.subr.bf16.mxu1 %v16644_v63  ;;  %v884_v63 = vld [vmem:[#allocation7 + $0x468] sm:$0xff]  ;;  %v16738_v4 = vcombine.high %v875_v60, %v883_v61  ;;  %v16737_v11 = vcombine.low %v875_v60, %v883_v61 }
 0x359   :  { %v16740_v5 = vcombine.high %v876_v62, %v884_v63  ;;  %v16739_v13 = vcombine.low %v876_v62, %v884_v63 }
 0x35a   :  { %7632 = vmatpush1.bf16.msra.mxu0 %v16641_v7  ;;  %v891_v7 = vld [vmem:[#allocation7 + $0x4a0] sm:$0xff] }
 0x35b   :  { %7796 = vmatpush1.bf16.msra.mxu1 %v16643_v35  ;;  %7633 = vmatprep.subr.bf16.mxu0 %v16658_v8  ;;  %v899_v35 = vld [vmem:[#allocation7 + $0x4e0] sm:$0xff]  ;;  %v892_v8 = vld [vmem:[#allocation7 + $0x4a8] sm:$0xff] }
 0x35c   :  { %7797 = vmatprep.subr.bf16.mxu1 %v16660_v10  ;;  %v900_v10 = vld [vmem:[#allocation7 + $0x4e8] sm:$0xff]  ;;  %v16754_v19 = vcombine.high %v891_v7, %v899_v35  ;;  %v16753_v24 = vcombine.low %v891_v7, %v899_v35 }
 0x35d   :  { %v16756_v6 = vcombine.high %v892_v8, %v900_v10  ;;  %v16755_v25 = vcombine.low %v892_v8, %v900_v10 }
 0x35e   :  { %7634 = vmatpush1.bf16.msra.mxu0 %v16657_v20  ;;  %v907_v20 = vld [vmem:[#allocation7 + $0x520] sm:$0xff] }
 0x35f   :  { %7798 = vmatpush1.bf16.msra.mxu1 %v16659_v14  ;;  %7635 = vmatprep.subr.bf16.mxu0 %v16674_v22  ;;  %v915_v14 = vld [vmem:[#allocation7 + $0x560] sm:$0xff]  ;;  %v908_v22 = vld [vmem:[#allocation7 + $0x528] sm:$0xff] }
 0x360   :  { %7799 = vmatprep.subr.bf16.mxu1 %v16676_v23  ;;  %v916_v23 = vld [vmem:[#allocation7 + $0x568] sm:$0xff]  ;;  %v16770_v28 = vcombine.high %v907_v20, %v915_v14  ;;  %v16769_v38 = vcombine.low %v907_v20, %v915_v14 }
 0x361   :  { %v16772_v29 = vcombine.high %v908_v22, %v916_v23  ;;  %v16771_v39 = vcombine.low %v908_v22, %v916_v23 }
 0x362   :  { %7636 = vmatpush1.bf16.msra.mxu0 %v16673_v30  ;;  %v923_v30 = vld [vmem:[#allocation7 + $0x5a0] sm:$0xff] }
 0x363   :  { %7800 = vmatpush1.bf16.msra.mxu1 %v16675_v32  ;;  %7637 = vmatprep.subr.bf16.mxu0 %v16690_v33  ;;  %v931_v32 = vld [vmem:[#allocation7 + $0x5e0] sm:$0xff]  ;;  %v924_v33 = vld [vmem:[#allocation7 + $0x5a8] sm:$0xff] }
 0x364   :  { %7801 = vmatprep.subr.bf16.mxu1 %v16692_v37  ;;  %v932_v37 = vld [vmem:[#allocation7 + $0x5e8] sm:$0xff]  ;;  %v16786_v40 = vcombine.high %v923_v30, %v931_v32  ;;  %v16785_v53 = vcombine.low %v923_v30, %v931_v32 }
 0x365   :  { %v16788_v42 = vcombine.high %v924_v33, %v932_v37  ;;  %v16787_v49 = vcombine.low %v924_v33, %v932_v37 }
 0x366   :  { %7638 = vmatpush1.bf16.msra.mxu0 %v16689_v43  ;;  %v939_v43 = vld [vmem:[#allocation7 + $0x620] sm:$0xff] }
 0x367   :  { %7802 = vmatpush1.bf16.msra.mxu1 %v16691_v0  ;;  %7639 = vmatprep.subr.bf16.mxu0 %v16706_v45  ;;  %v947_v0 = vld [vmem:[#allocation7 + $0x660] sm:$0xff]  ;;  %v940_v45 = vld [vmem:[#allocation7 + $0x628] sm:$0xff] }
 0x368   :  { %7803 = vmatprep.subr.bf16.mxu1 %v16708_v48  ;;  %v948_v48 = vld [vmem:[#allocation7 + $0x668] sm:$0xff]  ;;  %v16802_v55 = vcombine.high %v939_v43, %v947_v0  ;;  %v16801_v60 = vcombine.low %v939_v43, %v947_v0 }
 0x369   :  { %v16804_v16 = vcombine.high %v940_v45, %v948_v48  ;;  %v16803_v61 = vcombine.low %v940_v45, %v948_v48  ;;  %v1028_v43 = vld [vmem:[#allocation7 + $0x8e8] sm:$0xff]  ;;  %v1035_v48 = vld [vmem:[#allocation7 + $0x920] sm:$0xff] }
 0x36a   :  { %7640 = vmatpush1.bf16.msra.mxu0 %v16705_v56  ;;  %v955_v56 = vld [vmem:[#allocation7 + $0x6a0] sm:$0xff] }
 0x36b   :  { %7804 = vmatpush1.bf16.msra.mxu1 %v16707_v41  ;;  %7641 = vmatprep.subr.bf16.mxu0 %v16722_v57  ;;  %v963_v41 = vld [vmem:[#allocation7 + $0x6e0] sm:$0xff]  ;;  %v956_v57 = vld [vmem:[#allocation7 + $0x6a8] sm:$0xff] }
 0x36c   :  { %7805 = vmatprep.subr.bf16.mxu1 %v16724_v59  ;;  %v964_v59 = vld [vmem:[#allocation7 + $0x6e8] sm:$0xff]  ;;  %v16818_v62 = vcombine.high %v955_v56, %v963_v41  ;;  %v16817_v7 = vcombine.low %v955_v56, %v963_v41 }
 0x36d   :  { %v16820_v63 = vcombine.high %v956_v57, %v964_v59  ;;  %v16819_v35 = vcombine.low %v956_v57, %v964_v59 }
 0x36e   :  { %7642 = vmatpush1.bf16.msra.mxu0 %v16721_v2  ;;  %v971_v2 = vld [vmem:[#allocation7 + $0x720] sm:$0xff] }
 0x36f   :  { %7806 = vmatpush1.bf16.msra.mxu1 %v16723_v58  ;;  %7643 = vmatprep.subr.bf16.mxu0 %v16738_v4  ;;  %v979_v58 = vld [vmem:[#allocation7 + $0x760] sm:$0xff]  ;;  %v972_v4 = vld [vmem:[#allocation7 + $0x728] sm:$0xff] }
 0x370   :  { %7807 = vmatprep.subr.bf16.mxu1 %v16740_v5  ;;  %v980_v5 = vld [vmem:[#allocation7 + $0x768] sm:$0xff]  ;;  %v16834_v8 = vcombine.high %v971_v2, %v979_v58  ;;  %v16833_v20 = vcombine.low %v971_v2, %v979_v58 }
 0x371   :  { %v16836_v10 = vcombine.high %v972_v4, %v980_v5  ;;  %v16835_v14 = vcombine.low %v972_v4, %v980_v5 }
 0x372   :  { %7644 = vmatpush1.bf16.msra.mxu0 %v16737_v11  ;;  %v987_v11 = vld [vmem:[#allocation7 + $0x7a0] sm:$0xff] }
 0x373   :  { %7808 = vmatpush1.bf16.msra.mxu1 %v16739_v13  ;;  %7645 = vmatprep.subr.bf16.mxu0 %v16754_v19  ;;  %v995_v13 = vld [vmem:[#allocation7 + $0x7e0] sm:$0xff]  ;;  %v988_v19 = vld [vmem:[#allocation7 + $0x7a8] sm:$0xff] }
 0x374   :  { %7809 = vmatprep.subr.bf16.mxu1 %v16756_v6  ;;  %v996_v6 = vld [vmem:[#allocation7 + $0x7e8] sm:$0xff]  ;;  %v16850_v22 = vcombine.high %v987_v11, %v995_v13  ;;  %v16849_v30 = vcombine.low %v987_v11, %v995_v13 }
 0x375   :  { %v16852_v23 = vcombine.high %v988_v19, %v996_v6  ;;  %v16851_v32 = vcombine.low %v988_v19, %v996_v6 }
 0x376   :  { %7646 = vmatpush1.bf16.msra.mxu0 %v16753_v24  ;;  %v1003_v24 = vld [vmem:[#allocation7 + $0x820] sm:$0xff] }
 0x377   :  { %7810 = vmatpush1.bf16.msra.mxu1 %v16755_v25  ;;  %7647 = vmatprep.subr.bf16.mxu0 %v16770_v28  ;;  %v1011_v25 = vld [vmem:[#allocation7 + $0x860] sm:$0xff]  ;;  %v1004_v28 = vld [vmem:[#allocation7 + $0x828] sm:$0xff] }
 0x378   :  { %7811 = vmatprep.subr.bf16.mxu1 %v16772_v29  ;;  %v1012_v29 = vld [vmem:[#allocation7 + $0x868] sm:$0xff]  ;;  %v16866_v33 = vcombine.high %v1003_v24, %v1011_v25 }
 0x379   :  { %v16868_v37 = vcombine.high %v1004_v28, %v1012_v29  ;;  %v16867_v0 = vcombine.low %v1004_v28, %v1012_v29 }
 0x37a   :  { %7648 = vmatpush1.bf16.msra.mxu0 %v16769_v38  ;;  %v1019_v38 = vld [vmem:[#allocation7 + $0x8a0] sm:$0xff] }
 0x37b   :  { %7812 = vmatpush1.bf16.msra.mxu1 %v16771_v39  ;;  %7649 = vmatprep.subr.bf16.mxu0 %v16786_v40  ;;  %v1027_v39 = vld [vmem:[#allocation7 + $0x8e0] sm:$0xff]  ;;  %v16865_v40 = vcombine.low %v1003_v24, %v1011_v25 }
 0x37c   :  { %7813 = vmatprep.subr.bf16.mxu1 %v16788_v42  ;;  %v1020_v42 = vld [vmem:[#allocation7 + $0x8a8] sm:$0xff]  ;;  %v16882_v45 = vcombine.high %v1019_v38, %v1027_v39  ;;  %v16881_v56 = vcombine.low %v1019_v38, %v1027_v39 }
 0x37d   :  { %v16883_v41 = vcombine.low %v1020_v42, %v1028_v43 }
 0x37e   :  { %7650 = vmatpush1.bf16.msra.mxu0 %v16785_v53  ;;  %v1043_v53 = vld [vmem:[#allocation7 + $0x960] sm:$0xff] }
 0x37f   :  { %7814 = vmatpush1.bf16.msra.mxu1 %v16787_v49  ;;  %7651 = vmatprep.subr.bf16.mxu0 %v16802_v55  ;;  %v16884_v49 = vcombine.high %v1020_v42, %v1028_v43  ;;  %v1036_v55 = vld [vmem:[#allocation7 + $0x928] sm:$0xff]  ;;  %v16898_v57 = vcombine.high %v1035_v48, %v1043_v53  ;;  %v16897_v2 = vcombine.low %v1035_v48, %v1043_v53  ;;  %v1115_v43 = vld [vmem:[#allocation7 + $0xba0] sm:$0xff] }
 0x380   :  { %7815 = vmatprep.subr.bf16.mxu1 %v16804_v16  ;;  %v1044_v16 = vld [vmem:[#allocation7 + $0x968] sm:$0xff] }
 0x381   :  { %v16900_v59 = vcombine.high %v1036_v55, %v1044_v16  ;;  %v16899_v58 = vcombine.low %v1036_v55, %v1044_v16  ;;  %v1124_v48 = vld [vmem:[#allocation7 + $0xbe8] sm:$0xff] }
 0x382   :  { %7652 = vmatpush1.bf16.msra.mxu0 %v16801_v60  ;;  %v1051_v60 = vld [vmem:[#allocation7 + $0x9a0] sm:$0xff] }
 0x383   :  { %7816 = vmatpush1.bf16.msra.mxu1 %v16803_v61  ;;  %7653 = vmatprep.subr.bf16.mxu0 %v16818_v62  ;;  %v1059_v61 = vld [vmem:[#allocation7 + $0x9e0] sm:$0xff]  ;;  %v1052_v62 = vld [vmem:[#allocation7 + $0x9a8] sm:$0xff] }
 0x384   :  { %7817 = vmatprep.subr.bf16.mxu1 %v16820_v63  ;;  %v1060_v63 = vld [vmem:[#allocation7 + $0x9e8] sm:$0xff]  ;;  %v16914_v4 = vcombine.high %v1051_v60, %v1059_v61  ;;  %v16913_v11 = vcombine.low %v1051_v60, %v1059_v61 }
 0x385   :  { %v16916_v5 = vcombine.high %v1052_v62, %v1060_v63  ;;  %v16915_v13 = vcombine.low %v1052_v62, %v1060_v63 }
 0x386   :  { %7654 = vmatpush1.bf16.msra.mxu0 %v16817_v7  ;;  %v1067_v7 = vld [vmem:[#allocation7 + $0xa20] sm:$0xff] }
 0x387   :  { %7818 = vmatpush1.bf16.msra.mxu1 %v16819_v35  ;;  %7655 = vmatprep.subr.bf16.mxu0 %v16834_v8  ;;  %v1075_v35 = vld [vmem:[#allocation7 + $0xa60] sm:$0xff]  ;;  %v1068_v8 = vld [vmem:[#allocation7 + $0xa28] sm:$0xff] }
 0x388   :  { %7819 = vmatprep.subr.bf16.mxu1 %v16836_v10  ;;  %v1076_v10 = vld [vmem:[#allocation7 + $0xa68] sm:$0xff]  ;;  %v16930_v19 = vcombine.high %v1067_v7, %v1075_v35  ;;  %v16929_v24 = vcombine.low %v1067_v7, %v1075_v35 }
 0x389   :  { %v16932_v6 = vcombine.high %v1068_v8, %v1076_v10  ;;  %v16931_v25 = vcombine.low %v1068_v8, %v1076_v10 }
 0x38a   :  { %7656 = vmatpush1.bf16.msra.mxu0 %v16833_v20  ;;  %v1083_v20 = vld [vmem:[#allocation7 + $0xaa0] sm:$0xff] }
 0x38b   :  { %7820 = vmatpush1.bf16.msra.mxu1 %v16835_v14  ;;  %7657 = vmatprep.subr.bf16.mxu0 %v16850_v22  ;;  %v1091_v14 = vld [vmem:[#allocation7 + $0xae0] sm:$0xff]  ;;  %v1084_v22 = vld [vmem:[#allocation7 + $0xaa8] sm:$0xff] }
 0x38c   :  { %7821 = vmatprep.subr.bf16.mxu1 %v16852_v23  ;;  %v1092_v23 = vld [vmem:[#allocation7 + $0xae8] sm:$0xff]  ;;  %v16946_v28 = vcombine.high %v1083_v20, %v1091_v14  ;;  %v16945_v38 = vcombine.low %v1083_v20, %v1091_v14 }
 0x38d   :  { %v16948_v29 = vcombine.high %v1084_v22, %v1092_v23  ;;  %v16947_v39 = vcombine.low %v1084_v22, %v1092_v23 }
 0x38e   :  { %7658 = vmatpush1.bf16.msra.mxu0 %v16849_v30  ;;  %v1099_v30 = vld [vmem:[#allocation7 + $0xb20] sm:$0xff] }
 0x38f   :  { %7822 = vmatpush1.bf16.msra.mxu1 %v16851_v32  ;;  %7668 = vmatprep.subr.bf16.mxu0 %v16866_v33  ;;  %v1107_v32 = vld [vmem:[#allocation7 + $0xb60] sm:$0xff]  ;;  %v1100_v33 = vld [vmem:[#allocation7 + $0xb28] sm:$0xff] }
 0x390   :  { %7832 = vmatprep.subr.bf16.mxu1 %v16868_v37  ;;  %v1108_v37 = vld [vmem:[#allocation7 + $0xb68] sm:$0xff]  ;;  %v16961_v53 = vcombine.low %v1099_v30, %v1107_v32 }
 0x391   :  { %7660 = vmatmul.mubr.bf16.vlgmr.msra.gmra.mrb[16].mxu0 %v19543_v36  ;;  %v16964_v42 = vcombine.high %v1100_v33, %v1108_v37 }
 0x392   :  { %7824 = vmatmul.mubr.bf16.vlgmr.msra.gmra.mrb[16].mxu1 %v19543_v36  ;;  %7669 = vmatpush1.bf16.msra.mxu0 %v16865_v40  ;;  %v16962_v40 = vcombine.high %v1099_v30, %v1107_v32 }
 0x393   :  { %7700 = vmatprep.mubr.bf16.mxu0 %v19549_v54  ;;  %7833 = vmatpush1.bf16.msra.mxu1 %v16867_v0  ;;  %v1123_v0 = vld [vmem:[#allocation7 + $0xbe0] sm:$0xff] }
 0x394   :  { %7864 = vmatprep.mubr.bf16.mxu1 %v19549_v54  ;;  %7670 = vmatprep.subr.bf16.mxu0 %v16882_v45  ;;  %v1116_v45 = vld [vmem:[#allocation7 + $0xba8] sm:$0xff]  ;;  %v16978_v55 = vcombine.high %v1115_v43, %v1123_v0  ;;  %v16977_v60 = vcombine.low %v1115_v43, %v1123_v0 }
 0x395   :  { %7834 = vmatprep.subr.bf16.mxu1 %v16884_v49  ;;  %v16963_v49 = vcombine.low %v1100_v33, %v1108_v37  ;;  %v16980_v16 = vcombine.high %v1116_v45, %v1124_v48  ;;  %v16979_v61 = vcombine.low %v1116_v45, %v1124_v48 }
 0x396   :  { %7671 = vmatpush1.bf16.msra.mxu0 %v16881_v56  ;;  %v1131_v56 = vld [vmem:[#allocation7 + $0xc20] sm:$0xff] }
 0x397   :  { %7835 = vmatpush1.bf16.msra.mxu1 %v16883_v41  ;;  %7672 = vmatprep.subr.bf16.mxu0 %v16898_v57  ;;  %v1139_v41 = vld [vmem:[#allocation7 + $0xc60] sm:$0xff]  ;;  %v1132_v57 = vld [vmem:[#allocation7 + $0xc28] sm:$0xff] }
 0x398   :  { %7836 = vmatprep.subr.bf16.mxu1 %v16900_v59  ;;  %v1140_v59 = vld [vmem:[#allocation7 + $0xc68] sm:$0xff]  ;;  %v16994_v62 = vcombine.high %v1131_v56, %v1139_v41  ;;  %v16993_v7 = vcombine.low %v1131_v56, %v1139_v41 }
 0x399   :  { %v16996_v63 = vcombine.high %v1132_v57, %v1140_v59  ;;  %v16995_v35 = vcombine.low %v1132_v57, %v1140_v59 }
 0x39a   :  { %7673 = vmatpush1.bf16.msra.mxu0 %v16897_v2  ;;  %v1147_v2 = vld [vmem:[#allocation7 + $0xca0] sm:$0xff] }
 0x39b   :  { %7837 = vmatpush1.bf16.msra.mxu1 %v16899_v58  ;;  %7674 = vmatprep.subr.bf16.mxu0 %v16914_v4  ;;  %v1155_v58 = vld [vmem:[#allocation7 + $0xce0] sm:$0xff]  ;;  %v1148_v4 = vld [vmem:[#allocation7 + $0xca8] sm:$0xff] }
 0x39c   :  { %7838 = vmatprep.subr.bf16.mxu1 %v16916_v5  ;;  %v1156_v5 = vld [vmem:[#allocation7 + $0xce8] sm:$0xff]  ;;  %v17010_v8 = vcombine.high %v1147_v2, %v1155_v58  ;;  %v17009_v20 = vcombine.low %v1147_v2, %v1155_v58 }
 0x39d   :  { %v17012_v10 = vcombine.high %v1148_v4, %v1156_v5  ;;  %v17011_v14 = vcombine.low %v1148_v4, %v1156_v5 }
 0x39e   :  { %7675 = vmatpush1.bf16.msra.mxu0 %v16913_v11  ;;  %v1163_v11 = vld [vmem:[#allocation7 + $0xd20] sm:$0xff] }
 0x39f   :  { %7839 = vmatpush1.bf16.msra.mxu1 %v16915_v13  ;;  %7676 = vmatprep.subr.bf16.mxu0 %v16930_v19  ;;  %v1171_v13 = vld [vmem:[#allocation7 + $0xd60] sm:$0xff]  ;;  %v1164_v19 = vld [vmem:[#allocation7 + $0xd28] sm:$0xff] }
 0x3a0   :  { %7840 = vmatprep.subr.bf16.mxu1 %v16932_v6  ;;  %v1172_v6 = vld [vmem:[#allocation7 + $0xd68] sm:$0xff]  ;;  %v17026_v22 = vcombine.high %v1163_v11, %v1171_v13  ;;  %v17025_v30 = vcombine.low %v1163_v11, %v1171_v13 }
 0x3a1   :  { %v17028_v23 = vcombine.high %v1164_v19, %v1172_v6  ;;  %v17027_v32 = vcombine.low %v1164_v19, %v1172_v6 }
 0x3a2   :  { %7677 = vmatpush1.bf16.msra.mxu0 %v16929_v24  ;;  %v1179_v24 = vld [vmem:[#allocation7 + $0xda0] sm:$0xff] }
 0x3a3   :  { %7841 = vmatpush1.bf16.msra.mxu1 %v16931_v25  ;;  %7678 = vmatprep.subr.bf16.mxu0 %v16946_v28  ;;  %v1187_v25 = vld [vmem:[#allocation7 + $0xde0] sm:$0xff]  ;;  %v1180_v28 = vld [vmem:[#allocation7 + $0xda8] sm:$0xff] }
 0x3a4   :  { %7842 = vmatprep.subr.bf16.mxu1 %v16948_v29  ;;  %v1188_v29 = vld [vmem:[#allocation7 + $0xde8] sm:$0xff]  ;;  %v17042_v33 = vcombine.high %v1179_v24, %v1187_v25  ;;  %v17041_v43 = vcombine.low %v1179_v24, %v1187_v25 }
 0x3a5   :  { %v17044_v37 = vcombine.high %v1180_v28, %v1188_v29  ;;  %v17043_v0 = vcombine.low %v1180_v28, %v1188_v29 }
 0x3a6   :  { %7679 = vmatpush1.bf16.msra.mxu0 %v16945_v38  ;;  %v1195_v38 = vld [vmem:[#allocation7 + $0xe20] sm:$0xff] }
 0x3a7   :  { %7843 = vmatpush1.bf16.msra.mxu1 %v16947_v39  ;;  %7680 = vmatprep.subr.bf16.mxu0 %v16962_v40  ;;  %v1203_v39 = vld [vmem:[#allocation7 + $0xe60] sm:$0xff]  ;;  %v1196_v40 = vld [vmem:[#allocation7 + $0xe28] sm:$0xff] }
 0x3a8   :  { %7844 = vmatprep.subr.bf16.mxu1 %v16964_v42  ;;  %v1204_v42 = vld [vmem:[#allocation7 + $0xe68] sm:$0xff]  ;;  %v17058_v45 = vcombine.high %v1195_v38, %v1203_v39  ;;  %v17057_v56 = vcombine.low %v1195_v38, %v1203_v39 }
 0x3a9   :  { %v17060_v48 = vcombine.high %v1196_v40, %v1204_v42  ;;  %v17059_v41 = vcombine.low %v1196_v40, %v1204_v42  ;;  %v1284_v38 = vld [vmem:[#allocation7 + $0x10e8] sm:$0xff]  ;;  %v1291_v42 = vld [vmem:[#allocation7 + $0x1120] sm:$0xff] }
 0x3aa   :  { %7681 = vmatpush1.bf16.msra.mxu0 %v16961_v53  ;;  %v1211_v53 = vld [vmem:[#allocation7 + $0xea0] sm:$0xff] }
 0x3ab   :  { %7845 = vmatpush1.bf16.msra.mxu1 %v16963_v49  ;;  %7682 = vmatprep.subr.bf16.mxu0 %v16978_v55  ;;  %v1219_v49 = vld [vmem:[#allocation7 + $0xee0] sm:$0xff]  ;;  %v1212_v55 = vld [vmem:[#allocation7 + $0xea8] sm:$0xff] }
 0x3ac   :  { %7846 = vmatprep.subr.bf16.mxu1 %v16980_v16  ;;  %v1220_v16 = vld [vmem:[#allocation7 + $0xee8] sm:$0xff]  ;;  %v17074_v57 = vcombine.high %v1211_v53, %v1219_v49  ;;  %v17073_v2 = vcombine.low %v1211_v53, %v1219_v49 }
 0x3ad   :  { %v17076_v59 = vcombine.high %v1212_v55, %v1220_v16  ;;  %v17075_v58 = vcombine.low %v1212_v55, %v1220_v16 }
 0x3ae   :  { %7683 = vmatpush1.bf16.msra.mxu0 %v16977_v60  ;;  %v1227_v60 = vld [vmem:[#allocation7 + $0xf20] sm:$0xff] }
 0x3af   :  { %7847 = vmatpush1.bf16.msra.mxu1 %v16979_v61  ;;  %7684 = vmatprep.subr.bf16.mxu0 %v16994_v62  ;;  %v1235_v61 = vld [vmem:[#allocation7 + $0xf60] sm:$0xff]  ;;  %v1228_v62 = vld [vmem:[#allocation7 + $0xf28] sm:$0xff] }
 0x3b0   :  { %7848 = vmatprep.subr.bf16.mxu1 %v16996_v63  ;;  %v1236_v63 = vld [vmem:[#allocation7 + $0xf68] sm:$0xff]  ;;  %v17090_v4 = vcombine.high %v1227_v60, %v1235_v61  ;;  %v17089_v11 = vcombine.low %v1227_v60, %v1235_v61 }
 0x3b1   :  { %v17092_v5 = vcombine.high %v1228_v62, %v1236_v63  ;;  %v17091_v13 = vcombine.low %v1228_v62, %v1236_v63 }
 0x3b2   :  { %7685 = vmatpush1.bf16.msra.mxu0 %v16993_v7  ;;  %v1243_v7 = vld [vmem:[#allocation7 + $0xfa0] sm:$0xff] }
 0x3b3   :  { %7849 = vmatpush1.bf16.msra.mxu1 %v16995_v35  ;;  %7686 = vmatprep.subr.bf16.mxu0 %v17010_v8  ;;  %v1251_v35 = vld [vmem:[#allocation7 + $0xfe0] sm:$0xff]  ;;  %v1244_v8 = vld [vmem:[#allocation7 + $0xfa8] sm:$0xff] }
 0x3b4   :  { %7850 = vmatprep.subr.bf16.mxu1 %v17012_v10  ;;  %v1252_v10 = vld [vmem:[#allocation7 + $0xfe8] sm:$0xff]  ;;  %v17106_v19 = vcombine.high %v1243_v7, %v1251_v35  ;;  %v17105_v24 = vcombine.low %v1243_v7, %v1251_v35 }
 0x3b5   :  { %v17108_v6 = vcombine.high %v1244_v8, %v1252_v10  ;;  %v17107_v25 = vcombine.low %v1244_v8, %v1252_v10 }
 0x3b6   :  { %7687 = vmatpush1.bf16.msra.mxu0 %v17009_v20  ;;  %v1259_v20 = vld [vmem:[#allocation7 + $0x1020] sm:$0xff] }
 0x3b7   :  { %7851 = vmatpush1.bf16.msra.mxu1 %v17011_v14  ;;  %7688 = vmatprep.subr.bf16.mxu0 %v17026_v22  ;;  %v1267_v14 = vld [vmem:[#allocation7 + $0x1060] sm:$0xff]  ;;  %v1260_v22 = vld [vmem:[#allocation7 + $0x1028] sm:$0xff] }
 0x3b8   :  { %7852 = vmatprep.subr.bf16.mxu1 %v17028_v23  ;;  %v1268_v23 = vld [vmem:[#allocation7 + $0x1068] sm:$0xff]  ;;  %v17122_v28 = vcombine.high %v1259_v20, %v1267_v14 }
 0x3b9   :  { %v17124_v29 = vcombine.high %v1260_v22, %v1268_v23  ;;  %v17123_v39 = vcombine.low %v1260_v22, %v1268_v23 }
 0x3ba   :  { %7689 = vmatpush1.bf16.msra.mxu0 %v17025_v30  ;;  %v1275_v30 = vld [vmem:[#allocation7 + $0x10a0] sm:$0xff] }
 0x3bb   :  { %7853 = vmatpush1.bf16.msra.mxu1 %v17027_v32  ;;  %7690 = vmatprep.subr.bf16.mxu0 %v17042_v33  ;;  %v1283_v32 = vld [vmem:[#allocation7 + $0x10e0] sm:$0xff]  ;;  %v17121_v33 = vcombine.low %v1259_v20, %v1267_v14 }
 0x3bc   :  { %7854 = vmatprep.subr.bf16.mxu1 %v17044_v37  ;;  %v1276_v37 = vld [vmem:[#allocation7 + $0x10a8] sm:$0xff]  ;;  %v17138_v40 = vcombine.high %v1275_v30, %v1283_v32  ;;  %v17137_v53 = vcombine.low %v1275_v30, %v1283_v32 }
 0x3bd   :  { %v17139_v49 = vcombine.low %v1276_v37, %v1284_v38 }
 0x3be   :  { %7691 = vmatpush1.bf16.msra.mxu0 %v17041_v43  ;;  %v1299_v43 = vld [vmem:[#allocation7 + $0x1160] sm:$0xff] }
 0x3bf   :  { %7855 = vmatpush1.bf16.msra.mxu1 %v17043_v0  ;;  %7692 = vmatprep.subr.bf16.mxu0 %v17058_v45  ;;  %v17140_v0 = vcombine.high %v1276_v37, %v1284_v38  ;;  %v1292_v45 = vld [vmem:[#allocation7 + $0x1128] sm:$0xff]  ;;  %v17154_v55 = vcombine.high %v1291_v42, %v1299_v43  ;;  %v17153_v60 = vcombine.low %v1291_v42, %v1299_v43  ;;  %v1371_v38 = vld [vmem:[#allocation7 + $0x13a0] sm:$0xff] }
 0x3c0   :  { %7856 = vmatprep.subr.bf16.mxu1 %v17060_v48  ;;  %v1300_v48 = vld [vmem:[#allocation7 + $0x1168] sm:$0xff] }
 0x3c1   :  { %v17156_v16 = vcombine.high %v1292_v45, %v1300_v48  ;;  %v17155_v61 = vcombine.low %v1292_v45, %v1300_v48  ;;  %v1380_v42 = vld [vmem:[#allocation7 + $0x13e8] sm:$0xff] }
 0x3c2   :  { %7693 = vmatpush1.bf16.msra.mxu0 %v17057_v56  ;;  %v1307_v56 = vld [vmem:[#allocation7 + $0x11a0] sm:$0xff] }
 0x3c3   :  { %7857 = vmatpush1.bf16.msra.mxu1 %v17059_v41  ;;  %7694 = vmatprep.subr.bf16.mxu0 %v17074_v57  ;;  %v1315_v41 = vld [vmem:[#allocation7 + $0x11e0] sm:$0xff]  ;;  %v1308_v57 = vld [vmem:[#allocation7 + $0x11a8] sm:$0xff] }
 0x3c4   :  { %7858 = vmatprep.subr.bf16.mxu1 %v17076_v59  ;;  %v1316_v59 = vld [vmem:[#allocation7 + $0x11e8] sm:$0xff]  ;;  %v17170_v62 = vcombine.high %v1307_v56, %v1315_v41  ;;  %v17169_v7 = vcombine.low %v1307_v56, %v1315_v41 }
 0x3c5   :  { %v17172_v63 = vcombine.high %v1308_v57, %v1316_v59  ;;  %v17171_v35 = vcombine.low %v1308_v57, %v1316_v59 }
 0x3c6   :  { %7695 = vmatpush1.bf16.msra.mxu0 %v17073_v2  ;;  %v1323_v2 = vld [vmem:[#allocation7 + $0x1220] sm:$0xff] }
 0x3c7   :  { %7859 = vmatpush1.bf16.msra.mxu1 %v17075_v58  ;;  %7696 = vmatprep.subr.bf16.mxu0 %v17090_v4  ;;  %v1331_v58 = vld [vmem:[#allocation7 + $0x1260] sm:$0xff]  ;;  %v1324_v4 = vld [vmem:[#allocation7 + $0x1228] sm:$0xff] }
 0x3c8   :  { %7860 = vmatprep.subr.bf16.mxu1 %v17092_v5  ;;  %v1332_v5 = vld [vmem:[#allocation7 + $0x1268] sm:$0xff]  ;;  %v17186_v8 = vcombine.high %v1323_v2, %v1331_v58  ;;  %v17185_v20 = vcombine.low %v1323_v2, %v1331_v58 }
 0x3c9   :  { %v17188_v10 = vcombine.high %v1324_v4, %v1332_v5  ;;  %v17187_v14 = vcombine.low %v1324_v4, %v1332_v5 }
 0x3ca   :  { %7697 = vmatpush1.bf16.msra.mxu0 %v17089_v11  ;;  %v1339_v11 = vld [vmem:[#allocation7 + $0x12a0] sm:$0xff] }
 0x3cb   :  { %7861 = vmatpush1.bf16.msra.mxu1 %v17091_v13  ;;  %7698 = vmatprep.subr.bf16.mxu0 %v17106_v19  ;;  %v1347_v13 = vld [vmem:[#allocation7 + $0x12e0] sm:$0xff]  ;;  %v1340_v19 = vld [vmem:[#allocation7 + $0x12a8] sm:$0xff] }
 0x3cc   :  { %7862 = vmatprep.subr.bf16.mxu1 %v17108_v6  ;;  %v1348_v6 = vld [vmem:[#allocation7 + $0x12e8] sm:$0xff]  ;;  %v17202_v22 = vcombine.high %v1339_v11, %v1347_v13  ;;  %v17201_v30 = vcombine.low %v1339_v11, %v1347_v13 }
 0x3cd   :  { %v17204_v23 = vcombine.high %v1340_v19, %v1348_v6  ;;  %v17203_v32 = vcombine.low %v1340_v19, %v1348_v6 }
 0x3ce   :  { %7699 = vmatpush1.bf16.msra.mxu0 %v17105_v24  ;;  %v1355_v24 = vld [vmem:[#allocation7 + $0x1320] sm:$0xff] }
 0x3cf   :  { %7863 = vmatpush1.bf16.msra.mxu1 %v17107_v25  ;;  %7709 = vmatprep.subr.bf16.mxu0 %v17122_v28  ;;  %v1363_v25 = vld [vmem:[#allocation7 + $0x1360] sm:$0xff]  ;;  %v1356_v28 = vld [vmem:[#allocation7 + $0x1328] sm:$0xff] }
 0x3d0   :  { %7873 = vmatprep.subr.bf16.mxu1 %v17124_v29  ;;  %v1364_v29 = vld [vmem:[#allocation7 + $0x1368] sm:$0xff]  ;;  %v17217_v43 = vcombine.low %v1355_v24, %v1363_v25 }
 0x3d1   :  { %7701 = vmatmul.mubr.bf16.vlgmr.msra.gmra.mrb[16].mxu0 %v19573_v18  ;;  %v17220_v37 = vcombine.high %v1356_v28, %v1364_v29 }
 0x3d2   :  { %7865 = vmatmul.mubr.bf16.vlgmr.msra.gmra.mrb[16].mxu1 %v19573_v18  ;;  %7710 = vmatpush1.bf16.msra.mxu0 %v17121_v33  ;;  %v17218_v33 = vcombine.high %v1355_v24, %v1363_v25 }
 0x3d3   :  { %7741 = vmatprep.mubr.bf16.mxu0 %v19575_v27  ;;  %7874 = vmatpush1.bf16.msra.mxu1 %v17123_v39  ;;  %v1379_v39 = vld [vmem:[#allocation7 + $0x13e0] sm:$0xff] }
 0x3d4   :  { %7905 = vmatprep.mubr.bf16.mxu1 %v19575_v27  ;;  %7711 = vmatprep.subr.bf16.mxu0 %v17138_v40  ;;  %v1372_v40 = vld [vmem:[#allocation7 + $0x13a8] sm:$0xff]  ;;  %v17234_v45 = vcombine.high %v1371_v38, %v1379_v39  ;;  %v17233_v56 = vcombine.low %v1371_v38, %v1379_v39 }
 0x3d5   :  { %7875 = vmatprep.subr.bf16.mxu1 %v17140_v0  ;;  %v17219_v0 = vcombine.low %v1356_v28, %v1364_v29  ;;  %v17236_v48 = vcombine.high %v1372_v40, %v1380_v42  ;;  %v17235_v41 = vcombine.low %v1372_v40, %v1380_v42 }
 0x3d6   :  { %7712 = vmatpush1.bf16.msra.mxu0 %v17137_v53  ;;  %v1387_v53 = vld [vmem:[#allocation7 + $0x1420] sm:$0xff] }
 0x3d7   :  { %7876 = vmatpush1.bf16.msra.mxu1 %v17139_v49  ;;  %7713 = vmatprep.subr.bf16.mxu0 %v17154_v55  ;;  %v1395_v49 = vld [vmem:[#allocation7 + $0x1460] sm:$0xff]  ;;  %v1388_v55 = vld [vmem:[#allocation7 + $0x1428] sm:$0xff] }
 0x3d8   :  { %7877 = vmatprep.subr.bf16.mxu1 %v17156_v16  ;;  %v1396_v16 = vld [vmem:[#allocation7 + $0x1468] sm:$0xff]  ;;  %v17250_v57 = vcombine.high %v1387_v53, %v1395_v49  ;;  %v17249_v2 = vcombine.low %v1387_v53, %v1395_v49 }
 0x3d9   :  { %v17252_v59 = vcombine.high %v1388_v55, %v1396_v16  ;;  %v17251_v58 = vcombine.low %v1388_v55, %v1396_v16 }
 0x3da   :  { %7714 = vmatpush1.bf16.msra.mxu0 %v17153_v60  ;;  %v1403_v60 = vld [vmem:[#allocation7 + $0x14a0] sm:$0xff] }
 0x3db   :  { %7878 = vmatpush1.bf16.msra.mxu1 %v17155_v61  ;;  %7715 = vmatprep.subr.bf16.mxu0 %v17170_v62  ;;  %v1411_v61 = vld [vmem:[#allocation7 + $0x14e0] sm:$0xff]  ;;  %v1404_v62 = vld [vmem:[#allocation7 + $0x14a8] sm:$0xff] }
 0x3dc   :  { %7879 = vmatprep.subr.bf16.mxu1 %v17172_v63  ;;  %v1412_v63 = vld [vmem:[#allocation7 + $0x14e8] sm:$0xff]  ;;  %v17266_v4 = vcombine.high %v1403_v60, %v1411_v61  ;;  %v17265_v11 = vcombine.low %v1403_v60, %v1411_v61 }
 0x3dd   :  { %v17268_v5 = vcombine.high %v1404_v62, %v1412_v63  ;;  %v17267_v13 = vcombine.low %v1404_v62, %v1412_v63 }
 0x3de   :  { %7716 = vmatpush1.bf16.msra.mxu0 %v17169_v7  ;;  %v1419_v7 = vld [vmem:[#allocation7 + $0x1520] sm:$0xff] }
 0x3df   :  { %7880 = vmatpush1.bf16.msra.mxu1 %v17171_v35  ;;  %7717 = vmatprep.subr.bf16.mxu0 %v17186_v8  ;;  %v1427_v35 = vld [vmem:[#allocation7 + $0x1560] sm:$0xff]  ;;  %v1420_v8 = vld [vmem:[#allocation7 + $0x1528] sm:$0xff] }
 0x3e0   :  { %7881 = vmatprep.subr.bf16.mxu1 %v17188_v10  ;;  %v1428_v10 = vld [vmem:[#allocation7 + $0x1568] sm:$0xff]  ;;  %v17282_v19 = vcombine.high %v1419_v7, %v1427_v35  ;;  %v17281_v24 = vcombine.low %v1419_v7, %v1427_v35 }
 0x3e1   :  { %v17284_v6 = vcombine.high %v1420_v8, %v1428_v10  ;;  %v17283_v25 = vcombine.low %v1420_v8, %v1428_v10 }
 0x3e2   :  { %7718 = vmatpush1.bf16.msra.mxu0 %v17185_v20  ;;  %v1435_v20 = vld [vmem:[#allocation7 + $0x15a0] sm:$0xff] }
 0x3e3   :  { %7882 = vmatpush1.bf16.msra.mxu1 %v17187_v14  ;;  %7719 = vmatprep.subr.bf16.mxu0 %v17202_v22  ;;  %v1443_v14 = vld [vmem:[#allocation7 + $0x15e0] sm:$0xff]  ;;  %v1436_v22 = vld [vmem:[#allocation7 + $0x15a8] sm:$0xff] }
 0x3e4   :  { %7883 = vmatprep.subr.bf16.mxu1 %v17204_v23  ;;  %v1444_v23 = vld [vmem:[#allocation7 + $0x15e8] sm:$0xff]  ;;  %v17298_v28 = vcombine.high %v1435_v20, %v1443_v14  ;;  %v17297_v38 = vcombine.low %v1435_v20, %v1443_v14 }
 0x3e5   :  { %v17300_v29 = vcombine.high %v1436_v22, %v1444_v23  ;;  %v17299_v39 = vcombine.low %v1436_v22, %v1444_v23 }
 0x3e6   :  { %7720 = vmatpush1.bf16.msra.mxu0 %v17201_v30  ;;  %v1451_v30 = vld [vmem:[#allocation7 + $0x1620] sm:$0xff] }
 0x3e7   :  { %7884 = vmatpush1.bf16.msra.mxu1 %v17203_v32  ;;  %7721 = vmatprep.subr.bf16.mxu0 %v17218_v33  ;;  %v1459_v32 = vld [vmem:[#allocation7 + $0x1660] sm:$0xff]  ;;  %v1452_v33 = vld [vmem:[#allocation7 + $0x1628] sm:$0xff] }
 0x3e8   :  { %7885 = vmatprep.subr.bf16.mxu1 %v17220_v37  ;;  %v1460_v37 = vld [vmem:[#allocation7 + $0x1668] sm:$0xff]  ;;  %v17314_v40 = vcombine.high %v1451_v30, %v1459_v32  ;;  %v17313_v53 = vcombine.low %v1451_v30, %v1459_v32 }
 0x3e9   :  { %v17316_v42 = vcombine.high %v1452_v33, %v1460_v37  ;;  %v17315_v49 = vcombine.low %v1452_v33, %v1460_v37  ;;  %v1540_v30 = vld [vmem:[#allocation7 + $0x18e8] sm:$0xff]  ;;  %v1547_v37 = vld [vmem:[#allocation7 + $0x1920] sm:$0xff] }
 0x3ea   :  { %7722 = vmatpush1.bf16.msra.mxu0 %v17217_v43  ;;  %v1467_v43 = vld [vmem:[#allocation7 + $0x16a0] sm:$0xff] }
 0x3eb   :  { %7886 = vmatpush1.bf16.msra.mxu1 %v17219_v0  ;;  %7723 = vmatprep.subr.bf16.mxu0 %v17234_v45  ;;  %v1475_v0 = vld [vmem:[#allocation7 + $0x16e0] sm:$0xff]  ;;  %v1468_v45 = vld [vmem:[#allocation7 + $0x16a8] sm:$0xff] }
 0x3ec   :  { %7887 = vmatprep.subr.bf16.mxu1 %v17236_v48  ;;  %v1476_v48 = vld [vmem:[#allocation7 + $0x16e8] sm:$0xff]  ;;  %v17330_v55 = vcombine.high %v1467_v43, %v1475_v0  ;;  %v17329_v60 = vcombine.low %v1467_v43, %v1475_v0 }
 0x3ed   :  { %v17332_v16 = vcombine.high %v1468_v45, %v1476_v48  ;;  %v17331_v61 = vcombine.low %v1468_v45, %v1476_v48 }
 0x3ee   :  { %7724 = vmatpush1.bf16.msra.mxu0 %v17233_v56  ;;  %v1483_v56 = vld [vmem:[#allocation7 + $0x1720] sm:$0xff] }
 0x3ef   :  { %7888 = vmatpush1.bf16.msra.mxu1 %v17235_v41  ;;  %7725 = vmatprep.subr.bf16.mxu0 %v17250_v57  ;;  %v1491_v41 = vld [vmem:[#allocation7 + $0x1760] sm:$0xff]  ;;  %v1484_v57 = vld [vmem:[#allocation7 + $0x1728] sm:$0xff] }
 0x3f0   :  { %7889 = vmatprep.subr.bf16.mxu1 %v17252_v59  ;;  %v1492_v59 = vld [vmem:[#allocation7 + $0x1768] sm:$0xff]  ;;  %v17346_v62 = vcombine.high %v1483_v56, %v1491_v41  ;;  %v17345_v7 = vcombine.low %v1483_v56, %v1491_v41 }
 0x3f1   :  { %v17348_v63 = vcombine.high %v1484_v57, %v1492_v59  ;;  %v17347_v35 = vcombine.low %v1484_v57, %v1492_v59 }
 0x3f2   :  { %7726 = vmatpush1.bf16.msra.mxu0 %v17249_v2  ;;  %v1499_v2 = vld [vmem:[#allocation7 + $0x17a0] sm:$0xff] }
 0x3f3   :  { %7890 = vmatpush1.bf16.msra.mxu1 %v17251_v58  ;;  %7727 = vmatprep.subr.bf16.mxu0 %v17266_v4  ;;  %v1507_v58 = vld [vmem:[#allocation7 + $0x17e0] sm:$0xff]  ;;  %v1500_v4 = vld [vmem:[#allocation7 + $0x17a8] sm:$0xff] }
 0x3f4   :  { %7891 = vmatprep.subr.bf16.mxu1 %v17268_v5  ;;  %v1508_v5 = vld [vmem:[#allocation7 + $0x17e8] sm:$0xff]  ;;  %v17362_v8 = vcombine.high %v1499_v2, %v1507_v58  ;;  %v17361_v20 = vcombine.low %v1499_v2, %v1507_v58 }
 0x3f5   :  { %v17364_v10 = vcombine.high %v1500_v4, %v1508_v5  ;;  %v17363_v14 = vcombine.low %v1500_v4, %v1508_v5 }
 0x3f6   :  { %7728 = vmatpush1.bf16.msra.mxu0 %v17265_v11  ;;  %v1515_v11 = vld [vmem:[#allocation7 + $0x1820] sm:$0xff] }
 0x3f7   :  { %7892 = vmatpush1.bf16.msra.mxu1 %v17267_v13  ;;  %7729 = vmatprep.subr.bf16.mxu0 %v17282_v19  ;;  %v1523_v13 = vld [vmem:[#allocation7 + $0x1860] sm:$0xff]  ;;  %v1516_v19 = vld [vmem:[#allocation7 + $0x1828] sm:$0xff] }
 0x3f8   :  { %7893 = vmatprep.subr.bf16.mxu1 %v17284_v6  ;;  %v1524_v6 = vld [vmem:[#allocation7 + $0x1868] sm:$0xff]  ;;  %v17378_v22 = vcombine.high %v1515_v11, %v1523_v13 }
 0x3f9   :  { %v17380_v23 = vcombine.high %v1516_v19, %v1524_v6  ;;  %v17379_v32 = vcombine.low %v1516_v19, %v1524_v6 }
 0x3fa   :  { %7730 = vmatpush1.bf16.msra.mxu0 %v17281_v24  ;;  %v1531_v24 = vld [vmem:[#allocation7 + $0x18a0] sm:$0xff] }
 0x3fb   :  { %7894 = vmatpush1.bf16.msra.mxu1 %v17283_v25  ;;  %7731 = vmatprep.subr.bf16.mxu0 %v17298_v28  ;;  %v1539_v25 = vld [vmem:[#allocation7 + $0x18e0] sm:$0xff]  ;;  %v17377_v28 = vcombine.low %v1515_v11, %v1523_v13 }
 0x3fc   :  { %7895 = vmatprep.subr.bf16.mxu1 %v17300_v29  ;;  %v1532_v29 = vld [vmem:[#allocation7 + $0x18a8] sm:$0xff]  ;;  %v17394_v33 = vcombine.high %v1531_v24, %v1539_v25  ;;  %v17393_v43 = vcombine.low %v1531_v24, %v1539_v25 }
 0x3fd   :  { %v17395_v0 = vcombine.low %v1532_v29, %v1540_v30 }
 0x3fe   :  { %7732 = vmatpush1.bf16.msra.mxu0 %v17297_v38  ;;  %v1555_v38 = vld [vmem:[#allocation7 + $0x1960] sm:$0xff] }
 0x3ff   :  { %7896 = vmatpush1.bf16.msra.mxu1 %v17299_v39  ;;  %7733 = vmatprep.subr.bf16.mxu0 %v17314_v40  ;;  %v17396_v39 = vcombine.high %v1532_v29, %v1540_v30  ;;  %v1548_v40 = vld [vmem:[#allocation7 + $0x1928] sm:$0xff]  ;;  %v17410_v45 = vcombine.high %v1547_v37, %v1555_v38  ;;  %v17409_v56 = vcombine.low %v1547_v37, %v1555_v38 }
 0x400   :  { %7897 = vmatprep.subr.bf16.mxu1 %v17316_v42  ;;  %v1556_v42 = vld [vmem:[#allocation7 + $0x1968] sm:$0xff] }
 0x401   :  { %v17412_v48 = vcombine.high %v1548_v40, %v1556_v42  ;;  %v17411_v41 = vcombine.low %v1548_v40, %v1556_v42  ;;  %v1636_v40 = vld [vmem:[#allocation7 + $0x1be8] sm:$0xff] }
 0x402   :  { %7734 = vmatpush1.bf16.msra.mxu0 %v17313_v53  ;;  %v1563_v53 = vld [vmem:[#allocation7 + $0x19a0] sm:$0xff] }
 0x403   :  { %7898 = vmatpush1.bf16.msra.mxu1 %v17315_v49  ;;  %7735 = vmatprep.subr.bf16.mxu0 %v17330_v55  ;;  %v1571_v49 = vld [vmem:[#allocation7 + $0x19e0] sm:$0xff]  ;;  %v1564_v55 = vld [vmem:[#allocation7 + $0x19a8] sm:$0xff] }
 0x404   :  { %7899 = vmatprep.subr.bf16.mxu1 %v17332_v16  ;;  %v1572_v16 = vld [vmem:[#allocation7 + $0x19e8] sm:$0xff]  ;;  %v17426_v57 = vcombine.high %v1563_v53, %v1571_v49  ;;  %v17425_v2 = vcombine.low %v1563_v53, %v1571_v49 }
 0x405   :  { %v17428_v59 = vcombine.high %v1564_v55, %v1572_v16  ;;  %v17427_v58 = vcombine.low %v1564_v55, %v1572_v16 }
 0x406   :  { %7736 = vmatpush1.bf16.msra.mxu0 %v17329_v60  ;;  %v1579_v60 = vld [vmem:[#allocation7 + $0x1a20] sm:$0xff] }
 0x407   :  { %7900 = vmatpush1.bf16.msra.mxu1 %v17331_v61  ;;  %7737 = vmatprep.subr.bf16.mxu0 %v17346_v62  ;;  %v1587_v61 = vld [vmem:[#allocation7 + $0x1a60] sm:$0xff]  ;;  %v1580_v62 = vld [vmem:[#allocation7 + $0x1a28] sm:$0xff] }
 0x408   :  { %7901 = vmatprep.subr.bf16.mxu1 %v17348_v63  ;;  %v1588_v63 = vld [vmem:[#allocation7 + $0x1a68] sm:$0xff]  ;;  %v17442_v4 = vcombine.high %v1579_v60, %v1587_v61  ;;  %v17441_v11 = vcombine.low %v1579_v60, %v1587_v61 }
 0x409   :  { %v17444_v5 = vcombine.high %v1580_v62, %v1588_v63  ;;  %v17443_v13 = vcombine.low %v1580_v62, %v1588_v63 }
 0x40a   :  { %7738 = vmatpush1.bf16.msra.mxu0 %v17345_v7  ;;  %v1595_v7 = vld [vmem:[#allocation7 + $0x1aa0] sm:$0xff] }
 0x40b   :  { %7902 = vmatpush1.bf16.msra.mxu1 %v17347_v35  ;;  %7739 = vmatprep.subr.bf16.mxu0 %v17362_v8  ;;  %v1603_v35 = vld [vmem:[#allocation7 + $0x1ae0] sm:$0xff]  ;;  %v1596_v8 = vld [vmem:[#allocation7 + $0x1aa8] sm:$0xff] }
 0x40c   :  { %7903 = vmatprep.subr.bf16.mxu1 %v17364_v10  ;;  %v1604_v10 = vld [vmem:[#allocation7 + $0x1ae8] sm:$0xff]  ;;  %v17458_v19 = vcombine.high %v1595_v7, %v1603_v35  ;;  %v17457_v24 = vcombine.low %v1595_v7, %v1603_v35 }
 0x40d   :  { %v17460_v6 = vcombine.high %v1596_v8, %v1604_v10  ;;  %v17459_v25 = vcombine.low %v1596_v8, %v1604_v10 }
 0x40e   :  { %7740 = vmatpush1.bf16.msra.mxu0 %v17361_v20  ;;  %v1611_v20 = vld [vmem:[#allocation7 + $0x1b20] sm:$0xff] }
 0x40f   :  { %7904 = vmatpush1.bf16.msra.mxu1 %v17363_v14  ;;  %7750 = vmatprep.subr.bf16.mxu0 %v17378_v22  ;;  %v1619_v14 = vld [vmem:[#allocation7 + $0x1b60] sm:$0xff]  ;;  %v1612_v22 = vld [vmem:[#allocation7 + $0x1b28] sm:$0xff] }
 0x410   :  { %7914 = vmatprep.subr.bf16.mxu1 %v17380_v23  ;;  %v1620_v23 = vld [vmem:[#allocation7 + $0x1b68] sm:$0xff] }
 0x411   :  { %7742 = vmatmul.mubr.bf16.vlgmr.msra.gmra.mrb[16].mxu0 %v19593_v1  ;;  %v17476_v30 = vcombine.high %v1612_v22, %v1620_v23  ;;  %v17475_v53 = vcombine.low %v1612_v22, %v1620_v23 }
 0x412   :  { %7906 = vmatmul.mubr.bf16.vlgmr.msra.gmra.mrb[16].mxu1 %v19593_v1  ;;  %7751 = vmatpush1.bf16.msra.mxu0 %v17377_v28  ;;  %v17474_v28 = vcombine.high %v1611_v20, %v1619_v14 }
 0x413   :  { %7782 = vmatprep.mubr.bf16.mxu0 %v19595_v9  ;;  %7915 = vmatpush1.bf16.msra.mxu1 %v17379_v32  ;;  %v1627_v32 = vld [vmem:[#allocation7 + $0x1ba0] sm:$0xff] }
 0x414   :  { %7946 = vmatprep.mubr.bf16.mxu1 %v19595_v9  ;;  %7752 = vmatprep.subr.bf16.mxu0 %v17394_v33  ;;  %v1635_v33 = vld [vmem:[#allocation7 + $0x1be0] sm:$0xff] }
 0x415   :  { %7916 = vmatprep.subr.bf16.mxu1 %v17396_v39  ;;  %v1628_v39 = vld [vmem:[#allocation7 + $0x1ba8] sm:$0xff]  ;;  %v17490_v49 = vcombine.high %v1627_v32, %v1635_v33  ;;  %v17489_v60 = vcombine.low %v1627_v32, %v1635_v33 }
 0x416   :  { %7753 = vmatpush1.bf16.msra.mxu0 %v17393_v43  ;;  %v17492_v16 = vcombine.high %v1628_v39, %v1636_v40  ;;  %v17491_v61 = vcombine.low %v1628_v39, %v1636_v40 }
 0x417   :  { %7917 = vmatpush1.bf16.msra.mxu1 %v17395_v0  ;;  %7754 = vmatprep.subr.bf16.mxu0 %v17410_v45  ;;  %v17473_v0 = vcombine.low %v1611_v20, %v1619_v14 }
 0x418   :  { %7918 = vmatprep.subr.bf16.mxu1 %v17412_v48 }
 0x41a   :  { %7755 = vmatpush1.bf16.msra.mxu0 %v17409_v56  ;;  %v1643_v56 = vld [vmem:[#allocation7 + $0x1c20] sm:$0xff] }
 0x41b   :  { %7919 = vmatpush1.bf16.msra.mxu1 %v17411_v41  ;;  %7756 = vmatprep.subr.bf16.mxu0 %v17426_v57  ;;  %v1651_v41 = vld [vmem:[#allocation7 + $0x1c60] sm:$0xff]  ;;  %v1644_v57 = vld [vmem:[#allocation7 + $0x1c28] sm:$0xff] }
 0x41c   :  { %7920 = vmatprep.subr.bf16.mxu1 %v17428_v59  ;;  %v1652_v59 = vld [vmem:[#allocation7 + $0x1c68] sm:$0xff]  ;;  %v17506_v62 = vcombine.high %v1643_v56, %v1651_v41  ;;  %v17505_v7 = vcombine.low %v1643_v56, %v1651_v41  ;;  %v1723_v56 = vld [vmem:[#allocation7 + $0x1ea0] sm:$0xff] }
 0x41d   :  { %v17508_v63 = vcombine.high %v1644_v57, %v1652_v59  ;;  %v17507_v35 = vcombine.low %v1644_v57, %v1652_v59  ;;  %v1731_v41 = vld [vmem:[#allocation7 + $0x1ee0] sm:$0xff]  ;;  %v1724_v57 = vld [vmem:[#allocation7 + $0x1ea8] sm:$0xff] }
 0x41e   :  { %7757 = vmatpush1.bf16.msra.mxu0 %v17425_v2  ;;  %v1659_v2 = vld [vmem:[#allocation7 + $0x1ca0] sm:$0xff]  ;;  %v1732_v59 = vld [vmem:[#allocation7 + $0x1ee8] sm:$0xff] }
 0x41f   :  { %7921 = vmatpush1.bf16.msra.mxu1 %v17427_v58  ;;  %7758 = vmatprep.subr.bf16.mxu0 %v17442_v4  ;;  %v1667_v58 = vld [vmem:[#allocation7 + $0x1ce0] sm:$0xff]  ;;  %v1660_v4 = vld [vmem:[#allocation7 + $0x1ca8] sm:$0xff] }
 0x420   :  { %7922 = vmatprep.subr.bf16.mxu1 %v17444_v5  ;;  %v1668_v5 = vld [vmem:[#allocation7 + $0x1ce8] sm:$0xff]  ;;  %v17522_v8 = vcombine.high %v1659_v2, %v1667_v58  ;;  %v17521_v20 = vcombine.low %v1659_v2, %v1667_v58  ;;  %v1739_v2 = vld [vmem:[#allocation7 + $0x1f20] sm:$0xff] }
 0x421   :  { %v17524_v10 = vcombine.high %v1660_v4, %v1668_v5  ;;  %v17523_v14 = vcombine.low %v1660_v4, %v1668_v5  ;;  %v1747_v58 = vld [vmem:[#allocation7 + $0x1f60] sm:$0xff]  ;;  %v1740_v4 = vld [vmem:[#allocation7 + $0x1f28] sm:$0xff] }
 0x422   :  { %7759 = vmatpush1.bf16.msra.mxu0 %v17441_v11  ;;  %v1675_v11 = vld [vmem:[#allocation7 + $0x1d20] sm:$0xff]  ;;  %v1748_v5 = vld [vmem:[#allocation7 + $0x1f68] sm:$0xff] }
 0x423   :  { %7923 = vmatpush1.bf16.msra.mxu1 %v17443_v13  ;;  %7760 = vmatprep.subr.bf16.mxu0 %v17458_v19  ;;  %v1683_v13 = vld [vmem:[#allocation7 + $0x1d60] sm:$0xff]  ;;  %v1676_v19 = vld [vmem:[#allocation7 + $0x1d28] sm:$0xff] }
 0x424   :  { %v19648_v29 = vpop.f32.mrb[12].mxu0  ;;  %7924 = vmatprep.subr.bf16.mxu1 %v17460_v6  ;;  %v1684_v6 = vld [vmem:[#allocation7 + $0x1d68] sm:$0xff]  ;;  %v17538_v22 = vcombine.high %v1675_v11, %v1683_v13  ;;  %v17537_v32 = vcombine.low %v1675_v11, %v1683_v13  ;;  %v1755_v11 = vld [vmem:[#allocation7 + $0x1fa0] sm:$0xff] }
 0x425   :  { %v19650_v37 = vpop.f32.mrb[12].mxu1  ;;  %v19652_v38 = vpop.f32.mrb[13].mxu0  ;;  %v17540_v23 = vcombine.high %v1676_v19, %v1684_v6  ;;  %v17539_v33 = vcombine.low %v1676_v19, %v1684_v6  ;;  %v1763_v13 = vld [vmem:[#allocation7 + $0x1fe0] sm:$0xff]  ;;  %v1756_v19 = vld [vmem:[#allocation7 + $0x1fa8] sm:$0xff] }
 0x426   :  { %v19654_v42 = vpop.f32.mrb[13].mxu1  ;;  %v7460_v43 = vpop.f32.mrb[14].mxu0  ;;  %7761 = vmatpush1.bf16.msra.mxu0 %v17457_v24  ;;  %v1691_v24 = vld [vmem:[#allocation7 + $0x1da0] sm:$0xff]  ;;  %v1764_v6 = vld [vmem:[#allocation7 + $0x1fe8] sm:$0xff] }
 0x427   :  { %v7624_v45 = vpop.f32.mrb[14].mxu1  ;;  %7925 = vmatpush1.bf16.msra.mxu1 %v17459_v25  ;;  %v7461_v48 = vpop.f32.mrb[15].mxu0  ;;  %7762 = vmatprep.subr.bf16.mxu0 %v17474_v28  ;;  %v1699_v25 = vld [vmem:[#allocation7 + $0x1de0] sm:$0xff]  ;;  %v1692_v28 = vld [vmem:[#allocation7 + $0x1da8] sm:$0xff] }
 0x428   :  { %v7625_v55 = vpop.f32.mrb[15].mxu1  ;;  %7926 = vmatprep.subr.bf16.mxu1 %v17476_v30  ;;  %v1700_v30 = vld [vmem:[#allocation7 + $0x1de8] sm:$0xff]  ;;  %v17554_v39 = vcombine.high %v1691_v24, %v1699_v25  ;;  %v1707_v43 = vld [vmem:[#allocation7 + $0x1e20] sm:$0xff] }
 0x429   :  { %v17556_v40 = vcombine.high %v1692_v28, %v1700_v30  ;;  %v1708_v45 = vld [vmem:[#allocation7 + $0x1e28] sm:$0xff] }
 0x42a   :  { %7763 = vmatpush1.bf16.msra.mxu0 %v17473_v0  ;;  %v1715_v0 = vld [vmem:[#allocation7 + $0x1e60] sm:$0xff]  ;;  %v1716_v48 = vld [vmem:[#allocation7 + $0x1e68] sm:$0xff] }
 0x42b   :  { %7927 = vmatpush1.bf16.msra.mxu1 %v17475_v53  ;;  %7764 = vmatprep.subr.bf16.mxu0 %v17490_v49  ;;  %v17553_v53 = vcombine.low %v1691_v24, %v1699_v25  ;;  %v17555_v49 = vcombine.low %v1692_v28, %v1700_v30  ;;  %v17570_v55 = vcombine.high %v1707_v43, %v1715_v0  ;;  %v749_v24 = vld [vmem:[#allocation7 + $0x30] sm:$0xff]  ;;  %v750_v28 = vld [vmem:[#allocation7 + $0x38] sm:$0xff] }
 0x42c   :  { %7928 = vmatprep.subr.bf16.mxu1 %v17492_v16  ;;  %v17572_v16 = vcombine.high %v1708_v45, %v1716_v48  ;;  %v757_v25 = vld [vmem:[#allocation7 + $0x70] sm:$0xff]  ;;  %v758_v30 = vld [vmem:[#allocation7 + $0x78] sm:$0xff] }
 0x42e   :  { %7765 = vmatpush1.bf16.msra.mxu0 %v17489_v60  ;;  %v17569_v60 = vcombine.low %v1707_v43, %v1715_v0  ;;  %v765_v43 = vld [vmem:[#allocation7 + $0xb0] sm:$0xff] }
 0x42f   :  { %7929 = vmatpush1.bf16.msra.mxu1 %v17491_v61  ;;  %7766 = vmatprep.subr.bf16.mxu0 %v17506_v62  ;;  %v17571_v61 = vcombine.low %v1708_v45, %v1716_v48  ;;  %v17586_v62 = vcombine.high %v1723_v56, %v1731_v41  ;;  %v773_v0 = vld [vmem:[#allocation7 + $0xf0] sm:$0xff]  ;;  %v16613_v45 = vcombine.low %v749_v24, %v757_v25  ;;  %v766_v48 = vld [vmem:[#allocation7 + $0xb8] sm:$0xff] }
 0x430   :  { %7930 = vmatprep.subr.bf16.mxu1 %v17508_v63  ;;  %v17588_v63 = vcombine.high %v1724_v57, %v1732_v59 }
 0x432   :  { %7767 = vmatpush1.bf16.msra.mxu0 %v17505_v7  ;;  %v17585_v7 = vcombine.low %v1723_v56, %v1731_v41  ;;  %v789_v56 = vld [vmem:[#allocation7 + $0x170] sm:$0xff] }
 0x433   :  { %7931 = vmatpush1.bf16.msra.mxu1 %v17507_v35  ;;  %7768 = vmatprep.subr.bf16.mxu0 %v17522_v8  ;;  %v17587_v35 = vcombine.low %v1724_v57, %v1732_v59  ;;  %v17602_v8 = vcombine.high %v1739_v2, %v1747_v58  ;;  %v782_v57 = vld [vmem:[#allocation7 + $0x138] sm:$0xff] }
 0x434   :  { %7932 = vmatprep.subr.bf16.mxu1 %v17524_v10  ;;  %v17604_v10 = vcombine.high %v1740_v4, %v1748_v5  ;;  %v790_v59 = vld [vmem:[#allocation7 + $0x178] sm:$0xff] }
 0x436   :  { %7769 = vmatpush1.bf16.msra.mxu0 %v17521_v20  ;;  %v17601_v20 = vcombine.low %v1739_v2, %v1747_v58  ;;  %v797_v2 = vld [vmem:[#allocation7 + $0x1b0] sm:$0xff] }
 0x437   :  { %7933 = vmatpush1.bf16.msra.mxu1 %v17523_v14  ;;  %7770 = vmatprep.subr.bf16.mxu0 %v17538_v22  ;;  %v17603_v14 = vcombine.low %v1740_v4, %v1748_v5  ;;  %v17618_v22 = vcombine.high %v1755_v11, %v1763_v13  ;;  %v805_v58 = vld [vmem:[#allocation7 + $0x1f0] sm:$0xff]  ;;  %v798_v4 = vld [vmem:[#allocation7 + $0x1b8] sm:$0xff] }
 0x438   :  { %7934 = vmatprep.subr.bf16.mxu1 %v17540_v23  ;;  %v17620_v23 = vcombine.high %v1756_v19, %v1764_v6  ;;  %v806_v5 = vld [vmem:[#allocation7 + $0x1f8] sm:$0xff] }
 0x43a   :  { %7771 = vmatpush1.bf16.msra.mxu0 %v17537_v32  ;;  %v17617_v32 = vcombine.low %v1755_v11, %v1763_v13  ;;  %v813_v11 = vld [vmem:[#allocation7 + $0x230] sm:$0xff] }
 0x43b   :  { %7935 = vmatpush1.bf16.msra.mxu1 %v17539_v33  ;;  %7772 = vmatprep.subr.bf16.mxu0 %v17554_v39  ;;  %v17619_v33 = vcombine.low %v1756_v19, %v1764_v6  ;;  %v16614_v39 = vcombine.high %v749_v24, %v757_v25  ;;  %v821_v13 = vld [vmem:[#allocation7 + $0x270] sm:$0xff]  ;;  %v814_v19 = vld [vmem:[#allocation7 + $0x238] sm:$0xff] }
 0x43c   :  { %7936 = vmatprep.subr.bf16.mxu1 %v17556_v40  ;;  %v16616_v40 = vcombine.high %v750_v28, %v758_v30  ;;  %v822_v6 = vld [vmem:[#allocation7 + $0x278] sm:$0xff]  ;;  %v837_v24 = vld [vmem:[#allocation7 + $0x2f0] sm:$0xff] }
 0x43d   :  { %v830_v25 = vld [vmem:[#allocation7 + $0x2b8] sm:$0xff] }
 0x43e   :  { %7773 = vmatpush1.bf16.msra.mxu0 %v17553_v53  ;;  %v774_v53 = vld [vmem:[#allocation7 + $0xf8] sm:$0xff] }
 0x43f   :  { %7937 = vmatpush1.bf16.msra.mxu1 %v17555_v49  ;;  %7774 = vmatprep.subr.bf16.mxu0 %v17570_v55  ;;  %v16615_v49 = vcombine.low %v750_v28, %v758_v30  ;;  %v16630_v55 = vcombine.high %v765_v43, %v773_v0  ;;  %v16632_v41 = vcombine.high %v766_v48, %v774_v53  ;;  %v838_v28 = vld [vmem:[#allocation7 + $0x2f8] sm:$0xff] }
 0x440   :  { %7938 = vmatprep.subr.bf16.mxu1 %v17572_v16  ;;  %v781_v16 = vld [vmem:[#allocation7 + $0x130] sm:$0xff]  ;;  %v16677_v30 = vcombine.low %v813_v11, %v821_v13 }
 0x442   :  { %7775 = vmatpush1.bf16.msra.mxu0 %v17569_v60  ;;  %v16629_v60 = vcombine.low %v765_v43, %v773_v0  ;;  %v853_v43 = vld [vmem:[#allocation7 + $0x370] sm:$0xff]  ;;  %v846_v0 = vld [vmem:[#allocation7 + $0x338] sm:$0xff] }
 0x443   :  { %7939 = vmatpush1.bf16.msra.mxu1 %v17571_v61  ;;  %7776 = vmatprep.subr.bf16.mxu0 %v17586_v62  ;;  %v16631_v61 = vcombine.low %v766_v48, %v774_v53  ;;  %v16646_v62 = vcombine.high %v781_v16, %v789_v56  ;;  %v16695_v53 = vcombine.low %v830_v25, %v838_v28 }
 0x444   :  { %7940 = vmatprep.subr.bf16.mxu1 %v17588_v63  ;;  %v16648_v63 = vcombine.high %v782_v57, %v790_v59 }
 0x446   :  { %7777 = vmatpush1.bf16.msra.mxu0 %v17585_v7  ;;  %v16645_v7 = vcombine.low %v781_v16, %v789_v56  ;;  %v861_v16 = vld [vmem:[#allocation7 + $0x3b0] sm:$0xff] }
 0x447   :  { %7941 = vmatpush1.bf16.msra.mxu1 %v17587_v35  ;;  %7778 = vmatprep.subr.bf16.mxu0 %v17602_v8  ;;  %v16647_v35 = vcombine.low %v782_v57, %v790_v59  ;;  %v16662_v8 = vcombine.high %v797_v2, %v805_v58  ;;  %v869_v56 = vld [vmem:[#allocation7 + $0x3f0] sm:$0xff]  ;;  %v870_v57 = vld [vmem:[#allocation7 + $0x3f8] sm:$0xff] }
 0x448   :  { %7942 = vmatprep.subr.bf16.mxu1 %v17604_v10  ;;  %v16664_v10 = vcombine.high %v798_v4, %v806_v5 }
 0x44a   :  { %7779 = vmatpush1.bf16.msra.mxu0 %v17601_v20  ;;  %v16663_v20 = vcombine.low %v798_v4, %v806_v5  ;;  %v886_v4 = vld [vmem:[#allocation7 + $0x478] sm:$0xff]  ;;  %v16725_v5 = vcombine.low %v861_v16, %v869_v56 }
 0x44b   :  { %7943 = vmatpush1.bf16.msra.mxu1 %v17603_v14  ;;  %7780 = vmatprep.subr.bf16.mxu0 %v17618_v22  ;;  %v16678_v14 = vcombine.high %v813_v11, %v821_v13  ;;  %v16680_v22 = vcombine.high %v814_v19, %v822_v6  ;;  %v901_v11 = vld [vmem:[#allocation7 + $0x4f0] sm:$0xff]  ;;  %v894_v13 = vld [vmem:[#allocation7 + $0x4b8] sm:$0xff] }
 0x44c   :  { %7944 = vmatprep.subr.bf16.mxu1 %v17620_v23  ;;  %v829_v23 = vld [vmem:[#allocation7 + $0x2b0] sm:$0xff] }
 0x44d   :  { %v16693_v48 = vcombine.low %v829_v23, %v837_v24 }
 0x44e   :  { %7781 = vmatpush1.bf16.msra.mxu0 %v17617_v32  ;;  %v16679_v32 = vcombine.low %v814_v19, %v822_v6  ;;  %v902_v19 = vld [vmem:[#allocation7 + $0x4f8] sm:$0xff] }
 0x44f   :  { %7945 = vmatpush1.bf16.msra.mxu1 %v17619_v33  ;;  %7955 = vmatprep.subr.bf16.mxu0 %v16614_v39  ;;  %v16694_v33 = vcombine.high %v829_v23, %v837_v24  ;;  %v16696_v39 = vcombine.high %v830_v25, %v838_v28  ;;  %v917_v23 = vld [vmem:[#allocation7 + $0x570] sm:$0xff]  ;;  %v910_v24 = vld [vmem:[#allocation7 + $0x538] sm:$0xff] }
 0x450   :  { %8119 = vmatprep.subr.bf16.mxu1 %v16616_v40  ;;  %v845_v40 = vld [vmem:[#allocation7 + $0x330] sm:$0xff]  ;;  %v918_v25 = vld [vmem:[#allocation7 + $0x578] sm:$0xff] }
 0x451   :  { %7783 = vmatmul.mubr.bf16.vlgmr.msra.gmra.mrb[16].mxu0 %v19606_v51  ;;  %v16709_v59 = vcombine.low %v845_v40, %v853_v43 }
 0x452   :  { %7947 = vmatmul.mubr.bf16.vlgmr.msra.gmra.mrb[16].mxu1 %v19606_v51  ;;  %7956 = vmatpush1.bf16.msra.mxu0 %v16613_v45  ;;  %v854_v45 = vld [vmem:[#allocation7 + $0x378] sm:$0xff] }
 0x453   :  { %7987 = vmatprep.mubr.bf16.mxu0 %v19539_v34  ;;  %8120 = vmatpush1.bf16.msra.mxu1 %v16615_v49  ;;  %v16710_v49 = vcombine.high %v845_v40, %v853_v43  ;;  %v933_v40 = vld [vmem:[#allocation7 + $0x5f0] sm:$0xff]  ;;  %v926_v43 = vld [vmem:[#allocation7 + $0x5b8] sm:$0xff] }
 0x454   :  { %8151 = vmatprep.mubr.bf16.mxu1 %v19539_v34  ;;  %7957 = vmatprep.subr.bf16.mxu0 %v16630_v55  ;;  %v16661_v34 = vcombine.low %v797_v2, %v805_v58  ;;  %v16712_v55 = vcombine.high %v846_v0, %v854_v45  ;;  %v885_v2 = vld [vmem:[#allocation7 + $0x470] sm:$0xff]  ;;  %v878_v58 = vld [vmem:[#allocation7 + $0x438] sm:$0xff] }
 0x455   :  { %8121 = vmatprep.subr.bf16.mxu1 %v16632_v41  ;;  %v862_v41 = vld [vmem:[#allocation7 + $0x3b8] sm:$0xff] }
 0x456   :  { %7958 = vmatpush1.bf16.msra.mxu0 %v16629_v60  ;;  %v16711_v60 = vcombine.low %v846_v0, %v854_v45  ;;  %v934_v0 = vld [vmem:[#allocation7 + $0x5f8] sm:$0xff] }
 0x457   :  { %8122 = vmatpush1.bf16.msra.mxu1 %v16631_v61  ;;  %7959 = vmatprep.subr.bf16.mxu0 %v16646_v62  ;;  %v16726_v61 = vcombine.high %v861_v16, %v869_v56  ;;  %v16728_v62 = vcombine.high %v862_v41, %v870_v57  ;;  %v949_v16 = vld [vmem:[#allocation7 + $0x670] sm:$0xff]  ;;  %v942_v56 = vld [vmem:[#allocation7 + $0x638] sm:$0xff] }
 0x458   :  { %8123 = vmatprep.subr.bf16.mxu1 %v16648_v63  ;;  %v877_v63 = vld [vmem:[#allocation7 + $0x430] sm:$0xff] }
 0x459   :  { %v16741_v6 = vcombine.low %v877_v63, %v885_v2 }
 0x45a   :  { %7960 = vmatpush1.bf16.msra.mxu0 %v16645_v7  ;;  %v16727_v7 = vcombine.low %v862_v41, %v870_v57  ;;  %v950_v41 = vld [vmem:[#allocation7 + $0x678] sm:$0xff] }
 0x45b   :  { %8124 = vmatpush1.bf16.msra.mxu1 %v16647_v35  ;;  %7961 = vmatprep.subr.bf16.mxu0 %v16662_v8  ;;  %v16742_v35 = vcombine.high %v877_v63, %v885_v2  ;;  %v16744_v8 = vcombine.high %v878_v58, %v886_v4  ;;  %v965_v63 = vld [vmem:[#allocation7 + $0x6f0] sm:$0xff]  ;;  %v958_v2 = vld [vmem:[#allocation7 + $0x6b8] sm:$0xff] }
 0x45c   :  { %8125 = vmatprep.subr.bf16.mxu1 %v16664_v10  ;;  %v893_v10 = vld [vmem:[#allocation7 + $0x4b0] sm:$0xff] }
 0x45d   :  { %v16757_v28 = vcombine.low %v893_v10, %v901_v11 }
 0x45e   :  { %7962 = vmatpush1.bf16.msra.mxu0 %v16661_v34  ;;  %v16743_v34 = vcombine.low %v878_v58, %v886_v4  ;;  %v966_v58 = vld [vmem:[#allocation7 + $0x6f8] sm:$0xff] }
 0x45f   :  { %8126 = vmatpush1.bf16.msra.mxu1 %v16663_v20  ;;  %7963 = vmatprep.subr.bf16.mxu0 %v16678_v14  ;;  %v16758_v20 = vcombine.high %v893_v10, %v901_v11  ;;  %v16760_v14 = vcombine.high %v894_v13, %v902_v19  ;;  %v981_v10 = vld [vmem:[#allocation7 + $0x770] sm:$0xff]  ;;  %v974_v11 = vld [vmem:[#allocation7 + $0x738] sm:$0xff] }
 0x460   :  { %8127 = vmatprep.subr.bf16.mxu1 %v16680_v22  ;;  %v909_v22 = vld [vmem:[#allocation7 + $0x530] sm:$0xff] }
 0x461   :  { %v16773_v45 = vcombine.low %v909_v22, %v917_v23 }
 0x462   :  { %7964 = vmatpush1.bf16.msra.mxu0 %v16677_v30  ;;  %v16759_v30 = vcombine.low %v894_v13, %v902_v19  ;;  %v982_v13 = vld [vmem:[#allocation7 + $0x778] sm:$0xff] }
 0x463   :  { %8128 = vmatpush1.bf16.msra.mxu1 %v16679_v32  ;;  %7965 = vmatprep.subr.bf16.mxu0 %v16694_v33  ;;  %v16774_v32 = vcombine.high %v909_v22, %v917_v23  ;;  %v16776_v33 = vcombine.high %v910_v24, %v918_v25  ;;  %v997_v22 = vld [vmem:[#allocation7 + $0x7f0] sm:$0xff]  ;;  %v990_v23 = vld [vmem:[#allocation7 + $0x7b8] sm:$0xff] }
 0x464   :  { %8129 = vmatprep.subr.bf16.mxu1 %v16696_v39  ;;  %v925_v39 = vld [vmem:[#allocation7 + $0x5b0] sm:$0xff] }
 0x465   :  { %v16789_v57 = vcombine.low %v925_v39, %v933_v40 }
 0x466   :  { %7966 = vmatpush1.bf16.msra.mxu0 %v16693_v48  ;;  %v16775_v48 = vcombine.low %v910_v24, %v918_v25  ;;  %v998_v24 = vld [vmem:[#allocation7 + $0x7f8] sm:$0xff] }
 0x467   :  { %8130 = vmatpush1.bf16.msra.mxu1 %v16695_v53  ;;  %7967 = vmatprep.subr.bf16.mxu0 %v16710_v49  ;;  %v16790_v53 = vcombine.high %v925_v39, %v933_v40  ;;  %v16792_v49 = vcombine.high %v926_v43, %v934_v0  ;;  %v1013_v39 = vld [vmem:[#allocation7 + $0x870] sm:$0xff]  ;;  %v1006_v40 = vld [vmem:[#allocation7 + $0x838] sm:$0xff] }
 0x468   :  { %8131 = vmatprep.subr.bf16.mxu1 %v16712_v55  ;;  %v941_v55 = vld [vmem:[#allocation7 + $0x630] sm:$0xff] }
 0x469   :  { %v16805_v4 = vcombine.low %v941_v55, %v949_v16 }
 0x46a   :  { %7968 = vmatpush1.bf16.msra.mxu0 %v16709_v59  ;;  %v16791_v59 = vcombine.low %v926_v43, %v934_v0  ;;  %v1014_v43 = vld [vmem:[#allocation7 + $0x878] sm:$0xff] }
 0x46b   :  { %8132 = vmatpush1.bf16.msra.mxu1 %v16711_v60  ;;  %7969 = vmatprep.subr.bf16.mxu0 %v16726_v61  ;;  %v16806_v60 = vcombine.high %v941_v55, %v949_v16  ;;  %v16808_v61 = vcombine.high %v942_v56, %v950_v41  ;;  %v1029_v55 = vld [vmem:[#allocation7 + $0x8f0] sm:$0xff] }
 0x46c   :  { %8133 = vmatprep.subr.bf16.mxu1 %v16728_v62  ;;  %v957_v62 = vld [vmem:[#allocation7 + $0x6b0] sm:$0xff] }
 0x46d   :  { %v16821_v19 = vcombine.low %v957_v62, %v965_v63 }
 0x46e   :  { %7970 = vmatpush1.bf16.msra.mxu0 %v16725_v5  ;;  %v16807_v5 = vcombine.low %v942_v56, %v950_v41  ;;  %v1022_v56 = vld [vmem:[#allocation7 + $0x8b8] sm:$0xff] }
 0x46f   :  { %8134 = vmatpush1.bf16.msra.mxu1 %v16727_v7  ;;  %7971 = vmatprep.subr.bf16.mxu0 %v16742_v35  ;;  %v16822_v7 = vcombine.high %v957_v62, %v965_v63  ;;  %v16824_v35 = vcombine.high %v958_v2, %v966_v58  ;;  %v1030_v41 = vld [vmem:[#allocation7 + $0x8f8] sm:$0xff] }
 0x470   :  { %8135 = vmatprep.subr.bf16.mxu1 %v16744_v8  ;;  %v973_v8 = vld [vmem:[#allocation7 + $0x730] sm:$0xff]  ;;  %v16888_v62 = vcombine.high %v1022_v56, %v1030_v41  ;;  %v1038_v63 = vld [vmem:[#allocation7 + $0x938] sm:$0xff] }
 0x471   :  { %v16837_v25 = vcombine.low %v973_v8, %v981_v10 }
 0x472   :  { %7972 = vmatpush1.bf16.msra.mxu0 %v16741_v6  ;;  %v16823_v6 = vcombine.low %v958_v2, %v966_v58  ;;  %v1046_v2 = vld [vmem:[#allocation7 + $0x978] sm:$0xff] }
 0x473   :  { %8136 = vmatpush1.bf16.msra.mxu1 %v16743_v34  ;;  %7973 = vmatprep.subr.bf16.mxu0 %v16758_v20  ;;  %v16838_v34 = vcombine.high %v973_v8, %v981_v10  ;;  %v16840_v20 = vcombine.high %v974_v11, %v982_v13  ;;  %v1061_v8 = vld [vmem:[#allocation7 + $0x9f0] sm:$0xff]  ;;  %v1054_v10 = vld [vmem:[#allocation7 + $0x9b8] sm:$0xff] }
 0x474   :  { %8137 = vmatprep.subr.bf16.mxu1 %v16760_v14  ;;  %v989_v14 = vld [vmem:[#allocation7 + $0x7b0] sm:$0xff] }
 0x475   :  { %v16853_v0 = vcombine.low %v989_v14, %v997_v22 }
 0x476   :  { %7974 = vmatpush1.bf16.msra.mxu0 %v16757_v28  ;;  %v16839_v28 = vcombine.low %v974_v11, %v982_v13  ;;  %v1062_v11 = vld [vmem:[#allocation7 + $0x9f8] sm:$0xff] }
 0x477   :  { %8138 = vmatpush1.bf16.msra.mxu1 %v16759_v30  ;;  %7975 = vmatprep.subr.bf16.mxu0 %v16774_v32  ;;  %v16854_v30 = vcombine.high %v989_v14, %v997_v22  ;;  %v16856_v32 = vcombine.high %v990_v23, %v998_v24  ;;  %v1070_v14 = vld [vmem:[#allocation7 + $0xa38] sm:$0xff] }
 0x478   :  { %8139 = vmatprep.subr.bf16.mxu1 %v16776_v33  ;;  %v1005_v33 = vld [vmem:[#allocation7 + $0x830] sm:$0xff]  ;;  %v1078_v22 = vld [vmem:[#allocation7 + $0xa78] sm:$0xff] }
 0x479   :  { %v16869_v16 = vcombine.low %v1005_v33, %v1013_v39 }
 0x47a   :  { %7976 = vmatpush1.bf16.msra.mxu0 %v16773_v45  ;;  %v16855_v45 = vcombine.low %v990_v23, %v998_v24  ;;  %v16919_v23 = vcombine.low %v1054_v10, %v1062_v11 }
 0x47b   :  { %8140 = vmatpush1.bf16.msra.mxu1 %v16775_v48  ;;  %7977 = vmatprep.subr.bf16.mxu0 %v16790_v53  ;;  %v16870_v48 = vcombine.high %v1005_v33, %v1013_v39  ;;  %v16872_v53 = vcombine.high %v1006_v40, %v1014_v43  ;;  %v1094_v33 = vld [vmem:[#allocation7 + $0xaf8] sm:$0xff] }
 0x47c   :  { %8141 = vmatprep.subr.bf16.mxu1 %v16792_v49  ;;  %v1021_v49 = vld [vmem:[#allocation7 + $0x8b0] sm:$0xff] }
 0x47d   :  { %v16885_v58 = vcombine.low %v1021_v49, %v1029_v55 }
 0x47e   :  { %7978 = vmatpush1.bf16.msra.mxu0 %v16789_v57  ;;  %v16871_v57 = vcombine.low %v1006_v40, %v1014_v43  ;;  %v16935_v40 = vcombine.low %v1070_v14, %v1078_v22 }
 0x47f   :  { %8142 = vmatpush1.bf16.msra.mxu1 %v16791_v59  ;;  %7979 = vmatprep.subr.bf16.mxu0 %v16806_v60  ;;  %v16886_v59 = vcombine.high %v1021_v49, %v1029_v55  ;;  %v1037_v60 = vld [vmem:[#allocation7 + $0x930] sm:$0xff]  ;;  %v1110_v49 = vld [vmem:[#allocation7 + $0xb78] sm:$0xff] }
 0x480   :  { %8143 = vmatprep.subr.bf16.mxu1 %v16808_v61  ;;  %v1045_v61 = vld [vmem:[#allocation7 + $0x970] sm:$0xff] }
 0x481   :  { %v16901_v13 = vcombine.low %v1037_v60, %v1045_v61 }
 0x482   :  { %7980 = vmatpush1.bf16.msra.mxu0 %v16805_v4  ;;  %v16887_v4 = vcombine.low %v1022_v56, %v1030_v41 }
 0x483   :  { %8144 = vmatpush1.bf16.msra.mxu1 %v16807_v5  ;;  %7981 = vmatprep.subr.bf16.mxu0 %v16822_v7  ;;  %v16902_v5 = vcombine.high %v1037_v60, %v1045_v61  ;;  %v16904_v7 = vcombine.high %v1038_v63, %v1046_v2  ;;  %v1118_v60 = vld [vmem:[#allocation7 + $0xbb8] sm:$0xff] }
 0x484   :  { %8145 = vmatprep.subr.bf16.mxu1 %v16824_v35  ;;  %v1053_v35 = vld [vmem:[#allocation7 + $0x9b0] sm:$0xff]  ;;  %v1126_v61 = vld [vmem:[#allocation7 + $0xbf8] sm:$0xff] }
 0x486   :  { %7982 = vmatpush1.bf16.msra.mxu0 %v16821_v19  ;;  %v16918_v19 = vcombine.high %v1053_v35, %v1061_v8 }
 0x487   :  { %8146 = vmatpush1.bf16.msra.mxu1 %v16823_v6  ;;  %7983 = vmatprep.subr.bf16.mxu0 %v16838_v34  ;;  %v16920_v6 = vcombine.high %v1054_v10, %v1062_v11  ;;  %v1069_v34 = vld [vmem:[#allocation7 + $0xa30] sm:$0xff]  ;;  %v16983_v10 = vcombine.low %v1118_v60, %v1126_v61 }
 0x488   :  { %8147 = vmatprep.subr.bf16.mxu1 %v16840_v20  ;;  %v1077_v20 = vld [vmem:[#allocation7 + $0xa70] sm:$0xff] }
 0x489   :  { %v16934_v24 = vcombine.high %v1069_v34, %v1077_v20  ;;  %v16933_v39 = vcombine.low %v1069_v34, %v1077_v20  ;;  %v1158_v34 = vld [vmem:[#allocation7 + $0xcf8] sm:$0xff] }
 0x48a   :  { %7984 = vmatpush1.bf16.msra.mxu0 %v16837_v25  ;;  %v16936_v25 = vcombine.high %v1070_v14, %v1078_v22 }
 0x48b   :  { %8148 = vmatpush1.bf16.msra.mxu1 %v16839_v28  ;;  %7985 = vmatprep.subr.bf16.mxu0 %v16854_v30  ;;  %v1085_v28 = vld [vmem:[#allocation7 + $0xab0] sm:$0xff] }
 0x48c   :  { %8149 = vmatprep.subr.bf16.mxu1 %v16856_v32  ;;  %v1093_v30 = vld [vmem:[#allocation7 + $0xaf0] sm:$0xff]  ;;  %v1086_v32 = vld [vmem:[#allocation7 + $0xab8] sm:$0xff] }
 0x48d   :  { %v16950_v43 = vcombine.high %v1085_v28, %v1093_v30  ;;  %v16949_v55 = vcombine.low %v1085_v28, %v1093_v30  ;;  %v1174_v28 = vld [vmem:[#allocation7 + $0xd78] sm:$0xff] }
 0x48e   :  { %7986 = vmatpush1.bf16.msra.mxu0 %v16853_v0  ;;  %v16952_v0 = vcombine.high %v1086_v32, %v1094_v33 }
 0x48f   :  { %8150 = vmatpush1.bf16.msra.mxu1 %v16855_v45  ;;  %7996 = vmatprep.subr.bf16.mxu0 %v16870_v48  ;;  %v1101_v45 = vld [vmem:[#allocation7 + $0xb30] sm:$0xff] }
 0x490   :  { %8160 = vmatprep.subr.bf16.mxu1 %v16872_v53  ;;  %v1109_v48 = vld [vmem:[#allocation7 + $0xb70] sm:$0xff]  ;;  %v1102_v53 = vld [vmem:[#allocation7 + $0xb38] sm:$0xff] }
 0x491   :  { %7988 = vmatmul.mubr.bf16.vlgmr.msra.gmra.mrb[20].mxu0 %v19543_v36  ;;  %v16966_v56 = vcombine.high %v1101_v45, %v1109_v48  ;;  %v16968_v41 = vcombine.high %v1102_v53, %v1110_v49 }
 0x492   :  { %8152 = vmatmul.mubr.bf16.vlgmr.msra.gmra.mrb[20].mxu1 %v19543_v36  ;;  %7997 = vmatpush1.bf16.msra.mxu0 %v16869_v16  ;;  %v16903_v36 = vcombine.low %v1038_v63, %v1046_v2  ;;  %v16951_v16 = vcombine.low %v1086_v32, %v1094_v33  ;;  %v16967_v63 = vcombine.low %v1102_v53, %v1110_v49 }
 0x493   :  { %8028 = vmatprep.mubr.bf16.mxu0 %v19549_v54  ;;  %8161 = vmatpush1.bf16.msra.mxu1 %v16871_v57  ;;  %v1117_v57 = vld [vmem:[#allocation7 + $0xbb0] sm:$0xff] }
 0x494   :  { %8192 = vmatprep.mubr.bf16.mxu1 %v19549_v54  ;;  %7998 = vmatprep.subr.bf16.mxu0 %v16886_v59  ;;  %v16917_v54 = vcombine.low %v1053_v35, %v1061_v8  ;;  %v1125_v59 = vld [vmem:[#allocation7 + $0xbf0] sm:$0xff]  ;;  %v1142_v35 = vld [vmem:[#allocation7 + $0xc78] sm:$0xff] }
 0x495   :  { %8162 = vmatprep.subr.bf16.mxu1 %v16888_v62  ;;  %v16965_v62 = vcombine.low %v1101_v45, %v1109_v48  ;;  %v16982_v2 = vcombine.high %v1117_v57, %v1125_v59  ;;  %v16981_v8 = vcombine.low %v1117_v57, %v1125_v59  ;;  %v1190_v45 = vld [vmem:[#allocation7 + $0xdf8] sm:$0xff] }
 0x496   :  { %7999 = vmatpush1.bf16.msra.mxu0 %v16885_v58  ;;  %v16984_v58 = vcombine.high %v1118_v60, %v1126_v61  ;;  %v1206_v57 = vld [vmem:[#allocation7 + $0xe78] sm:$0xff] }
 0x497   :  { %8163 = vmatpush1.bf16.msra.mxu1 %v16887_v4  ;;  %8000 = vmatprep.subr.bf16.mxu0 %v16902_v5  ;;  %v1133_v4 = vld [vmem:[#allocation7 + $0xc30] sm:$0xff] }
 0x498   :  { %8164 = vmatprep.subr.bf16.mxu1 %v16904_v7  ;;  %v1141_v5 = vld [vmem:[#allocation7 + $0xc70] sm:$0xff]  ;;  %v1134_v7 = vld [vmem:[#allocation7 + $0xc38] sm:$0xff] }
 0x499   :  { %v16998_v11 = vcombine.high %v1133_v4, %v1141_v5  ;;  %v16997_v20 = vcombine.low %v1133_v4, %v1141_v5  ;;  %v16999_v14 = vcombine.low %v1134_v7, %v1142_v35  ;;  %v1222_v4 = vld [vmem:[#allocation7 + $0xef8] sm:$0xff] }
 0x49a   :  { %8001 = vmatpush1.bf16.msra.mxu0 %v16901_v13  ;;  %v17000_v13 = vcombine.high %v1134_v7, %v1142_v35 }
 0x49b   :  { %8165 = vmatpush1.bf16.msra.mxu1 %v16903_v36  ;;  %8002 = vmatprep.subr.bf16.mxu0 %v16918_v19  ;;  %v1149_v36 = vld [vmem:[#allocation7 + $0xcb0] sm:$0xff] }
 0x49c   :  { %8166 = vmatprep.subr.bf16.mxu1 %v16920_v6  ;;  %v1157_v19 = vld [vmem:[#allocation7 + $0xcf0] sm:$0xff]  ;;  %v1150_v6 = vld [vmem:[#allocation7 + $0xcb8] sm:$0xff] }
 0x49d   :  { %v17014_v22 = vcombine.high %v1149_v36, %v1157_v19  ;;  %v17013_v30 = vcombine.low %v1149_v36, %v1157_v19  ;;  %v17015_v32 = vcombine.low %v1150_v6, %v1158_v34  ;;  %v1238_v36 = vld [vmem:[#allocation7 + $0xf78] sm:$0xff] }
 0x49e   :  { %8003 = vmatpush1.bf16.msra.mxu0 %v16917_v54  ;;  %v17016_v54 = vcombine.high %v1150_v6, %v1158_v34 }
 0x49f   :  { %8167 = vmatpush1.bf16.msra.mxu1 %v16919_v23  ;;  %8004 = vmatprep.subr.bf16.mxu0 %v16934_v24  ;;  %v1165_v23 = vld [vmem:[#allocation7 + $0xd30] sm:$0xff] }
 0x4a0   :  { %8168 = vmatprep.subr.bf16.mxu1 %v16936_v25  ;;  %v1173_v24 = vld [vmem:[#allocation7 + $0xd70] sm:$0xff]  ;;  %v1166_v25 = vld [vmem:[#allocation7 + $0xd38] sm:$0xff] }
 0x4a1   :  { %v17030_v33 = vcombine.high %v1165_v23, %v1173_v24  ;;  %v17029_v48 = vcombine.low %v1165_v23, %v1173_v24  ;;  %v17031_v53 = vcombine.low %v1166_v25, %v1174_v28  ;;  %v1254_v23 = vld [vmem:[#allocation7 + $0xff8] sm:$0xff] }
 0x4a2   :  { %8005 = vmatpush1.bf16.msra.mxu0 %v16933_v39  ;;  %v17032_v39 = vcombine.high %v1166_v25, %v1174_v28 }
 0x4a3   :  { %8169 = vmatpush1.bf16.msra.mxu1 %v16935_v40  ;;  %8006 = vmatprep.subr.bf16.mxu0 %v16950_v43  ;;  %v1181_v40 = vld [vmem:[#allocation7 + $0xdb0] sm:$0xff] }
 0x4a4   :  { %8170 = vmatprep.subr.bf16.mxu1 %v16952_v0  ;;  %v1189_v43 = vld [vmem:[#allocation7 + $0xdf0] sm:$0xff]  ;;  %v1182_v0 = vld [vmem:[#allocation7 + $0xdb8] sm:$0xff] }
 0x4a5   :  { %v17046_v49 = vcombine.high %v1181_v40, %v1189_v43  ;;  %v17045_v59 = vcombine.low %v1181_v40, %v1189_v43  ;;  %v17047_v60 = vcombine.low %v1182_v0, %v1190_v45  ;;  %v1270_v40 = vld [vmem:[#allocation7 + $0x1078] sm:$0xff] }
 0x4a6   :  { %8007 = vmatpush1.bf16.msra.mxu0 %v16949_v55  ;;  %v17048_v55 = vcombine.high %v1182_v0, %v1190_v45 }
 0x4a7   :  { %8171 = vmatpush1.bf16.msra.mxu1 %v16951_v16  ;;  %8008 = vmatprep.subr.bf16.mxu0 %v16966_v56  ;;  %v1197_v16 = vld [vmem:[#allocation7 + $0xe30] sm:$0xff] }
 0x4a8   :  { %8172 = vmatprep.subr.bf16.mxu1 %v16968_v41  ;;  %v1205_v56 = vld [vmem:[#allocation7 + $0xe70] sm:$0xff]  ;;  %v1198_v41 = vld [vmem:[#allocation7 + $0xe38] sm:$0xff] }
 0x4a9   :  { %v17062_v61 = vcombine.high %v1197_v16, %v1205_v56  ;;  %v17061_v5 = vcombine.low %v1197_v16, %v1205_v56  ;;  %v17063_v7 = vcombine.low %v1198_v41, %v1206_v57  ;;  %v1278_v16 = vld [vmem:[#allocation7 + $0x10b8] sm:$0xff] }
 0x4aa   :  { %8009 = vmatpush1.bf16.msra.mxu0 %v16965_v62  ;;  %v17064_v62 = vcombine.high %v1198_v41, %v1206_v57  ;;  %v1286_v56 = vld [vmem:[#allocation7 + $0x10f8] sm:$0xff] }
 0x4ab   :  { %8173 = vmatpush1.bf16.msra.mxu1 %v16967_v63  ;;  %8010 = vmatprep.subr.bf16.mxu0 %v16982_v2  ;;  %v1213_v63 = vld [vmem:[#allocation7 + $0xeb0] sm:$0xff] }
 0x4ac   :  { %8174 = vmatprep.subr.bf16.mxu1 %v16984_v58  ;;  %v1221_v2 = vld [vmem:[#allocation7 + $0xef0] sm:$0xff]  ;;  %v1214_v58 = vld [vmem:[#allocation7 + $0xeb8] sm:$0xff] }
 0x4ad   :  { %v17078_v35 = vcombine.high %v1213_v63, %v1221_v2  ;;  %v17077_v19 = vcombine.low %v1213_v63, %v1221_v2  ;;  %v17079_v6 = vcombine.low %v1214_v58, %v1222_v4  ;;  %v1302_v63 = vld [vmem:[#allocation7 + $0x1178] sm:$0xff] }
 0x4ae   :  { %8011 = vmatpush1.bf16.msra.mxu0 %v16981_v8  ;;  %v17080_v8 = vcombine.high %v1214_v58, %v1222_v4  ;;  %v17143_v58 = vcombine.low %v1278_v16, %v1286_v56 }
 0x4af   :  { %8175 = vmatpush1.bf16.msra.mxu1 %v16983_v10  ;;  %8012 = vmatprep.subr.bf16.mxu0 %v16998_v11  ;;  %v1229_v10 = vld [vmem:[#allocation7 + $0xf30] sm:$0xff] }
 0x4b0   :  { %8176 = vmatprep.subr.bf16.mxu1 %v17000_v13  ;;  %v1237_v11 = vld [vmem:[#allocation7 + $0xf70] sm:$0xff]  ;;  %v1230_v13 = vld [vmem:[#allocation7 + $0xf38] sm:$0xff] }
 0x4b1   :  { %v17094_v34 = vcombine.high %v1229_v10, %v1237_v11  ;;  %v17093_v24 = vcombine.low %v1229_v10, %v1237_v11  ;;  %v17095_v25 = vcombine.low %v1230_v13, %v1238_v36  ;;  %v1318_v10 = vld [vmem:[#allocation7 + $0x11f8] sm:$0xff] }
 0x4b2   :  { %8013 = vmatpush1.bf16.msra.mxu0 %v16997_v20  ;;  %v17096_v20 = vcombine.high %v1230_v13, %v1238_v36 }
 0x4b3   :  { %8177 = vmatpush1.bf16.msra.mxu1 %v16999_v14  ;;  %8014 = vmatprep.subr.bf16.mxu0 %v17014_v22  ;;  %v1245_v14 = vld [vmem:[#allocation7 + $0xfb0] sm:$0xff] }
 0x4b4   :  { %8178 = vmatprep.subr.bf16.mxu1 %v17016_v54  ;;  %v1253_v22 = vld [vmem:[#allocation7 + $0xff0] sm:$0xff]  ;;  %v1246_v54 = vld [vmem:[#allocation7 + $0xfb8] sm:$0xff] }
 0x4b5   :  { %v17110_v28 = vcombine.high %v1245_v14, %v1253_v22  ;;  %v17109_v43 = vcombine.low %v1245_v14, %v1253_v22  ;;  %v17111_v0 = vcombine.low %v1246_v54, %v1254_v23 }
 0x4b6   :  { %8015 = vmatpush1.bf16.msra.mxu0 %v17013_v30  ;;  %v17112_v30 = vcombine.high %v1246_v54, %v1254_v23  ;;  %v1341_v23 = vld [vmem:[#allocation7 + $0x12b0] sm:$0xff] }
 0x4b7   :  { %8179 = vmatpush1.bf16.msra.mxu1 %v17015_v32  ;;  %8016 = vmatprep.subr.bf16.mxu0 %v17030_v33  ;;  %v1261_v32 = vld [vmem:[#allocation7 + $0x1030] sm:$0xff] }
 0x4b8   :  { %8180 = vmatprep.subr.bf16.mxu1 %v17032_v39  ;;  %v1269_v33 = vld [vmem:[#allocation7 + $0x1070] sm:$0xff]  ;;  %v1262_v39 = vld [vmem:[#allocation7 + $0x1038] sm:$0xff] }
 0x4b9   :  { %v17126_v45 = vcombine.high %v1261_v32, %v1269_v33  ;;  %v17127_v41 = vcombine.low %v1262_v39, %v1270_v40 }
 0x4ba   :  { %8017 = vmatpush1.bf16.msra.mxu0 %v17029_v48  ;;  %v17128_v48 = vcombine.high %v1262_v39, %v1270_v40  ;;  %v1357_v40 = vld [vmem:[#allocation7 + $0x1330] sm:$0xff] }
 0x4bb   :  { %8181 = vmatpush1.bf16.msra.mxu1 %v17031_v53  ;;  %8018 = vmatprep.subr.bf16.mxu0 %v17046_v49  ;;  %v1277_v53 = vld [vmem:[#allocation7 + $0x10b0] sm:$0xff] }
 0x4bc   :  { %8182 = vmatprep.subr.bf16.mxu1 %v17048_v55  ;;  %v1285_v49 = vld [vmem:[#allocation7 + $0x10f0] sm:$0xff]  ;;  %v17125_v55 = vcombine.low %v1261_v32, %v1269_v33 }
 0x4bd   :  { %v17142_v57 = vcombine.high %v1277_v53, %v1285_v49  ;;  %v17141_v2 = vcombine.low %v1277_v53, %v1285_v49 }
 0x4be   :  { %8019 = vmatpush1.bf16.msra.mxu0 %v17045_v59  ;;  %v1293_v59 = vld [vmem:[#allocation7 + $0x1130] sm:$0xff] }
 0x4bf   :  { %8183 = vmatpush1.bf16.msra.mxu1 %v17047_v60  ;;  %8020 = vmatprep.subr.bf16.mxu0 %v17062_v61  ;;  %v1301_v60 = vld [vmem:[#allocation7 + $0x1170] sm:$0xff]  ;;  %v17144_v61 = vcombine.high %v1278_v16, %v1286_v56 }
 0x4c0   :  { %8184 = vmatprep.subr.bf16.mxu1 %v17064_v62  ;;  %v1294_v62 = vld [vmem:[#allocation7 + $0x1138] sm:$0xff]  ;;  %v17158_v4 = vcombine.high %v1293_v59, %v1301_v60  ;;  %v17157_v11 = vcombine.low %v1293_v59, %v1301_v60  ;;  %v1373_v16 = vld [vmem:[#allocation7 + $0x13b0] sm:$0xff] }
 0x4c1   :  { %v1381_v56 = vld [vmem:[#allocation7 + $0x13f0] sm:$0xff] }
 0x4c2   :  { %8021 = vmatpush1.bf16.msra.mxu0 %v17061_v5  ;;  %v17160_v5 = vcombine.high %v1294_v62, %v1302_v63 }
 0x4c3   :  { %8185 = vmatpush1.bf16.msra.mxu1 %v17063_v7  ;;  %8022 = vmatprep.subr.bf16.mxu0 %v17078_v35  ;;  %v1309_v7 = vld [vmem:[#allocation7 + $0x11b0] sm:$0xff] }
 0x4c4   :  { %8186 = vmatprep.subr.bf16.mxu1 %v17080_v8  ;;  %v1317_v35 = vld [vmem:[#allocation7 + $0x11f0] sm:$0xff]  ;;  %v1310_v8 = vld [vmem:[#allocation7 + $0x11b8] sm:$0xff] }
 0x4c5   :  { %v17174_v13 = vcombine.high %v1309_v7, %v1317_v35  ;;  %v17176_v36 = vcombine.high %v1310_v8, %v1318_v10  ;;  %v17175_v14 = vcombine.low %v1310_v8, %v1318_v10  ;;  %v1405_v10 = vld [vmem:[#allocation7 + $0x14b0] sm:$0xff] }
 0x4c6   :  { %8023 = vmatpush1.bf16.msra.mxu0 %v17077_v19  ;;  %v1325_v19 = vld [vmem:[#allocation7 + $0x1230] sm:$0xff] }
 0x4c7   :  { %8187 = vmatpush1.bf16.msra.mxu1 %v17079_v6  ;;  %8024 = vmatprep.subr.bf16.mxu0 %v17094_v34  ;;  %v1333_v6 = vld [vmem:[#allocation7 + $0x1270] sm:$0xff]  ;;  %v1326_v34 = vld [vmem:[#allocation7 + $0x1238] sm:$0xff] }
 0x4c8   :  { %8188 = vmatprep.subr.bf16.mxu1 %v17096_v20  ;;  %v1334_v20 = vld [vmem:[#allocation7 + $0x1278] sm:$0xff]  ;;  %v17190_v22 = vcombine.high %v1325_v19, %v1333_v6 }
 0x4c9   :  { %v17192_v54 = vcombine.high %v1326_v34, %v1334_v20  ;;  %v17191_v32 = vcombine.low %v1326_v34, %v1334_v20  ;;  %v1421_v20 = vld [vmem:[#allocation7 + $0x1530] sm:$0xff] }
 0x4ca   :  { %8025 = vmatpush1.bf16.msra.mxu0 %v17093_v24  ;;  %v1349_v24 = vld [vmem:[#allocation7 + $0x12f0] sm:$0xff] }
 0x4cb   :  { %8189 = vmatpush1.bf16.msra.mxu1 %v17095_v25  ;;  %8026 = vmatprep.subr.bf16.mxu0 %v17110_v28  ;;  %v1342_v25 = vld [vmem:[#allocation7 + $0x12b8] sm:$0xff]  ;;  %v17206_v33 = vcombine.high %v1341_v23, %v1349_v24 }
 0x4cc   :  { %8190 = vmatprep.subr.bf16.mxu1 %v17112_v30  ;;  %v1350_v28 = vld [vmem:[#allocation7 + $0x12f8] sm:$0xff]  ;;  %v17189_v30 = vcombine.low %v1325_v19, %v1333_v6 }
 0x4cd   :  { %v17208_v39 = vcombine.high %v1342_v25, %v1350_v28  ;;  %v17207_v53 = vcombine.low %v1342_v25, %v1350_v28  ;;  %v1437_v28 = vld [vmem:[#allocation7 + $0x15b0] sm:$0xff] }
 0x4ce   :  { %8027 = vmatpush1.bf16.msra.mxu0 %v17109_v43  ;;  %v1365_v43 = vld [vmem:[#allocation7 + $0x1370] sm:$0xff] }
 0x4cf   :  { %8191 = vmatpush1.bf16.msra.mxu1 %v17111_v0  ;;  %8037 = vmatprep.subr.bf16.mxu0 %v17126_v45  ;;  %v1358_v0 = vld [vmem:[#allocation7 + $0x1338] sm:$0xff]  ;;  %v17222_v49 = vcombine.high %v1357_v40, %v1365_v43  ;;  %v17221_v59 = vcombine.low %v1357_v40, %v1365_v43 }
 0x4d0   :  { %8201 = vmatprep.subr.bf16.mxu1 %v17128_v48  ;;  %v1366_v45 = vld [vmem:[#allocation7 + $0x1378] sm:$0xff]  ;;  %v17205_v48 = vcombine.low %v1341_v23, %v1349_v24 }
 0x4d1   :  { %8029 = vmatmul.mubr.bf16.vlgmr.msra.gmra.mrb[20].mxu0 %v19573_v18  ;;  %v17223_v60 = vcombine.low %v1358_v0, %v1366_v45 }
 0x4d2   :  { %8193 = vmatmul.mubr.bf16.vlgmr.msra.gmra.mrb[20].mxu1 %v19573_v18  ;;  %8038 = vmatpush1.bf16.msra.mxu0 %v17125_v55  ;;  %v17159_v18 = vcombine.low %v1294_v62, %v1302_v63  ;;  %v17224_v55 = vcombine.high %v1358_v0, %v1366_v45  ;;  %v1389_v63 = vld [vmem:[#allocation7 + $0x1430] sm:$0xff] }
 0x4d3   :  { %8069 = vmatprep.mubr.bf16.mxu0 %v19575_v27  ;;  %8202 = vmatpush1.bf16.msra.mxu1 %v17127_v41  ;;  %v1374_v41 = vld [vmem:[#allocation7 + $0x13b8] sm:$0xff]  ;;  %v1453_v45 = vld [vmem:[#allocation7 + $0x1630] sm:$0xff] }
 0x4d4   :  { %8233 = vmatprep.mubr.bf16.mxu1 %v19575_v27  ;;  %8039 = vmatprep.subr.bf16.mxu0 %v17142_v57  ;;  %v17173_v27 = vcombine.low %v1309_v7, %v1317_v35  ;;  %v1382_v57 = vld [vmem:[#allocation7 + $0x13f8] sm:$0xff] }
 0x4d5   :  { %8203 = vmatprep.subr.bf16.mxu1 %v17144_v61  ;;  %v17238_v61 = vcombine.high %v1373_v16, %v1381_v56  ;;  %v17240_v62 = vcombine.high %v1374_v41, %v1382_v57  ;;  %v17239_v7 = vcombine.low %v1374_v41, %v1382_v57  ;;  %v1469_v57 = vld [vmem:[#allocation7 + $0x16b0] sm:$0xff] }
 0x4d6   :  { %8040 = vmatpush1.bf16.msra.mxu0 %v17141_v2  ;;  %v1397_v2 = vld [vmem:[#allocation7 + $0x1470] sm:$0xff] }
 0x4d7   :  { %8204 = vmatpush1.bf16.msra.mxu1 %v17143_v58  ;;  %8041 = vmatprep.subr.bf16.mxu0 %v17158_v4  ;;  %v1390_v58 = vld [vmem:[#allocation7 + $0x1438] sm:$0xff]  ;;  %v17254_v35 = vcombine.high %v1389_v63, %v1397_v2 }
 0x4d8   :  { %8205 = vmatprep.subr.bf16.mxu1 %v17160_v5  ;;  %v1398_v4 = vld [vmem:[#allocation7 + $0x1478] sm:$0xff]  ;;  %v17237_v5 = vcombine.low %v1373_v16, %v1381_v56 }
 0x4d9   :  { %v17256_v8 = vcombine.high %v1390_v58, %v1398_v4  ;;  %v17255_v19 = vcombine.low %v1390_v58, %v1398_v4  ;;  %v1485_v4 = vld [vmem:[#allocation7 + $0x1730] sm:$0xff] }
 0x4da   :  { %8042 = vmatpush1.bf16.msra.mxu0 %v17157_v11  ;;  %v1413_v11 = vld [vmem:[#allocation7 + $0x14f0] sm:$0xff] }
 0x4db   :  { %8206 = vmatpush1.bf16.msra.mxu1 %v17159_v18  ;;  %8043 = vmatprep.subr.bf16.mxu0 %v17174_v13  ;;  %v1406_v18 = vld [vmem:[#allocation7 + $0x14b8] sm:$0xff]  ;;  %v17270_v6 = vcombine.high %v1405_v10, %v1413_v11 }
 0x4dc   :  { %8207 = vmatprep.subr.bf16.mxu1 %v17176_v36  ;;  %v1414_v13 = vld [vmem:[#allocation7 + $0x14f8] sm:$0xff]  ;;  %v17253_v36 = vcombine.low %v1389_v63, %v1397_v2 }
 0x4dd   :  { %v17272_v34 = vcombine.high %v1406_v18, %v1414_v13  ;;  %v17271_v23 = vcombine.low %v1406_v18, %v1414_v13  ;;  %v1501_v13 = vld [vmem:[#allocation7 + $0x17b0] sm:$0xff] }
 0x4de   :  { %8044 = vmatpush1.bf16.msra.mxu0 %v17173_v27  ;;  %v1429_v27 = vld [vmem:[#allocation7 + $0x1570] sm:$0xff] }
 0x4df   :  { %8208 = vmatpush1.bf16.msra.mxu1 %v17175_v14  ;;  %8045 = vmatprep.subr.bf16.mxu0 %v17190_v22  ;;  %v1422_v14 = vld [vmem:[#allocation7 + $0x1538] sm:$0xff]  ;;  %v17286_v24 = vcombine.high %v1421_v20, %v1429_v27 }
 0x4e0   :  { %8209 = vmatprep.subr.bf16.mxu1 %v17192_v54  ;;  %v1430_v22 = vld [vmem:[#allocation7 + $0x1578] sm:$0xff]  ;;  %v17269_v54 = vcombine.low %v1405_v10, %v1413_v11 }
 0x4e1   :  { %v17288_v25 = vcombine.high %v1422_v14, %v1430_v22  ;;  %v17287_v40 = vcombine.low %v1422_v14, %v1430_v22  ;;  %v1517_v22 = vld [vmem:[#allocation7 + $0x1830] sm:$0xff] }
 0x4e2   :  { %8046 = vmatpush1.bf16.msra.mxu0 %v17189_v30  ;;  %v1445_v30 = vld [vmem:[#allocation7 + $0x15f0] sm:$0xff] }
 0x4e3   :  { %8210 = vmatpush1.bf16.msra.mxu1 %v17191_v32  ;;  %8047 = vmatprep.subr.bf16.mxu0 %v17206_v33  ;;  %v1438_v32 = vld [vmem:[#allocation7 + $0x15b8] sm:$0xff]  ;;  %v17302_v43 = vcombine.high %v1437_v28, %v1445_v30 }
 0x4e4   :  { %8211 = vmatprep.subr.bf16.mxu1 %v17208_v39  ;;  %v1446_v33 = vld [vmem:[#allocation7 + $0x15f8] sm:$0xff]  ;;  %v17285_v39 = vcombine.low %v1421_v20, %v1429_v27 }
 0x4e5   :  { %v17304_v0 = vcombine.high %v1438_v32, %v1446_v33  ;;  %v17303_v16 = vcombine.low %v1438_v32, %v1446_v33  ;;  %v1533_v33 = vld [vmem:[#allocation7 + $0x18b0] sm:$0xff] }
 0x4e6   :  { %8048 = vmatpush1.bf16.msra.mxu0 %v17205_v48  ;;  %v1461_v48 = vld [vmem:[#allocation7 + $0x1670] sm:$0xff] }
 0x4e7   :  { %8212 = vmatpush1.bf16.msra.mxu1 %v17207_v53  ;;  %8049 = vmatprep.subr.bf16.mxu0 %v17222_v49  ;;  %v1454_v53 = vld [vmem:[#allocation7 + $0x1638] sm:$0xff]  ;;  %v17318_v56 = vcombine.high %v1453_v45, %v1461_v48 }
 0x4e8   :  { %8213 = vmatprep.subr.bf16.mxu1 %v17224_v55  ;;  %v1462_v49 = vld [vmem:[#allocation7 + $0x1678] sm:$0xff]  ;;  %v17301_v55 = vcombine.low %v1437_v28, %v1445_v30 }
 0x4e9   :  { %v17320_v41 = vcombine.high %v1454_v53, %v1462_v49  ;;  %v17319_v63 = vcombine.low %v1454_v53, %v1462_v49  ;;  %v1549_v53 = vld [vmem:[#allocation7 + $0x1930] sm:$0xff] }
 0x4ea   :  { %8050 = vmatpush1.bf16.msra.mxu0 %v17221_v59  ;;  %v1477_v59 = vld [vmem:[#allocation7 + $0x16f0] sm:$0xff] }
 0x4eb   :  { %8214 = vmatpush1.bf16.msra.mxu1 %v17223_v60  ;;  %8051 = vmatprep.subr.bf16.mxu0 %v17238_v61  ;;  %v1470_v60 = vld [vmem:[#allocation7 + $0x16b8] sm:$0xff]  ;;  %v17334_v2 = vcombine.high %v1469_v57, %v1477_v59  ;;  %v1557_v49 = vld [vmem:[#allocation7 + $0x1970] sm:$0xff] }
 0x4ec   :  { %8215 = vmatprep.subr.bf16.mxu1 %v17240_v62  ;;  %v1478_v61 = vld [vmem:[#allocation7 + $0x16f8] sm:$0xff]  ;;  %v17317_v62 = vcombine.low %v1453_v45, %v1461_v48 }
 0x4ed   :  { %v17336_v58 = vcombine.high %v1470_v60, %v1478_v61  ;;  %v17335_v10 = vcombine.low %v1470_v60, %v1478_v61  ;;  %v1565_v61 = vld [vmem:[#allocation7 + $0x19b0] sm:$0xff] }
 0x4ee   :  { %8052 = vmatpush1.bf16.msra.mxu0 %v17237_v5  ;;  %v1493_v5 = vld [vmem:[#allocation7 + $0x1770] sm:$0xff] }
 0x4ef   :  { %8216 = vmatpush1.bf16.msra.mxu1 %v17239_v7  ;;  %8053 = vmatprep.subr.bf16.mxu0 %v17254_v35  ;;  %v1486_v7 = vld [vmem:[#allocation7 + $0x1738] sm:$0xff]  ;;  %v17350_v11 = vcombine.high %v1485_v4, %v1493_v5 }
 0x4f0   :  { %8217 = vmatprep.subr.bf16.mxu1 %v17256_v8  ;;  %v1494_v35 = vld [vmem:[#allocation7 + $0x1778] sm:$0xff]  ;;  %v17333_v8 = vcombine.low %v1469_v57, %v1477_v59  ;;  %v17414_v59 = vcombine.high %v1549_v53, %v1557_v49 }
 0x4f1   :  { %v17352_v18 = vcombine.high %v1486_v7, %v1494_v35  ;;  %v17351_v20 = vcombine.low %v1486_v7, %v1494_v35  ;;  %v1581_v7 = vld [vmem:[#allocation7 + $0x1a30] sm:$0xff] }
 0x4f2   :  { %8054 = vmatpush1.bf16.msra.mxu0 %v17253_v36  ;;  %v1509_v36 = vld [vmem:[#allocation7 + $0x17f0] sm:$0xff] }
 0x4f3   :  { %8218 = vmatpush1.bf16.msra.mxu1 %v17255_v19  ;;  %8055 = vmatprep.subr.bf16.mxu0 %v17270_v6  ;;  %v1502_v19 = vld [vmem:[#allocation7 + $0x17b8] sm:$0xff]  ;;  %v17366_v27 = vcombine.high %v1501_v13, %v1509_v36  ;;  %v1589_v35 = vld [vmem:[#allocation7 + $0x1a70] sm:$0xff] }
 0x4f4   :  { %8219 = vmatprep.subr.bf16.mxu1 %v17272_v34  ;;  %v1510_v6 = vld [vmem:[#allocation7 + $0x17f8] sm:$0xff]  ;;  %v17349_v34 = vcombine.low %v1485_v4, %v1493_v5 }
 0x4f5   :  { %v17368_v14 = vcombine.high %v1502_v19, %v1510_v6  ;;  %v17367_v28 = vcombine.low %v1502_v19, %v1510_v6  ;;  %v1605_v19 = vld [vmem:[#allocation7 + $0x1af0] sm:$0xff]  ;;  %v1598_v6 = vld [vmem:[#allocation7 + $0x1ab8] sm:$0xff] }
 0x4f6   :  { %8056 = vmatpush1.bf16.msra.mxu0 %v17269_v54  ;;  %v1525_v54 = vld [vmem:[#allocation7 + $0x1870] sm:$0xff] }
 0x4f7   :  { %8220 = vmatpush1.bf16.msra.mxu1 %v17271_v23  ;;  %8057 = vmatprep.subr.bf16.mxu0 %v17286_v24  ;;  %v1518_v23 = vld [vmem:[#allocation7 + $0x1838] sm:$0xff]  ;;  %v17382_v30 = vcombine.high %v1517_v22, %v1525_v54 }
 0x4f8   :  { %8221 = vmatprep.subr.bf16.mxu1 %v17288_v25  ;;  %v1526_v24 = vld [vmem:[#allocation7 + $0x1878] sm:$0xff]  ;;  %v17365_v25 = vcombine.low %v1501_v13, %v1509_v36  ;;  %v1597_v36 = vld [vmem:[#allocation7 + $0x1ab0] sm:$0xff] }
 0x4f9   :  { %v17384_v32 = vcombine.high %v1518_v23, %v1526_v24  ;;  %v17383_v45 = vcombine.low %v1518_v23, %v1526_v24  ;;  %v1621_v23 = vld [vmem:[#allocation7 + $0x1b70] sm:$0xff]  ;;  %v1614_v24 = vld [vmem:[#allocation7 + $0x1b38] sm:$0xff] }
 0x4fa   :  { %8058 = vmatpush1.bf16.msra.mxu0 %v17285_v39  ;;  %v1541_v39 = vld [vmem:[#allocation7 + $0x18f0] sm:$0xff] }
 0x4fb   :  { %8222 = vmatpush1.bf16.msra.mxu1 %v17287_v40  ;;  %8059 = vmatprep.subr.bf16.mxu0 %v17302_v43  ;;  %v17381_v40 = vcombine.low %v1517_v22, %v1525_v54  ;;  %v1534_v43 = vld [vmem:[#allocation7 + $0x18b8] sm:$0xff]  ;;  %v17398_v48 = vcombine.high %v1533_v33, %v1541_v39  ;;  %v1613_v54 = vld [vmem:[#allocation7 + $0x1b30] sm:$0xff] }
 0x4fc   :  { %8223 = vmatprep.subr.bf16.mxu1 %v17304_v0  ;;  %v1542_v0 = vld [vmem:[#allocation7 + $0x18f8] sm:$0xff] }
 0x4fd   :  { %v17399_v57 = vcombine.low %v1534_v43, %v1542_v0 }
 0x4fe   :  { %8060 = vmatpush1.bf16.msra.mxu0 %v17301_v55  ;;  %v17400_v55 = vcombine.high %v1534_v43, %v1542_v0  ;;  %v1637_v43 = vld [vmem:[#allocation7 + $0x1bf0] sm:$0xff] }
 0x4ff   :  { %8224 = vmatpush1.bf16.msra.mxu1 %v17303_v16  ;;  %8061 = vmatprep.subr.bf16.mxu0 %v17318_v56  ;;  %v1550_v16 = vld [vmem:[#allocation7 + $0x1938] sm:$0xff] }
 0x500   :  { %8225 = vmatprep.subr.bf16.mxu1 %v17320_v41  ;;  %v1558_v56 = vld [vmem:[#allocation7 + $0x1978] sm:$0xff]  ;;  %v17397_v41 = vcombine.low %v1533_v33, %v1541_v39 }
 0x501   :  { %v17416_v60 = vcombine.high %v1550_v16, %v1558_v56 }
 0x502   :  { %8062 = vmatpush1.bf16.msra.mxu0 %v17317_v62  ;;  %v1573_v62 = vld [vmem:[#allocation7 + $0x19f0] sm:$0xff] }
 0x503   :  { %8226 = vmatpush1.bf16.msra.mxu1 %v17319_v63  ;;  %8063 = vmatprep.subr.bf16.mxu0 %v17334_v2  ;;  %v1566_v63 = vld [vmem:[#allocation7 + $0x19b8] sm:$0xff]  ;;  %v17430_v4 = vcombine.high %v1565_v61, %v1573_v62 }
 0x504   :  { %8227 = vmatprep.subr.bf16.mxu1 %v17336_v58  ;;  %v1574_v2 = vld [vmem:[#allocation7 + $0x19f8] sm:$0xff]  ;;  %v17413_v58 = vcombine.low %v1549_v53, %v1557_v49 }
 0x505   :  { %v17432_v5 = vcombine.high %v1566_v63, %v1574_v2  ;;  %v1638_v53 = vld [vmem:[#allocation7 + $0x1bf8] sm:$0xff] }
 0x506   :  { %8064 = vmatpush1.bf16.msra.mxu0 %v17333_v8  ;;  %v1582_v8 = vld [vmem:[#allocation7 + $0x1a38] sm:$0xff] }
 0x507   :  { %8228 = vmatpush1.bf16.msra.mxu1 %v17335_v10  ;;  %8065 = vmatprep.subr.bf16.mxu0 %v17350_v11  ;;  %v1590_v10 = vld [vmem:[#allocation7 + $0x1a78] sm:$0xff]  ;;  %v17431_v11 = vcombine.low %v1566_v63, %v1574_v2  ;;  %v1653_v63 = vld [vmem:[#allocation7 + $0x1c70] sm:$0xff] }
 0x508   :  { %8229 = vmatprep.subr.bf16.mxu1 %v17352_v18  ;;  %v17446_v18 = vcombine.high %v1581_v7, %v1589_v35  ;;  %v17448_v13 = vcombine.high %v1582_v8, %v1590_v10  ;;  %v1646_v2 = vld [vmem:[#allocation7 + $0x1c38] sm:$0xff] }
 0x50a   :  { %8066 = vmatpush1.bf16.msra.mxu0 %v17349_v34  ;;  %v1606_v34 = vld [vmem:[#allocation7 + $0x1af8] sm:$0xff] }
 0x50b   :  { %8230 = vmatpush1.bf16.msra.mxu1 %v17351_v20  ;;  %8067 = vmatprep.subr.bf16.mxu0 %v17366_v27  ;;  %v17445_v20 = vcombine.low %v1581_v7, %v1589_v35  ;;  %v17447_v27 = vcombine.low %v1582_v8, %v1590_v10  ;;  %v17464_v22 = vcombine.high %v1598_v6, %v1606_v34  ;;  %v1661_v35 = vld [vmem:[#allocation7 + $0x1cb0] sm:$0xff]  ;;  %v1662_v10 = vld [vmem:[#allocation7 + $0x1cb8] sm:$0xff] }
 0x50c   :  { %8231 = vmatprep.subr.bf16.mxu1 %v17368_v14  ;;  %v17462_v14 = vcombine.high %v1597_v36, %v1605_v19  ;;  %v1669_v8 = vld [vmem:[#allocation7 + $0x1cf0] sm:$0xff] }
 0x50e   :  { %8068 = vmatpush1.bf16.msra.mxu0 %v17365_v25  ;;  %v1622_v25 = vld [vmem:[#allocation7 + $0x1b78] sm:$0xff] }
 0x50f   :  { %8232 = vmatpush1.bf16.msra.mxu1 %v17367_v28  ;;  %8078 = vmatprep.subr.bf16.mxu0 %v17382_v30  ;;  %v17461_v28 = vcombine.low %v1597_v36, %v1605_v19  ;;  %v17463_v30 = vcombine.low %v1598_v6, %v1606_v34  ;;  %v17480_v39 = vcombine.high %v1614_v24, %v1622_v25  ;;  %v1677_v19 = vld [vmem:[#allocation7 + $0x1d30] sm:$0xff]  ;;  %v1678_v34 = vld [vmem:[#allocation7 + $0x1d38] sm:$0xff] }
 0x510   :  { %8242 = vmatprep.subr.bf16.mxu1 %v17384_v32  ;;  %v17478_v32 = vcombine.high %v1613_v54, %v1621_v23  ;;  %v1685_v6 = vld [vmem:[#allocation7 + $0x1d70] sm:$0xff] }
 0x511   :  { %8070 = vmatmul.mubr.bf16.vlgmr.msra.gmra.mrb[20].mxu0 %v19593_v1 }
 0x512   :  { %8234 = vmatmul.mubr.bf16.vlgmr.msra.gmra.mrb[20].mxu1 %v19593_v1  ;;  %8079 = vmatpush1.bf16.msra.mxu0 %v17381_v40  ;;  %v17415_v1 = vcombine.low %v1550_v16, %v1558_v56  ;;  %v1629_v40 = vld [vmem:[#allocation7 + $0x1bb0] sm:$0xff]  ;;  %v17477_v16 = vcombine.low %v1613_v54, %v1621_v23 }
 0x513   :  { %8110 = vmatprep.mubr.bf16.mxu0 %v19595_v9  ;;  %8243 = vmatpush1.bf16.msra.mxu1 %v17383_v45  ;;  %v1693_v23 = vld [vmem:[#allocation7 + $0x1db0] sm:$0xff] }
 0x514   :  { %8274 = vmatprep.mubr.bf16.mxu1 %v19595_v9  ;;  %8080 = vmatprep.subr.bf16.mxu0 %v17398_v48  ;;  %v17429_v9 = vcombine.low %v1565_v61, %v1573_v62  ;;  %v1630_v48 = vld [vmem:[#allocation7 + $0x1bb8] sm:$0xff]  ;;  %v1645_v62 = vld [vmem:[#allocation7 + $0x1c30] sm:$0xff] }
 0x515   :  { %8244 = vmatprep.subr.bf16.mxu1 %v17400_v55  ;;  %v17496_v61 = vcombine.high %v1630_v48, %v1638_v53 }
 0x516   :  { %8081 = vmatpush1.bf16.msra.mxu0 %v17397_v41 }
 0x517   :  { %8245 = vmatpush1.bf16.msra.mxu1 %v17399_v57  ;;  %8082 = vmatprep.subr.bf16.mxu0 %v17414_v59  ;;  %v17479_v57 = vcombine.low %v1614_v24, %v1622_v25  ;;  %v17494_v59 = vcombine.high %v1629_v40, %v1637_v43  ;;  %v1701_v24 = vld [vmem:[#allocation7 + $0x1df0] sm:$0xff]  ;;  %v1694_v25 = vld [vmem:[#allocation7 + $0x1db8] sm:$0xff] }
 0x518   :  { %8246 = vmatprep.subr.bf16.mxu1 %v17416_v60 }
 0x51a   :  { %8083 = vmatpush1.bf16.msra.mxu0 %v17413_v58  ;;  %v1654_v58 = vld [vmem:[#allocation7 + $0x1c78] sm:$0xff] }
 0x51b   :  { %8247 = vmatpush1.bf16.msra.mxu1 %v17415_v1  ;;  %8084 = vmatprep.subr.bf16.mxu0 %v17430_v4  ;;  %v17493_v1 = vcombine.low %v1629_v40, %v1637_v43  ;;  %v17495_v4 = vcombine.low %v1630_v48, %v1638_v53  ;;  %v17512_v7 = vcombine.high %v1646_v2, %v1654_v58  ;;  %v1709_v43 = vld [vmem:[#allocation7 + $0x1e30] sm:$0xff]  ;;  %v1710_v53 = vld [vmem:[#allocation7 + $0x1e38] sm:$0xff] }
 0x51c   :  { %8248 = vmatprep.subr.bf16.mxu1 %v17432_v5  ;;  %v17510_v5 = vcombine.high %v1645_v62, %v1653_v63  ;;  %v1717_v48 = vld [vmem:[#allocation7 + $0x1e70] sm:$0xff] }
 0x51e   :  { %8085 = vmatpush1.bf16.msra.mxu0 %v17429_v9  ;;  %v1670_v9 = vld [vmem:[#allocation7 + $0x1cf8] sm:$0xff] }
 0x51f   :  { %8249 = vmatpush1.bf16.msra.mxu1 %v17431_v11  ;;  %8086 = vmatprep.subr.bf16.mxu0 %v17446_v18  ;;  %v17509_v11 = vcombine.low %v1645_v62, %v1653_v63  ;;  %v17511_v18 = vcombine.low %v1646_v2, %v1654_v58  ;;  %v17528_v36 = vcombine.high %v1662_v10, %v1670_v9  ;;  %v1734_v62 = vld [vmem:[#allocation7 + $0x1ef8] sm:$0xff] }
 0x520   :  { %8250 = vmatprep.subr.bf16.mxu1 %v17448_v13  ;;  %v17526_v13 = vcombine.high %v1661_v35, %v1669_v8  ;;  %v17573_v63 = vcombine.low %v1709_v43, %v1717_v48 }
 0x522   :  { %8087 = vmatpush1.bf16.msra.mxu0 %v17445_v20  ;;  %v1686_v20 = vld [vmem:[#allocation7 + $0x1d78] sm:$0xff] }
 0x523   :  { %8251 = vmatpush1.bf16.msra.mxu1 %v17447_v27  ;;  %8088 = vmatprep.subr.bf16.mxu0 %v17462_v14  ;;  %v17525_v27 = vcombine.low %v1661_v35, %v1669_v8  ;;  %v17527_v14 = vcombine.low %v1662_v10, %v1670_v9  ;;  %v17544_v54 = vcombine.high %v1678_v34, %v1686_v20  ;;  %v1750_v35 = vld [vmem:[#allocation7 + $0x1f78] sm:$0xff]  ;;  %v19680_v8 = vld [vmem:[#allocation8] sm:$0xff] }
 0x524   :  { %v19672_v33 = vpop.f32.mrb[16].mxu0  ;;  %8252 = vmatprep.subr.bf16.mxu1 %v17464_v22  ;;  %v17542_v22 = vcombine.high %v1677_v19, %v1685_v6 }
 0x525   :  { %v19674_v0 = vpop.f32.mrb[16].mxu1  ;;  %v19676_v45 = vpop.f32.mrb[17].mxu0 }
 0x526   :  { %v19678_v49 = vpop.f32.mrb[17].mxu1  ;;  %v7788_v55 = vpop.f32.mrb[18].mxu0  ;;  %8089 = vmatpush1.bf16.msra.mxu0 %v17461_v28  ;;  %v1702_v28 = vld [vmem:[#allocation7 + $0x1df8] sm:$0xff] }
 0x527   :  { %v7952_v56 = vpop.f32.mrb[18].mxu1  ;;  %8253 = vmatpush1.bf16.msra.mxu1 %v17463_v30  ;;  %v7789_v41 = vpop.f32.mrb[19].mxu0  ;;  %8090 = vmatprep.subr.bf16.mxu0 %v17478_v32  ;;  %v17541_v30 = vcombine.low %v1677_v19, %v1685_v6  ;;  %v17543_v32 = vcombine.low %v1678_v34, %v1686_v20  ;;  %v17560_v40 = vcombine.high %v1694_v25, %v1702_v28  ;;  %v1718_v55 = vld [vmem:[#allocation7 + $0x1e78] sm:$0xff] }
 0x528   :  { %v7953_v60 = vpop.f32.mrb[19].mxu1  ;;  %8254 = vmatprep.subr.bf16.mxu1 %v17480_v39  ;;  %v17558_v39 = vcombine.high %v1693_v23, %v1701_v24  ;;  %v17559_v56 = vcombine.low %v1694_v25, %v1702_v28  ;;  %v17574_v41 = vcombine.high %v1709_v43, %v1717_v48  ;;  %v17575_v2 = vcombine.low %v1710_v53, %v1718_v55  ;;  %v1758_v6 = vld [vmem:[#allocation7 + $0x1fb8] sm:$0xff]  ;;  %v8323_v48 = vld [vmem:[#allocation10 + $0x40] sm:$0xff] }
 0x529   :  { %v1733_v60 = vld [vmem:[#allocation7 + $0x1ef0] sm:$0xff]  ;;  %v1778_v19 = vrot.slane %v19680_v8, %v19528_v17  ;;  %v1766_v34 = vld [vmem:[#allocation7 + $0x1ff8] sm:$0xff] }
 0x52a   :  { %8091 = vmatpush1.bf16.msra.mxu0 %v17477_v16  ;;  %v17557_v16 = vcombine.low %v1693_v23, %v1701_v24  ;;  %v8319_v23 = vld [vmem:[#allocation10 + $0x20] sm:$0xff]  ;;  %v8316_v25 = vld [vmem:[#allocation10 + $0x8] sm:$0xff] }
 0x52b   :  { %8255 = vmatpush1.bf16.msra.mxu1 %v17479_v57  ;;  %8092 = vmatprep.subr.bf16.mxu0 %v17494_v59  ;;  %v17576_v57 = vcombine.high %v1710_v53, %v1718_v55  ;;  %v1725_v59 = vld [vmem:[#allocation7 + $0x1eb0] sm:$0xff]  ;;  %v18803_v24 = vadd.f32 %v19628_v50, %v1778_v19  ;;  %v8320_v28 = vld [vmem:[#allocation10 + $0x28] sm:$0xff] }
 0x52c   :  { %8256 = vmatprep.subr.bf16.mxu1 %v17496_v61  ;;  %v1726_v61 = vld [vmem:[#allocation7 + $0x1eb8] sm:$0xff]  ;;  %v17590_v58 = vcombine.high %v1725_v59, %v1733_v60  ;;  %v17589_v10 = vcombine.low %v1725_v59, %v1733_v60  ;;  %v8327_v53 = vld [vmem:[#allocation10 + $0x60] sm:$0xff]  ;;  %v17627_v50 = vcombine.low %v8316_v25, %v8320_v28 }
 0x52d   :  { %v17591_v9 = vcombine.low %v1726_v61, %v1734_v62  ;;  %v8284_v43 = vmax.f32 %v18803_v24, 0.0  ;;  %v8335_v59 = vld [vmem:[#allocation10 + $0xa0] sm:$0xff]  ;;  %v8348_v19 = vld [vmem:[#allocation10 + $0x108] sm:$0xff] }
 0x52e   :  { %8093 = vmatpush1.bf16.msra.mxu0 %v17493_v1  ;;  %v17592_v1 = vcombine.high %v1726_v61, %v1734_v62  ;;  %v8332_v62 = vld [vmem:[#allocation10 + $0x88] sm:$0xff] }
 0x52f   :  { %8257 = vmatpush1.bf16.msra.mxu1 %v17495_v4  ;;  %8094 = vmatprep.subr.bf16.mxu0 %v17510_v5  ;;  %v1741_v4 = vld [vmem:[#allocation7 + $0x1f30] sm:$0xff]  ;;  %v19685_v60 = vpack.c.bf16 %v8284_v43, %v8284_v43  ;;  %v8360_v24 = vld [vmem:[#allocation10 + $0x168] sm:$0xff] }
 0x530   :  { %8258 = vmatprep.subr.bf16.mxu1 %v17512_v7  ;;  %v1749_v5 = vld [vmem:[#allocation7 + $0x1f70] sm:$0xff]  ;;  %v1742_v7 = vld [vmem:[#allocation7 + $0x1f38] sm:$0xff] }
 0x531   :  { %v17605_v20 = vcombine.low %v1741_v4, %v1749_v5  ;;  %v8364_v43 = vld [vmem:[#allocation10 + $0x188] sm:$0xff] }
 0x532   :  { %8095 = vmatpush1.bf16.msra.mxu0 %v17509_v11  ;;  %v17606_v11 = vcombine.high %v1741_v4, %v1749_v5  ;;  %v8339_v5 = vld [vmem:[#allocation10 + $0xc0] sm:$0xff] }
 0x533   :  { %8259 = vmatpush1.bf16.msra.mxu1 %v17511_v18  ;;  %8096 = vmatprep.subr.bf16.mxu0 %v17526_v13  ;;  %v17608_v18 = vcombine.high %v1742_v7, %v1750_v35  ;;  %v1757_v13 = vld [vmem:[#allocation7 + $0x1fb0] sm:$0xff] }
 0x534   :  { %8260 = vmatprep.subr.bf16.mxu1 %v17528_v36  ;;  %v1765_v36 = vld [vmem:[#allocation7 + $0x1ff0] sm:$0xff] }
 0x536   :  { %8097 = vmatpush1.bf16.msra.mxu0 %v17525_v27  ;;  %v17607_v27 = vcombine.low %v1742_v7, %v1750_v35  ;;  %v8343_v7 = vld [vmem:[#allocation10 + $0xe0] sm:$0xff]  ;;  %v8340_v35 = vld [vmem:[#allocation10 + $0xc8] sm:$0xff] }
 0x537   :  { %8261 = vmatpush1.bf16.msra.mxu1 %v17527_v14  ;;  %8098 = vmatprep.subr.bf16.mxu0 %v17542_v22  ;;  %v17622_v14 = vcombine.high %v1757_v13, %v1765_v36  ;;  %v17624_v22 = vcombine.high %v1758_v6, %v1766_v34 }
 0x538   :  { %8262 = vmatprep.subr.bf16.mxu1 %v17544_v54  ;;  %v8315_v54 = vld [vmem:[#allocation10] sm:$0xff] }
 0x539   :  { %v17625_v55 = vcombine.low %v8315_v54, %v8319_v23 }
 0x53a   :  { %8099 = vmatpush1.bf16.msra.mxu0 %v17541_v30  ;;  %v17621_v30 = vcombine.low %v1757_v13, %v1765_v36  ;;  %v8347_v13 = vld [vmem:[#allocation10 + $0x100] sm:$0xff] }
 0x53b   :  { %8263 = vmatpush1.bf16.msra.mxu1 %v17543_v32  ;;  %8100 = vmatprep.subr.bf16.mxu0 %v17558_v39  ;;  %v17623_v32 = vcombine.low %v1758_v6, %v1766_v34  ;;  %v17626_v39 = vcombine.high %v8315_v54, %v8319_v23  ;;  %v8351_v36 = vld [vmem:[#allocation10 + $0x120] sm:$0xff]  ;;  %v8352_v6 = vld [vmem:[#allocation10 + $0x128] sm:$0xff]  ;;  %v17649_v34 = vcombine.low %v8339_v5, %v8343_v7 }
 0x53c   :  { %8264 = vmatprep.subr.bf16.mxu1 %v17560_v40  ;;  %v17628_v40 = vcombine.high %v8316_v25, %v8320_v28  ;;  %v8359_v54 = vld [vmem:[#allocation10 + $0x160] sm:$0xff]  ;;  %v8356_v23 = vld [vmem:[#allocation10 + $0x148] sm:$0xff]  ;;  %v17657_v25 = vcombine.low %v8347_v13, %v8351_v36  ;;  %v17659_v28 = vcombine.low %v8348_v19, %v8352_v6 }
 0x53e   :  { %8101 = vmatpush1.bf16.msra.mxu0 %v17557_v16  ;;  %v8324_v16 = vld [vmem:[#allocation10 + $0x48] sm:$0xff] }
 0x53f   :  { %8265 = vmatpush1.bf16.msra.mxu1 %v17559_v56  ;;  %8102 = vmatprep.subr.bf16.mxu0 %v17574_v41  ;;  %v8328_v56 = vld [vmem:[#allocation10 + $0x68] sm:$0xff]  ;;  %v17634_v41 = vcombine.high %v8323_v48, %v8327_v53 }
 0x540   :  { %8266 = vmatprep.subr.bf16.mxu1 %v17576_v57  ;;  %v8331_v57 = vld [vmem:[#allocation10 + $0x80] sm:$0xff]  ;;  %v17636_v61 = vcombine.high %v8324_v16, %v8328_v56 }
 0x542   :  { %8103 = vmatpush1.bf16.msra.mxu0 %v17573_v63  ;;  %v8336_v63 = vld [vmem:[#allocation10 + $0xa8] sm:$0xff] }
 0x543   :  { %8267 = vmatpush1.bf16.msra.mxu1 %v17575_v2  ;;  %8104 = vmatprep.subr.bf16.mxu0 %v17590_v58  ;;  %v17633_v2 = vcombine.low %v8323_v48, %v8327_v53  ;;  %v17635_v58 = vcombine.low %v8324_v16, %v8328_v56  ;;  %v17644_v4 = vcombine.high %v8332_v62, %v8336_v63  ;;  %v8368_v48 = vld [vmem:[#allocation10 + $0x1a8] sm:$0xff] }
 0x544   :  { %8268 = vmatprep.subr.bf16.mxu1 %v17592_v1  ;;  %v17642_v1 = vcombine.high %v8331_v57, %v8335_v59  ;;  %v17676_v56 = vcombine.high %v8364_v43, %v8368_v48 }
 0x546   :  { %8105 = vmatpush1.bf16.msra.mxu0 %v17589_v10  ;;  %v8344_v10 = vld [vmem:[#allocation10 + $0xe8] sm:$0xff] }
 0x547   :  { %8269 = vmatpush1.bf16.msra.mxu1 %v17591_v9  ;;  %8106 = vmatprep.subr.bf16.mxu0 %v17606_v11  ;;  %v17641_v9 = vcombine.low %v8331_v57, %v8335_v59  ;;  %v17650_v11 = vcombine.high %v8339_v5, %v8343_v7  ;;  %v8372_v57 = vld [vmem:[#allocation10 + $0x1c8] sm:$0xff] }
 0x548   :  { %8270 = vmatprep.subr.bf16.mxu1 %v17608_v18  ;;  %v17652_v18 = vcombine.high %v8340_v35, %v8344_v10  ;;  %v8376_v59 = vld [vmem:[#allocation10 + $0x1e8] sm:$0xff] }
 0x549   :  { %v8384_v5 = vld [vmem:[#allocation10 + $0x228] sm:$0xff] }
 0x54a   :  { %8107 = vmatpush1.bf16.msra.mxu0 %v17605_v20  ;;  %v17651_v20 = vcombine.low %v8340_v35, %v8344_v10  ;;  %v17683_v35 = vcombine.low %v8372_v57, %v8376_v59 }
 0x54b   :  { %8271 = vmatpush1.bf16.msra.mxu1 %v17607_v27  ;;  %8108 = vmatprep.subr.bf16.mxu0 %v17622_v14  ;;  %v17658_v27 = vcombine.high %v8347_v13, %v8351_v36  ;;  %v17660_v14 = vcombine.high %v8348_v19, %v8352_v6  ;;  %v8392_v13 = vld [vmem:[#allocation10 + $0x268] sm:$0xff] }
 0x54c   :  { %8272 = vmatprep.subr.bf16.mxu1 %v17624_v22  ;;  %v8355_v22 = vld [vmem:[#allocation10 + $0x140] sm:$0xff] }
 0x54d   :  { %v17665_v53 = vcombine.low %v8355_v22, %v8359_v54 }
 0x54e   :  { %8109 = vmatpush1.bf16.msra.mxu0 %v17621_v30  ;;  %v17666_v30 = vcombine.high %v8355_v22, %v8359_v54  ;;  %v8400_v22 = vld [vmem:[#allocation10 + $0x2a8] sm:$0xff] }
 0x54f   :  { %8273 = vmatpush1.bf16.msra.mxu1 %v17623_v32  ;;  %14501 = vmatprep.subr.bf16.mxu0 %v17626_v39  ;;  %v17668_v32 = vcombine.high %v8356_v23, %v8360_v24  ;;  %v8363_v39 = vld [vmem:[#allocation10 + $0x180] sm:$0xff] }
 0x550   :  { %14829 = vmatprep.subr.bf16.mxu1 %v17628_v40  ;;  %v8367_v40 = vld [vmem:[#allocation10 + $0x1a0] sm:$0xff] }
 0x551   :  { %8111 = vmatmul.mubr.bf16.vlgmr.msra.gmra.mrb[20].mxu0 %v19606_v51  ;;  %v17674_v16 = vcombine.high %v8363_v39, %v8367_v40 }
 0x552   :  { %8275 = vmatmul.mubr.bf16.vlgmr.msra.gmra.mrb[20].mxu1 %v19606_v51  ;;  %14502 = vmatpush1.bf16.msra.mxu0 %v17625_v55  ;;  %v17643_v51 = vcombine.low %v8332_v62, %v8336_v63  ;;  %v17667_v55 = vcombine.low %v8356_v23, %v8360_v24  ;;  %v17675_v62 = vcombine.low %v8364_v43, %v8368_v48 }
 0x553   :  { %14533 = vmatprep.mubr.bf16.mxu0 %v19685_v60  ;;  %14830 = vmatpush1.bf16.msra.mxu1 %v17627_v50  ;;  %v8371_v50 = vld [vmem:[#allocation10 + $0x1c0] sm:$0xff] }
 0x554   :  { %14861 = vmatprep.mubr.bf16.mxu1 %v19685_v60  ;;  %14503 = vmatprep.subr.bf16.mxu0 %v17634_v41  ;;  %v8375_v41 = vld [vmem:[#allocation10 + $0x1e0] sm:$0xff] }
 0x555   :  { %14831 = vmatprep.subr.bf16.mxu1 %v17636_v61  ;;  %v17673_v61 = vcombine.low %v8363_v39, %v8367_v40  ;;  %v17682_v63 = vcombine.high %v8371_v50, %v8375_v41  ;;  %v17681_v7 = vcombine.low %v8371_v50, %v8375_v41  ;;  %v8408_v39 = vld [vmem:[#allocation10 + $0x2e8] sm:$0xff] }
 0x556   :  { %14504 = vmatpush1.bf16.msra.mxu0 %v17633_v2  ;;  %v17684_v2 = vcombine.high %v8372_v57, %v8376_v59  ;;  %v8416_v50 = vld [vmem:[#allocation10 + $0x328] sm:$0xff] }
 0x557   :  { %14832 = vmatpush1.bf16.msra.mxu1 %v17635_v58  ;;  %14505 = vmatprep.subr.bf16.mxu0 %v17642_v1  ;;  %v8379_v58 = vld [vmem:[#allocation10 + $0x200] sm:$0xff] }
 0x558   :  { %14833 = vmatprep.subr.bf16.mxu1 %v17644_v4  ;;  %v8383_v1 = vld [vmem:[#allocation10 + $0x220] sm:$0xff]  ;;  %v8380_v4 = vld [vmem:[#allocation10 + $0x208] sm:$0xff] }
 0x559   :  { %v17690_v10 = vcombine.high %v8379_v58, %v8383_v1  ;;  %v17689_v36 = vcombine.low %v8379_v58, %v8383_v1  ;;  %v17691_v19 = vcombine.low %v8380_v4, %v8384_v5  ;;  %v8424_v58 = vld [vmem:[#allocation10 + $0x368] sm:$0xff] }
 0x55a   :  { %14506 = vmatpush1.bf16.msra.mxu0 %v17641_v9  ;;  %v17692_v9 = vcombine.high %v8380_v4, %v8384_v5 }
 0x55b   :  { %14834 = vmatpush1.bf16.msra.mxu1 %v17643_v51  ;;  %14507 = vmatprep.subr.bf16.mxu0 %v17650_v11  ;;  %v8387_v51 = vld [vmem:[#allocation10 + $0x240] sm:$0xff] }
 0x55c   :  { %14835 = vmatprep.subr.bf16.mxu1 %v17652_v18  ;;  %v8391_v11 = vld [vmem:[#allocation10 + $0x260] sm:$0xff]  ;;  %v8388_v18 = vld [vmem:[#allocation10 + $0x248] sm:$0xff] }
 0x55d   :  { %v17698_v6 = vcombine.high %v8387_v51, %v8391_v11  ;;  %v17697_v54 = vcombine.low %v8387_v51, %v8391_v11  ;;  %v17699_v23 = vcombine.low %v8388_v18, %v8392_v13  ;;  %v8432_v51 = vld [vmem:[#allocation10 + $0x3a8] sm:$0xff] }
 0x55e   :  { %14508 = vmatpush1.bf16.msra.mxu0 %v17649_v34  ;;  %v17700_v34 = vcombine.high %v8388_v18, %v8392_v13  ;;  %v1774_v18 = vrot.slane %v19680_v8, %v19523_v15 }
 0x55f   :  { %14836 = vmatpush1.bf16.msra.mxu1 %v17651_v20  ;;  %14509 = vmatprep.subr.bf16.mxu0 %v17658_v27  ;;  %v8395_v20 = vld [vmem:[#allocation10 + $0x280] sm:$0xff] }
 0x560   :  { %14837 = vmatprep.subr.bf16.mxu1 %v17660_v14  ;;  %v8399_v27 = vld [vmem:[#allocation10 + $0x2a0] sm:$0xff]  ;;  %v8396_v14 = vld [vmem:[#allocation10 + $0x288] sm:$0xff] }
 0x561   :  { %v17706_v24 = vcombine.high %v8395_v20, %v8399_v27  ;;  %v17705_v40 = vcombine.low %v8395_v20, %v8399_v27  ;;  %v17707_v43 = vcombine.low %v8396_v14, %v8400_v22  ;;  %v1786_v20 = vrot.slane %v19680_v8, %v19535_v21  ;;  %v8436_v27 = vld [vmem:[#allocation10 + $0x3c8] sm:$0xff] }
 0x562   :  { %14510 = vmatpush1.bf16.msra.mxu0 %v17657_v25  ;;  %v17708_v25 = vcombine.high %v8396_v14, %v8400_v22  ;;  %v8440_v14 = vld [vmem:[#allocation10 + $0x3e8] sm:$0xff] }
 0x563   :  { %14838 = vmatpush1.bf16.msra.mxu1 %v17659_v28  ;;  %14511 = vmatprep.subr.bf16.mxu0 %v17666_v30  ;;  %v8403_v28 = vld [vmem:[#allocation10 + $0x2c0] sm:$0xff] }
 0x564   :  { %14839 = vmatprep.subr.bf16.mxu1 %v17668_v32  ;;  %v8407_v30 = vld [vmem:[#allocation10 + $0x2e0] sm:$0xff]  ;;  %v8404_v32 = vld [vmem:[#allocation10 + $0x2c8] sm:$0xff] }
 0x565   :  { %v17714_v48 = vcombine.high %v8403_v28, %v8407_v30  ;;  %v17713_v41 = vcombine.low %v8403_v28, %v8407_v30  ;;  %v17715_v57 = vcombine.low %v8404_v32, %v8408_v39  ;;  %v8443_v28 = vld [vmem:[#allocation10 + $0x400] sm:$0xff] }
 0x566   :  { %14512 = vmatpush1.bf16.msra.mxu0 %v17665_v53  ;;  %v17716_v53 = vcombine.high %v8404_v32, %v8408_v39  ;;  %v8447_v30 = vld [vmem:[#allocation10 + $0x420] sm:$0xff]  ;;  %v18805_v32 = vadd.f32 %v19630_v52, %v1786_v20  ;;  %v8444_v39 = vld [vmem:[#allocation10 + $0x408] sm:$0xff] }
 0x567   :  { %14840 = vmatpush1.bf16.msra.mxu1 %v17667_v55  ;;  %14513 = vmatprep.subr.bf16.mxu0 %v17674_v16  ;;  %v8411_v55 = vld [vmem:[#allocation10 + $0x300] sm:$0xff] }
 0x568   :  { %14841 = vmatprep.subr.bf16.mxu1 %v17676_v56  ;;  %v8415_v16 = vld [vmem:[#allocation10 + $0x320] sm:$0xff]  ;;  %v8412_v56 = vld [vmem:[#allocation10 + $0x308] sm:$0xff] }
 0x569   :  { %v17722_v59 = vcombine.high %v8411_v55, %v8415_v16  ;;  %v17721_v1 = vcombine.low %v8411_v55, %v8415_v16  ;;  %v17723_v4 = vcombine.low %v8412_v56, %v8416_v50  ;;  %v17754_v55 = vcombine.high %v8443_v28, %v8447_v30  ;;  %v8475_v20 = vld [vmem:[#allocation10 + $0x500] sm:$0xff] }
 0x56a   :  { %14514 = vmatpush1.bf16.msra.mxu0 %v17673_v61  ;;  %v17724_v61 = vcombine.high %v8412_v56, %v8416_v50  ;;  %v8286_v16 = vmax.f32 %v18805_v32, 0.0  ;;  %v8451_v56 = vld [vmem:[#allocation10 + $0x440] sm:$0xff]  ;;  %v8484_v32 = vld [vmem:[#allocation10 + $0x548] sm:$0xff] }
 0x56b   :  { %14842 = vmatpush1.bf16.msra.mxu1 %v17675_v62  ;;  %14515 = vmatprep.subr.bf16.mxu0 %v17682_v63  ;;  %v8419_v62 = vld [vmem:[#allocation10 + $0x340] sm:$0xff] }
 0x56c   :  { %14843 = vmatprep.subr.bf16.mxu1 %v17684_v2  ;;  %v8423_v63 = vld [vmem:[#allocation10 + $0x360] sm:$0xff]  ;;  %v8420_v2 = vld [vmem:[#allocation10 + $0x348] sm:$0xff] }
 0x56d   :  { %v17730_v5 = vcombine.high %v8419_v62, %v8423_v63  ;;  %v17729_v11 = vcombine.low %v8419_v62, %v8423_v63  ;;  %v17731_v13 = vcombine.low %v8420_v2, %v8424_v58  ;;  %v8455_v50 = vld [vmem:[#allocation10 + $0x460] sm:$0xff] }
 0x56e   :  { %14516 = vmatpush1.bf16.msra.mxu0 %v17681_v7  ;;  %v17732_v7 = vcombine.high %v8420_v2, %v8424_v58  ;;  %v17762_v62 = vcombine.high %v8451_v56, %v8455_v50  ;;  %v8459_v63 = vld [vmem:[#allocation10 + $0x480] sm:$0xff]  ;;  %v19699_v58 = vpack.c.bf16 %v8286_v16, %v8286_v16  ;;  %v8492_v16 = vld [vmem:[#allocation10 + $0x588] sm:$0xff] }
 0x56f   :  { %14844 = vmatpush1.bf16.msra.mxu1 %v17683_v35  ;;  %14517 = vmatprep.subr.bf16.mxu0 %v17690_v10  ;;  %v8427_v35 = vld [vmem:[#allocation10 + $0x380] sm:$0xff] }
 0x570   :  { %14845 = vmatprep.subr.bf16.mxu1 %v17692_v9  ;;  %v8431_v10 = vld [vmem:[#allocation10 + $0x3a0] sm:$0xff]  ;;  %v8428_v9 = vld [vmem:[#allocation10 + $0x388] sm:$0xff] }
 0x571   :  { %v17737_v22 = vcombine.low %v8427_v35, %v8431_v10  ;;  %v8463_v2 = vld [vmem:[#allocation10 + $0x4a0] sm:$0xff] }
 0x572   :  { %14518 = vmatpush1.bf16.msra.mxu0 %v17689_v36  ;;  %v17738_v36 = vcombine.high %v8427_v35, %v8431_v10  ;;  %v17770_v10 = vcombine.high %v8459_v63, %v8463_v2 }
 0x573   :  { %14846 = vmatpush1.bf16.msra.mxu1 %v17691_v19  ;;  %14519 = vmatprep.subr.bf16.mxu0 %v17698_v6  ;;  %v17740_v19 = vcombine.high %v8428_v9, %v8432_v51  ;;  %v8435_v6 = vld [vmem:[#allocation10 + $0x3c0] sm:$0xff] }
 0x574   :  { %14847 = vmatprep.subr.bf16.mxu1 %v17700_v34  ;;  %v8439_v34 = vld [vmem:[#allocation10 + $0x3e0] sm:$0xff] }
 0x576   :  { %14520 = vmatpush1.bf16.msra.mxu0 %v17697_v54  ;;  %v18802_v54 = vadd.f32 %v19624_v46, %v1774_v18  ;;  %v8468_v18 = vld [vmem:[#allocation10 + $0x4c8] sm:$0xff] }
 0x577   :  { %14848 = vmatpush1.bf16.msra.mxu1 %v17699_v23  ;;  %14521 = vmatprep.subr.bf16.mxu0 %v17706_v24  ;;  %v17739_v23 = vcombine.low %v8428_v9, %v8432_v51  ;;  %v17746_v24 = vcombine.high %v8435_v6, %v8439_v34  ;;  %v8467_v51 = vld [vmem:[#allocation10 + $0x4c0] sm:$0xff] }
 0x578   :  { %14849 = vmatprep.subr.bf16.mxu1 %v17708_v25  ;;  %v17748_v25 = vcombine.high %v8436_v27, %v8440_v14 }
 0x57a   :  { %14522 = vmatpush1.bf16.msra.mxu0 %v17705_v40  ;;  %v8448_v40 = vld [vmem:[#allocation10 + $0x428] sm:$0xff] }
 0x57b   :  { %14850 = vmatpush1.bf16.msra.mxu1 %v17707_v43  ;;  %14523 = vmatprep.subr.bf16.mxu0 %v17714_v48  ;;  %v17745_v43 = vcombine.low %v8435_v6, %v8439_v34  ;;  %v8283_v48 = vmax.f32 %v18802_v54, 0.0  ;;  %v17756_v46 = vcombine.high %v8444_v39, %v8448_v40  ;;  %v17755_v52 = vcombine.low %v8444_v39, %v8448_v40  ;;  %v8488_v39 = vld [vmem:[#allocation10 + $0x568] sm:$0xff] }
 0x57c   :  { %14851 = vmatprep.subr.bf16.mxu1 %v17716_v53  ;;  %v17747_v53 = vcombine.low %v8436_v27, %v8440_v14  ;;  %v8479_v27 = vld [vmem:[#allocation10 + $0x520] sm:$0xff]  ;;  %v8476_v14 = vld [vmem:[#allocation10 + $0x508] sm:$0xff] }
 0x57d   :  { %v17785_v40 = vcombine.low %v8475_v20, %v8479_v27 }
 0x57e   :  { %14524 = vmatpush1.bf16.msra.mxu0 %v17713_v41  ;;  %v17753_v41 = vcombine.low %v8443_v28, %v8447_v30  ;;  %v8483_v28 = vld [vmem:[#allocation10 + $0x540] sm:$0xff] }
 0x57f   :  { %14852 = vmatpush1.bf16.msra.mxu1 %v17715_v57  ;;  %14525 = vmatprep.subr.bf16.mxu0 %v17722_v59  ;;  %v8452_v57 = vld [vmem:[#allocation10 + $0x448] sm:$0xff]  ;;  %v8487_v30 = vld [vmem:[#allocation10 + $0x560] sm:$0xff] }
 0x580   :  { %14853 = vmatprep.subr.bf16.mxu1 %v17724_v61  ;;  %v8456_v59 = vld [vmem:[#allocation10 + $0x468] sm:$0xff]  ;;  %v19697_v61 = vpack.c.bf16 %v8283_v48, %v8283_v48  ;;  %v17794_v48 = vcombine.high %v8483_v28, %v8487_v30 }
 0x581   :  { %v17763_v35 = vcombine.low %v8452_v57, %v8456_v59 }
 0x582   :  { %14526 = vmatpush1.bf16.msra.mxu0 %v17721_v1  ;;  %v17764_v1 = vcombine.high %v8452_v57, %v8456_v59 }
 0x583   :  { %14854 = vmatpush1.bf16.msra.mxu1 %v17723_v4  ;;  %14527 = vmatprep.subr.bf16.mxu0 %v17730_v5  ;;  %v8460_v4 = vld [vmem:[#allocation10 + $0x488] sm:$0xff] }
 0x584   :  { %14855 = vmatprep.subr.bf16.mxu1 %v17732_v7  ;;  %v8464_v5 = vld [vmem:[#allocation10 + $0x4a8] sm:$0xff]  ;;  %v17761_v7 = vcombine.low %v8451_v56, %v8455_v50  ;;  %v17793_v50 = vcombine.low %v8483_v28, %v8487_v30 }
 0x585   :  { %v17772_v9 = vcombine.high %v8460_v4, %v8464_v5  ;;  %v8496_v56 = vld [vmem:[#allocation10 + $0x5a8] sm:$0xff] }
 0x586   :  { %14528 = vmatpush1.bf16.msra.mxu0 %v17729_v11  ;;  %v8471_v11 = vld [vmem:[#allocation10 + $0x4e0] sm:$0xff]  ;;  %v17804_v59 = vcombine.high %v8492_v16, %v8496_v56  ;;  %v8528_v28 = vld [vmem:[#allocation10 + $0x6a8] sm:$0xff] }
 0x587   :  { %14856 = vmatpush1.bf16.msra.mxu1 %v17731_v13  ;;  %14529 = vmatprep.subr.bf16.mxu0 %v17738_v36  ;;  %v8472_v13 = vld [vmem:[#allocation10 + $0x4e8] sm:$0xff]  ;;  %v17769_v36 = vcombine.low %v8459_v63, %v8463_v2  ;;  %v17778_v6 = vcombine.high %v8467_v51, %v8471_v11  ;;  %v17777_v54 = vcombine.low %v8467_v51, %v8471_v11 }
 0x588   :  { %14857 = vmatprep.subr.bf16.mxu1 %v17740_v19  ;;  %v17771_v19 = vcombine.low %v8460_v4, %v8464_v5  ;;  %v17780_v34 = vcombine.high %v8468_v18, %v8472_v13  ;;  %v8500_v63 = vld [vmem:[#allocation10 + $0x5c8] sm:$0xff]  ;;  %v17803_v4 = vcombine.low %v8492_v16, %v8496_v56 }
 0x589   :  { %v8504_v2 = vld [vmem:[#allocation10 + $0x5e8] sm:$0xff] }
 0x58a   :  { %14530 = vmatpush1.bf16.msra.mxu0 %v17737_v22  ;;  %v8480_v22 = vld [vmem:[#allocation10 + $0x528] sm:$0xff] }
 0x58b   :  { %14858 = vmatpush1.bf16.msra.mxu1 %v17739_v23  ;;  %14531 = vmatprep.subr.bf16.mxu0 %v17746_v24  ;;  %v17779_v23 = vcombine.low %v8468_v18, %v8472_v13  ;;  %v17786_v24 = vcombine.high %v8475_v20, %v8479_v27  ;;  %v8512_v51 = vld [vmem:[#allocation10 + $0x628] sm:$0xff]  ;;  %v17811_v18 = vcombine.low %v8500_v63, %v8504_v2 }
 0x58c   :  { %14859 = vmatprep.subr.bf16.mxu1 %v17748_v25  ;;  %v17788_v25 = vcombine.high %v8476_v14, %v8480_v22  ;;  %v8520_v20 = vld [vmem:[#allocation10 + $0x668] sm:$0xff] }
 0x58e   :  { %14532 = vmatpush1.bf16.msra.mxu0 %v17745_v43  ;;  %v17787_v43 = vcombine.low %v8476_v14, %v8480_v22 }
 0x58f   :  { %14860 = vmatpush1.bf16.msra.mxu1 %v17747_v53  ;;  %14542 = vmatprep.subr.bf16.mxu0 %v17754_v55  ;;  %v17796_v53 = vcombine.high %v8484_v32, %v8488_v39  ;;  %v8491_v55 = vld [vmem:[#allocation10 + $0x580] sm:$0xff] }
 0x590   :  { %14870 = vmatprep.subr.bf16.mxu1 %v17756_v46  ;;  %v8495_v46 = vld [vmem:[#allocation10 + $0x5a0] sm:$0xff] }
 0x591   :  { %14534 = vmatmul.mubr.bf16.vlgmr.msra.gmra.mrb[24].mxu0 %v19697_v61  ;;  %v17802_v57 = vcombine.high %v8491_v55, %v8495_v46 }
 0x592   :  { %14862 = vmatmul.mubr.bf16.vlgmr.msra.gmra.mrb[24].mxu1 %v19697_v61  ;;  %14543 = vmatpush1.bf16.msra.mxu0 %v17753_v41  ;;  %v17795_v41 = vcombine.low %v8484_v32, %v8488_v39 }
 0x593   :  { %14574 = vmatprep.mubr.bf16.mxu0 %v19699_v58  ;;  %14871 = vmatpush1.bf16.msra.mxu1 %v17755_v52  ;;  %v8499_v52 = vld [vmem:[#allocation10 + $0x5c0] sm:$0xff] }
 0x594   :  { %14902 = vmatprep.mubr.bf16.mxu1 %v19699_v58  ;;  %14544 = vmatprep.subr.bf16.mxu0 %v17762_v62  ;;  %v8503_v62 = vld [vmem:[#allocation10 + $0x5e0] sm:$0xff] }
 0x595   :  { %14872 = vmatprep.subr.bf16.mxu1 %v17764_v1  ;;  %v17801_v1 = vcombine.low %v8491_v55, %v8495_v46  ;;  %v17810_v5 = vcombine.high %v8499_v52, %v8503_v62  ;;  %v17809_v11 = vcombine.low %v8499_v52, %v8503_v62  ;;  %v8536_v55 = vld [vmem:[#allocation10 + $0x6e8] sm:$0xff] }
 0x596   :  { %14545 = vmatpush1.bf16.msra.mxu0 %v17761_v7  ;;  %v17812_v7 = vcombine.high %v8500_v63, %v8504_v2  ;;  %v8544_v52 = vld [vmem:[#allocation10 + $0x728] sm:$0xff] }
 0x597   :  { %14873 = vmatpush1.bf16.msra.mxu1 %v17763_v35  ;;  %14546 = vmatprep.subr.bf16.mxu0 %v17770_v10  ;;  %v8507_v35 = vld [vmem:[#allocation10 + $0x600] sm:$0xff] }
 0x598   :  { %14874 = vmatprep.subr.bf16.mxu1 %v17772_v9  ;;  %v8511_v10 = vld [vmem:[#allocation10 + $0x620] sm:$0xff]  ;;  %v8508_v9 = vld [vmem:[#allocation10 + $0x608] sm:$0xff] }
 0x599   :  { %v17818_v13 = vcombine.high %v8507_v35, %v8511_v10  ;;  %v17817_v27 = vcombine.low %v8507_v35, %v8511_v10  ;;  %v17819_v14 = vcombine.low %v8508_v9, %v8512_v51  ;;  %v8552_v35 = vld [vmem:[#allocation10 + $0x768] sm:$0xff] }
 0x59a   :  { %14547 = vmatpush1.bf16.msra.mxu0 %v17769_v36  ;;  %v17820_v36 = vcombine.high %v8508_v9, %v8512_v51 }
 0x59b   :  { %14875 = vmatpush1.bf16.msra.mxu1 %v17771_v19  ;;  %14548 = vmatprep.subr.bf16.mxu0 %v17778_v6  ;;  %v8515_v19 = vld [vmem:[#allocation10 + $0x640] sm:$0xff] }
 0x59c   :  { %14876 = vmatprep.subr.bf16.mxu1 %v17780_v34  ;;  %v8519_v6 = vld [vmem:[#allocation10 + $0x660] sm:$0xff]  ;;  %v8516_v34 = vld [vmem:[#allocation10 + $0x648] sm:$0xff] }
 0x59d   :  { %v17826_v22 = vcombine.high %v8515_v19, %v8519_v6  ;;  %v17825_v30 = vcombine.low %v8515_v19, %v8519_v6  ;;  %v17827_v32 = vcombine.low %v8516_v34, %v8520_v20  ;;  %v8560_v19 = vld [vmem:[#allocation10 + $0x7a8] sm:$0xff] }
 0x59e   :  { %14549 = vmatpush1.bf16.msra.mxu0 %v17777_v54  ;;  %v17828_v54 = vcombine.high %v8516_v34, %v8520_v20  ;;  %v1782_v34 = vrot.slane %v19680_v8, %v19562_v31 }
 0x59f   :  { %14877 = vmatpush1.bf16.msra.mxu1 %v17779_v23  ;;  %14550 = vmatprep.subr.bf16.mxu0 %v17786_v24  ;;  %v8523_v23 = vld [vmem:[#allocation10 + $0x680] sm:$0xff] }
 0x5a0   :  { %14878 = vmatprep.subr.bf16.mxu1 %v17788_v25  ;;  %v8527_v24 = vld [vmem:[#allocation10 + $0x6a0] sm:$0xff]  ;;  %v8524_v25 = vld [vmem:[#allocation10 + $0x688] sm:$0xff] }
 0x5a1   :  { %v17834_v39 = vcombine.high %v8523_v23, %v8527_v24  ;;  %v17833_v46 = vcombine.low %v8523_v23, %v8527_v24  ;;  %v17835_v16 = vcombine.low %v8524_v25, %v8528_v28  ;;  %v1794_v23 = vrot.slane %v19680_v8, %v19565_v44  ;;  %v8564_v24 = vld [vmem:[#allocation10 + $0x7c8] sm:$0xff] }
 0x5a2   :  { %14551 = vmatpush1.bf16.msra.mxu0 %v17785_v40  ;;  %v17836_v40 = vcombine.high %v8524_v25, %v8528_v28  ;;  %v8568_v25 = vld [vmem:[#allocation10 + $0x7e8] sm:$0xff] }
 0x5a3   :  { %14879 = vmatpush1.bf16.msra.mxu1 %v17787_v43  ;;  %14552 = vmatprep.subr.bf16.mxu0 %v17794_v48  ;;  %v8531_v43 = vld [vmem:[#allocation10 + $0x6c0] sm:$0xff] }
 0x5a4   :  { %14880 = vmatprep.subr.bf16.mxu1 %v17796_v53  ;;  %v8535_v48 = vld [vmem:[#allocation10 + $0x6e0] sm:$0xff]  ;;  %v8532_v53 = vld [vmem:[#allocation10 + $0x6c8] sm:$0xff] }
 0x5a5   :  { %v17842_v56 = vcombine.high %v8531_v43, %v8535_v48  ;;  %v17841_v62 = vcombine.low %v8531_v43, %v8535_v48  ;;  %v17843_v63 = vcombine.low %v8532_v53, %v8536_v55  ;;  %v8571_v43 = vld [vmem:[#allocation10 + $0x800] sm:$0xff] }
 0x5a6   :  { %14553 = vmatpush1.bf16.msra.mxu0 %v17793_v50  ;;  %v17844_v50 = vcombine.high %v8532_v53, %v8536_v55  ;;  %v8575_v48 = vld [vmem:[#allocation10 + $0x820] sm:$0xff]  ;;  %v18807_v53 = vadd.f32 %v19652_v38, %v1794_v23  ;;  %v8572_v55 = vld [vmem:[#allocation10 + $0x808] sm:$0xff] }
 0x5a7   :  { %14881 = vmatpush1.bf16.msra.mxu1 %v17795_v41  ;;  %14554 = vmatprep.subr.bf16.mxu0 %v17802_v57  ;;  %v8539_v41 = vld [vmem:[#allocation10 + $0x700] sm:$0xff] }
 0x5a8   :  { %14882 = vmatprep.subr.bf16.mxu1 %v17804_v59  ;;  %v8543_v57 = vld [vmem:[#allocation10 + $0x720] sm:$0xff]  ;;  %v8540_v59 = vld [vmem:[#allocation10 + $0x708] sm:$0xff] }
 0x5a9   :  { %v17850_v2 = vcombine.high %v8539_v41, %v8543_v57  ;;  %v17849_v10 = vcombine.low %v8539_v41, %v8543_v57  ;;  %v17851_v9 = vcombine.low %v8540_v59, %v8544_v52  ;;  %v8288_v41 = vmax.f32 %v18807_v53, 0.0  ;;  %v8579_v57 = vld [vmem:[#allocation10 + $0x840] sm:$0xff]  ;;  %v8616_v53 = vld [vmem:[#allocation10 + $0x968] sm:$0xff] }
 0x5aa   :  { %14555 = vmatpush1.bf16.msra.mxu0 %v17801_v1  ;;  %v17852_v1 = vcombine.high %v8540_v59, %v8544_v52  ;;  %v8583_v59 = vld [vmem:[#allocation10 + $0x860] sm:$0xff]  ;;  %v17881_v52 = vcombine.low %v8571_v43, %v8575_v48 }
 0x5ab   :  { %14883 = vmatpush1.bf16.msra.mxu1 %v17803_v4  ;;  %14556 = vmatprep.subr.bf16.mxu0 %v17810_v5  ;;  %v8547_v4 = vld [vmem:[#allocation10 + $0x740] sm:$0xff] }
 0x5ac   :  { %14884 = vmatprep.subr.bf16.mxu1 %v17812_v7  ;;  %v8551_v5 = vld [vmem:[#allocation10 + $0x760] sm:$0xff]  ;;  %v8548_v7 = vld [vmem:[#allocation10 + $0x748] sm:$0xff] }
 0x5ad   :  { %v17858_v51 = vcombine.high %v8547_v4, %v8551_v5  ;;  %v17857_v6 = vcombine.low %v8547_v4, %v8551_v5  ;;  %v17859_v20 = vcombine.low %v8548_v7, %v8552_v35  ;;  %v8587_v4 = vld [vmem:[#allocation10 + $0x880] sm:$0xff] }
 0x5ae   :  { %14557 = vmatpush1.bf16.msra.mxu0 %v17809_v11  ;;  %v17860_v11 = vcombine.high %v8548_v7, %v8552_v35  ;;  %v8591_v5 = vld [vmem:[#allocation10 + $0x8a0] sm:$0xff]  ;;  %v19713_v7 = vpack.c.bf16 %v8288_v41, %v8288_v41  ;;  %v8624_v41 = vld [vmem:[#allocation10 + $0x9a8] sm:$0xff] }
 0x5af   :  { %14885 = vmatpush1.bf16.msra.mxu1 %v17811_v18  ;;  %14558 = vmatprep.subr.bf16.mxu0 %v17818_v13  ;;  %v8555_v18 = vld [vmem:[#allocation10 + $0x780] sm:$0xff] }
 0x5b0   :  { %14886 = vmatprep.subr.bf16.mxu1 %v17820_v36  ;;  %v8559_v13 = vld [vmem:[#allocation10 + $0x7a0] sm:$0xff]  ;;  %v8556_v36 = vld [vmem:[#allocation10 + $0x788] sm:$0xff] }
 0x5b1   :  { %v17865_v28 = vcombine.low %v8555_v18, %v8559_v13  ;;  %v8607_v23 = vld [vmem:[#allocation10 + $0x920] sm:$0xff] }
 0x5b2   :  { %14559 = vmatpush1.bf16.msra.mxu0 %v17817_v27  ;;  %v17866_v27 = vcombine.high %v8555_v18, %v8559_v13  ;;  %v17898_v18 = vcombine.high %v8587_v4, %v8591_v5 }
 0x5b3   :  { %14887 = vmatpush1.bf16.msra.mxu1 %v17819_v14  ;;  %14560 = vmatprep.subr.bf16.mxu0 %v17826_v22  ;;  %v17868_v14 = vcombine.high %v8556_v36, %v8560_v19  ;;  %v8563_v22 = vld [vmem:[#allocation10 + $0x7c0] sm:$0xff] }
 0x5b4   :  { %14888 = vmatprep.subr.bf16.mxu1 %v17828_v54  ;;  %v8567_v54 = vld [vmem:[#allocation10 + $0x7e0] sm:$0xff] }
 0x5b5   :  { %v17873_v8 = vcombine.low %v8563_v22, %v8567_v54 }
 0x5b6   :  { %14561 = vmatpush1.bf16.msra.mxu0 %v17825_v30  ;;  %v18804_v30 = vadd.f32 %v19626_v47, %v1782_v34  ;;  %v8600_v34 = vld [vmem:[#allocation10 + $0x8e8] sm:$0xff] }
 0x5b7   :  { %14889 = vmatpush1.bf16.msra.mxu1 %v17827_v32  ;;  %14562 = vmatprep.subr.bf16.mxu0 %v17834_v39  ;;  %v17867_v32 = vcombine.low %v8556_v36, %v8560_v19  ;;  %v17874_v39 = vcombine.high %v8563_v22, %v8567_v54  ;;  %v8595_v36 = vld [vmem:[#allocation10 + $0x8c0] sm:$0xff] }
 0x5b8   :  { %14890 = vmatprep.subr.bf16.mxu1 %v17836_v40  ;;  %v17876_v40 = vcombine.high %v8564_v24, %v8568_v25  ;;  %v8599_v19 = vld [vmem:[#allocation10 + $0x8e0] sm:$0xff] }
 0x5b9   :  { %v8603_v54 = vld [vmem:[#allocation10 + $0x900] sm:$0xff] }
 0x5ba   :  { %14563 = vmatpush1.bf16.msra.mxu0 %v17833_v46  ;;  %v8576_v46 = vld [vmem:[#allocation10 + $0x828] sm:$0xff] }
 0x5bb   :  { %14891 = vmatpush1.bf16.msra.mxu1 %v17835_v16  ;;  %14564 = vmatprep.subr.bf16.mxu0 %v17842_v56  ;;  %v8285_v16 = vmax.f32 %v18804_v30, 0.0  ;;  %v17875_v56 = vcombine.low %v8564_v24, %v8568_v25  ;;  %v17884_v47 = vcombine.high %v8572_v55, %v8576_v46  ;;  %v17883_v38 = vcombine.low %v8572_v55, %v8576_v46  ;;  %v8604_v24 = vld [vmem:[#allocation10 + $0x908] sm:$0xff] }
 0x5bc   :  { %14892 = vmatprep.subr.bf16.mxu1 %v17844_v50  ;;  %v17882_v50 = vcombine.high %v8571_v43, %v8575_v48  ;;  %v8608_v25 = vld [vmem:[#allocation10 + $0x928] sm:$0xff]  ;;  %v8615_v43 = vld [vmem:[#allocation10 + $0x960] sm:$0xff]  ;;  %v17913_v55 = vcombine.low %v8603_v54, %v8607_v23 }
 0x5bd   :  { %v8612_v48 = vld [vmem:[#allocation10 + $0x948] sm:$0xff]  ;;  %v17915_v46 = vcombine.low %v8604_v24, %v8608_v25 }
 0x5be   :  { %14565 = vmatpush1.bf16.msra.mxu0 %v17841_v62  ;;  %v8580_v62 = vld [vmem:[#allocation10 + $0x848] sm:$0xff] }
 0x5bf   :  { %14893 = vmatpush1.bf16.msra.mxu1 %v17843_v63  ;;  %14566 = vmatprep.subr.bf16.mxu0 %v17850_v2  ;;  %v8584_v63 = vld [vmem:[#allocation10 + $0x868] sm:$0xff]  ;;  %v19711_v2 = vpack.c.bf16 %v8285_v16, %v8285_v16  ;;  %v17924_v16 = vcombine.high %v8612_v48, %v8616_v53 }
 0x5c0   :  { %14894 = vmatprep.subr.bf16.mxu1 %v17852_v1  ;;  %v17890_v1 = vcombine.high %v8579_v57, %v8583_v59  ;;  %v17892_v35 = vcombine.high %v8580_v62, %v8584_v63 }
 0x5c2   :  { %14567 = vmatpush1.bf16.msra.mxu0 %v17849_v10  ;;  %v8588_v10 = vld [vmem:[#allocation10 + $0x888] sm:$0xff] }
 0x5c3   :  { %14895 = vmatpush1.bf16.msra.mxu1 %v17851_v9  ;;  %14568 = vmatprep.subr.bf16.mxu0 %v17858_v51  ;;  %v8592_v9 = vld [vmem:[#allocation10 + $0x8a8] sm:$0xff]  ;;  %v17889_v51 = vcombine.low %v8579_v57, %v8583_v59  ;;  %v17923_v59 = vcombine.low %v8612_v48, %v8616_v53 }
 0x5c4   :  { %14896 = vmatprep.subr.bf16.mxu1 %v17860_v11  ;;  %v17891_v11 = vcombine.low %v8580_v62, %v8584_v63  ;;  %v17900_v13 = vcombine.high %v8588_v10, %v8592_v9  ;;  %v8627_v63 = vld [vmem:[#allocation10 + $0x9c0] sm:$0xff] }
 0x5c6   :  { %14569 = vmatpush1.bf16.msra.mxu0 %v17857_v6  ;;  %v8596_v6 = vld [vmem:[#allocation10 + $0x8c8] sm:$0xff] }
 0x5c7   :  { %14897 = vmatpush1.bf16.msra.mxu1 %v17859_v20  ;;  %14570 = vmatprep.subr.bf16.mxu0 %v17866_v27  ;;  %v17897_v20 = vcombine.low %v8587_v4, %v8591_v5  ;;  %v17899_v27 = vcombine.low %v8588_v10, %v8592_v9  ;;  %v17908_v22 = vcombine.high %v8596_v6, %v8600_v34  ;;  %v8632_v4 = vld [vmem:[#allocation10 + $0x9e8] sm:$0xff] }
 0x5c8   :  { %14898 = vmatprep.subr.bf16.mxu1 %v17868_v14  ;;  %v17906_v14 = vcombine.high %v8595_v36, %v8599_v19  ;;  %v17907_v30 = vcombine.low %v8596_v6, %v8600_v34 }
 0x5ca   :  { %14571 = vmatpush1.bf16.msra.mxu0 %v17865_v28  ;;  %v17905_v28 = vcombine.low %v8595_v36, %v8599_v19 }
 0x5cb   :  { %14899 = vmatpush1.bf16.msra.mxu1 %v17867_v32  ;;  %14572 = vmatprep.subr.bf16.mxu0 %v17874_v39  ;;  %v17914_v32 = vcombine.high %v8603_v54, %v8607_v23  ;;  %v17916_v39 = vcombine.high %v8604_v24, %v8608_v25 }
 0x5cc   :  { %14900 = vmatprep.subr.bf16.mxu1 %v17876_v40  ;;  %v8611_v40 = vld [vmem:[#allocation10 + $0x940] sm:$0xff] }
 0x5cd   :  { %v17921_v57 = vcombine.low %v8611_v40, %v8615_v43 }
 0x5ce   :  { %14573 = vmatpush1.bf16.msra.mxu0 %v17873_v8  ;;  %v17922_v8 = vcombine.high %v8611_v40, %v8615_v43 }
 0x5cf   :  { %14901 = vmatpush1.bf16.msra.mxu1 %v17875_v56  ;;  %14583 = vmatprep.subr.bf16.mxu0 %v17882_v50  ;;  %v8619_v56 = vld [vmem:[#allocation10 + $0x980] sm:$0xff] }
 0x5d0   :  { %14911 = vmatprep.subr.bf16.mxu1 %v17884_v47  ;;  %v8623_v50 = vld [vmem:[#allocation10 + $0x9a0] sm:$0xff]  ;;  %v8620_v47 = vld [vmem:[#allocation10 + $0x988] sm:$0xff] }
 0x5d1   :  { %14575 = vmatmul.mubr.bf16.vlgmr.msra.gmra.mrb[24].mxu0 %v19711_v2  ;;  %v17932_v62 = vcombine.high %v8620_v47, %v8624_v41  ;;  %v17929_v5 = vcombine.low %v8619_v56, %v8623_v50 }
 0x5d2   :  { %14903 = vmatmul.mubr.bf16.vlgmr.msra.gmra.mrb[24].mxu1 %v19711_v2  ;;  %14584 = vmatpush1.bf16.msra.mxu0 %v17881_v52  ;;  %v17930_v52 = vcombine.high %v8619_v56, %v8623_v50 }
 0x5d3   :  { %14615 = vmatprep.mubr.bf16.mxu0 %v19713_v7  ;;  %14912 = vmatpush1.bf16.msra.mxu1 %v17883_v38  ;;  %v8631_v38 = vld [vmem:[#allocation10 + $0x9e0] sm:$0xff] }
 0x5d4   :  { %14943 = vmatprep.mubr.bf16.mxu1 %v19713_v7  ;;  %14585 = vmatprep.subr.bf16.mxu0 %v17890_v1  ;;  %v8628_v1 = vld [vmem:[#allocation10 + $0x9c8] sm:$0xff]  ;;  %v17938_v10 = vcombine.high %v8627_v63, %v8631_v38  ;;  %v17937_v36 = vcombine.low %v8627_v63, %v8631_v38 }
 0x5d5   :  { %14913 = vmatprep.subr.bf16.mxu1 %v17892_v35  ;;  %v17931_v35 = vcombine.low %v8620_v47, %v8624_v41  ;;  %v17940_v9 = vcombine.high %v8628_v1, %v8632_v4  ;;  %v17939_v19 = vcombine.low %v8628_v1, %v8632_v4 }
 0x5d6   :  { %14586 = vmatpush1.bf16.msra.mxu0 %v17889_v51  ;;  %v8635_v51 = vld [vmem:[#allocation10 + $0xa00] sm:$0xff] }
 0x5d7   :  { %14914 = vmatpush1.bf16.msra.mxu1 %v17891_v11  ;;  %14587 = vmatprep.subr.bf16.mxu0 %v17898_v18  ;;  %v8639_v11 = vld [vmem:[#allocation10 + $0xa20] sm:$0xff]  ;;  %v8636_v18 = vld [vmem:[#allocation10 + $0xa08] sm:$0xff] }
 0x5d8   :  { %14915 = vmatprep.subr.bf16.mxu1 %v17900_v13  ;;  %v8640_v13 = vld [vmem:[#allocation10 + $0xa28] sm:$0xff]  ;;  %v17946_v6 = vcombine.high %v8635_v51, %v8639_v11  ;;  %v17945_v54 = vcombine.low %v8635_v51, %v8639_v11 }
 0x5d9   :  { %v17948_v34 = vcombine.high %v8636_v18, %v8640_v13  ;;  %v17947_v23 = vcombine.low %v8636_v18, %v8640_v13 }
 0x5da   :  { %14588 = vmatpush1.bf16.msra.mxu0 %v17897_v20  ;;  %v8643_v20 = vld [vmem:[#allocation10 + $0xa40] sm:$0xff] }
 0x5db   :  { %14916 = vmatpush1.bf16.msra.mxu1 %v17899_v27  ;;  %14589 = vmatprep.subr.bf16.mxu0 %v17906_v14  ;;  %v8647_v27 = vld [vmem:[#allocation10 + $0xa60] sm:$0xff]  ;;  %v8644_v14 = vld [vmem:[#allocation10 + $0xa48] sm:$0xff] }
 0x5dc   :  { %14917 = vmatprep.subr.bf16.mxu1 %v17908_v22  ;;  %v8648_v22 = vld [vmem:[#allocation10 + $0xa68] sm:$0xff]  ;;  %v17954_v24 = vcombine.high %v8643_v20, %v8647_v27  ;;  %v17953_v40 = vcombine.low %v8643_v20, %v8647_v27  ;;  %v19719_v27 = vld [vmem:[#allocation8] sm:$0xff] }
 0x5dd   :  { %v17956_v25 = vcombine.high %v8644_v14, %v8648_v22  ;;  %v17955_v43 = vcombine.low %v8644_v14, %v8648_v22  ;;  %v1790_v14 = vrot.slane %v19719_v27, %v19582_v12 }
 0x5de   :  { %14590 = vmatpush1.bf16.msra.mxu0 %v17905_v28  ;;  %v8651_v28 = vld [vmem:[#allocation10 + $0xa80] sm:$0xff] }
 0x5df   :  { %14918 = vmatpush1.bf16.msra.mxu1 %v17907_v30  ;;  %14591 = vmatprep.subr.bf16.mxu0 %v17914_v32  ;;  %v8655_v30 = vld [vmem:[#allocation10 + $0xaa0] sm:$0xff]  ;;  %v8652_v32 = vld [vmem:[#allocation10 + $0xa88] sm:$0xff] }
 0x5e0   :  { %14919 = vmatprep.subr.bf16.mxu1 %v17916_v39  ;;  %v8656_v39 = vld [vmem:[#allocation10 + $0xaa8] sm:$0xff]  ;;  %v17962_v48 = vcombine.high %v8651_v28, %v8655_v30  ;;  %v17961_v56 = vcombine.low %v8651_v28, %v8655_v30  ;;  %v1802_v28 = vrot.slane %v19719_v27, %v19585_v26 }
 0x5e1   :  { %v17964_v53 = vcombine.high %v8652_v32, %v8656_v39  ;;  %v17963_v50 = vcombine.low %v8652_v32, %v8656_v39  ;;  %v8692_v30 = vld [vmem:[#allocation10 + $0xbc8] sm:$0xff] }
 0x5e2   :  { %14592 = vmatpush1.bf16.msra.mxu0 %v17913_v55  ;;  %v8659_v55 = vld [vmem:[#allocation10 + $0xac0] sm:$0xff]  ;;  %v8696_v32 = vld [vmem:[#allocation10 + $0xbe8] sm:$0xff] }
 0x5e3   :  { %14920 = vmatpush1.bf16.msra.mxu1 %v17915_v46  ;;  %14593 = vmatprep.subr.bf16.mxu0 %v17922_v8  ;;  %v8663_v46 = vld [vmem:[#allocation10 + $0xae0] sm:$0xff]  ;;  %v8660_v8 = vld [vmem:[#allocation10 + $0xac8] sm:$0xff] }
 0x5e4   :  { %14921 = vmatprep.subr.bf16.mxu1 %v17924_v16  ;;  %v8664_v16 = vld [vmem:[#allocation10 + $0xae8] sm:$0xff]  ;;  %v17970_v47 = vcombine.high %v8659_v55, %v8663_v46  ;;  %v17969_v63 = vcombine.low %v8659_v55, %v8663_v46  ;;  %v8699_v55 = vld [vmem:[#allocation10 + $0xc00] sm:$0xff] }
 0x5e5   :  { %v17972_v41 = vcombine.high %v8660_v8, %v8664_v16  ;;  %v17971_v38 = vcombine.low %v8660_v8, %v8664_v16  ;;  %v8703_v46 = vld [vmem:[#allocation10 + $0xc20] sm:$0xff]  ;;  %v18809_v8 = vadd.f32 %v19654_v42, %v1802_v28  ;;  %v8700_v16 = vld [vmem:[#allocation10 + $0xc08] sm:$0xff] }
 0x5e6   :  { %14594 = vmatpush1.bf16.msra.mxu0 %v17921_v57  ;;  %v8667_v57 = vld [vmem:[#allocation10 + $0xb00] sm:$0xff] }
 0x5e7   :  { %14922 = vmatpush1.bf16.msra.mxu1 %v17923_v59  ;;  %14595 = vmatprep.subr.bf16.mxu0 %v17930_v52  ;;  %v8671_v59 = vld [vmem:[#allocation10 + $0xb20] sm:$0xff]  ;;  %v8668_v52 = vld [vmem:[#allocation10 + $0xb08] sm:$0xff] }
 0x5e8   :  { %14923 = vmatprep.subr.bf16.mxu1 %v17932_v62  ;;  %v8672_v62 = vld [vmem:[#allocation10 + $0xb28] sm:$0xff]  ;;  %v17978_v1 = vcombine.high %v8667_v57, %v8671_v59  ;;  %v17977_v51 = vcombine.low %v8667_v57, %v8671_v59  ;;  %v18010_v57 = vcombine.high %v8699_v55, %v8703_v46  ;;  %v8290_v59 = vmax.f32 %v18809_v8, 0.0  ;;  %v8731_v28 = vld [vmem:[#allocation10 + $0xd00] sm:$0xff] }
 0x5e9   :  { %v17980_v4 = vcombine.high %v8668_v52, %v8672_v62  ;;  %v17979_v11 = vcombine.low %v8668_v52, %v8672_v62  ;;  %v8707_v52 = vld [vmem:[#allocation10 + $0xc40] sm:$0xff]  ;;  %v8740_v8 = vld [vmem:[#allocation10 + $0xd48] sm:$0xff] }
 0x5ea   :  { %14596 = vmatpush1.bf16.msra.mxu0 %v17929_v5  ;;  %v8675_v5 = vld [vmem:[#allocation10 + $0xb40] sm:$0xff] }
 0x5eb   :  { %14924 = vmatpush1.bf16.msra.mxu1 %v17931_v35  ;;  %14597 = vmatprep.subr.bf16.mxu0 %v17938_v10  ;;  %v8679_v35 = vld [vmem:[#allocation10 + $0xb60] sm:$0xff]  ;;  %v8676_v10 = vld [vmem:[#allocation10 + $0xb48] sm:$0xff] }
 0x5ec   :  { %14925 = vmatprep.subr.bf16.mxu1 %v17940_v9  ;;  %v8680_v9 = vld [vmem:[#allocation10 + $0xb68] sm:$0xff]  ;;  %v17986_v18 = vcombine.high %v8675_v5, %v8679_v35  ;;  %v17985_v20 = vcombine.low %v8675_v5, %v8679_v35  ;;  %v8711_v62 = vld [vmem:[#allocation10 + $0xc60] sm:$0xff] }
 0x5ed   :  { %v17988_v13 = vcombine.high %v8676_v10, %v8680_v9  ;;  %v17987_v22 = vcombine.low %v8676_v10, %v8680_v9  ;;  %v18018_v5 = vcombine.high %v8707_v52, %v8711_v62  ;;  %v8715_v35 = vld [vmem:[#allocation10 + $0xc80] sm:$0xff]  ;;  %v19729_v9 = vpack.c.bf16 %v8290_v59, %v8290_v59  ;;  %v8748_v59 = vld [vmem:[#allocation10 + $0xd88] sm:$0xff] }
 0x5ee   :  { %14598 = vmatpush1.bf16.msra.mxu0 %v17937_v36  ;;  %v8683_v36 = vld [vmem:[#allocation10 + $0xb80] sm:$0xff] }
 0x5ef   :  { %14926 = vmatpush1.bf16.msra.mxu1 %v17939_v19  ;;  %14599 = vmatprep.subr.bf16.mxu0 %v17946_v6  ;;  %v8687_v19 = vld [vmem:[#allocation10 + $0xba0] sm:$0xff]  ;;  %v8684_v6 = vld [vmem:[#allocation10 + $0xb88] sm:$0xff] }
 0x5f0   :  { %14927 = vmatprep.subr.bf16.mxu1 %v17948_v34  ;;  %v8688_v34 = vld [vmem:[#allocation10 + $0xba8] sm:$0xff]  ;;  %v17993_v39 = vcombine.low %v8683_v36, %v8687_v19  ;;  %v8719_v10 = vld [vmem:[#allocation10 + $0xca0] sm:$0xff] }
 0x5f2   :  { %14600 = vmatpush1.bf16.msra.mxu0 %v17945_v54  ;;  %v17994_v54 = vcombine.high %v8683_v36, %v8687_v19  ;;  %v18026_v19 = vcombine.high %v8715_v35, %v8719_v10 }
 0x5f3   :  { %14928 = vmatpush1.bf16.msra.mxu1 %v17947_v23  ;;  %14601 = vmatprep.subr.bf16.mxu0 %v17954_v24  ;;  %v17996_v23 = vcombine.high %v8684_v6, %v8688_v34  ;;  %v8691_v24 = vld [vmem:[#allocation10 + $0xbc0] sm:$0xff] }
 0x5f4   :  { %14929 = vmatprep.subr.bf16.mxu1 %v17956_v25  ;;  %v8695_v25 = vld [vmem:[#allocation10 + $0xbe0] sm:$0xff] }
 0x5f6   :  { %14602 = vmatpush1.bf16.msra.mxu0 %v17953_v40  ;;  %v18806_v40 = vadd.f32 %v19648_v29, %v1790_v14  ;;  %v8724_v14 = vld [vmem:[#allocation10 + $0xcc8] sm:$0xff] }
 0x5f7   :  { %14930 = vmatpush1.bf16.msra.mxu1 %v17955_v43  ;;  %14603 = vmatprep.subr.bf16.mxu0 %v17962_v48  ;;  %v17995_v43 = vcombine.low %v8684_v6, %v8688_v34  ;;  %v18002_v48 = vcombine.high %v8691_v24, %v8695_v25  ;;  %v8723_v34 = vld [vmem:[#allocation10 + $0xcc0] sm:$0xff] }
 0x5f8   :  { %14931 = vmatprep.subr.bf16.mxu1 %v17964_v53  ;;  %v18004_v53 = vcombine.high %v8692_v30, %v8696_v32 }
 0x5fa   :  { %14604 = vmatpush1.bf16.msra.mxu0 %v17961_v56  ;;  %v8704_v56 = vld [vmem:[#allocation10 + $0xc28] sm:$0xff] }
 0x5fb   :  { %14932 = vmatpush1.bf16.msra.mxu1 %v17963_v50  ;;  %14605 = vmatprep.subr.bf16.mxu0 %v17970_v47  ;;  %v18001_v50 = vcombine.low %v8691_v24, %v8695_v25  ;;  %v8287_v47 = vmax.f32 %v18806_v40, 0.0  ;;  %v18012_v29 = vcombine.high %v8700_v16, %v8704_v56  ;;  %v18011_v42 = vcombine.low %v8700_v16, %v8704_v56  ;;  %v8744_v16 = vld [vmem:[#allocation10 + $0xd68] sm:$0xff] }
 0x5fc   :  { %14933 = vmatprep.subr.bf16.mxu1 %v17972_v41  ;;  %v18003_v41 = vcombine.low %v8692_v30, %v8696_v32  ;;  %v8735_v30 = vld [vmem:[#allocation10 + $0xd20] sm:$0xff]  ;;  %v8732_v32 = vld [vmem:[#allocation10 + $0xd08] sm:$0xff] }
 0x5fd   :  { %v18041_v56 = vcombine.low %v8731_v28, %v8735_v30 }
 0x5fe   :  { %14606 = vmatpush1.bf16.msra.mxu0 %v17969_v63  ;;  %v18009_v63 = vcombine.low %v8699_v55, %v8703_v46  ;;  %v8739_v55 = vld [vmem:[#allocation10 + $0xd40] sm:$0xff] }
 0x5ff   :  { %14934 = vmatpush1.bf16.msra.mxu1 %v17971_v38  ;;  %14607 = vmatprep.subr.bf16.mxu0 %v17978_v1  ;;  %v8708_v38 = vld [vmem:[#allocation10 + $0xc48] sm:$0xff]  ;;  %v8743_v46 = vld [vmem:[#allocation10 + $0xd60] sm:$0xff] }
 0x600   :  { %14935 = vmatprep.subr.bf16.mxu1 %v17980_v4  ;;  %v8712_v1 = vld [vmem:[#allocation10 + $0xc68] sm:$0xff]  ;;  %v19727_v4 = vpack.c.bf16 %v8287_v47, %v8287_v47  ;;  %v18050_v47 = vcombine.high %v8739_v55, %v8743_v46 }
 0x601   :  { %v18019_v36 = vcombine.low %v8708_v38, %v8712_v1 }
 0x602   :  { %14608 = vmatpush1.bf16.msra.mxu0 %v17977_v51  ;;  %v18020_v51 = vcombine.high %v8708_v38, %v8712_v1 }
 0x603   :  { %14936 = vmatpush1.bf16.msra.mxu1 %v17979_v11  ;;  %14609 = vmatprep.subr.bf16.mxu0 %v17986_v18  ;;  %v8716_v11 = vld [vmem:[#allocation10 + $0xc88] sm:$0xff] }
 0x604   :  { %14937 = vmatprep.subr.bf16.mxu1 %v17988_v13  ;;  %v8720_v18 = vld [vmem:[#allocation10 + $0xca8] sm:$0xff]  ;;  %v18017_v13 = vcombine.low %v8707_v52, %v8711_v62  ;;  %v18049_v62 = vcombine.low %v8739_v55, %v8743_v46 }
 0x605   :  { %v18028_v6 = vcombine.high %v8716_v11, %v8720_v18  ;;  %v8752_v52 = vld [vmem:[#allocation10 + $0xda8] sm:$0xff] }
 0x606   :  { %14610 = vmatpush1.bf16.msra.mxu0 %v17985_v20  ;;  %v8727_v20 = vld [vmem:[#allocation10 + $0xce0] sm:$0xff]  ;;  %v8776_v55 = vld [vmem:[#allocation10 + $0xe68] sm:$0xff] }
 0x607   :  { %14938 = vmatpush1.bf16.msra.mxu1 %v17987_v22  ;;  %14611 = vmatprep.subr.bf16.mxu0 %v17994_v54  ;;  %v8728_v22 = vld [vmem:[#allocation10 + $0xce8] sm:$0xff]  ;;  %v18025_v54 = vcombine.low %v8715_v35, %v8719_v10  ;;  %v18034_v24 = vcombine.high %v8723_v34, %v8727_v20  ;;  %v18033_v40 = vcombine.low %v8723_v34, %v8727_v20  ;;  %v8759_v35 = vld [vmem:[#allocation10 + $0xde0] sm:$0xff] }
 0x608   :  { %14939 = vmatprep.subr.bf16.mxu1 %v17996_v23  ;;  %v18027_v23 = vcombine.low %v8716_v11, %v8720_v18  ;;  %v18036_v25 = vcombine.high %v8724_v14, %v8728_v22  ;;  %v8756_v11 = vld [vmem:[#allocation10 + $0xdc8] sm:$0xff]  ;;  %v18059_v20 = vcombine.low %v8748_v59, %v8752_v52 }
 0x609   :  { %v8760_v18 = vld [vmem:[#allocation10 + $0xde8] sm:$0xff] }
 0x60a   :  { %14612 = vmatpush1.bf16.msra.mxu0 %v17993_v39  ;;  %v8736_v39 = vld [vmem:[#allocation10 + $0xd28] sm:$0xff] }
 0x60b   :  { %14940 = vmatpush1.bf16.msra.mxu1 %v17995_v43  ;;  %14613 = vmatprep.subr.bf16.mxu0 %v18002_v48  ;;  %v18035_v43 = vcombine.low %v8724_v14, %v8728_v22  ;;  %v18042_v48 = vcombine.high %v8731_v28, %v8735_v30  ;;  %v8768_v28 = vld [vmem:[#allocation10 + $0xe28] sm:$0xff] }
 0x60c   :  { %14941 = vmatprep.subr.bf16.mxu1 %v18004_v53  ;;  %v18044_v53 = vcombine.high %v8732_v32, %v8736_v39 }
 0x60e   :  { %14614 = vmatpush1.bf16.msra.mxu0 %v18001_v50  ;;  %v18043_v50 = vcombine.low %v8732_v32, %v8736_v39  ;;  %v18067_v32 = vcombine.low %v8756_v11, %v8760_v18 }
 0x60f   :  { %14942 = vmatpush1.bf16.msra.mxu1 %v18003_v41  ;;  %14624 = vmatprep.subr.bf16.mxu0 %v18010_v57  ;;  %v18052_v41 = vcombine.high %v8740_v8, %v8744_v16  ;;  %v8747_v57 = vld [vmem:[#allocation10 + $0xd80] sm:$0xff] }
 0x610   :  { %14952 = vmatprep.subr.bf16.mxu1 %v18012_v29  ;;  %v8751_v29 = vld [vmem:[#allocation10 + $0xda0] sm:$0xff] }
 0x611   :  { %14616 = vmatmul.mubr.bf16.vlgmr.msra.gmra.mrb[24].mxu0 %v19727_v4  ;;  %v18058_v38 = vcombine.high %v8747_v57, %v8751_v29 }
 0x612   :  { %14944 = vmatmul.mubr.bf16.vlgmr.msra.gmra.mrb[24].mxu1 %v19727_v4  ;;  %14625 = vmatpush1.bf16.msra.mxu0 %v18009_v63  ;;  %v18051_v63 = vcombine.low %v8740_v8, %v8744_v16 }
 0x613   :  { %14656 = vmatprep.mubr.bf16.mxu0 %v19729_v9  ;;  %14953 = vmatpush1.bf16.msra.mxu1 %v18011_v42  ;;  %v18060_v42 = vcombine.high %v8748_v59, %v8752_v52 }
 0x614   :  { %14984 = vmatprep.mubr.bf16.mxu1 %v19729_v9  ;;  %14626 = vmatprep.subr.bf16.mxu0 %v18018_v5  ;;  %v8755_v5 = vld [vmem:[#allocation10 + $0xdc0] sm:$0xff] }
 0x615   :  { %14954 = vmatprep.subr.bf16.mxu1 %v18020_v51  ;;  %v18066_v14 = vcombine.high %v8755_v5, %v8759_v35  ;;  %v18065_v30 = vcombine.low %v8755_v5, %v8759_v35  ;;  %v8792_v5 = vld [vmem:[#allocation10 + $0xee8] sm:$0xff] }
 0x616   :  { %14627 = vmatpush1.bf16.msra.mxu0 %v18017_v13 }
 0x617   :  { %14955 = vmatpush1.bf16.msra.mxu1 %v18019_v36  ;;  %14628 = vmatprep.subr.bf16.mxu0 %v18026_v19  ;;  %v18057_v19 = vcombine.low %v8747_v57, %v8751_v29  ;;  %v8784_v57 = vld [vmem:[#allocation10 + $0xea8] sm:$0xff] }
 0x618   :  { %14956 = vmatprep.subr.bf16.mxu1 %v18028_v6 }
 0x61a   :  { %14629 = vmatpush1.bf16.msra.mxu0 %v18025_v54  ;;  %v18068_v54 = vcombine.high %v8756_v11, %v8760_v18 }
 0x61b   :  { %14957 = vmatpush1.bf16.msra.mxu1 %v18027_v23  ;;  %14630 = vmatprep.subr.bf16.mxu0 %v18034_v24  ;;  %v8763_v23 = vld [vmem:[#allocation10 + $0xe00] sm:$0xff] }
 0x61c   :  { %14958 = vmatprep.subr.bf16.mxu1 %v18036_v25  ;;  %v8767_v24 = vld [vmem:[#allocation10 + $0xe20] sm:$0xff]  ;;  %v8764_v25 = vld [vmem:[#allocation10 + $0xe08] sm:$0xff] }
 0x61d   :  { %v18074_v39 = vcombine.high %v8763_v23, %v8767_v24  ;;  %v18073_v46 = vcombine.low %v8763_v23, %v8767_v24  ;;  %v18075_v8 = vcombine.low %v8764_v25, %v8768_v28  ;;  %v8803_v24 = vld [vmem:[#allocation10 + $0xf40] sm:$0xff] }
 0x61e   :  { %14631 = vmatpush1.bf16.msra.mxu0 %v18033_v40  ;;  %v18076_v40 = vcombine.high %v8764_v25, %v8768_v28  ;;  %v8807_v25 = vld [vmem:[#allocation10 + $0xf60] sm:$0xff]  ;;  %v8804_v28 = vld [vmem:[#allocation10 + $0xf48] sm:$0xff] }
 0x61f   :  { %14959 = vmatpush1.bf16.msra.mxu1 %v18035_v43  ;;  %14632 = vmatprep.subr.bf16.mxu0 %v18042_v48  ;;  %v8771_v43 = vld [vmem:[#allocation10 + $0xe40] sm:$0xff] }
 0x620   :  { %14960 = vmatprep.subr.bf16.mxu1 %v18044_v53  ;;  %v8775_v48 = vld [vmem:[#allocation10 + $0xe60] sm:$0xff]  ;;  %v8772_v53 = vld [vmem:[#allocation10 + $0xe48] sm:$0xff] }
 0x621   :  { %v18082_v16 = vcombine.high %v8771_v43, %v8775_v48  ;;  %v18081_v29 = vcombine.low %v8771_v43, %v8775_v48  ;;  %v18083_v59 = vcombine.low %v8772_v53, %v8776_v55  ;;  %v8811_v48 = vld [vmem:[#allocation10 + $0xf80] sm:$0xff] }
 0x622   :  { %14633 = vmatpush1.bf16.msra.mxu0 %v18041_v56  ;;  %v18084_v56 = vcombine.high %v8772_v53, %v8776_v55  ;;  %v8815_v53 = vld [vmem:[#allocation10 + $0xfa0] sm:$0xff]  ;;  %v8812_v55 = vld [vmem:[#allocation10 + $0xf88] sm:$0xff] }
 0x623   :  { %14961 = vmatpush1.bf16.msra.mxu1 %v18043_v50  ;;  %14634 = vmatprep.subr.bf16.mxu0 %v18050_v47  ;;  %v8779_v50 = vld [vmem:[#allocation10 + $0xe80] sm:$0xff] }
 0x624   :  { %v19735_v1 = vpop.f32.mrb[20].mxu0  ;;  %14962 = vmatprep.subr.bf16.mxu1 %v18052_v41  ;;  %v8783_v47 = vld [vmem:[#allocation10 + $0xea0] sm:$0xff]  ;;  %v8780_v41 = vld [vmem:[#allocation10 + $0xe88] sm:$0xff] }
 0x625   :  { %v19737_v10 = vpop.f32.mrb[20].mxu1  ;;  %v19739_v51 = vpop.f32.mrb[21].mxu0  ;;  %v18090_v52 = vcombine.high %v8779_v50, %v8783_v47  ;;  %v18089_v35 = vcombine.low %v8779_v50, %v8783_v47  ;;  %v18091_v11 = vcombine.low %v8780_v41, %v8784_v57  ;;  %v18122_v47 = vcombine.high %v8811_v48, %v8815_v53 }
 0x626   :  { %v19741_v13 = vpop.f32.mrb[21].mxu1  ;;  %v8116_v36 = vpop.f32.mrb[22].mxu0  ;;  %14635 = vmatpush1.bf16.msra.mxu0 %v18049_v62  ;;  %v18092_v62 = vcombine.high %v8780_v41, %v8784_v57  ;;  %v8819_v57 = vld [vmem:[#allocation10 + $0xfc0] sm:$0xff] }
 0x627   :  { %v8280_v6 = vpop.f32.mrb[22].mxu1  ;;  %14963 = vmatpush1.bf16.msra.mxu1 %v18051_v63  ;;  %v8117_v34 = vpop.f32.mrb[23].mxu0  ;;  %14636 = vmatprep.subr.bf16.mxu0 %v18058_v38  ;;  %v8787_v63 = vld [vmem:[#allocation10 + $0xec0] sm:$0xff] }
 0x628   :  { %v8281_v22 = vpop.f32.mrb[23].mxu1  ;;  %14964 = vmatprep.subr.bf16.mxu1 %v18060_v42  ;;  %v8791_v38 = vld [vmem:[#allocation10 + $0xee0] sm:$0xff]  ;;  %v8788_v42 = vld [vmem:[#allocation10 + $0xec8] sm:$0xff] }
 0x629   :  { %v18098_v18 = vcombine.high %v8787_v63, %v8791_v38  ;;  %v18100_v36 = vcombine.high %v8788_v42, %v8792_v5  ;;  %v8799_v6 = vld [vmem:[#allocation10 + $0xf20] sm:$0xff]  ;;  %v8796_v34 = vld [vmem:[#allocation10 + $0xf08] sm:$0xff]  ;;  %v18099_v22 = vcombine.low %v8788_v42, %v8792_v5 }
 0x62a   :  { %14637 = vmatpush1.bf16.msra.mxu0 %v18057_v19  ;;  %v8795_v19 = vld [vmem:[#allocation10 + $0xf00] sm:$0xff] }
 0x62b   :  { %14965 = vmatpush1.bf16.msra.mxu1 %v18059_v20  ;;  %14638 = vmatprep.subr.bf16.mxu0 %v18066_v14  ;;  %v8800_v20 = vld [vmem:[#allocation10 + $0xf28] sm:$0xff]  ;;  %v18097_v14 = vcombine.low %v8787_v63, %v8791_v38  ;;  %v18121_v63 = vcombine.low %v8811_v48, %v8815_v53 }
 0x62c   :  { %14966 = vmatprep.subr.bf16.mxu1 %v18068_v54  ;;  %v18106_v54 = vcombine.high %v8795_v19, %v8799_v6  ;;  %v18108_v23 = vcombine.high %v8796_v34, %v8800_v20  ;;  %v8844_v53 = vld [vmem:[#allocation10 + $0x1088] sm:$0xff] }
 0x62e   :  { %14639 = vmatpush1.bf16.msra.mxu0 %v18065_v30  ;;  %v8808_v30 = vld [vmem:[#allocation10 + $0xf68] sm:$0xff] }
 0x62f   :  { %14967 = vmatpush1.bf16.msra.mxu1 %v18067_v32  ;;  %14640 = vmatprep.subr.bf16.mxu0 %v18074_v39  ;;  %v18105_v32 = vcombine.low %v8795_v19, %v8799_v6  ;;  %v18107_v39 = vcombine.low %v8796_v34, %v8800_v20  ;;  %v18116_v43 = vcombine.high %v8804_v28, %v8808_v30  ;;  %v8832_v19 = vld [vmem:[#allocation10 + $0x1028] sm:$0xff] }
 0x630   :  { %14968 = vmatprep.subr.bf16.mxu1 %v18076_v40  ;;  %v18114_v40 = vcombine.high %v8803_v24, %v8807_v25  ;;  %v18115_v50 = vcombine.low %v8804_v28, %v8808_v30  ;;  %v8840_v28 = vld [vmem:[#allocation10 + $0x1068] sm:$0xff] }
 0x632   :  { %14641 = vmatpush1.bf16.msra.mxu0 %v18073_v46  ;;  %v8816_v46 = vld [vmem:[#allocation10 + $0xfa8] sm:$0xff] }
 0x633   :  { %14969 = vmatpush1.bf16.msra.mxu1 %v18075_v8  ;;  %14642 = vmatprep.subr.bf16.mxu0 %v18082_v16  ;;  %v19743_v8 = vld [vmem:[#allocation8 + $0x8] sm:$0xff]  ;;  %v18113_v16 = vcombine.low %v8803_v24, %v8807_v25  ;;  %v18124_v41 = vcombine.high %v8812_v55, %v8816_v46  ;;  %v8836_v25 = vld [vmem:[#allocation10 + $0x1048] sm:$0xff] }
 0x634   :  { %14970 = vmatprep.subr.bf16.mxu1 %v18084_v56  ;;  %v1798_v56 = vrot.slane %v19719_v27, %v19602_v3  ;;  %v18123_v27 = vcombine.low %v8812_v55, %v8816_v46  ;;  %v18148_v48 = vcombine.high %v8836_v25, %v8840_v28  ;;  %v8848_v55 = vld [vmem:[#allocation10 + $0x10a8] sm:$0xff] }
 0x636   :  { %14643 = vmatpush1.bf16.msra.mxu0 %v18081_v29  ;;  %v8823_v29 = vld [vmem:[#allocation10 + $0xfe0] sm:$0xff]  ;;  %v18808_v38 = vadd.f32 %v19650_v37, %v1798_v56 }
 0x637   :  { %14971 = vmatpush1.bf16.msra.mxu1 %v18083_v59  ;;  %14644 = vmatprep.subr.bf16.mxu0 %v18090_v52  ;;  %v1810_v59 = vrot.slane %v19743_v8, %v19528_v17  ;;  %v8820_v52 = vld [vmem:[#allocation10 + $0xfc8] sm:$0xff]  ;;  %v18130_v42 = vcombine.high %v8819_v57, %v8823_v29  ;;  %v18129_v6 = vcombine.low %v8819_v57, %v8823_v29 }
 0x638   :  { %14972 = vmatprep.subr.bf16.mxu1 %v18092_v62  ;;  %v8824_v62 = vld [vmem:[#allocation10 + $0xfe8] sm:$0xff]  ;;  %v8289_v34 = vmax.f32 %v18808_v38, 0.0  ;;  %v8859_v38 = vld [vmem:[#allocation10 + $0x1100] sm:$0xff] }
 0x639   :  { %v18132_v5 = vcombine.high %v8820_v52, %v8824_v62  ;;  %v18131_v20 = vcombine.low %v8820_v52, %v8824_v62  ;;  %v8852_v57 = vld [vmem:[#allocation10 + $0x10c8] sm:$0xff]  ;;  %v18155_v52 = vcombine.low %v8844_v53, %v8848_v55 }
 0x63a   :  { %14645 = vmatpush1.bf16.msra.mxu0 %v18089_v35  ;;  %v8827_v35 = vld [vmem:[#allocation10 + $0x1000] sm:$0xff]  ;;  %v19751_v30 = vpack.c.bf16 %v8289_v34, %v8289_v34  ;;  %v8856_v29 = vld [vmem:[#allocation10 + $0x10e8] sm:$0xff] }
 0x63b   :  { %14973 = vmatpush1.bf16.msra.mxu1 %v18091_v11  ;;  %14646 = vmatprep.subr.bf16.mxu0 %v18098_v18  ;;  %v8831_v11 = vld [vmem:[#allocation10 + $0x1020] sm:$0xff]  ;;  %v18811_v18 = vadd.f32 %v19676_v45, %v1810_v59  ;;  %v8868_v34 = vld [vmem:[#allocation10 + $0x1148] sm:$0xff] }
 0x63c   :  { %14974 = vmatprep.subr.bf16.mxu1 %v18100_v36  ;;  %v8828_v36 = vld [vmem:[#allocation10 + $0x1008] sm:$0xff]  ;;  %v18137_v24 = vcombine.low %v8827_v35, %v8831_v11 }
 0x63d   :  { %v18140_v37 = vcombine.high %v8828_v36, %v8832_v19  ;;  %v18139_v45 = vcombine.low %v8828_v36, %v8832_v19  ;;  %v8867_v19 = vld [vmem:[#allocation10 + $0x1140] sm:$0xff] }
 0x63e   :  { %14647 = vmatpush1.bf16.msra.mxu0 %v18097_v14  ;;  %v18138_v14 = vcombine.high %v8827_v35, %v8831_v11  ;;  %v18163_v11 = vcombine.low %v8852_v57, %v8856_v29 }
 0x63f   :  { %14975 = vmatpush1.bf16.msra.mxu1 %v18099_v22  ;;  %14648 = vmatprep.subr.bf16.mxu0 %v18106_v54  ;;  %v8292_v22 = vmax.f32 %v18811_v18, 0.0  ;;  %v8835_v54 = vld [vmem:[#allocation10 + $0x1040] sm:$0xff] }
 0x640   :  { %14976 = vmatprep.subr.bf16.mxu1 %v18108_v23  ;;  %v8839_v23 = vld [vmem:[#allocation10 + $0x1060] sm:$0xff] }
 0x641   :  { %v18145_v46 = vcombine.low %v8835_v54, %v8839_v23 }
 0x642   :  { %14649 = vmatpush1.bf16.msra.mxu0 %v18105_v32  ;;  %v18146_v32 = vcombine.high %v8835_v54, %v8839_v23  ;;  %v8875_v23 = vld [vmem:[#allocation10 + $0x1180] sm:$0xff] }
 0x643   :  { %14977 = vmatpush1.bf16.msra.mxu1 %v18107_v39  ;;  %14650 = vmatprep.subr.bf16.mxu0 %v18114_v40  ;;  %v8843_v39 = vld [vmem:[#allocation10 + $0x1080] sm:$0xff] }
 0x644   :  { %14978 = vmatprep.subr.bf16.mxu1 %v18116_v43  ;;  %v8847_v40 = vld [vmem:[#allocation10 + $0x10a0] sm:$0xff]  ;;  %v19753_v43 = vpack.c.bf16 %v8292_v22, %v8292_v22 }
 0x645   :  { %v18154_v56 = vcombine.high %v8843_v39, %v8847_v40  ;;  %v18153_v59 = vcombine.low %v8843_v39, %v8847_v40 }
 0x646   :  { %14651 = vmatpush1.bf16.msra.mxu0 %v18113_v16  ;;  %v18147_v16 = vcombine.low %v8836_v25, %v8840_v28  ;;  %v8876_v25 = vld [vmem:[#allocation10 + $0x1188] sm:$0xff] }
 0x647   :  { %14979 = vmatpush1.bf16.msra.mxu1 %v18115_v50  ;;  %14652 = vmatprep.subr.bf16.mxu0 %v18122_v47  ;;  %v18156_v50 = vcombine.high %v8844_v53, %v8848_v55  ;;  %v8851_v47 = vld [vmem:[#allocation10 + $0x10c0] sm:$0xff]  ;;  %v8880_v28 = vld [vmem:[#allocation10 + $0x11a8] sm:$0xff] }
 0x648   :  { %14980 = vmatprep.subr.bf16.mxu1 %v18124_v41  ;;  %v8855_v41 = vld [vmem:[#allocation10 + $0x10e0] sm:$0xff]  ;;  %v18188_v40 = vcombine.high %v8876_v25, %v8880_v28  ;;  %v8884_v55 = vld [vmem:[#allocation10 + $0x11c8] sm:$0xff] }
 0x649   :  { %v18162_v62 = vcombine.high %v8851_v47, %v8855_v41  ;;  %v18161_v35 = vcombine.low %v8851_v47, %v8855_v41  ;;  %v8887_v53 = vld [vmem:[#allocation10 + $0x11e0] sm:$0xff] }
 0x64a   :  { %14653 = vmatpush1.bf16.msra.mxu0 %v18121_v63  ;;  %v18164_v63 = vcombine.high %v8852_v57, %v8856_v29  ;;  %v8891_v41 = vld [vmem:[#allocation10 + $0x1200] sm:$0xff]  ;;  %v8892_v29 = vld [vmem:[#allocation10 + $0x1208] sm:$0xff] }
 0x64b   :  { %14981 = vmatpush1.bf16.msra.mxu1 %v18123_v27  ;;  %14654 = vmatprep.subr.bf16.mxu0 %v18130_v42  ;;  %v8863_v27 = vld [vmem:[#allocation10 + $0x1120] sm:$0xff]  ;;  %v8860_v42 = vld [vmem:[#allocation10 + $0x1108] sm:$0xff] }
 0x64c   :  { %14982 = vmatprep.subr.bf16.mxu1 %v18132_v5  ;;  %v8864_v5 = vld [vmem:[#allocation10 + $0x1128] sm:$0xff]  ;;  %v18170_v18 = vcombine.high %v8859_v38, %v8863_v27  ;;  %v8895_v57 = vld [vmem:[#allocation10 + $0x1220] sm:$0xff] }
 0x64d   :  { %v18172_v36 = vcombine.high %v8860_v42, %v8864_v5 }
 0x64e   :  { %14655 = vmatpush1.bf16.msra.mxu0 %v18129_v6  ;;  %v8871_v6 = vld [vmem:[#allocation10 + $0x1160] sm:$0xff] }
 0x64f   :  { %14983 = vmatpush1.bf16.msra.mxu1 %v18131_v20  ;;  %14665 = vmatprep.subr.bf16.mxu0 %v18138_v14  ;;  %v8872_v20 = vld [vmem:[#allocation10 + $0x1168] sm:$0xff]  ;;  %v18169_v14 = vcombine.low %v8859_v38, %v8863_v27  ;;  %v18178_v22 = vcombine.high %v8867_v19, %v8871_v6  ;;  %v8899_v27 = vld [vmem:[#allocation10 + $0x1240] sm:$0xff] }
 0x650   :  { %14993 = vmatprep.subr.bf16.mxu1 %v18140_v37  ;;  %v18171_v37 = vcombine.low %v8860_v42, %v8864_v5  ;;  %v18180_v54 = vcombine.high %v8868_v34, %v8872_v20  ;;  %v8903_v42 = vld [vmem:[#allocation10 + $0x1260] sm:$0xff]  ;;  %v8900_v5 = vld [vmem:[#allocation10 + $0x1248] sm:$0xff] }
 0x651   :  { %14657 = vmatmul.mubr.bf16.vlgmr.msra.gmra.mrb[24].mxu0 %v19751_v30 }
 0x652   :  { %14985 = vmatmul.mubr.bf16.vlgmr.msra.gmra.mrb[24].mxu1 %v19751_v30  ;;  %14666 = vmatpush1.bf16.msra.mxu0 %v18137_v24  ;;  %v8879_v24 = vld [vmem:[#allocation10 + $0x11a0] sm:$0xff] }
 0x653   :  { %14697 = vmatprep.mubr.bf16.mxu0 %v19753_v43  ;;  %14994 = vmatpush1.bf16.msra.mxu1 %v18139_v45  ;;  %v18177_v45 = vcombine.low %v8867_v19, %v8871_v6  ;;  %v18186_v39 = vcombine.high %v8875_v23, %v8879_v24  ;;  %v8907_v6 = vld [vmem:[#allocation10 + $0x1280] sm:$0xff] }
 0x654   :  { %15025 = vmatprep.mubr.bf16.mxu1 %v19753_v43  ;;  %14667 = vmatprep.subr.bf16.mxu0 %v18146_v32  ;;  %v18179_v32 = vcombine.low %v8868_v34, %v8872_v20  ;;  %v8911_v34 = vld [vmem:[#allocation10 + $0x12a0] sm:$0xff]  ;;  %v8908_v20 = vld [vmem:[#allocation10 + $0x1288] sm:$0xff] }
 0x655   :  { %14995 = vmatprep.subr.bf16.mxu1 %v18148_v48  ;;  %v8883_v48 = vld [vmem:[#allocation10 + $0x11c0] sm:$0xff] }
 0x656   :  { %14668 = vmatpush1.bf16.msra.mxu0 %v18145_v46  ;;  %v8888_v46 = vld [vmem:[#allocation10 + $0x11e8] sm:$0xff] }
 0x657   :  { %14996 = vmatpush1.bf16.msra.mxu1 %v18147_v16  ;;  %14669 = vmatprep.subr.bf16.mxu0 %v18154_v56  ;;  %v18185_v16 = vcombine.low %v8875_v23, %v8879_v24  ;;  %v18187_v56 = vcombine.low %v8876_v25, %v8880_v28  ;;  %v18196_v47 = vcombine.high %v8884_v55, %v8888_v46  ;;  %v8915_v24 = vld [vmem:[#allocation10 + $0x12c0] sm:$0xff]  ;;  %v8916_v28 = vld [vmem:[#allocation10 + $0x12c8] sm:$0xff] }
 0x658   :  { %14997 = vmatprep.subr.bf16.mxu1 %v18156_v50  ;;  %v18194_v50 = vcombine.high %v8883_v48, %v8887_v53  ;;  %v8919_v25 = vld [vmem:[#allocation10 + $0x12e0] sm:$0xff] }
 0x65a   :  { %14670 = vmatpush1.bf16.msra.mxu0 %v18153_v59  ;;  %v8896_v59 = vld [vmem:[#allocation10 + $0x1228] sm:$0xff] }
 0x65b   :  { %14998 = vmatpush1.bf16.msra.mxu1 %v18155_v52  ;;  %14671 = vmatprep.subr.bf16.mxu0 %v18162_v62  ;;  %v18193_v52 = vcombine.low %v8883_v48, %v8887_v53  ;;  %v18195_v62 = vcombine.low %v8884_v55, %v8888_v46  ;;  %v18204_v38 = vcombine.high %v8892_v29, %v8896_v59  ;;  %v8923_v53 = vld [vmem:[#allocation10 + $0x1300] sm:$0xff]  ;;  %v8924_v46 = vld [vmem:[#allocation10 + $0x1308] sm:$0xff] }
 0x65c   :  { %14999 = vmatprep.subr.bf16.mxu1 %v18164_v63  ;;  %v18202_v63 = vcombine.high %v8891_v41, %v8895_v57  ;;  %v8927_v55 = vld [vmem:[#allocation10 + $0x1320] sm:$0xff] }
 0x65e   :  { %14672 = vmatpush1.bf16.msra.mxu0 %v18161_v35  ;;  %v8904_v35 = vld [vmem:[#allocation10 + $0x1268] sm:$0xff] }
 0x65f   :  { %15000 = vmatpush1.bf16.msra.mxu1 %v18163_v11  ;;  %14673 = vmatprep.subr.bf16.mxu0 %v18170_v18  ;;  %v18201_v11 = vcombine.low %v8891_v41, %v8895_v57  ;;  %v18203_v18 = vcombine.low %v8892_v29, %v8896_v59  ;;  %v18212_v19 = vcombine.high %v8900_v5, %v8904_v35  ;;  %v8931_v57 = vld [vmem:[#allocation10 + $0x1340] sm:$0xff]  ;;  %v8932_v59 = vld [vmem:[#allocation10 + $0x1348] sm:$0xff] }
 0x660   :  { %15001 = vmatprep.subr.bf16.mxu1 %v18172_v36  ;;  %v18210_v36 = vcombine.high %v8899_v27, %v8903_v42  ;;  %v8935_v29 = vld [vmem:[#allocation10 + $0x1360] sm:$0xff] }
 0x662   :  { %14674 = vmatpush1.bf16.msra.mxu0 %v18169_v14  ;;  %v8912_v14 = vld [vmem:[#allocation10 + $0x12a8] sm:$0xff] }
 0x663   :  { %15002 = vmatpush1.bf16.msra.mxu1 %v18171_v37  ;;  %14675 = vmatprep.subr.bf16.mxu0 %v18178_v22  ;;  %v18209_v37 = vcombine.low %v8899_v27, %v8903_v42  ;;  %v18211_v22 = vcombine.low %v8900_v5, %v8904_v35  ;;  %v18220_v23 = vcombine.high %v8908_v20, %v8912_v14  ;;  %v8939_v42 = vld [vmem:[#allocation10 + $0x1380] sm:$0xff]  ;;  %v8940_v35 = vld [vmem:[#allocation10 + $0x1388] sm:$0xff] }
 0x664   :  { %15003 = vmatprep.subr.bf16.mxu1 %v18180_v54  ;;  %v18218_v54 = vcombine.high %v8907_v6, %v8911_v34  ;;  %v8943_v5 = vld [vmem:[#allocation10 + $0x13a0] sm:$0xff] }
 0x666   :  { %14676 = vmatpush1.bf16.msra.mxu0 %v18177_v45  ;;  %v8920_v45 = vld [vmem:[#allocation10 + $0x12e8] sm:$0xff] }
 0x667   :  { %15004 = vmatpush1.bf16.msra.mxu1 %v18179_v32  ;;  %14677 = vmatprep.subr.bf16.mxu0 %v18186_v39  ;;  %v18217_v32 = vcombine.low %v8907_v6, %v8911_v34  ;;  %v18219_v39 = vcombine.low %v8908_v20, %v8912_v14  ;;  %v18228_v48 = vcombine.high %v8916_v28, %v8920_v45  ;;  %v8947_v20 = vld [vmem:[#allocation10 + $0x13c0] sm:$0xff] }
 0x668   :  { %15005 = vmatprep.subr.bf16.mxu1 %v18188_v40  ;;  %v18226_v40 = vcombine.high %v8915_v24, %v8919_v25  ;;  %v18250_v6 = vcombine.high %v8939_v42, %v8943_v5  ;;  %v8951_v14 = vld [vmem:[#allocation10 + $0x13e0] sm:$0xff] }
 0x66a   :  { %14678 = vmatpush1.bf16.msra.mxu0 %v18185_v16  ;;  %v8928_v16 = vld [vmem:[#allocation10 + $0x1328] sm:$0xff] }
 0x66b   :  { %15006 = vmatpush1.bf16.msra.mxu1 %v18187_v56  ;;  %14679 = vmatprep.subr.bf16.mxu0 %v18194_v50  ;;  %v18225_v56 = vcombine.low %v8915_v24, %v8919_v25  ;;  %v18227_v50 = vcombine.low %v8916_v28, %v8920_v45  ;;  %v18236_v41 = vcombine.high %v8924_v46, %v8928_v16 }
 0x66c   :  { %15007 = vmatprep.subr.bf16.mxu1 %v18196_v47  ;;  %v18234_v47 = vcombine.high %v8923_v53, %v8927_v55  ;;  %v18258_v28 = vcombine.high %v8947_v20, %v8951_v14 }
 0x66e   :  { %14680 = vmatpush1.bf16.msra.mxu0 %v18193_v52  ;;  %v8936_v52 = vld [vmem:[#allocation10 + $0x1368] sm:$0xff] }
 0x66f   :  { %15008 = vmatpush1.bf16.msra.mxu1 %v18195_v62  ;;  %14681 = vmatprep.subr.bf16.mxu0 %v18202_v63  ;;  %v18233_v62 = vcombine.low %v8923_v53, %v8927_v55  ;;  %v18235_v63 = vcombine.low %v8924_v46, %v8928_v16  ;;  %v18244_v27 = vcombine.high %v8932_v59, %v8936_v52  ;;  %v8960_v53 = vld [vmem:[#allocation10 + $0x1428] sm:$0xff] }
 0x670   :  { %15009 = vmatprep.subr.bf16.mxu1 %v18204_v38  ;;  %v18242_v38 = vcombine.high %v8931_v57, %v8935_v29  ;;  %v18257_v55 = vcombine.low %v8947_v20, %v8951_v14  ;;  %v8980_v20 = vld [vmem:[#allocation10 + $0x14c8] sm:$0xff] }
 0x671   :  { %v8984_v14 = vld [vmem:[#allocation10 + $0x14e8] sm:$0xff] }
 0x672   :  { %14682 = vmatpush1.bf16.msra.mxu0 %v18201_v11  ;;  %v8944_v11 = vld [vmem:[#allocation10 + $0x13a8] sm:$0xff] }
 0x673   :  { %15010 = vmatpush1.bf16.msra.mxu1 %v18203_v18  ;;  %14683 = vmatprep.subr.bf16.mxu0 %v18210_v36  ;;  %v18241_v18 = vcombine.low %v8931_v57, %v8935_v29  ;;  %v1806_v36 = vrot.slane %v19743_v8, %v19523_v15  ;;  %v18252_v34 = vcombine.high %v8940_v35, %v8944_v11  ;;  %v8964_v29 = vld [vmem:[#allocation10 + $0x1448] sm:$0xff] }
 0x674   :  { %15011 = vmatprep.subr.bf16.mxu1 %v18212_v19  ;;  %v18243_v19 = vcombine.low %v8932_v59, %v8936_v52  ;;  %v18251_v25 = vcombine.low %v8940_v35, %v8944_v11  ;;  %v8968_v59 = vld [vmem:[#allocation10 + $0x1468] sm:$0xff] }
 0x675   :  { %v18810_v24 = vadd.f32 %v19672_v33, %v1806_v36  ;;  %v8976_v35 = vld [vmem:[#allocation10 + $0x14a8] sm:$0xff] }
 0x676   :  { %14684 = vmatpush1.bf16.msra.mxu0 %v18209_v37  ;;  %v1818_v37 = vrot.slane %v19743_v8, %v19535_v21 }
 0x677   :  { %15012 = vmatpush1.bf16.msra.mxu1 %v18211_v22  ;;  %14685 = vmatprep.subr.bf16.mxu0 %v18218_v54  ;;  %v8948_v22 = vld [vmem:[#allocation10 + $0x13c8] sm:$0xff]  ;;  %v8291_v46 = vmax.f32 %v18810_v24, 0.0  ;;  %v8987_v24 = vld [vmem:[#allocation10 + $0x1500] sm:$0xff] }
 0x678   :  { %15013 = vmatprep.subr.bf16.mxu1 %v18220_v23  ;;  %v8952_v54 = vld [vmem:[#allocation10 + $0x13e8] sm:$0xff]  ;;  %v18249_v23 = vcombine.low %v8939_v42, %v8943_v5  ;;  %v18276_v42 = vcombine.high %v8964_v29, %v8968_v59 }
 0x679   :  { %v18260_v45 = vcombine.high %v8948_v22, %v8952_v54  ;;  %v18259_v16 = vcombine.low %v8948_v22, %v8952_v54  ;;  %v19765_v52 = vpack.c.bf16 %v8291_v46, %v8291_v46  ;;  %v8972_v5 = vld [vmem:[#allocation10 + $0x1488] sm:$0xff] }
 0x67a   :  { %14686 = vmatpush1.bf16.msra.mxu0 %v18217_v32  ;;  %v8955_v32 = vld [vmem:[#allocation10 + $0x1400] sm:$0xff]  ;;  %v18283_v22 = vcombine.low %v8972_v5, %v8976_v35  ;;  %v8996_v46 = vld [vmem:[#allocation10 + $0x1548] sm:$0xff] }
 0x67b   :  { %15014 = vmatpush1.bf16.msra.mxu1 %v18219_v39  ;;  %14687 = vmatprep.subr.bf16.mxu0 %v18226_v40  ;;  %v8959_v39 = vld [vmem:[#allocation10 + $0x1420] sm:$0xff]  ;;  %v18813_v40 = vadd.f32 %v19678_v49, %v1818_v37 }
 0x67c   :  { %15015 = vmatprep.subr.bf16.mxu1 %v18228_v48  ;;  %v8956_v48 = vld [vmem:[#allocation10 + $0x1408] sm:$0xff]  ;;  %v18265_v57 = vcombine.low %v8955_v32, %v8959_v39 }
 0x67d   :  { %v18268_v33 = vcombine.high %v8956_v48, %v8960_v53  ;;  %v18267_v49 = vcombine.low %v8956_v48, %v8960_v53  ;;  %v8995_v53 = vld [vmem:[#allocation10 + $0x1540] sm:$0xff] }
 0x67e   :  { %14688 = vmatpush1.bf16.msra.mxu0 %v18225_v56  ;;  %v18266_v56 = vcombine.high %v8955_v32, %v8959_v39  ;;  %v18291_v39 = vcombine.low %v8980_v20, %v8984_v14 }
 0x67f   :  { %15016 = vmatpush1.bf16.msra.mxu1 %v18227_v50  ;;  %14689 = vmatprep.subr.bf16.mxu0 %v18234_v47  ;;  %v8294_v50 = vmax.f32 %v18813_v40, 0.0  ;;  %v8963_v47 = vld [vmem:[#allocation10 + $0x1440] sm:$0xff] }
 0x680   :  { %15017 = vmatprep.subr.bf16.mxu1 %v18236_v41  ;;  %v8967_v41 = vld [vmem:[#allocation10 + $0x1460] sm:$0xff] }
 0x681   :  { %v18273_v11 = vcombine.low %v8963_v47, %v8967_v41 }
 0x682   :  { %14690 = vmatpush1.bf16.msra.mxu0 %v18233_v62  ;;  %v18274_v62 = vcombine.high %v8963_v47, %v8967_v41  ;;  %v9003_v41 = vld [vmem:[#allocation10 + $0x1580] sm:$0xff] }
 0x683   :  { %15018 = vmatpush1.bf16.msra.mxu1 %v18235_v63  ;;  %14691 = vmatprep.subr.bf16.mxu0 %v18242_v38  ;;  %v8971_v63 = vld [vmem:[#allocation10 + $0x1480] sm:$0xff] }
 0x684   :  { %15019 = vmatprep.subr.bf16.mxu1 %v18244_v27  ;;  %v8975_v38 = vld [vmem:[#allocation10 + $0x14a0] sm:$0xff]  ;;  %v19767_v27 = vpack.c.bf16 %v8294_v50, %v8294_v50 }
 0x685   :  { %v18282_v36 = vcombine.high %v8971_v63, %v8975_v38  ;;  %v18281_v37 = vcombine.low %v8971_v63, %v8975_v38 }
 0x686   :  { %14692 = vmatpush1.bf16.msra.mxu0 %v18241_v18  ;;  %v18275_v18 = vcombine.low %v8964_v29, %v8968_v59  ;;  %v9004_v29 = vld [vmem:[#allocation10 + $0x1588] sm:$0xff] }
 0x687   :  { %15020 = vmatpush1.bf16.msra.mxu1 %v18243_v19  ;;  %14693 = vmatprep.subr.bf16.mxu0 %v18250_v6  ;;  %v18284_v19 = vcombine.high %v8972_v5, %v8976_v35  ;;  %v8979_v6 = vld [vmem:[#allocation10 + $0x14c0] sm:$0xff]  ;;  %v9008_v59 = vld [vmem:[#allocation10 + $0x15a8] sm:$0xff] }
 0x688   :  { %15021 = vmatprep.subr.bf16.mxu1 %v18252_v34  ;;  %v8983_v34 = vld [vmem:[#allocation10 + $0x14e0] sm:$0xff]  ;;  %v18316_v38 = vcombine.high %v9004_v29, %v9008_v59  ;;  %v9012_v35 = vld [vmem:[#allocation10 + $0x15c8] sm:$0xff] }
 0x689   :  { %v18290_v54 = vcombine.high %v8979_v6, %v8983_v34  ;;  %v18289_v32 = vcombine.low %v8979_v6, %v8983_v34  ;;  %v9015_v5 = vld [vmem:[#allocation10 + $0x15e0] sm:$0xff] }
 0x68a   :  { %14694 = vmatpush1.bf16.msra.mxu0 %v18249_v23  ;;  %v18292_v23 = vcombine.high %v8980_v20, %v8984_v14  ;;  %v9019_v34 = vld [vmem:[#allocation10 + $0x1600] sm:$0xff]  ;;  %v9020_v14 = vld [vmem:[#allocation10 + $0x1608] sm:$0xff] }
 0x68b   :  { %15022 = vmatpush1.bf16.msra.mxu1 %v18251_v25  ;;  %14695 = vmatprep.subr.bf16.mxu0 %v18258_v28  ;;  %v8991_v25 = vld [vmem:[#allocation10 + $0x1520] sm:$0xff]  ;;  %v8988_v28 = vld [vmem:[#allocation10 + $0x1508] sm:$0xff] }
 0x68c   :  { %15023 = vmatprep.subr.bf16.mxu1 %v18260_v45  ;;  %v8992_v45 = vld [vmem:[#allocation10 + $0x1528] sm:$0xff]  ;;  %v18298_v40 = vcombine.high %v8987_v24, %v8991_v25  ;;  %v9023_v20 = vld [vmem:[#allocation10 + $0x1620] sm:$0xff] }
 0x68d   :  { %v18300_v48 = vcombine.high %v8988_v28, %v8992_v45 }
 0x68e   :  { %14696 = vmatpush1.bf16.msra.mxu0 %v18257_v55  ;;  %v8999_v55 = vld [vmem:[#allocation10 + $0x1560] sm:$0xff] }
 0x68f   :  { %15024 = vmatpush1.bf16.msra.mxu1 %v18259_v16  ;;  %14706 = vmatprep.subr.bf16.mxu0 %v18266_v56  ;;  %v9000_v16 = vld [vmem:[#allocation10 + $0x1568] sm:$0xff]  ;;  %v18297_v56 = vcombine.low %v8987_v24, %v8991_v25  ;;  %v18306_v50 = vcombine.high %v8995_v53, %v8999_v55  ;;  %v9027_v25 = vld [vmem:[#allocation10 + $0x1640] sm:$0xff] }
 0x690   :  { %15034 = vmatprep.subr.bf16.mxu1 %v18268_v33  ;;  %v18299_v33 = vcombine.low %v8988_v28, %v8992_v45  ;;  %v18308_v47 = vcombine.high %v8996_v46, %v9000_v16  ;;  %v9031_v28 = vld [vmem:[#allocation10 + $0x1660] sm:$0xff]  ;;  %v9028_v45 = vld [vmem:[#allocation10 + $0x1648] sm:$0xff] }
 0x691   :  { %14698 = vmatmul.mubr.bf16.vlgmr.msra.gmra.mrb[24].mxu0 %v19765_v52 }
 0x692   :  { %15026 = vmatmul.mubr.bf16.vlgmr.msra.gmra.mrb[24].mxu1 %v19765_v52  ;;  %14707 = vmatpush1.bf16.msra.mxu0 %v18265_v57  ;;  %v9007_v57 = vld [vmem:[#allocation10 + $0x15a0] sm:$0xff] }
 0x693   :  { %14738 = vmatprep.mubr.bf16.mxu0 %v19767_v27  ;;  %15035 = vmatpush1.bf16.msra.mxu1 %v18267_v49  ;;  %v18305_v49 = vcombine.low %v8995_v53, %v8999_v55  ;;  %v18314_v63 = vcombine.high %v9003_v41, %v9007_v57  ;;  %v9035_v55 = vld [vmem:[#allocation10 + $0x1680] sm:$0xff] }
 0x694   :  { %15066 = vmatprep.mubr.bf16.mxu1 %v19767_v27  ;;  %14708 = vmatprep.subr.bf16.mxu0 %v18274_v62  ;;  %v18307_v62 = vcombine.low %v8996_v46, %v9000_v16  ;;  %v9039_v46 = vld [vmem:[#allocation10 + $0x16a0] sm:$0xff]  ;;  %v9036_v16 = vld [vmem:[#allocation10 + $0x1688] sm:$0xff] }
 0x695   :  { %15036 = vmatprep.subr.bf16.mxu1 %v18276_v42  ;;  %v9011_v42 = vld [vmem:[#allocation10 + $0x15c0] sm:$0xff] }
 0x696   :  { %14709 = vmatpush1.bf16.msra.mxu0 %v18273_v11  ;;  %v9016_v11 = vld [vmem:[#allocation10 + $0x15e8] sm:$0xff] }
 0x697   :  { %15037 = vmatpush1.bf16.msra.mxu1 %v18275_v18  ;;  %14710 = vmatprep.subr.bf16.mxu0 %v18282_v36  ;;  %v18313_v18 = vcombine.low %v9003_v41, %v9007_v57  ;;  %v18315_v36 = vcombine.low %v9004_v29, %v9008_v59  ;;  %v18324_v6 = vcombine.high %v9012_v35, %v9016_v11  ;;  %v9043_v57 = vld [vmem:[#allocation10 + $0x16c0] sm:$0xff]  ;;  %v9044_v59 = vld [vmem:[#allocation10 + $0x16c8] sm:$0xff] }
 0x698   :  { %15038 = vmatprep.subr.bf16.mxu1 %v18284_v19  ;;  %v18322_v19 = vcombine.high %v9011_v42, %v9015_v5  ;;  %v9047_v29 = vld [vmem:[#allocation10 + $0x16e0] sm:$0xff] }
 0x69a   :  { %14711 = vmatpush1.bf16.msra.mxu0 %v18281_v37  ;;  %v9024_v37 = vld [vmem:[#allocation10 + $0x1628] sm:$0xff] }
 0x69b   :  { %15039 = vmatpush1.bf16.msra.mxu1 %v18283_v22  ;;  %14712 = vmatprep.subr.bf16.mxu0 %v18290_v54  ;;  %v18321_v22 = vcombine.low %v9011_v42, %v9015_v5  ;;  %v18323_v54 = vcombine.low %v9012_v35, %v9016_v11  ;;  %v18332_v24 = vcombine.high %v9020_v14, %v9024_v37  ;;  %v9051_v5 = vld [vmem:[#allocation10 + $0x1700] sm:$0xff]  ;;  %v9052_v11 = vld [vmem:[#allocation10 + $0x1708] sm:$0xff] }
 0x69c   :  { %15040 = vmatprep.subr.bf16.mxu1 %v18292_v23  ;;  %v18330_v23 = vcombine.high %v9019_v34, %v9023_v20  ;;  %v9055_v35 = vld [vmem:[#allocation10 + $0x1720] sm:$0xff] }
 0x69e   :  { %14713 = vmatpush1.bf16.msra.mxu0 %v18289_v32  ;;  %v9032_v32 = vld [vmem:[#allocation10 + $0x1668] sm:$0xff] }
 0x69f   :  { %15041 = vmatpush1.bf16.msra.mxu1 %v18291_v39  ;;  %14714 = vmatprep.subr.bf16.mxu0 %v18298_v40  ;;  %v18329_v39 = vcombine.low %v9019_v34, %v9023_v20  ;;  %v18331_v40 = vcombine.low %v9020_v14, %v9024_v37  ;;  %v18340_v53 = vcombine.high %v9028_v45, %v9032_v32  ;;  %v9059_v20 = vld [vmem:[#allocation10 + $0x1740] sm:$0xff]  ;;  %v9060_v37 = vld [vmem:[#allocation10 + $0x1748] sm:$0xff] }
 0x6a0   :  { %15042 = vmatprep.subr.bf16.mxu1 %v18300_v48  ;;  %v18338_v48 = vcombine.high %v9027_v25, %v9031_v28  ;;  %v9063_v14 = vld [vmem:[#allocation10 + $0x1760] sm:$0xff] }
 0x6a2   :  { %14715 = vmatpush1.bf16.msra.mxu0 %v18297_v56  ;;  %v9040_v56 = vld [vmem:[#allocation10 + $0x16a8] sm:$0xff] }
 0x6a3   :  { %15043 = vmatpush1.bf16.msra.mxu1 %v18299_v33  ;;  %14716 = vmatprep.subr.bf16.mxu0 %v18306_v50  ;;  %v18337_v33 = vcombine.low %v9027_v25, %v9031_v28  ;;  %v18339_v50 = vcombine.low %v9028_v45, %v9032_v32  ;;  %v18348_v41 = vcombine.high %v9036_v16, %v9040_v56  ;;  %v9067_v28 = vld [vmem:[#allocation10 + $0x1780] sm:$0xff]  ;;  %v9068_v32 = vld [vmem:[#allocation10 + $0x1788] sm:$0xff] }
 0x6a4   :  { %15044 = vmatprep.subr.bf16.mxu1 %v18308_v47  ;;  %v18346_v47 = vcombine.high %v9035_v55, %v9039_v46  ;;  %v9071_v45 = vld [vmem:[#allocation10 + $0x17a0] sm:$0xff] }
 0x6a6   :  { %14717 = vmatpush1.bf16.msra.mxu0 %v18305_v49  ;;  %v9048_v49 = vld [vmem:[#allocation10 + $0x16e8] sm:$0xff] }
 0x6a7   :  { %15045 = vmatpush1.bf16.msra.mxu1 %v18307_v62  ;;  %14718 = vmatprep.subr.bf16.mxu0 %v18314_v63  ;;  %v18345_v62 = vcombine.low %v9035_v55, %v9039_v46  ;;  %v18347_v63 = vcombine.low %v9036_v16, %v9040_v56  ;;  %v18356_v42 = vcombine.high %v9044_v59, %v9048_v49  ;;  %v9075_v16 = vld [vmem:[#allocation10 + $0x17c0] sm:$0xff] }
 0x6a8   :  { %15046 = vmatprep.subr.bf16.mxu1 %v18316_v38  ;;  %v18354_v38 = vcombine.high %v9043_v57, %v9047_v29  ;;  %v18378_v55 = vcombine.high %v9067_v28, %v9071_v45  ;;  %v9079_v56 = vld [vmem:[#allocation10 + $0x17e0] sm:$0xff] }
 0x6aa   :  { %14719 = vmatpush1.bf16.msra.mxu0 %v18313_v18  ;;  %v9056_v18 = vld [vmem:[#allocation10 + $0x1728] sm:$0xff] }
 0x6ab   :  { %15047 = vmatpush1.bf16.msra.mxu1 %v18315_v36  ;;  %14720 = vmatprep.subr.bf16.mxu0 %v18322_v19  ;;  %v18353_v36 = vcombine.low %v9043_v57, %v9047_v29  ;;  %v18355_v19 = vcombine.low %v9044_v59, %v9048_v49  ;;  %v18364_v34 = vcombine.high %v9052_v11, %v9056_v18 }
 0x6ac   :  { %15048 = vmatprep.subr.bf16.mxu1 %v18324_v6  ;;  %v18362_v6 = vcombine.high %v9051_v5, %v9055_v35  ;;  %v18386_v59 = vcombine.high %v9075_v16, %v9079_v56 }
 0x6ae   :  { %14721 = vmatpush1.bf16.msra.mxu0 %v18321_v22  ;;  %v9064_v22 = vld [vmem:[#allocation10 + $0x1768] sm:$0xff] }
 0x6af   :  { %15049 = vmatpush1.bf16.msra.mxu1 %v18323_v54  ;;  %14722 = vmatprep.subr.bf16.mxu0 %v18330_v23  ;;  %v18361_v54 = vcombine.low %v9051_v5, %v9055_v35  ;;  %v18363_v23 = vcombine.low %v9052_v11, %v9056_v18  ;;  %v18372_v25 = vcombine.high %v9060_v37, %v9064_v22  ;;  %v9088_v5 = vld [vmem:[#allocation10 + $0x1828] sm:$0xff] }
 0x6b0   :  { %15050 = vmatprep.subr.bf16.mxu1 %v18332_v24  ;;  %v18370_v24 = vcombine.high %v9059_v20, %v9063_v14 }
 0x6b2   :  { %14723 = vmatpush1.bf16.msra.mxu0 %v18329_v39  ;;  %v9072_v39 = vld [vmem:[#allocation10 + $0x17a8] sm:$0xff] }
 0x6b3   :  { %15051 = vmatpush1.bf16.msra.mxu1 %v18331_v40  ;;  %14724 = vmatprep.subr.bf16.mxu0 %v18338_v48  ;;  %v18369_v40 = vcombine.low %v9059_v20, %v9063_v14  ;;  %v1814_v48 = vrot.slane %v19743_v8, %v19562_v31  ;;  %v18380_v46 = vcombine.high %v9068_v32, %v9072_v39  ;;  %v9092_v20 = vld [vmem:[#allocation10 + $0x1848] sm:$0xff] }
 0x6b4   :  { %15052 = vmatprep.subr.bf16.mxu1 %v18340_v53  ;;  %v18371_v53 = vcombine.low %v9060_v37, %v9064_v22  ;;  %v18379_v29 = vcombine.low %v9068_v32, %v9072_v39  ;;  %v9096_v14 = vld [vmem:[#allocation10 + $0x1868] sm:$0xff] }
 0x6b5   :  { %v18812_v57 = vadd.f32 %v19674_v0, %v1814_v48  ;;  %v18403_v39 = vcombine.low %v9092_v20, %v9096_v14 }
 0x6b6   :  { %14725 = vmatpush1.bf16.msra.mxu0 %v18337_v33  ;;  %v1826_v33 = vrot.slane %v19743_v8, %v19565_v44  ;;  %v18385_v8 = vcombine.low %v9075_v16, %v9079_v56  ;;  %v9112_v16 = vld [vmem:[#allocation10 + $0x18e8] sm:$0xff] }
 0x6b7   :  { %15053 = vmatpush1.bf16.msra.mxu1 %v18339_v50  ;;  %14726 = vmatprep.subr.bf16.mxu0 %v18346_v47  ;;  %v9076_v50 = vld [vmem:[#allocation10 + $0x17c8] sm:$0xff]  ;;  %v8293_v35 = vmax.f32 %v18812_v57, 0.0  ;;  %v9119_v57 = vld [vmem:[#allocation10 + $0x1920] sm:$0xff] }
 0x6b8   :  { %15054 = vmatprep.subr.bf16.mxu1 %v18348_v41  ;;  %v9080_v47 = vld [vmem:[#allocation10 + $0x17e8] sm:$0xff]  ;;  %v18377_v41 = vcombine.low %v9067_v28, %v9071_v45 }
 0x6b9   :  { %v18388_v49 = vcombine.high %v9076_v50, %v9080_v47  ;;  %v18387_v11 = vcombine.low %v9076_v50, %v9080_v47  ;;  %v19779_v37 = vpack.c.bf16 %v8293_v35, %v8293_v35  ;;  %v9100_v28 = vld [vmem:[#allocation10 + $0x1888] sm:$0xff] }
 0x6ba   :  { %14727 = vmatpush1.bf16.msra.mxu0 %v18345_v62  ;;  %v9083_v62 = vld [vmem:[#allocation10 + $0x1800] sm:$0xff]  ;;  %v9104_v45 = vld [vmem:[#allocation10 + $0x18a8] sm:$0xff] }
 0x6bb   :  { %15055 = vmatpush1.bf16.msra.mxu1 %v18347_v63  ;;  %14728 = vmatprep.subr.bf16.mxu0 %v18354_v38  ;;  %v9087_v63 = vld [vmem:[#allocation10 + $0x1820] sm:$0xff]  ;;  %v18815_v38 = vadd.f32 %v19739_v51, %v1826_v33  ;;  %v18412_v48 = vcombine.high %v9100_v28, %v9104_v45  ;;  %v18411_v33 = vcombine.low %v9100_v28, %v9104_v45  ;;  %v9128_v35 = vld [vmem:[#allocation10 + $0x1968] sm:$0xff] }
 0x6bc   :  { %15056 = vmatprep.subr.bf16.mxu1 %v18356_v42  ;;  %v9084_v42 = vld [vmem:[#allocation10 + $0x1808] sm:$0xff]  ;;  %v18394_v18 = vcombine.high %v9083_v62, %v9087_v63 }
 0x6bd   :  { %v18396_v0 = vcombine.high %v9084_v42, %v9088_v5  ;;  %v18395_v51 = vcombine.low %v9084_v42, %v9088_v5  ;;  %v9123_v42 = vld [vmem:[#allocation10 + $0x1940] sm:$0xff]  ;;  %v9140_v28 = vld [vmem:[#allocation10 + $0x19c8] sm:$0xff] }
 0x6be   :  { %14729 = vmatpush1.bf16.msra.mxu0 %v18353_v36  ;;  %v8296_v36 = vmax.f32 %v18815_v38, 0.0  ;;  %v9127_v5 = vld [vmem:[#allocation10 + $0x1960] sm:$0xff]  ;;  %v9144_v45 = vld [vmem:[#allocation10 + $0x19e8] sm:$0xff] }
 0x6bf   :  { %15057 = vmatpush1.bf16.msra.mxu1 %v18355_v19  ;;  %14730 = vmatprep.subr.bf16.mxu0 %v18362_v6  ;;  %v9091_v19 = vld [vmem:[#allocation10 + $0x1840] sm:$0xff] }
 0x6c0   :  { %15058 = vmatprep.subr.bf16.mxu1 %v18364_v34  ;;  %v9095_v6 = vld [vmem:[#allocation10 + $0x1860] sm:$0xff]  ;;  %v18393_v34 = vcombine.low %v9083_v62, %v9087_v63 }
 0x6c1   :  { %v18402_v22 = vcombine.high %v9091_v19, %v9095_v6  ;;  %v18401_v32 = vcombine.low %v9091_v19, %v9095_v6  ;;  %v9131_v19 = vld [vmem:[#allocation10 + $0x1980] sm:$0xff] }
 0x6c2   :  { %14731 = vmatpush1.bf16.msra.mxu0 %v18361_v54  ;;  %v9099_v54 = vld [vmem:[#allocation10 + $0x1880] sm:$0xff] }
 0x6c3   :  { %15059 = vmatpush1.bf16.msra.mxu1 %v18363_v23  ;;  %14732 = vmatprep.subr.bf16.mxu0 %v18370_v24  ;;  %v9103_v23 = vld [vmem:[#allocation10 + $0x18a0] sm:$0xff]  ;;  %v19781_v24 = vpack.c.bf16 %v8296_v36, %v8296_v36 }
 0x6c4   :  { %15060 = vmatprep.subr.bf16.mxu1 %v18372_v25  ;;  %v18404_v25 = vcombine.high %v9092_v20, %v9096_v14  ;;  %v18409_v56 = vcombine.low %v9099_v54, %v9103_v23  ;;  %v9135_v6 = vld [vmem:[#allocation10 + $0x19a0] sm:$0xff]  ;;  %v9136_v20 = vld [vmem:[#allocation10 + $0x19a8] sm:$0xff]  ;;  %v18433_v14 = vcombine.low %v9123_v42, %v9127_v5 }
 0x6c6   :  { %14733 = vmatpush1.bf16.msra.mxu0 %v18369_v40  ;;  %v18410_v40 = vcombine.high %v9099_v54, %v9103_v23  ;;  %v9139_v23 = vld [vmem:[#allocation10 + $0x19c0] sm:$0xff] }
 0x6c7   :  { %15061 = vmatpush1.bf16.msra.mxu1 %v18371_v53  ;;  %14734 = vmatprep.subr.bf16.mxu0 %v18378_v55  ;;  %v9107_v53 = vld [vmem:[#allocation10 + $0x18c0] sm:$0xff] }
 0x6c8   :  { %15062 = vmatprep.subr.bf16.mxu1 %v18380_v46  ;;  %v9111_v55 = vld [vmem:[#allocation10 + $0x18e0] sm:$0xff]  ;;  %v9108_v46 = vld [vmem:[#allocation10 + $0x18c8] sm:$0xff] }
 0x6c9   :  { %v18418_v50 = vcombine.high %v9107_v53, %v9111_v55  ;;  %v18420_v47 = vcombine.high %v9108_v46, %v9112_v16  ;;  %v18419_v62 = vcombine.low %v9108_v46, %v9112_v16  ;;  %v9148_v46 = vld [vmem:[#allocation10 + $0x1a08] sm:$0xff] }
 0x6ca   :  { %14735 = vmatpush1.bf16.msra.mxu0 %v18377_v41  ;;  %v9115_v41 = vld [vmem:[#allocation10 + $0x1900] sm:$0xff]  ;;  %v9152_v16 = vld [vmem:[#allocation10 + $0x1a28] sm:$0xff] }
 0x6cb   :  { %15063 = vmatpush1.bf16.msra.mxu1 %v18379_v29  ;;  %14736 = vmatprep.subr.bf16.mxu0 %v18386_v59  ;;  %v9116_v29 = vld [vmem:[#allocation10 + $0x1908] sm:$0xff]  ;;  %v18426_v63 = vcombine.high %v9115_v41, %v9119_v57 }
 0x6cc   :  { %15064 = vmatprep.subr.bf16.mxu1 %v18388_v49  ;;  %v9120_v59 = vld [vmem:[#allocation10 + $0x1928] sm:$0xff]  ;;  %v18417_v49 = vcombine.low %v9107_v53, %v9111_v55  ;;  %v9147_v53 = vld [vmem:[#allocation10 + $0x1a00] sm:$0xff] }
 0x6cd   :  { %v18428_v38 = vcombine.high %v9116_v29, %v9120_v59  ;;  %v9151_v55 = vld [vmem:[#allocation10 + $0x1a20] sm:$0xff] }
 0x6ce   :  { %14737 = vmatpush1.bf16.msra.mxu0 %v18385_v8  ;;  %v9124_v8 = vld [vmem:[#allocation10 + $0x1948] sm:$0xff] }
 0x6cf   :  { %15065 = vmatpush1.bf16.msra.mxu1 %v18387_v11  ;;  %14747 = vmatprep.subr.bf16.mxu0 %v18394_v18  ;;  %v18425_v11 = vcombine.low %v9115_v41, %v9119_v57  ;;  %v18427_v18 = vcombine.low %v9116_v29, %v9120_v59  ;;  %v18436_v36 = vcombine.high %v9124_v8, %v9128_v35  ;;  %v9155_v41 = vld [vmem:[#allocation10 + $0x1a40] sm:$0xff]  ;;  %v9156_v29 = vld [vmem:[#allocation10 + $0x1a48] sm:$0xff] }
 0x6d0   :  { %15075 = vmatprep.subr.bf16.mxu1 %v18396_v0  ;;  %v18434_v0 = vcombine.high %v9123_v42, %v9127_v5  ;;  %v9159_v57 = vld [vmem:[#allocation10 + $0x1a60] sm:$0xff]  ;;  %v9160_v59 = vld [vmem:[#allocation10 + $0x1a68] sm:$0xff] }
 0x6d1   :  { %14739 = vmatmul.mubr.bf16.vlgmr.msra.gmra.mrb[24].mxu0 %v19779_v37  ;;  %v9163_v42 = vld [vmem:[#allocation10 + $0x1a80] sm:$0xff] }
 0x6d2   :  { %15067 = vmatmul.mubr.bf16.vlgmr.msra.gmra.mrb[24].mxu1 %v19779_v37  ;;  %14748 = vmatpush1.bf16.msra.mxu0 %v18393_v34  ;;  %v9132_v34 = vld [vmem:[#allocation10 + $0x1988] sm:$0xff]  ;;  %v9167_v5 = vld [vmem:[#allocation10 + $0x1aa0] sm:$0xff] }
 0x6d3   :  { %14779 = vmatprep.mubr.bf16.mxu0 %v19781_v24  ;;  %15076 = vmatpush1.bf16.msra.mxu1 %v18395_v51  ;;  %v18435_v51 = vcombine.low %v9124_v8, %v9128_v35  ;;  %v18444_v54 = vcombine.high %v9132_v34, %v9136_v20  ;;  %v9164_v8 = vld [vmem:[#allocation10 + $0x1a88] sm:$0xff] }
 0x6d4   :  { %15107 = vmatprep.mubr.bf16.mxu1 %v19781_v24  ;;  %14749 = vmatprep.subr.bf16.mxu0 %v18402_v22  ;;  %v18442_v22 = vcombine.high %v9131_v19, %v9135_v6  ;;  %v9168_v35 = vld [vmem:[#allocation10 + $0x1aa8] sm:$0xff] }
 0x6d5   :  { %15077 = vmatprep.subr.bf16.mxu1 %v18404_v25  ;;  %v9143_v25 = vld [vmem:[#allocation10 + $0x19e0] sm:$0xff] }
 0x6d6   :  { %14750 = vmatpush1.bf16.msra.mxu0 %v18401_v32  ;;  %v18441_v32 = vcombine.low %v9131_v19, %v9135_v6  ;;  %v9171_v19 = vld [vmem:[#allocation10 + $0x1ac0] sm:$0xff] }
 0x6d7   :  { %15078 = vmatpush1.bf16.msra.mxu1 %v18403_v39  ;;  %14751 = vmatprep.subr.bf16.mxu0 %v18410_v40  ;;  %v18443_v39 = vcombine.low %v9132_v34, %v9136_v20  ;;  %v18450_v40 = vcombine.high %v9139_v23, %v9143_v25  ;;  %v9175_v6 = vld [vmem:[#allocation10 + $0x1ae0] sm:$0xff]  ;;  %v9172_v34 = vld [vmem:[#allocation10 + $0x1ac8] sm:$0xff] }
 0x6d8   :  { %15079 = vmatprep.subr.bf16.mxu1 %v18412_v48  ;;  %v18452_v48 = vcombine.high %v9140_v28, %v9144_v45  ;;  %v9176_v20 = vld [vmem:[#allocation10 + $0x1ae8] sm:$0xff] }
 0x6da   :  { %14752 = vmatpush1.bf16.msra.mxu0 %v18409_v56  ;;  %v18449_v56 = vcombine.low %v9139_v23, %v9143_v25  ;;  %v9179_v23 = vld [vmem:[#allocation10 + $0x1b00] sm:$0xff] }
 0x6db   :  { %15080 = vmatpush1.bf16.msra.mxu1 %v18411_v33  ;;  %14753 = vmatprep.subr.bf16.mxu0 %v18418_v50  ;;  %v18451_v33 = vcombine.low %v9140_v28, %v9144_v45  ;;  %v18458_v50 = vcombine.high %v9147_v53, %v9151_v55  ;;  %v9183_v25 = vld [vmem:[#allocation10 + $0x1b20] sm:$0xff]  ;;  %v9180_v28 = vld [vmem:[#allocation10 + $0x1b08] sm:$0xff] }
 0x6dc   :  { %15081 = vmatprep.subr.bf16.mxu1 %v18420_v47  ;;  %v18460_v47 = vcombine.high %v9148_v46, %v9152_v16  ;;  %v9184_v45 = vld [vmem:[#allocation10 + $0x1b28] sm:$0xff] }
 0x6de   :  { %14754 = vmatpush1.bf16.msra.mxu0 %v18417_v49  ;;  %v18457_v49 = vcombine.low %v9147_v53, %v9151_v55  ;;  %v9187_v53 = vld [vmem:[#allocation10 + $0x1b40] sm:$0xff] }
 0x6df   :  { %15082 = vmatpush1.bf16.msra.mxu1 %v18419_v62  ;;  %14755 = vmatprep.subr.bf16.mxu0 %v18426_v63  ;;  %v18459_v62 = vcombine.low %v9148_v46, %v9152_v16  ;;  %v18466_v63 = vcombine.high %v9155_v41, %v9159_v57  ;;  %v9191_v55 = vld [vmem:[#allocation10 + $0x1b60] sm:$0xff]  ;;  %v9188_v46 = vld [vmem:[#allocation10 + $0x1b48] sm:$0xff] }
 0x6e0   :  { %15083 = vmatprep.subr.bf16.mxu1 %v18428_v38  ;;  %v18468_v38 = vcombine.high %v9156_v29, %v9160_v59  ;;  %v9192_v16 = vld [vmem:[#allocation10 + $0x1b68] sm:$0xff] }
 0x6e2   :  { %14756 = vmatpush1.bf16.msra.mxu0 %v18425_v11  ;;  %v18465_v11 = vcombine.low %v9155_v41, %v9159_v57  ;;  %v9195_v41 = vld [vmem:[#allocation10 + $0x1b80] sm:$0xff] }
 0x6e3   :  { %15084 = vmatpush1.bf16.msra.mxu1 %v18427_v18  ;;  %14757 = vmatprep.subr.bf16.mxu0 %v18434_v0  ;;  %v18467_v18 = vcombine.low %v9156_v29, %v9160_v59  ;;  %v18474_v0 = vcombine.high %v9163_v42, %v9167_v5  ;;  %v9199_v57 = vld [vmem:[#allocation10 + $0x1ba0] sm:$0xff]  ;;  %v9196_v29 = vld [vmem:[#allocation10 + $0x1b88] sm:$0xff] }
 0x6e4   :  { %15085 = vmatprep.subr.bf16.mxu1 %v18436_v36  ;;  %v18476_v36 = vcombine.high %v9164_v8, %v9168_v35  ;;  %v9200_v59 = vld [vmem:[#allocation10 + $0x1ba8] sm:$0xff] }
 0x6e6   :  { %14758 = vmatpush1.bf16.msra.mxu0 %v18433_v14  ;;  %v18473_v14 = vcombine.low %v9163_v42, %v9167_v5  ;;  %v18506_v42 = vcombine.high %v9195_v41, %v9199_v57  ;;  %v18508_v5 = vcombine.high %v9196_v29, %v9200_v59 }
 0x6e7   :  { %15086 = vmatpush1.bf16.msra.mxu1 %v18435_v51  ;;  %14759 = vmatprep.subr.bf16.mxu0 %v18442_v22  ;;  %v18475_v51 = vcombine.low %v9164_v8, %v9168_v35  ;;  %v18482_v22 = vcombine.high %v9171_v19, %v9175_v6  ;;  %v9203_v8 = vld [vmem:[#allocation10 + $0x1bc0] sm:$0xff] }
 0x6e8   :  { %15087 = vmatprep.subr.bf16.mxu1 %v18444_v54  ;;  %v18484_v54 = vcombine.high %v9172_v34, %v9176_v20  ;;  %v9207_v35 = vld [vmem:[#allocation10 + $0x1be0] sm:$0xff] }
 0x6ea   :  { %14760 = vmatpush1.bf16.msra.mxu0 %v18441_v32  ;;  %v18481_v32 = vcombine.low %v9171_v19, %v9175_v6  ;;  %v18507_v6 = vcombine.low %v9196_v29, %v9200_v59  ;;  %v9232_v29 = vld [vmem:[#allocation10 + $0x1ca8] sm:$0xff] }
 0x6eb   :  { %15088 = vmatpush1.bf16.msra.mxu1 %v18443_v39  ;;  %14761 = vmatprep.subr.bf16.mxu0 %v18450_v40  ;;  %v18483_v39 = vcombine.low %v9172_v34, %v9176_v20  ;;  %v18490_v40 = vcombine.high %v9179_v23, %v9183_v25  ;;  %v18514_v34 = vcombine.high %v9203_v8, %v9207_v35 }
 0x6ec   :  { %15089 = vmatprep.subr.bf16.mxu1 %v18452_v48  ;;  %v18492_v48 = vcombine.high %v9180_v28, %v9184_v45 }
 0x6ee   :  { %14762 = vmatpush1.bf16.msra.mxu0 %v18449_v56  ;;  %v18489_v56 = vcombine.low %v9179_v23, %v9183_v25  ;;  %v9216_v23 = vld [vmem:[#allocation10 + $0x1c28] sm:$0xff]  ;;  %v18513_v25 = vcombine.low %v9203_v8, %v9207_v35 }
 0x6ef   :  { %15090 = vmatpush1.bf16.msra.mxu1 %v18451_v33  ;;  %14763 = vmatprep.subr.bf16.mxu0 %v18458_v50  ;;  %v18491_v33 = vcombine.low %v9180_v28, %v9184_v45  ;;  %v18498_v50 = vcombine.high %v9187_v53, %v9191_v55  ;;  %v9236_v8 = vld [vmem:[#allocation10 + $0x1cc8] sm:$0xff] }
 0x6f0   :  { %15091 = vmatprep.subr.bf16.mxu1 %v18460_v47  ;;  %v18500_v47 = vcombine.high %v9188_v46, %v9192_v16  ;;  %v9240_v35 = vld [vmem:[#allocation10 + $0x1ce8] sm:$0xff] }
 0x6f2   :  { %14764 = vmatpush1.bf16.msra.mxu0 %v18457_v49  ;;  %v18497_v49 = vcombine.low %v9187_v53, %v9191_v55  ;;  %v9220_v55 = vld [vmem:[#allocation10 + $0x1c48] sm:$0xff] }
 0x6f3   :  { %15092 = vmatpush1.bf16.msra.mxu1 %v18459_v62  ;;  %14765 = vmatprep.subr.bf16.mxu0 %v18466_v63  ;;  %v19787_v62 = vld [vmem:[#allocation8 + $0x8] sm:$0xff] }
 0x6f4   :  { %15093 = vmatprep.subr.bf16.mxu1 %v18468_v38  ;;  %v1822_v63 = vrot.slane %v19787_v62, %v19582_v12  ;;  %v18499_v38 = vcombine.low %v9188_v46, %v9192_v16  ;;  %v9224_v46 = vld [vmem:[#allocation10 + $0x1c68] sm:$0xff] }
 0x6f6   :  { %14766 = vmatpush1.bf16.msra.mxu0 %v18465_v11  ;;  %v1834_v11 = vrot.slane %v19787_v62, %v19585_v26  ;;  %v18814_v19 = vadd.f32 %v19735_v1, %v1822_v63 }
 0x6f7   :  { %15094 = vmatpush1.bf16.msra.mxu1 %v18467_v18  ;;  %14767 = vmatprep.subr.bf16.mxu0 %v18474_v0  ;;  %v9204_v18 = vld [vmem:[#allocation10 + $0x1bc8] sm:$0xff] }
 0x6f8   :  { %15095 = vmatprep.subr.bf16.mxu1 %v18476_v36  ;;  %v9208_v0 = vld [vmem:[#allocation10 + $0x1be8] sm:$0xff]  ;;  %v18505_v36 = vcombine.low %v9195_v41, %v9199_v57  ;;  %v8295_v28 = vmax.f32 %v18814_v19, 0.0  ;;  %v18532_v41 = vcombine.high %v9220_v55, %v9224_v46  ;;  %v9243_v19 = vld [vmem:[#allocation10 + $0x1d00] sm:$0xff] }
 0x6f9   :  { %v18516_v20 = vcombine.high %v9204_v18, %v9208_v0  ;;  %v18515_v45 = vcombine.low %v9204_v18, %v9208_v0  ;;  %v9228_v57 = vld [vmem:[#allocation10 + $0x1c88] sm:$0xff] }
 0x6fa   :  { %14768 = vmatpush1.bf16.msra.mxu0 %v18473_v14  ;;  %v9211_v14 = vld [vmem:[#allocation10 + $0x1c00] sm:$0xff]  ;;  %v19795_v16 = vpack.c.bf16 %v8295_v28, %v8295_v28  ;;  %v18539_v18 = vcombine.low %v9228_v57, %v9232_v29  ;;  %v9252_v28 = vld [vmem:[#allocation10 + $0x1d48] sm:$0xff] }
 0x6fb   :  { %15096 = vmatpush1.bf16.msra.mxu1 %v18475_v51  ;;  %14769 = vmatprep.subr.bf16.mxu0 %v18482_v22  ;;  %v9215_v51 = vld [vmem:[#allocation10 + $0x1c20] sm:$0xff]  ;;  %v18817_v22 = vadd.f32 %v19741_v13, %v1834_v11 }
 0x6fc   :  { %15097 = vmatprep.subr.bf16.mxu1 %v18484_v54  ;;  %v9212_v54 = vld [vmem:[#allocation10 + $0x1c08] sm:$0xff]  ;;  %v18521_v53 = vcombine.low %v9211_v14, %v9215_v51 }
 0x6fd   :  { %v18524_v1 = vcombine.high %v9212_v54, %v9216_v23  ;;  %v18523_v13 = vcombine.low %v9212_v54, %v9216_v23  ;;  %v9251_v23 = vld [vmem:[#allocation10 + $0x1d40] sm:$0xff] }
 0x6fe   :  { %14770 = vmatpush1.bf16.msra.mxu0 %v18481_v32  ;;  %v18522_v32 = vcombine.high %v9211_v14, %v9215_v51  ;;  %v18547_v51 = vcombine.low %v9236_v8, %v9240_v35 }
 0x6ff   :  { %15098 = vmatpush1.bf16.msra.mxu1 %v18483_v39  ;;  %14771 = vmatprep.subr.bf16.mxu0 %v18490_v40  ;;  %v8298_v39 = vmax.f32 %v18817_v22, 0.0  ;;  %v9219_v40 = vld [vmem:[#allocation10 + $0x1c40] sm:$0xff] }
 0x700   :  { %15099 = vmatprep.subr.bf16.mxu1 %v18492_v48  ;;  %v9223_v48 = vld [vmem:[#allocation10 + $0x1c60] sm:$0xff] }
 0x701   :  { %v18529_v59 = vcombine.low %v9219_v40, %v9223_v48 }
 0x702   :  { %14772 = vmatpush1.bf16.msra.mxu0 %v18489_v56  ;;  %v18530_v56 = vcombine.high %v9219_v40, %v9223_v48  ;;  %v9259_v48 = vld [vmem:[#allocation10 + $0x1d80] sm:$0xff] }
 0x703   :  { %15100 = vmatpush1.bf16.msra.mxu1 %v18491_v33  ;;  %14773 = vmatprep.subr.bf16.mxu0 %v18498_v50  ;;  %v9227_v33 = vld [vmem:[#allocation10 + $0x1c80] sm:$0xff] }
 0x704   :  { %15101 = vmatprep.subr.bf16.mxu1 %v18500_v47  ;;  %v9231_v50 = vld [vmem:[#allocation10 + $0x1ca0] sm:$0xff]  ;;  %v19797_v47 = vpack.c.bf16 %v8298_v39, %v8298_v39 }
 0x705   :  { %v18538_v63 = vcombine.high %v9227_v33, %v9231_v50  ;;  %v18537_v11 = vcombine.low %v9227_v33, %v9231_v50 }
 0x706   :  { %14774 = vmatpush1.bf16.msra.mxu0 %v18497_v49  ;;  %v18531_v49 = vcombine.low %v9220_v55, %v9224_v46  ;;  %v9260_v55 = vld [vmem:[#allocation10 + $0x1d88] sm:$0xff] }
 0x707   :  { %15102 = vmatpush1.bf16.msra.mxu1 %v18499_v38  ;;  %14775 = vmatprep.subr.bf16.mxu0 %v18506_v42  ;;  %v18540_v38 = vcombine.high %v9228_v57, %v9232_v29  ;;  %v9235_v42 = vld [vmem:[#allocation10 + $0x1cc0] sm:$0xff]  ;;  %v9264_v46 = vld [vmem:[#allocation10 + $0x1da8] sm:$0xff] }
 0x708   :  { %15103 = vmatprep.subr.bf16.mxu1 %v18508_v5  ;;  %v9239_v5 = vld [vmem:[#allocation10 + $0x1ce0] sm:$0xff]  ;;  %v18572_v50 = vcombine.high %v9260_v55, %v9264_v46  ;;  %v9268_v29 = vld [vmem:[#allocation10 + $0x1dc8] sm:$0xff] }
 0x709   :  { %v18546_v0 = vcombine.high %v9235_v42, %v9239_v5  ;;  %v18545_v14 = vcombine.low %v9235_v42, %v9239_v5  ;;  %v9271_v57 = vld [vmem:[#allocation10 + $0x1de0] sm:$0xff] }
 0x70a   :  { %14776 = vmatpush1.bf16.msra.mxu0 %v18505_v36  ;;  %v18548_v36 = vcombine.high %v9236_v8, %v9240_v35  ;;  %v9275_v5 = vld [vmem:[#allocation10 + $0x1e00] sm:$0xff]  ;;  %v9276_v35 = vld [vmem:[#allocation10 + $0x1e08] sm:$0xff] }
 0x70b   :  { %15104 = vmatpush1.bf16.msra.mxu1 %v18507_v6  ;;  %14777 = vmatprep.subr.bf16.mxu0 %v18514_v34  ;;  %v9247_v6 = vld [vmem:[#allocation10 + $0x1d20] sm:$0xff]  ;;  %v9244_v34 = vld [vmem:[#allocation10 + $0x1d08] sm:$0xff] }
 0x70c   :  { %15105 = vmatprep.subr.bf16.mxu1 %v18516_v20  ;;  %v9248_v20 = vld [vmem:[#allocation10 + $0x1d28] sm:$0xff]  ;;  %v18554_v22 = vcombine.high %v9243_v19, %v9247_v6  ;;  %v9279_v8 = vld [vmem:[#allocation10 + $0x1e20] sm:$0xff] }
 0x70d   :  { %v18556_v54 = vcombine.high %v9244_v34, %v9248_v20 }
 0x70e   :  { %14778 = vmatpush1.bf16.msra.mxu0 %v18513_v25  ;;  %v9255_v25 = vld [vmem:[#allocation10 + $0x1d60] sm:$0xff] }
 0x70f   :  { %15106 = vmatpush1.bf16.msra.mxu1 %v18515_v45  ;;  %14788 = vmatprep.subr.bf16.mxu0 %v18522_v32  ;;  %v9256_v45 = vld [vmem:[#allocation10 + $0x1d68] sm:$0xff]  ;;  %v18553_v32 = vcombine.low %v9243_v19, %v9247_v6  ;;  %v18562_v39 = vcombine.high %v9251_v23, %v9255_v25  ;;  %v9283_v6 = vld [vmem:[#allocation10 + $0x1e40] sm:$0xff] }
 0x710   :  { %15116 = vmatprep.subr.bf16.mxu1 %v18524_v1  ;;  %v18555_v1 = vcombine.low %v9244_v34, %v9248_v20  ;;  %v18564_v40 = vcombine.high %v9252_v28, %v9256_v45  ;;  %v9287_v34 = vld [vmem:[#allocation10 + $0x1e60] sm:$0xff]  ;;  %v9284_v20 = vld [vmem:[#allocation10 + $0x1e48] sm:$0xff] }
 0x711   :  { %14780 = vmatmul.mubr.bf16.vlgmr.msra.gmra.mrb[24].mxu0 %v19795_v16 }
 0x712   :  { %15108 = vmatmul.mubr.bf16.vlgmr.msra.gmra.mrb[24].mxu1 %v19795_v16  ;;  %14789 = vmatpush1.bf16.msra.mxu0 %v18521_v53  ;;  %v9263_v53 = vld [vmem:[#allocation10 + $0x1da0] sm:$0xff] }
 0x713   :  { %14820 = vmatprep.mubr.bf16.mxu0 %v19797_v47  ;;  %15117 = vmatpush1.bf16.msra.mxu1 %v18523_v13  ;;  %v18561_v13 = vcombine.low %v9251_v23, %v9255_v25  ;;  %v18570_v33 = vcombine.high %v9259_v48, %v9263_v53  ;;  %v9291_v25 = vld [vmem:[#allocation10 + $0x1e80] sm:$0xff] }
 0x714   :  { %15148 = vmatprep.mubr.bf16.mxu1 %v19797_v47  ;;  %14790 = vmatprep.subr.bf16.mxu0 %v18530_v56  ;;  %v18563_v56 = vcombine.low %v9252_v28, %v9256_v45  ;;  %v9295_v28 = vld [vmem:[#allocation10 + $0x1ea0] sm:$0xff]  ;;  %v9292_v45 = vld [vmem:[#allocation10 + $0x1e88] sm:$0xff] }
 0x715   :  { %15118 = vmatprep.subr.bf16.mxu1 %v18532_v41  ;;  %v9267_v41 = vld [vmem:[#allocation10 + $0x1dc0] sm:$0xff] }
 0x716   :  { %14791 = vmatpush1.bf16.msra.mxu0 %v18529_v59  ;;  %v9272_v59 = vld [vmem:[#allocation10 + $0x1de8] sm:$0xff] }
 0x717   :  { %15119 = vmatpush1.bf16.msra.mxu1 %v18531_v49  ;;  %14792 = vmatprep.subr.bf16.mxu0 %v18538_v63  ;;  %v18569_v49 = vcombine.low %v9259_v48, %v9263_v53  ;;  %v18571_v63 = vcombine.low %v9260_v55, %v9264_v46  ;;  %v18580_v42 = vcombine.high %v9268_v29, %v9272_v59  ;;  %v9299_v53 = vld [vmem:[#allocation10 + $0x1ec0] sm:$0xff]  ;;  %v9300_v46 = vld [vmem:[#allocation10 + $0x1ec8] sm:$0xff] }
 0x718   :  { %15120 = vmatprep.subr.bf16.mxu1 %v18540_v38  ;;  %v18578_v38 = vcombine.high %v9267_v41, %v9271_v57  ;;  %v9303_v55 = vld [vmem:[#allocation10 + $0x1ee0] sm:$0xff] }
 0x71a   :  { %14793 = vmatpush1.bf16.msra.mxu0 %v18537_v11  ;;  %v9280_v11 = vld [vmem:[#allocation10 + $0x1e28] sm:$0xff] }
 0x71b   :  { %15121 = vmatpush1.bf16.msra.mxu1 %v18539_v18  ;;  %14794 = vmatprep.subr.bf16.mxu0 %v18546_v0  ;;  %v18577_v18 = vcombine.low %v9267_v41, %v9271_v57  ;;  %v18579_v0 = vcombine.low %v9268_v29, %v9272_v59  ;;  %v18588_v19 = vcombine.high %v9276_v35, %v9280_v11  ;;  %v9307_v57 = vld [vmem:[#allocation10 + $0x1f00] sm:$0xff]  ;;  %v9308_v59 = vld [vmem:[#allocation10 + $0x1f08] sm:$0xff] }
 0x71c   :  { %15122 = vmatprep.subr.bf16.mxu1 %v18548_v36  ;;  %v18586_v36 = vcombine.high %v9275_v5, %v9279_v8  ;;  %v9311_v29 = vld [vmem:[#allocation10 + $0x1f20] sm:$0xff] }
 0x71e   :  { %14795 = vmatpush1.bf16.msra.mxu0 %v18545_v14  ;;  %v9288_v14 = vld [vmem:[#allocation10 + $0x1e68] sm:$0xff] }
 0x71f   :  { %15123 = vmatpush1.bf16.msra.mxu1 %v18547_v51  ;;  %14796 = vmatprep.subr.bf16.mxu0 %v18554_v22  ;;  %v18585_v51 = vcombine.low %v9275_v5, %v9279_v8  ;;  %v18587_v22 = vcombine.low %v9276_v35, %v9280_v11  ;;  %v18596_v23 = vcombine.high %v9284_v20, %v9288_v14  ;;  %v9315_v8 = vld [vmem:[#allocation10 + $0x1f40] sm:$0xff]  ;;  %v9316_v11 = vld [vmem:[#allocation10 + $0x1f48] sm:$0xff] }
 0x720   :  { %15124 = vmatprep.subr.bf16.mxu1 %v18556_v54  ;;  %v18594_v54 = vcombine.high %v9283_v6, %v9287_v34  ;;  %v9319_v35 = vld [vmem:[#allocation10 + $0x1f60] sm:$0xff] }
 0x722   :  { %14797 = vmatpush1.bf16.msra.mxu0 %v18553_v32  ;;  %v9296_v32 = vld [vmem:[#allocation10 + $0x1ea8] sm:$0xff] }
 0x723   :  { %15125 = vmatpush1.bf16.msra.mxu1 %v18555_v1  ;;  %14798 = vmatprep.subr.bf16.mxu0 %v18562_v39  ;;  %v18593_v1 = vcombine.low %v9283_v6, %v9287_v34  ;;  %v18595_v39 = vcombine.low %v9284_v20, %v9288_v14  ;;  %v18604_v48 = vcombine.high %v9292_v45, %v9296_v32  ;;  %v9323_v34 = vld [vmem:[#allocation10 + $0x1f80] sm:$0xff]  ;;  %v9324_v14 = vld [vmem:[#allocation10 + $0x1f88] sm:$0xff] }
 0x724   :  { %15126 = vmatprep.subr.bf16.mxu1 %v18564_v40  ;;  %v18602_v40 = vcombine.high %v9291_v25, %v9295_v28  ;;  %v9327_v20 = vld [vmem:[#allocation10 + $0x1fa0] sm:$0xff] }
 0x726   :  { %14799 = vmatpush1.bf16.msra.mxu0 %v18561_v13  ;;  %v9304_v13 = vld [vmem:[#allocation10 + $0x1ee8] sm:$0xff] }
 0x727   :  { %15127 = vmatpush1.bf16.msra.mxu1 %v18563_v56  ;;  %14800 = vmatprep.subr.bf16.mxu0 %v18570_v33  ;;  %v18601_v56 = vcombine.low %v9291_v25, %v9295_v28  ;;  %v18603_v33 = vcombine.low %v9292_v45, %v9296_v32  ;;  %v18612_v41 = vcombine.high %v9300_v46, %v9304_v13  ;;  %v9331_v45 = vld [vmem:[#allocation10 + $0x1fc0] sm:$0xff] }
 0x728   :  { %15128 = vmatprep.subr.bf16.mxu1 %v18572_v50  ;;  %v18610_v50 = vcombine.high %v9299_v53, %v9303_v55  ;;  %v18634_v25 = vcombine.high %v9323_v34, %v9327_v20  ;;  %v9335_v32 = vld [vmem:[#allocation10 + $0x1fe0] sm:$0xff] }
 0x72a   :  { %14801 = vmatpush1.bf16.msra.mxu0 %v18569_v49  ;;  %v9312_v49 = vld [vmem:[#allocation10 + $0x1f28] sm:$0xff] }
 0x72b   :  { %15129 = vmatpush1.bf16.msra.mxu1 %v18571_v63  ;;  %14802 = vmatprep.subr.bf16.mxu0 %v18578_v38  ;;  %v18609_v63 = vcombine.low %v9299_v53, %v9303_v55  ;;  %v18611_v38 = vcombine.low %v9300_v46, %v9304_v13  ;;  %v18620_v5 = vcombine.high %v9308_v59, %v9312_v49  ;;  %v8317_v46 = vld [vmem:[#allocation10 + $0x10] sm:$0xff] }
 0x72c   :  { %15130 = vmatprep.subr.bf16.mxu1 %v18580_v42  ;;  %v18618_v42 = vcombine.high %v9307_v57, %v9311_v29  ;;  %v18642_v55 = vcombine.high %v9331_v45, %v9335_v32  ;;  %v8321_v13 = vld [vmem:[#allocation10 + $0x30] sm:$0xff] }
 0x72e   :  { %14803 = vmatpush1.bf16.msra.mxu0 %v18577_v18  ;;  %v9320_v18 = vld [vmem:[#allocation10 + $0x1f68] sm:$0xff] }
 0x72f   :  { %15131 = vmatpush1.bf16.msra.mxu1 %v18579_v0  ;;  %14804 = vmatprep.subr.bf16.mxu0 %v18586_v36  ;;  %v18617_v0 = vcombine.low %v9307_v57, %v9311_v29  ;;  %v18619_v36 = vcombine.low %v9308_v59, %v9312_v49  ;;  %v18628_v6 = vcombine.high %v9316_v11, %v9320_v18  ;;  %v8329_v49 = vld [vmem:[#allocation10 + $0x70] sm:$0xff] }
 0x730   :  { %15132 = vmatprep.subr.bf16.mxu1 %v18588_v19  ;;  %v18626_v19 = vcombine.high %v9315_v8, %v9319_v35  ;;  %v17630_v29 = vcombine.high %v8317_v46, %v8321_v13 }
 0x732   :  { %14805 = vmatpush1.bf16.msra.mxu0 %v18585_v51  ;;  %v9328_v51 = vld [vmem:[#allocation10 + $0x1fa8] sm:$0xff] }
 0x733   :  { %15133 = vmatpush1.bf16.msra.mxu1 %v18587_v22  ;;  %14806 = vmatprep.subr.bf16.mxu0 %v18594_v54  ;;  %v18625_v22 = vcombine.low %v9315_v8, %v9319_v35  ;;  %v1830_v54 = vrot.slane %v19787_v62, %v19602_v3  ;;  %v18636_v28 = vcombine.high %v9324_v14, %v9328_v51 }
 0x734   :  { %15134 = vmatprep.subr.bf16.mxu1 %v18596_v23  ;;  %v18627_v23 = vcombine.low %v9316_v11, %v9320_v18  ;;  %v18635_v53 = vcombine.low %v9324_v14, %v9328_v51  ;;  %v8333_v11 = vld [vmem:[#allocation10 + $0x90] sm:$0xff] }
 0x735   :  { %v8337_v18 = vld [vmem:[#allocation10 + $0xb0] sm:$0xff] }
 0x736   :  { %14807 = vmatpush1.bf16.msra.mxu0 %v18593_v1  ;;  %v9332_v1 = vld [vmem:[#allocation10 + $0x1fc8] sm:$0xff]  ;;  %v8341_v51 = vld [vmem:[#allocation10 + $0xd0] sm:$0xff] }
 0x737   :  { %15135 = vmatpush1.bf16.msra.mxu1 %v18595_v39  ;;  %14808 = vmatprep.subr.bf16.mxu0 %v18602_v40  ;;  %v9336_v39 = vld [vmem:[#allocation10 + $0x1fe8] sm:$0xff]  ;;  %v18633_v40 = vcombine.low %v9323_v34, %v9327_v20  ;;  %v17646_v20 = vcombine.high %v8333_v11, %v8337_v18 }
 0x738   :  { %15136 = vmatprep.subr.bf16.mxu1 %v18604_v48  ;;  %v18816_v48 = vadd.f32 %v19737_v10, %v1830_v54  ;;  %v18644_v62 = vcombine.high %v9332_v1, %v9336_v39  ;;  %v18643_v57 = vcombine.low %v9332_v1, %v9336_v39  ;;  %v8325_v10 = vld [vmem:[#allocation10 + $0x50] sm:$0xff]  ;;  %v8342_v54 = vld [vmem:[#allocation10 + $0xd8] sm:$0xff] }
 0x739   :  { %v17638_v35 = vcombine.high %v8325_v10, %v8329_v49  ;;  %v8349_v1 = vld [vmem:[#allocation10 + $0x110] sm:$0xff] }
 0x73a   :  { %14809 = vmatpush1.bf16.msra.mxu0 %v18601_v56  ;;  %v8318_v56 = vld [vmem:[#allocation10 + $0x18] sm:$0xff]  ;;  %v8353_v39 = vld [vmem:[#allocation10 + $0x130] sm:$0xff] }
 0x73b   :  { %15137 = vmatpush1.bf16.msra.mxu1 %v18603_v33  ;;  %14810 = vmatprep.subr.bf16.mxu0 %v18610_v50  ;;  %v8322_v33 = vld [vmem:[#allocation10 + $0x38] sm:$0xff]  ;;  %v18641_v50 = vcombine.low %v9331_v45, %v9335_v32 }
 0x73c   :  { %15138 = vmatprep.subr.bf16.mxu1 %v18612_v41  ;;  %v8297_v41 = vmax.f32 %v18816_v48, 0.0  ;;  %v17632_v59 = vcombine.high %v8318_v56, %v8322_v33  ;;  %v17631_v8 = vcombine.low %v8318_v56, %v8322_v33  ;;  %v8354_v48 = vld [vmem:[#allocation10 + $0x138] sm:$0xff] }
 0x73d   :  { %v8358_v56 = vld [vmem:[#allocation10 + $0x158] sm:$0xff] }
 0x73e   :  { %14811 = vmatpush1.bf16.msra.mxu0 %v18609_v63  ;;  %v17629_v63 = vcombine.low %v8317_v46, %v8321_v13  ;;  %v8357_v46 = vld [vmem:[#allocation10 + $0x150] sm:$0xff]  ;;  %v8362_v33 = vld [vmem:[#allocation10 + $0x178] sm:$0xff] }
 0x73f   :  { %15139 = vmatpush1.bf16.msra.mxu1 %v18611_v38  ;;  %14812 = vmatprep.subr.bf16.mxu0 %v18618_v42  ;;  %v8326_v38 = vld [vmem:[#allocation10 + $0x58] sm:$0xff]  ;;  %v8361_v13 = vld [vmem:[#allocation10 + $0x170] sm:$0xff] }
 0x740   :  { %15140 = vmatprep.subr.bf16.mxu1 %v18620_v5  ;;  %v8330_v42 = vld [vmem:[#allocation10 + $0x78] sm:$0xff]  ;;  %v19806_v5 = vpack.c.bf16 %v8297_v41, %v8297_v41 }
 0x741   :  { %v17639_v34 = vcombine.low %v8326_v38, %v8330_v42 }
 0x742   :  { %14813 = vmatpush1.bf16.msra.mxu0 %v18617_v0  ;;  %v17640_v0 = vcombine.high %v8326_v38, %v8330_v42  ;;  %v17669_v38 = vcombine.low %v8357_v46, %v8361_v13  ;;  %v17671_v42 = vcombine.low %v8358_v56, %v8362_v33 }
 0x743   :  { %15141 = vmatpush1.bf16.msra.mxu1 %v18619_v36  ;;  %14814 = vmatprep.subr.bf16.mxu0 %v18626_v19  ;;  %v8334_v36 = vld [vmem:[#allocation10 + $0x98] sm:$0xff] }
 0x744   :  { %15142 = vmatprep.subr.bf16.mxu1 %v18628_v6  ;;  %v8338_v19 = vld [vmem:[#allocation10 + $0xb8] sm:$0xff]  ;;  %v17637_v6 = vcombine.low %v8325_v10, %v8329_v49  ;;  %v8369_v10 = vld [vmem:[#allocation10 + $0x1b0] sm:$0xff] }
 0x745   :  { %v17648_v14 = vcombine.high %v8334_v36, %v8338_v19  ;;  %v8366_v49 = vld [vmem:[#allocation10 + $0x198] sm:$0xff] }
 0x746   :  { %14815 = vmatpush1.bf16.msra.mxu0 %v18625_v22  ;;  %v8345_v22 = vld [vmem:[#allocation10 + $0xf0] sm:$0xff] }
 0x747   :  { %15143 = vmatpush1.bf16.msra.mxu1 %v18627_v23  ;;  %14816 = vmatprep.subr.bf16.mxu0 %v18634_v25  ;;  %v8346_v23 = vld [vmem:[#allocation10 + $0xf8] sm:$0xff]  ;;  %v17645_v25 = vcombine.low %v8333_v11, %v8337_v18  ;;  %v17654_v45 = vcombine.high %v8341_v51, %v8345_v22  ;;  %v8373_v11 = vld [vmem:[#allocation10 + $0x1d0] sm:$0xff] }
 0x748   :  { %15144 = vmatprep.subr.bf16.mxu1 %v18636_v28  ;;  %v17647_v28 = vcombine.low %v8334_v36, %v8338_v19  ;;  %v17656_v32 = vcombine.high %v8342_v54, %v8346_v23  ;;  %v8377_v18 = vld [vmem:[#allocation10 + $0x1f0] sm:$0xff]  ;;  %v8378_v36 = vld [vmem:[#allocation10 + $0x1f8] sm:$0xff] }
 0x74a   :  { %14817 = vmatpush1.bf16.msra.mxu0 %v18633_v40  ;;  %v8350_v40 = vld [vmem:[#allocation10 + $0x118] sm:$0xff] }
 0x74b   :  { %15145 = vmatpush1.bf16.msra.mxu1 %v18635_v53  ;;  %14818 = vmatprep.subr.bf16.mxu0 %v18642_v55  ;;  %v17655_v53 = vcombine.low %v8342_v54, %v8346_v23  ;;  %v17662_v55 = vcombine.high %v8349_v1, %v8353_v39  ;;  %v17663_v41 = vcombine.low %v8350_v40, %v8354_v48  ;;  %v8386_v54 = vld [vmem:[#allocation10 + $0x238] sm:$0xff] }
 0x74c   :  { %15146 = vmatprep.subr.bf16.mxu1 %v18644_v62  ;;  %v17664_v62 = vcombine.high %v8350_v40, %v8354_v48  ;;  %v17685_v23 = vcombine.low %v8373_v11, %v8377_v18  ;;  %v8394_v40 = vld [vmem:[#allocation10 + $0x278] sm:$0xff] }
 0x74e   :  { %14819 = vmatpush1.bf16.msra.mxu0 %v18641_v50  ;;  %v17661_v50 = vcombine.low %v8349_v1, %v8353_v39  ;;  %v8393_v1 = vld [vmem:[#allocation10 + $0x270] sm:$0xff]  ;;  %v8390_v39 = vld [vmem:[#allocation10 + $0x258] sm:$0xff] }
 0x74f   :  { %15147 = vmatpush1.bf16.msra.mxu1 %v18643_v57  ;;  %15157 = vmatprep.subr.bf16.mxu0 %v17630_v29  ;;  %v17670_v57 = vcombine.high %v8357_v46, %v8361_v13  ;;  %v17672_v29 = vcombine.high %v8358_v56, %v8362_v33  ;;  %v8401_v46 = vld [vmem:[#allocation10 + $0x2b0] sm:$0xff]  ;;  %v8398_v13 = vld [vmem:[#allocation10 + $0x298] sm:$0xff] }
 0x750   :  { %15485 = vmatprep.subr.bf16.mxu1 %v17632_v59  ;;  %v8365_v59 = vld [vmem:[#allocation10 + $0x190] sm:$0xff]  ;;  %v8402_v56 = vld [vmem:[#allocation10 + $0x2b8] sm:$0xff] }
 0x751   :  { %14821 = vmatmul.mubr.bf16.vlgmr.msra.gmra.mrb[24].mxu0 %v19806_v5  ;;  %v17677_v19 = vcombine.low %v8365_v59, %v8369_v10 }
 0x752   :  { %15149 = vmatmul.mubr.bf16.vlgmr.msra.gmra.mrb[24].mxu1 %v19806_v5  ;;  %15158 = vmatpush1.bf16.msra.mxu0 %v17629_v63  ;;  %v8370_v63 = vld [vmem:[#allocation10 + $0x1b8] sm:$0xff] }
 0x753   :  { %15189 = vmatprep.mubr.bf16.mxu0 %v19685_v60  ;;  %15486 = vmatpush1.bf16.msra.mxu1 %v17631_v8  ;;  %v17678_v8 = vcombine.high %v8365_v59, %v8369_v10  ;;  %v8409_v59 = vld [vmem:[#allocation10 + $0x2f0] sm:$0xff]  ;;  %v8406_v10 = vld [vmem:[#allocation10 + $0x2d8] sm:$0xff] }
 0x754   :  { %15517 = vmatprep.mubr.bf16.mxu1 %v19685_v60  ;;  %15159 = vmatprep.subr.bf16.mxu0 %v17638_v35  ;;  %v17653_v60 = vcombine.low %v8341_v51, %v8345_v22  ;;  %v17680_v35 = vcombine.high %v8366_v49, %v8370_v63  ;;  %v8385_v51 = vld [vmem:[#allocation10 + $0x230] sm:$0xff]  ;;  %v8382_v22 = vld [vmem:[#allocation10 + $0x218] sm:$0xff] }
 0x755   :  { %15487 = vmatprep.subr.bf16.mxu1 %v17640_v0  ;;  %v8374_v0 = vld [vmem:[#allocation10 + $0x1d8] sm:$0xff] }
 0x756   :  { %15160 = vmatpush1.bf16.msra.mxu0 %v17637_v6  ;;  %v17679_v6 = vcombine.low %v8366_v49, %v8370_v63  ;;  %v8410_v49 = vld [vmem:[#allocation10 + $0x2f8] sm:$0xff] }
 0x757   :  { %15488 = vmatpush1.bf16.msra.mxu1 %v17639_v34  ;;  %15161 = vmatprep.subr.bf16.mxu0 %v17646_v20  ;;  %v17686_v34 = vcombine.high %v8373_v11, %v8377_v18  ;;  %v17688_v20 = vcombine.high %v8374_v0, %v8378_v36  ;;  %v8417_v11 = vld [vmem:[#allocation10 + $0x330] sm:$0xff]  ;;  %v8414_v18 = vld [vmem:[#allocation10 + $0x318] sm:$0xff] }
 0x758   :  { %15489 = vmatprep.subr.bf16.mxu1 %v17648_v14  ;;  %v8381_v14 = vld [vmem:[#allocation10 + $0x210] sm:$0xff] }
 0x759   :  { %v17693_v48 = vcombine.low %v8381_v14, %v8385_v51 }
 0x75a   :  { %15162 = vmatpush1.bf16.msra.mxu0 %v17645_v25  ;;  %v17687_v25 = vcombine.low %v8374_v0, %v8378_v36  ;;  %v8418_v0 = vld [vmem:[#allocation10 + $0x338] sm:$0xff] }
 0x75b   :  { %15490 = vmatpush1.bf16.msra.mxu1 %v17647_v28  ;;  %15163 = vmatprep.subr.bf16.mxu0 %v17654_v45  ;;  %v17694_v28 = vcombine.high %v8381_v14, %v8385_v51  ;;  %v17696_v45 = vcombine.high %v8382_v22, %v8386_v54  ;;  %v8425_v14 = vld [vmem:[#allocation10 + $0x370] sm:$0xff]  ;;  %v8422_v51 = vld [vmem:[#allocation10 + $0x358] sm:$0xff] }
 0x75c   :  { %15491 = vmatprep.subr.bf16.mxu1 %v17656_v32  ;;  %v8389_v32 = vld [vmem:[#allocation10 + $0x250] sm:$0xff] }
 0x75d   :  { %v17701_v33 = vcombine.low %v8389_v32, %v8393_v1 }
 0x75e   :  { %15164 = vmatpush1.bf16.msra.mxu0 %v17653_v60  ;;  %v17695_v60 = vcombine.low %v8382_v22, %v8386_v54  ;;  %v8426_v22 = vld [vmem:[#allocation10 + $0x378] sm:$0xff] }
 0x75f   :  { %15492 = vmatpush1.bf16.msra.mxu1 %v17655_v53  ;;  %15165 = vmatprep.subr.bf16.mxu0 %v17662_v55  ;;  %v17702_v53 = vcombine.high %v8389_v32, %v8393_v1  ;;  %v17704_v55 = vcombine.high %v8390_v39, %v8394_v40  ;;  %v8433_v32 = vld [vmem:[#allocation10 + $0x3b0] sm:$0xff]  ;;  %v8430_v1 = vld [vmem:[#allocation10 + $0x398] sm:$0xff] }
 0x760   :  { %15493 = vmatprep.subr.bf16.mxu1 %v17664_v62  ;;  %v8397_v62 = vld [vmem:[#allocation10 + $0x290] sm:$0xff] }
 0x761   :  { %v17709_v63 = vcombine.low %v8397_v62, %v8401_v46 }
 0x762   :  { %15166 = vmatpush1.bf16.msra.mxu0 %v17661_v50  ;;  %v17703_v50 = vcombine.low %v8390_v39, %v8394_v40  ;;  %v8434_v39 = vld [vmem:[#allocation10 + $0x3b8] sm:$0xff] }
 0x763   :  { %15494 = vmatpush1.bf16.msra.mxu1 %v17663_v41  ;;  %15167 = vmatprep.subr.bf16.mxu0 %v17670_v57  ;;  %v17710_v41 = vcombine.high %v8397_v62, %v8401_v46  ;;  %v17712_v57 = vcombine.high %v8398_v13, %v8402_v56  ;;  %v8441_v62 = vld [vmem:[#allocation10 + $0x3f0] sm:$0xff]  ;;  %v8438_v46 = vld [vmem:[#allocation10 + $0x3d8] sm:$0xff] }
 0x764   :  { %15495 = vmatprep.subr.bf16.mxu1 %v17672_v29  ;;  %v8405_v29 = vld [vmem:[#allocation10 + $0x2d0] sm:$0xff] }
 0x765   :  { %v17717_v36 = vcombine.low %v8405_v29, %v8409_v59 }
 0x766   :  { %15168 = vmatpush1.bf16.msra.mxu0 %v17669_v38  ;;  %v17711_v38 = vcombine.low %v8398_v13, %v8402_v56  ;;  %v8442_v13 = vld [vmem:[#allocation10 + $0x3f8] sm:$0xff] }
 0x767   :  { %15496 = vmatpush1.bf16.msra.mxu1 %v17671_v42  ;;  %15169 = vmatprep.subr.bf16.mxu0 %v17678_v8  ;;  %v17718_v42 = vcombine.high %v8405_v29, %v8409_v59  ;;  %v17720_v8 = vcombine.high %v8406_v10, %v8410_v49  ;;  %v8449_v29 = vld [vmem:[#allocation10 + $0x430] sm:$0xff]  ;;  %v8446_v59 = vld [vmem:[#allocation10 + $0x418] sm:$0xff] }
 0x768   :  { %15497 = vmatprep.subr.bf16.mxu1 %v17680_v35  ;;  %v8413_v35 = vld [vmem:[#allocation10 + $0x310] sm:$0xff] }
 0x769   :  { %v17725_v54 = vcombine.low %v8413_v35, %v8417_v11 }
 0x76a   :  { %15170 = vmatpush1.bf16.msra.mxu0 %v17677_v19  ;;  %v17719_v19 = vcombine.low %v8406_v10, %v8410_v49  ;;  %v8450_v10 = vld [vmem:[#allocation10 + $0x438] sm:$0xff] }
 0x76b   :  { %15498 = vmatpush1.bf16.msra.mxu1 %v17679_v6  ;;  %15171 = vmatprep.subr.bf16.mxu0 %v17686_v34  ;;  %v17726_v6 = vcombine.high %v8413_v35, %v8417_v11  ;;  %v17728_v34 = vcombine.high %v8414_v18, %v8418_v0  ;;  %v8457_v35 = vld [vmem:[#allocation10 + $0x470] sm:$0xff] }
 0x76c   :  { %15499 = vmatprep.subr.bf16.mxu1 %v17688_v20  ;;  %v8421_v20 = vld [vmem:[#allocation10 + $0x350] sm:$0xff] }
 0x76d   :  { %v17733_v40 = vcombine.low %v8421_v20, %v8425_v14 }
 0x76e   :  { %15172 = vmatpush1.bf16.msra.mxu0 %v17685_v23  ;;  %v17727_v23 = vcombine.low %v8414_v18, %v8418_v0  ;;  %v8454_v18 = vld [vmem:[#allocation10 + $0x458] sm:$0xff] }
 0x76f   :  { %15500 = vmatpush1.bf16.msra.mxu1 %v17687_v25  ;;  %15173 = vmatprep.subr.bf16.mxu0 %v17694_v28  ;;  %v17734_v25 = vcombine.high %v8421_v20, %v8425_v14  ;;  %v17736_v28 = vcombine.high %v8422_v51, %v8426_v22  ;;  %v8458_v0 = vld [vmem:[#allocation10 + $0x478] sm:$0xff] }
 0x770   :  { %15501 = vmatprep.subr.bf16.mxu1 %v17696_v45  ;;  %v8429_v45 = vld [vmem:[#allocation10 + $0x390] sm:$0xff]  ;;  %v17768_v20 = vcombine.high %v8454_v18, %v8458_v0  ;;  %v8462_v14 = vld [vmem:[#allocation10 + $0x498] sm:$0xff] }
 0x771   :  { %v17741_v56 = vcombine.low %v8429_v45, %v8433_v32 }
 0x772   :  { %15174 = vmatpush1.bf16.msra.mxu0 %v17693_v48  ;;  %v17735_v48 = vcombine.low %v8422_v51, %v8426_v22  ;;  %v8466_v51 = vld [vmem:[#allocation10 + $0x4b8] sm:$0xff] }
 0x773   :  { %15502 = vmatpush1.bf16.msra.mxu1 %v17695_v60  ;;  %15175 = vmatprep.subr.bf16.mxu0 %v17702_v53  ;;  %v17742_v60 = vcombine.high %v8429_v45, %v8433_v32  ;;  %v17744_v53 = vcombine.high %v8430_v1, %v8434_v39  ;;  %v8473_v45 = vld [vmem:[#allocation10 + $0x4f0] sm:$0xff]  ;;  %v8470_v32 = vld [vmem:[#allocation10 + $0x4d8] sm:$0xff] }
 0x774   :  { %15503 = vmatprep.subr.bf16.mxu1 %v17704_v55  ;;  %v8437_v55 = vld [vmem:[#allocation10 + $0x3d0] sm:$0xff] }
 0x775   :  { %v17749_v49 = vcombine.low %v8437_v55, %v8441_v62 }
 0x776   :  { %15176 = vmatpush1.bf16.msra.mxu0 %v17701_v33  ;;  %v17743_v33 = vcombine.low %v8430_v1, %v8434_v39  ;;  %v8474_v1 = vld [vmem:[#allocation10 + $0x4f8] sm:$0xff] }
 0x777   :  { %15504 = vmatpush1.bf16.msra.mxu1 %v17703_v50  ;;  %15177 = vmatprep.subr.bf16.mxu0 %v17710_v41  ;;  %v17750_v50 = vcombine.high %v8437_v55, %v8441_v62  ;;  %v17752_v41 = vcombine.high %v8438_v46, %v8442_v13  ;;  %v8478_v55 = vld [vmem:[#allocation10 + $0x518] sm:$0xff] }
 0x778   :  { %15505 = vmatprep.subr.bf16.mxu1 %v17712_v57  ;;  %v8445_v57 = vld [vmem:[#allocation10 + $0x410] sm:$0xff]  ;;  %v8482_v62 = vld [vmem:[#allocation10 + $0x538] sm:$0xff] }
 0x779   :  { %v17757_v11 = vcombine.low %v8445_v57, %v8449_v29 }
 0x77a   :  { %15178 = vmatpush1.bf16.msra.mxu0 %v17709_v63  ;;  %v17751_v63 = vcombine.low %v8438_v46, %v8442_v13  ;;  %v17783_v46 = vcombine.low %v8470_v32, %v8474_v1 }
 0x77b   :  { %15506 = vmatpush1.bf16.msra.mxu1 %v17711_v38  ;;  %15179 = vmatprep.subr.bf16.mxu0 %v17718_v42  ;;  %v17758_v38 = vcombine.high %v8445_v57, %v8449_v29  ;;  %v17760_v42 = vcombine.high %v8446_v59, %v8450_v10  ;;  %v8490_v57 = vld [vmem:[#allocation10 + $0x578] sm:$0xff] }
 0x77c   :  { %15507 = vmatprep.subr.bf16.mxu1 %v17720_v8  ;;  %v8453_v8 = vld [vmem:[#allocation10 + $0x450] sm:$0xff] }
 0x77d   :  { %v17765_v22 = vcombine.low %v8453_v8, %v8457_v35 }
 0x77e   :  { %15180 = vmatpush1.bf16.msra.mxu0 %v17717_v36  ;;  %v17759_v36 = vcombine.low %v8446_v59, %v8450_v10  ;;  %v17791_v59 = vcombine.low %v8478_v55, %v8482_v62 }
 0x77f   :  { %15508 = vmatpush1.bf16.msra.mxu1 %v17719_v19  ;;  %15181 = vmatprep.subr.bf16.mxu0 %v17726_v6  ;;  %v17766_v19 = vcombine.high %v8453_v8, %v8457_v35  ;;  %v8461_v6 = vld [vmem:[#allocation10 + $0x490] sm:$0xff]  ;;  %v8498_v8 = vld [vmem:[#allocation10 + $0x5b8] sm:$0xff] }
 0x780   :  { %15509 = vmatprep.subr.bf16.mxu1 %v17728_v34  ;;  %v8465_v34 = vld [vmem:[#allocation10 + $0x4b0] sm:$0xff] }
 0x781   :  { %v17773_v39 = vcombine.low %v8461_v6, %v8465_v34 }
 0x782   :  { %15182 = vmatpush1.bf16.msra.mxu0 %v17725_v54  ;;  %v17767_v54 = vcombine.low %v8454_v18, %v8458_v0 }
 0x783   :  { %15510 = vmatpush1.bf16.msra.mxu1 %v17727_v23  ;;  %15183 = vmatprep.subr.bf16.mxu0 %v17734_v25  ;;  %v17774_v23 = vcombine.high %v8461_v6, %v8465_v34  ;;  %v17776_v25 = vcombine.high %v8462_v14, %v8466_v51  ;;  %v8502_v6 = vld [vmem:[#allocation10 + $0x5d8] sm:$0xff] }
 0x784   :  { %15511 = vmatprep.subr.bf16.mxu1 %v17736_v28  ;;  %v8469_v28 = vld [vmem:[#allocation10 + $0x4d0] sm:$0xff]  ;;  %v8506_v34 = vld [vmem:[#allocation10 + $0x5f8] sm:$0xff] }
 0x786   :  { %15184 = vmatpush1.bf16.msra.mxu0 %v17733_v40  ;;  %v17782_v40 = vcombine.high %v8469_v28, %v8473_v45 }
 0x787   :  { %15512 = vmatpush1.bf16.msra.mxu1 %v17735_v48  ;;  %15185 = vmatprep.subr.bf16.mxu0 %v17742_v60  ;;  %v17784_v48 = vcombine.high %v8470_v32, %v8474_v1  ;;  %v8477_v60 = vld [vmem:[#allocation10 + $0x510] sm:$0xff]  ;;  %v17815_v32 = vcombine.low %v8502_v6, %v8506_v34 }
 0x788   :  { %15513 = vmatprep.subr.bf16.mxu1 %v17744_v53  ;;  %v8481_v53 = vld [vmem:[#allocation10 + $0x530] sm:$0xff] }
 0x789   :  { %v17790_v13 = vcombine.high %v8477_v60, %v8481_v53  ;;  %v17789_v29 = vcombine.low %v8477_v60, %v8481_v53  ;;  %v8522_v60 = vld [vmem:[#allocation10 + $0x678] sm:$0xff] }
 0x78a   :  { %15186 = vmatpush1.bf16.msra.mxu0 %v17741_v56  ;;  %v17792_v56 = vcombine.high %v8478_v55, %v8482_v62 }
 0x78b   :  { %15514 = vmatpush1.bf16.msra.mxu1 %v17743_v33  ;;  %15187 = vmatprep.subr.bf16.mxu0 %v17750_v50  ;;  %v8485_v33 = vld [vmem:[#allocation10 + $0x550] sm:$0xff] }
 0x78c   :  { %15515 = vmatprep.subr.bf16.mxu1 %v17752_v41  ;;  %v8489_v50 = vld [vmem:[#allocation10 + $0x570] sm:$0xff]  ;;  %v8486_v41 = vld [vmem:[#allocation10 + $0x558] sm:$0xff] }
 0x78d   :  { %v17798_v10 = vcombine.high %v8485_v33, %v8489_v50  ;;  %v17797_v35 = vcombine.low %v8485_v33, %v8489_v50  ;;  %v8530_v33 = vld [vmem:[#allocation10 + $0x6b8] sm:$0xff] }
 0x78e   :  { %15188 = vmatpush1.bf16.msra.mxu0 %v17749_v49  ;;  %v17800_v49 = vcombine.high %v8486_v41, %v8490_v57 }
 0x78f   :  { %15516 = vmatpush1.bf16.msra.mxu1 %v17751_v63  ;;  %15198 = vmatprep.subr.bf16.mxu0 %v17758_v38  ;;  %v8493_v63 = vld [vmem:[#allocation10 + $0x590] sm:$0xff] }
 0x790   :  { %15526 = vmatprep.subr.bf16.mxu1 %v17760_v42  ;;  %v8497_v38 = vld [vmem:[#allocation10 + $0x5b0] sm:$0xff]  ;;  %v8494_v42 = vld [vmem:[#allocation10 + $0x598] sm:$0xff] }
 0x791   :  { %15190 = vmatmul.mubr.bf16.vlgmr.msra.gmra.mrb[28].mxu0 %v19697_v61  ;;  %v17806_v18 = vcombine.high %v8493_v63, %v8497_v38  ;;  %v17808_v0 = vcombine.high %v8494_v42, %v8498_v8 }
 0x792   :  { %15518 = vmatmul.mubr.bf16.vlgmr.msra.gmra.mrb[28].mxu1 %v19697_v61  ;;  %15199 = vmatpush1.bf16.msra.mxu0 %v17757_v11  ;;  %v17775_v61 = vcombine.low %v8462_v14, %v8466_v51  ;;  %v17799_v11 = vcombine.low %v8486_v41, %v8490_v57  ;;  %v17807_v14 = vcombine.low %v8494_v42, %v8498_v8 }
 0x793   :  { %15230 = vmatprep.mubr.bf16.mxu0 %v19699_v58  ;;  %15527 = vmatpush1.bf16.msra.mxu1 %v17759_v36  ;;  %v8501_v36 = vld [vmem:[#allocation10 + $0x5d0] sm:$0xff] }
 0x794   :  { %15558 = vmatprep.mubr.bf16.mxu1 %v19699_v58  ;;  %15200 = vmatprep.subr.bf16.mxu0 %v17766_v19  ;;  %v17781_v58 = vcombine.low %v8469_v28, %v8473_v45  ;;  %v8505_v19 = vld [vmem:[#allocation10 + $0x5f0] sm:$0xff]  ;;  %v8514_v28 = vld [vmem:[#allocation10 + $0x638] sm:$0xff] }
 0x795   :  { %15528 = vmatprep.subr.bf16.mxu1 %v17768_v20  ;;  %v17805_v20 = vcombine.low %v8493_v63, %v8497_v38  ;;  %v17814_v51 = vcombine.high %v8501_v36, %v8505_v19  ;;  %v17813_v45 = vcombine.low %v8501_v36, %v8505_v19  ;;  %v8538_v63 = vld [vmem:[#allocation10 + $0x6f8] sm:$0xff] }
 0x796   :  { %15201 = vmatpush1.bf16.msra.mxu0 %v17765_v22  ;;  %v17816_v22 = vcombine.high %v8502_v6, %v8506_v34  ;;  %v8546_v36 = vld [vmem:[#allocation10 + $0x738] sm:$0xff] }
 0x797   :  { %15529 = vmatpush1.bf16.msra.mxu1 %v17767_v54  ;;  %15202 = vmatprep.subr.bf16.mxu0 %v17774_v23  ;;  %v8509_v54 = vld [vmem:[#allocation10 + $0x610] sm:$0xff] }
 0x798   :  { %15530 = vmatprep.subr.bf16.mxu1 %v17776_v25  ;;  %v8513_v23 = vld [vmem:[#allocation10 + $0x630] sm:$0xff]  ;;  %v8510_v25 = vld [vmem:[#allocation10 + $0x618] sm:$0xff] }
 0x799   :  { %v17822_v1 = vcombine.high %v8509_v54, %v8513_v23  ;;  %v17821_v53 = vcombine.low %v8509_v54, %v8513_v23  ;;  %v17823_v55 = vcombine.low %v8510_v25, %v8514_v28  ;;  %v8554_v54 = vld [vmem:[#allocation10 + $0x778] sm:$0xff] }
 0x79a   :  { %15203 = vmatpush1.bf16.msra.mxu0 %v17773_v39  ;;  %v17824_v39 = vcombine.high %v8510_v25, %v8514_v28 }
 0x79b   :  { %15531 = vmatpush1.bf16.msra.mxu1 %v17775_v61  ;;  %15204 = vmatprep.subr.bf16.mxu0 %v17782_v40  ;;  %v8517_v61 = vld [vmem:[#allocation10 + $0x650] sm:$0xff] }
 0x79c   :  { %15532 = vmatprep.subr.bf16.mxu1 %v17784_v48  ;;  %v8521_v40 = vld [vmem:[#allocation10 + $0x670] sm:$0xff]  ;;  %v8518_v48 = vld [vmem:[#allocation10 + $0x658] sm:$0xff] }
 0x79d   :  { %v17830_v62 = vcombine.high %v8517_v61, %v8521_v40  ;;  %v17829_v50 = vcombine.low %v8517_v61, %v8521_v40  ;;  %v17831_v41 = vcombine.low %v8518_v48, %v8522_v60  ;;  %v8562_v61 = vld [vmem:[#allocation10 + $0x7b8] sm:$0xff] }
 0x79e   :  { %15205 = vmatpush1.bf16.msra.mxu0 %v17781_v58  ;;  %v17832_v58 = vcombine.high %v8518_v48, %v8522_v60 }
 0x79f   :  { %15533 = vmatpush1.bf16.msra.mxu1 %v17783_v46  ;;  %15206 = vmatprep.subr.bf16.mxu0 %v17790_v13  ;;  %v8525_v46 = vld [vmem:[#allocation10 + $0x690] sm:$0xff] }
 0x7a0   :  { %15534 = vmatprep.subr.bf16.mxu1 %v17792_v56  ;;  %v8529_v13 = vld [vmem:[#allocation10 + $0x6b0] sm:$0xff]  ;;  %v8526_v56 = vld [vmem:[#allocation10 + $0x698] sm:$0xff] }
 0x7a1   :  { %v17838_v57 = vcombine.high %v8525_v46, %v8529_v13  ;;  %v17837_v38 = vcombine.low %v8525_v46, %v8529_v13  ;;  %v17839_v42 = vcombine.low %v8526_v56, %v8530_v33  ;;  %v8570_v46 = vld [vmem:[#allocation10 + $0x7f8] sm:$0xff] }
 0x7a2   :  { %15207 = vmatpush1.bf16.msra.mxu0 %v17789_v29  ;;  %v17840_v29 = vcombine.high %v8526_v56, %v8530_v33 }
 0x7a3   :  { %15535 = vmatpush1.bf16.msra.mxu1 %v17791_v59  ;;  %15208 = vmatprep.subr.bf16.mxu0 %v17798_v10  ;;  %v8533_v59 = vld [vmem:[#allocation10 + $0x6d0] sm:$0xff] }
 0x7a4   :  { %15536 = vmatprep.subr.bf16.mxu1 %v17800_v49  ;;  %v8537_v10 = vld [vmem:[#allocation10 + $0x6f0] sm:$0xff]  ;;  %v8534_v49 = vld [vmem:[#allocation10 + $0x6d8] sm:$0xff] }
 0x7a5   :  { %v17846_v8 = vcombine.high %v8533_v59, %v8537_v10  ;;  %v17845_v19 = vcombine.low %v8533_v59, %v8537_v10  ;;  %v17847_v6 = vcombine.low %v8534_v49, %v8538_v63  ;;  %v8578_v59 = vld [vmem:[#allocation10 + $0x838] sm:$0xff] }
 0x7a6   :  { %15209 = vmatpush1.bf16.msra.mxu0 %v17797_v35  ;;  %v17848_v35 = vcombine.high %v8534_v49, %v8538_v63 }
 0x7a7   :  { %15537 = vmatpush1.bf16.msra.mxu1 %v17799_v11  ;;  %15210 = vmatprep.subr.bf16.mxu0 %v17806_v18  ;;  %v8541_v11 = vld [vmem:[#allocation10 + $0x710] sm:$0xff] }
 0x7a8   :  { %15538 = vmatprep.subr.bf16.mxu1 %v17808_v0  ;;  %v8545_v18 = vld [vmem:[#allocation10 + $0x730] sm:$0xff]  ;;  %v8542_v0 = vld [vmem:[#allocation10 + $0x718] sm:$0xff] }
 0x7a9   :  { %v17854_v34 = vcombine.high %v8541_v11, %v8545_v18  ;;  %v17853_v23 = vcombine.low %v8541_v11, %v8545_v18  ;;  %v17855_v25 = vcombine.low %v8542_v0, %v8546_v36  ;;  %v8582_v11 = vld [vmem:[#allocation10 + $0x858] sm:$0xff] }
 0x7aa   :  { %15211 = vmatpush1.bf16.msra.mxu0 %v17805_v20  ;;  %v17856_v20 = vcombine.high %v8542_v0, %v8546_v36  ;;  %v8586_v18 = vld [vmem:[#allocation10 + $0x878] sm:$0xff] }
 0x7ab   :  { %15539 = vmatpush1.bf16.msra.mxu1 %v17807_v14  ;;  %15212 = vmatprep.subr.bf16.mxu0 %v17814_v51  ;;  %v8549_v14 = vld [vmem:[#allocation10 + $0x750] sm:$0xff] }
 0x7ac   :  { %15540 = vmatprep.subr.bf16.mxu1 %v17816_v22  ;;  %v8553_v51 = vld [vmem:[#allocation10 + $0x770] sm:$0xff]  ;;  %v8550_v22 = vld [vmem:[#allocation10 + $0x758] sm:$0xff] }
 0x7ad   :  { %v17862_v28 = vcombine.high %v8549_v14, %v8553_v51  ;;  %v17861_v40 = vcombine.low %v8549_v14, %v8553_v51  ;;  %v17863_v48 = vcombine.low %v8550_v22, %v8554_v54  ;;  %v8594_v14 = vld [vmem:[#allocation10 + $0x8b8] sm:$0xff] }
 0x7ae   :  { %15213 = vmatpush1.bf16.msra.mxu0 %v17813_v45  ;;  %v17864_v45 = vcombine.high %v8550_v22, %v8554_v54  ;;  %v17895_v22 = vcombine.low %v8582_v11, %v8586_v18 }
 0x7af   :  { %15541 = vmatpush1.bf16.msra.mxu1 %v17815_v32  ;;  %15214 = vmatprep.subr.bf16.mxu0 %v17822_v1  ;;  %v8557_v32 = vld [vmem:[#allocation10 + $0x790] sm:$0xff] }
 0x7b0   :  { %15542 = vmatprep.subr.bf16.mxu1 %v17824_v39  ;;  %v8561_v1 = vld [vmem:[#allocation10 + $0x7b0] sm:$0xff]  ;;  %v8558_v39 = vld [vmem:[#allocation10 + $0x798] sm:$0xff] }
 0x7b1   :  { %v17870_v60 = vcombine.high %v8557_v32, %v8561_v1  ;;  %v17869_v13 = vcombine.low %v8557_v32, %v8561_v1  ;;  %v17871_v56 = vcombine.low %v8558_v39, %v8562_v61  ;;  %v8602_v32 = vld [vmem:[#allocation10 + $0x8f8] sm:$0xff] }
 0x7b2   :  { %15215 = vmatpush1.bf16.msra.mxu0 %v17821_v53  ;;  %v17872_v53 = vcombine.high %v8558_v39, %v8562_v61 }
 0x7b3   :  { %15543 = vmatpush1.bf16.msra.mxu1 %v17823_v55  ;;  %15216 = vmatprep.subr.bf16.mxu0 %v17830_v62  ;;  %v8565_v55 = vld [vmem:[#allocation10 + $0x7d0] sm:$0xff] }
 0x7b4   :  { %15544 = vmatprep.subr.bf16.mxu1 %v17832_v58  ;;  %v8569_v62 = vld [vmem:[#allocation10 + $0x7f0] sm:$0xff]  ;;  %v8566_v58 = vld [vmem:[#allocation10 + $0x7d8] sm:$0xff] }
 0x7b5   :  { %v17878_v33 = vcombine.high %v8565_v55, %v8569_v62  ;;  %v17877_v10 = vcombine.low %v8565_v55, %v8569_v62  ;;  %v17879_v49 = vcombine.low %v8566_v58, %v8570_v46 }
 0x7b6   :  { %15217 = vmatpush1.bf16.msra.mxu0 %v17829_v50  ;;  %v17880_v50 = vcombine.high %v8566_v58, %v8570_v46  ;;  %v8613_v46 = vld [vmem:[#allocation10 + $0x950] sm:$0xff] }
 0x7b7   :  { %15545 = vmatpush1.bf16.msra.mxu1 %v17831_v41  ;;  %15218 = vmatprep.subr.bf16.mxu0 %v17838_v57  ;;  %v8573_v41 = vld [vmem:[#allocation10 + $0x810] sm:$0xff] }
 0x7b8   :  { %15546 = vmatprep.subr.bf16.mxu1 %v17840_v29  ;;  %v8577_v57 = vld [vmem:[#allocation10 + $0x830] sm:$0xff]  ;;  %v8574_v29 = vld [vmem:[#allocation10 + $0x818] sm:$0xff] }
 0x7b9   :  { %v17886_v63 = vcombine.high %v8573_v41, %v8577_v57  ;;  %v17887_v0 = vcombine.low %v8574_v29, %v8578_v59 }
 0x7ba   :  { %15219 = vmatpush1.bf16.msra.mxu0 %v17837_v38  ;;  %v17888_v38 = vcombine.high %v8574_v29, %v8578_v59  ;;  %v8621_v59 = vld [vmem:[#allocation10 + $0x990] sm:$0xff] }
 0x7bb   :  { %15547 = vmatpush1.bf16.msra.mxu1 %v17839_v42  ;;  %15220 = vmatprep.subr.bf16.mxu0 %v17846_v8  ;;  %v8581_v42 = vld [vmem:[#allocation10 + $0x850] sm:$0xff] }
 0x7bc   :  { %15548 = vmatprep.subr.bf16.mxu1 %v17848_v35  ;;  %v8585_v8 = vld [vmem:[#allocation10 + $0x870] sm:$0xff]  ;;  %v17885_v35 = vcombine.low %v8573_v41, %v8577_v57 }
 0x7bd   :  { %v17894_v36 = vcombine.high %v8581_v42, %v8585_v8  ;;  %v17893_v51 = vcombine.low %v8581_v42, %v8585_v8 }
 0x7be   :  { %15221 = vmatpush1.bf16.msra.mxu0 %v17845_v19  ;;  %v8589_v19 = vld [vmem:[#allocation10 + $0x890] sm:$0xff] }
 0x7bf   :  { %15549 = vmatpush1.bf16.msra.mxu1 %v17847_v6  ;;  %15222 = vmatprep.subr.bf16.mxu0 %v17854_v34  ;;  %v8593_v6 = vld [vmem:[#allocation10 + $0x8b0] sm:$0xff]  ;;  %v17896_v34 = vcombine.high %v8582_v11, %v8586_v18 }
 0x7c0   :  { %15550 = vmatprep.subr.bf16.mxu1 %v17856_v20  ;;  %v8590_v20 = vld [vmem:[#allocation10 + $0x898] sm:$0xff]  ;;  %v17902_v54 = vcombine.high %v8589_v19, %v8593_v6  ;;  %v17901_v1 = vcombine.low %v8589_v19, %v8593_v6  ;;  %v8629_v11 = vld [vmem:[#allocation10 + $0x9d0] sm:$0xff] }
 0x7c1   :  { %v8633_v18 = vld [vmem:[#allocation10 + $0x9f0] sm:$0xff] }
 0x7c2   :  { %15223 = vmatpush1.bf16.msra.mxu0 %v17853_v23  ;;  %v17904_v23 = vcombine.high %v8590_v20, %v8594_v14 }
 0x7c3   :  { %15551 = vmatpush1.bf16.msra.mxu1 %v17855_v25  ;;  %15224 = vmatprep.subr.bf16.mxu0 %v17862_v28  ;;  %v8597_v25 = vld [vmem:[#allocation10 + $0x8d0] sm:$0xff] }
 0x7c4   :  { %15552 = vmatprep.subr.bf16.mxu1 %v17864_v45  ;;  %v8601_v28 = vld [vmem:[#allocation10 + $0x8f0] sm:$0xff]  ;;  %v8598_v45 = vld [vmem:[#allocation10 + $0x8d8] sm:$0xff] }
 0x7c5   :  { %v17910_v39 = vcombine.high %v8597_v25, %v8601_v28  ;;  %v17912_v61 = vcombine.high %v8598_v45, %v8602_v32  ;;  %v17911_v55 = vcombine.low %v8598_v45, %v8602_v32  ;;  %v8645_v32 = vld [vmem:[#allocation10 + $0xa50] sm:$0xff] }
 0x7c6   :  { %15225 = vmatpush1.bf16.msra.mxu0 %v17861_v40  ;;  %v8605_v40 = vld [vmem:[#allocation10 + $0x910] sm:$0xff] }
 0x7c7   :  { %15553 = vmatpush1.bf16.msra.mxu1 %v17863_v48  ;;  %15226 = vmatprep.subr.bf16.mxu0 %v17870_v60  ;;  %v8609_v48 = vld [vmem:[#allocation10 + $0x930] sm:$0xff]  ;;  %v8606_v60 = vld [vmem:[#allocation10 + $0x918] sm:$0xff] }
 0x7c8   :  { %15554 = vmatprep.subr.bf16.mxu1 %v17872_v53  ;;  %v8610_v53 = vld [vmem:[#allocation10 + $0x938] sm:$0xff]  ;;  %v17918_v62 = vcombine.high %v8605_v40, %v8609_v48 }
 0x7c9   :  { %v17920_v58 = vcombine.high %v8606_v60, %v8610_v53  ;;  %v17919_v41 = vcombine.low %v8606_v60, %v8610_v53  ;;  %v8653_v53 = vld [vmem:[#allocation10 + $0xa90] sm:$0xff] }
 0x7ca   :  { %15227 = vmatpush1.bf16.msra.mxu0 %v17869_v13  ;;  %v8617_v13 = vld [vmem:[#allocation10 + $0x970] sm:$0xff] }
 0x7cb   :  { %15555 = vmatpush1.bf16.msra.mxu1 %v17871_v56  ;;  %15228 = vmatprep.subr.bf16.mxu0 %v17878_v33  ;;  %v8614_v56 = vld [vmem:[#allocation10 + $0x958] sm:$0xff]  ;;  %v17926_v57 = vcombine.high %v8613_v46, %v8617_v13 }
 0x7cc   :  { %15556 = vmatprep.subr.bf16.mxu1 %v17880_v50  ;;  %v8618_v33 = vld [vmem:[#allocation10 + $0x978] sm:$0xff]  ;;  %v17917_v50 = vcombine.low %v8605_v40, %v8609_v48 }
 0x7cd   :  { %v17928_v29 = vcombine.high %v8614_v56, %v8618_v33  ;;  %v17927_v42 = vcombine.low %v8614_v56, %v8618_v33  ;;  %v8661_v33 = vld [vmem:[#allocation10 + $0xad0] sm:$0xff] }
 0x7ce   :  { %15229 = vmatpush1.bf16.msra.mxu0 %v17877_v10  ;;  %v8625_v10 = vld [vmem:[#allocation10 + $0x9b0] sm:$0xff] }
 0x7cf   :  { %15557 = vmatpush1.bf16.msra.mxu1 %v17879_v49  ;;  %15239 = vmatprep.subr.bf16.mxu0 %v17886_v63  ;;  %v8622_v49 = vld [vmem:[#allocation10 + $0x998] sm:$0xff]  ;;  %v17934_v8 = vcombine.high %v8621_v59, %v8625_v10  ;;  %v17933_v19 = vcombine.low %v8621_v59, %v8625_v10 }
 0x7d0   :  { %15567 = vmatprep.subr.bf16.mxu1 %v17888_v38  ;;  %v8626_v63 = vld [vmem:[#allocation10 + $0x9b8] sm:$0xff]  ;;  %v17925_v38 = vcombine.low %v8613_v46, %v8617_v13 }
 0x7d1   :  { %15231 = vmatmul.mubr.bf16.vlgmr.msra.gmra.mrb[28].mxu0 %v19711_v2  ;;  %v17935_v6 = vcombine.low %v8622_v49, %v8626_v63 }
 0x7d2   :  { %15559 = vmatmul.mubr.bf16.vlgmr.msra.gmra.mrb[28].mxu1 %v19711_v2  ;;  %15240 = vmatpush1.bf16.msra.mxu0 %v17885_v35  ;;  %v17903_v2 = vcombine.low %v8590_v20, %v8594_v14  ;;  %v17936_v35 = vcombine.high %v8622_v49, %v8626_v63  ;;  %v8637_v14 = vld [vmem:[#allocation10 + $0xa10] sm:$0xff] }
 0x7d3   :  { %15271 = vmatprep.mubr.bf16.mxu0 %v19713_v7  ;;  %15568 = vmatpush1.bf16.msra.mxu1 %v17887_v0  ;;  %v8630_v0 = vld [vmem:[#allocation10 + $0x9d8] sm:$0xff]  ;;  %v8669_v63 = vld [vmem:[#allocation10 + $0xb10] sm:$0xff] }
 0x7d4   :  { %15599 = vmatprep.mubr.bf16.mxu1 %v19713_v7  ;;  %15241 = vmatprep.subr.bf16.mxu0 %v17894_v36  ;;  %v17909_v7 = vcombine.low %v8597_v25, %v8601_v28  ;;  %v8634_v36 = vld [vmem:[#allocation10 + $0x9f8] sm:$0xff] }
 0x7d5   :  { %15569 = vmatprep.subr.bf16.mxu1 %v17896_v34  ;;  %v17942_v34 = vcombine.high %v8629_v11, %v8633_v18  ;;  %v17944_v20 = vcombine.high %v8630_v0, %v8634_v36  ;;  %v17943_v25 = vcombine.low %v8630_v0, %v8634_v36  ;;  %v8677_v36 = vld [vmem:[#allocation10 + $0xb50] sm:$0xff] }
 0x7d6   :  { %15242 = vmatpush1.bf16.msra.mxu0 %v17893_v51  ;;  %v8641_v51 = vld [vmem:[#allocation10 + $0xa30] sm:$0xff] }
 0x7d7   :  { %15570 = vmatpush1.bf16.msra.mxu1 %v17895_v22  ;;  %15243 = vmatprep.subr.bf16.mxu0 %v17902_v54  ;;  %v8638_v22 = vld [vmem:[#allocation10 + $0xa18] sm:$0xff]  ;;  %v17950_v28 = vcombine.high %v8637_v14, %v8641_v51 }
 0x7d8   :  { %15571 = vmatprep.subr.bf16.mxu1 %v17904_v23  ;;  %v8642_v54 = vld [vmem:[#allocation10 + $0xa38] sm:$0xff]  ;;  %v17941_v23 = vcombine.low %v8629_v11, %v8633_v18 }
 0x7d9   :  { %v17952_v45 = vcombine.high %v8638_v22, %v8642_v54  ;;  %v17951_v40 = vcombine.low %v8638_v22, %v8642_v54  ;;  %v8685_v54 = vld [vmem:[#allocation10 + $0xb90] sm:$0xff] }
 0x7da   :  { %15244 = vmatpush1.bf16.msra.mxu0 %v17901_v1  ;;  %v8649_v1 = vld [vmem:[#allocation10 + $0xa70] sm:$0xff] }
 0x7db   :  { %15572 = vmatpush1.bf16.msra.mxu1 %v17903_v2  ;;  %15245 = vmatprep.subr.bf16.mxu0 %v17910_v39  ;;  %v8646_v2 = vld [vmem:[#allocation10 + $0xa58] sm:$0xff]  ;;  %v17958_v48 = vcombine.high %v8645_v32, %v8649_v1 }
 0x7dc   :  { %15573 = vmatprep.subr.bf16.mxu1 %v17912_v61  ;;  %v8650_v39 = vld [vmem:[#allocation10 + $0xa78] sm:$0xff]  ;;  %v17949_v61 = vcombine.low %v8637_v14, %v8641_v51 }
 0x7dd   :  { %v17960_v60 = vcombine.high %v8646_v2, %v8650_v39  ;;  %v17959_v46 = vcombine.low %v8646_v2, %v8650_v39  ;;  %v8693_v39 = vld [vmem:[#allocation10 + $0xbd0] sm:$0xff] }
 0x7de   :  { %15246 = vmatpush1.bf16.msra.mxu0 %v17909_v7  ;;  %v8657_v7 = vld [vmem:[#allocation10 + $0xab0] sm:$0xff] }
 0x7df   :  { %15574 = vmatpush1.bf16.msra.mxu1 %v17911_v55  ;;  %15247 = vmatprep.subr.bf16.mxu0 %v17918_v62  ;;  %v8654_v55 = vld [vmem:[#allocation10 + $0xa98] sm:$0xff]  ;;  %v17966_v13 = vcombine.high %v8653_v53, %v8657_v7 }
 0x7e0   :  { %15575 = vmatprep.subr.bf16.mxu1 %v17920_v58  ;;  %v8658_v62 = vld [vmem:[#allocation10 + $0xab8] sm:$0xff]  ;;  %v17957_v58 = vcombine.low %v8645_v32, %v8649_v1 }
 0x7e1   :  { %v17968_v56 = vcombine.high %v8654_v55, %v8658_v62  ;;  %v17967_v59 = vcombine.low %v8654_v55, %v8658_v62  ;;  %v8701_v62 = vld [vmem:[#allocation10 + $0xc10] sm:$0xff] }
 0x7e2   :  { %15248 = vmatpush1.bf16.msra.mxu0 %v17917_v50  ;;  %v8665_v50 = vld [vmem:[#allocation10 + $0xaf0] sm:$0xff] }
 0x7e3   :  { %15576 = vmatpush1.bf16.msra.mxu1 %v17919_v41  ;;  %15249 = vmatprep.subr.bf16.mxu0 %v17926_v57  ;;  %v8662_v41 = vld [vmem:[#allocation10 + $0xad8] sm:$0xff]  ;;  %v17974_v10 = vcombine.high %v8661_v33, %v8665_v50 }
 0x7e4   :  { %15577 = vmatprep.subr.bf16.mxu1 %v17928_v29  ;;  %v8666_v57 = vld [vmem:[#allocation10 + $0xaf8] sm:$0xff]  ;;  %v17965_v29 = vcombine.low %v8653_v53, %v8657_v7 }
 0x7e5   :  { %v17976_v49 = vcombine.high %v8662_v41, %v8666_v57  ;;  %v17975_v11 = vcombine.low %v8662_v41, %v8666_v57  ;;  %v8709_v57 = vld [vmem:[#allocation10 + $0xc50] sm:$0xff] }
 0x7e6   :  { %15250 = vmatpush1.bf16.msra.mxu0 %v17925_v38  ;;  %v8673_v38 = vld [vmem:[#allocation10 + $0xb30] sm:$0xff] }
 0x7e7   :  { %15578 = vmatpush1.bf16.msra.mxu1 %v17927_v42  ;;  %15251 = vmatprep.subr.bf16.mxu0 %v17934_v8  ;;  %v8670_v42 = vld [vmem:[#allocation10 + $0xb18] sm:$0xff]  ;;  %v17982_v18 = vcombine.high %v8669_v63, %v8673_v38 }
 0x7e8   :  { %15579 = vmatprep.subr.bf16.mxu1 %v17936_v35  ;;  %v8674_v8 = vld [vmem:[#allocation10 + $0xb38] sm:$0xff]  ;;  %v17973_v35 = vcombine.low %v8661_v33, %v8665_v50 }
 0x7e9   :  { %v17984_v0 = vcombine.high %v8670_v42, %v8674_v8  ;;  %v17983_v14 = vcombine.low %v8670_v42, %v8674_v8  ;;  %v8717_v42 = vld [vmem:[#allocation10 + $0xc90] sm:$0xff] }
 0x7ea   :  { %15252 = vmatpush1.bf16.msra.mxu0 %v17933_v19  ;;  %v8681_v19 = vld [vmem:[#allocation10 + $0xb70] sm:$0xff] }
 0x7eb   :  { %15580 = vmatpush1.bf16.msra.mxu1 %v17935_v6  ;;  %15253 = vmatprep.subr.bf16.mxu0 %v17942_v34  ;;  %v8678_v6 = vld [vmem:[#allocation10 + $0xb58] sm:$0xff]  ;;  %v17990_v51 = vcombine.high %v8677_v36, %v8681_v19  ;;  %v8721_v8 = vld [vmem:[#allocation10 + $0xcb0] sm:$0xff] }
 0x7ec   :  { %15581 = vmatprep.subr.bf16.mxu1 %v17944_v20  ;;  %v8682_v34 = vld [vmem:[#allocation10 + $0xb78] sm:$0xff]  ;;  %v17981_v20 = vcombine.low %v8669_v63, %v8673_v38 }
 0x7ed   :  { %v17992_v22 = vcombine.high %v8678_v6, %v8682_v34  ;;  %v17991_v32 = vcombine.low %v8678_v6, %v8682_v34  ;;  %v8725_v34 = vld [vmem:[#allocation10 + $0xcd0] sm:$0xff] }
 0x7ee   :  { %15254 = vmatpush1.bf16.msra.mxu0 %v17941_v23  ;;  %v8689_v23 = vld [vmem:[#allocation10 + $0xbb0] sm:$0xff] }
 0x7ef   :  { %15582 = vmatpush1.bf16.msra.mxu1 %v17943_v25  ;;  %15255 = vmatprep.subr.bf16.mxu0 %v17950_v28  ;;  %v8686_v25 = vld [vmem:[#allocation10 + $0xb98] sm:$0xff]  ;;  %v17998_v1 = vcombine.high %v8685_v54, %v8689_v23 }
 0x7f0   :  { %15583 = vmatprep.subr.bf16.mxu1 %v17952_v45  ;;  %v8690_v28 = vld [vmem:[#allocation10 + $0xbb8] sm:$0xff]  ;;  %v17989_v45 = vcombine.low %v8677_v36, %v8681_v19  ;;  %v18030_v19 = vcombine.high %v8717_v42, %v8721_v8 }
 0x7f1   :  { %v18000_v2 = vcombine.high %v8686_v25, %v8690_v28  ;;  %v17999_v53 = vcombine.low %v8686_v25, %v8690_v28  ;;  %v8733_v25 = vld [vmem:[#allocation10 + $0xd10] sm:$0xff] }
 0x7f2   :  { %15256 = vmatpush1.bf16.msra.mxu0 %v17949_v61  ;;  %v8697_v61 = vld [vmem:[#allocation10 + $0xbf0] sm:$0xff] }
 0x7f3   :  { %15584 = vmatpush1.bf16.msra.mxu1 %v17951_v40  ;;  %15257 = vmatprep.subr.bf16.mxu0 %v17958_v48  ;;  %v8694_v40 = vld [vmem:[#allocation10 + $0xbd8] sm:$0xff]  ;;  %v18006_v7 = vcombine.high %v8693_v39, %v8697_v61  ;;  %v8737_v28 = vld [vmem:[#allocation10 + $0xd30] sm:$0xff] }
 0x7f4   :  { %15585 = vmatprep.subr.bf16.mxu1 %v17960_v60  ;;  %v8698_v48 = vld [vmem:[#allocation10 + $0xbf8] sm:$0xff]  ;;  %v17997_v60 = vcombine.low %v8685_v54, %v8689_v23 }
 0x7f5   :  { %v18008_v55 = vcombine.high %v8694_v40, %v8698_v48  ;;  %v18007_v33 = vcombine.low %v8694_v40, %v8698_v48  ;;  %v8745_v40 = vld [vmem:[#allocation10 + $0xd70] sm:$0xff]  ;;  %v8742_v48 = vld [vmem:[#allocation10 + $0xd58] sm:$0xff] }
 0x7f6   :  { %15258 = vmatpush1.bf16.msra.mxu0 %v17957_v58  ;;  %v8705_v58 = vld [vmem:[#allocation10 + $0xc30] sm:$0xff] }
 0x7f7   :  { %15586 = vmatpush1.bf16.msra.mxu1 %v17959_v46  ;;  %15259 = vmatprep.subr.bf16.mxu0 %v17966_v13  ;;  %v8702_v46 = vld [vmem:[#allocation10 + $0xc18] sm:$0xff]  ;;  %v18014_v50 = vcombine.high %v8701_v62, %v8705_v58 }
 0x7f8   :  { %15587 = vmatprep.subr.bf16.mxu1 %v17968_v56  ;;  %v8706_v13 = vld [vmem:[#allocation10 + $0xc38] sm:$0xff]  ;;  %v18005_v56 = vcombine.low %v8693_v39, %v8697_v61  ;;  %v8741_v61 = vld [vmem:[#allocation10 + $0xd50] sm:$0xff] }
 0x7f9   :  { %v18016_v41 = vcombine.high %v8702_v46, %v8706_v13  ;;  %v18015_v63 = vcombine.low %v8702_v46, %v8706_v13  ;;  %v8753_v46 = vld [vmem:[#allocation10 + $0xdb0] sm:$0xff]  ;;  %v8750_v13 = vld [vmem:[#allocation10 + $0xd98] sm:$0xff] }
 0x7fa   :  { %15260 = vmatpush1.bf16.msra.mxu0 %v17965_v29  ;;  %v8713_v29 = vld [vmem:[#allocation10 + $0xc70] sm:$0xff] }
 0x7fb   :  { %15588 = vmatpush1.bf16.msra.mxu1 %v17967_v59  ;;  %15261 = vmatprep.subr.bf16.mxu0 %v17974_v10  ;;  %v18013_v59 = vcombine.low %v8701_v62, %v8705_v58  ;;  %v8710_v10 = vld [vmem:[#allocation10 + $0xc58] sm:$0xff]  ;;  %v18022_v38 = vcombine.high %v8709_v57, %v8713_v29  ;;  %v8749_v58 = vld [vmem:[#allocation10 + $0xd90] sm:$0xff] }
 0x7fc   :  { %15589 = vmatprep.subr.bf16.mxu1 %v17976_v49  ;;  %v8714_v49 = vld [vmem:[#allocation10 + $0xc78] sm:$0xff] }
 0x7fd   :  { %v18023_v36 = vcombine.low %v8710_v10, %v8714_v49 }
 0x7fe   :  { %15262 = vmatpush1.bf16.msra.mxu0 %v17973_v35  ;;  %v18024_v35 = vcombine.high %v8710_v10, %v8714_v49  ;;  %v8761_v10 = vld [vmem:[#allocation10 + $0xdf0] sm:$0xff] }
 0x7ff   :  { %15590 = vmatpush1.bf16.msra.mxu1 %v17975_v11  ;;  %15263 = vmatprep.subr.bf16.mxu0 %v17982_v18  ;;  %v8718_v11 = vld [vmem:[#allocation10 + $0xc98] sm:$0xff] }
 0x800   :  { %15591 = vmatprep.subr.bf16.mxu1 %v17984_v0  ;;  %v8722_v18 = vld [vmem:[#allocation10 + $0xcb8] sm:$0xff]  ;;  %v18021_v0 = vcombine.low %v8709_v57, %v8713_v29 }
 0x801   :  { %v18032_v6 = vcombine.high %v8718_v11, %v8722_v18 }
 0x802   :  { %15264 = vmatpush1.bf16.msra.mxu0 %v17981_v20  ;;  %v8729_v20 = vld [vmem:[#allocation10 + $0xcf0] sm:$0xff] }
 0x803   :  { %15592 = vmatpush1.bf16.msra.mxu1 %v17983_v14  ;;  %15265 = vmatprep.subr.bf16.mxu0 %v17990_v51  ;;  %v8726_v14 = vld [vmem:[#allocation10 + $0xcd8] sm:$0xff]  ;;  %v18038_v54 = vcombine.high %v8725_v34, %v8729_v20 }
 0x804   :  { %15593 = vmatprep.subr.bf16.mxu1 %v17992_v22  ;;  %v8730_v51 = vld [vmem:[#allocation10 + $0xcf8] sm:$0xff]  ;;  %v18029_v22 = vcombine.low %v8717_v42, %v8721_v8 }
 0x805   :  { %v18040_v23 = vcombine.high %v8726_v14, %v8730_v51  ;;  %v8762_v42 = vld [vmem:[#allocation10 + $0xdf8] sm:$0xff] }
 0x806   :  { %15266 = vmatpush1.bf16.msra.mxu0 %v17989_v45  ;;  %v8734_v45 = vld [vmem:[#allocation10 + $0xd18] sm:$0xff] }
 0x807   :  { %15594 = vmatpush1.bf16.msra.mxu1 %v17991_v32  ;;  %15267 = vmatprep.subr.bf16.mxu0 %v17998_v1  ;;  %v8738_v32 = vld [vmem:[#allocation10 + $0xd38] sm:$0xff]  ;;  %v18039_v1 = vcombine.low %v8726_v14, %v8730_v51  ;;  %v8769_v14 = vld [vmem:[#allocation10 + $0xe30] sm:$0xff] }
 0x808   :  { %15595 = vmatprep.subr.bf16.mxu1 %v18000_v2  ;;  %v18046_v2 = vcombine.high %v8733_v25, %v8737_v28  ;;  %v18048_v39 = vcombine.high %v8734_v45, %v8738_v32  ;;  %v8766_v51 = vld [vmem:[#allocation10 + $0xe18] sm:$0xff] }
 0x80a   :  { %15268 = vmatpush1.bf16.msra.mxu0 %v17997_v60  ;;  %v8746_v60 = vld [vmem:[#allocation10 + $0xd78] sm:$0xff] }
 0x80b   :  { %15596 = vmatpush1.bf16.msra.mxu1 %v17999_v53  ;;  %15269 = vmatprep.subr.bf16.mxu0 %v18006_v7  ;;  %v18045_v53 = vcombine.low %v8733_v25, %v8737_v28  ;;  %v18047_v7 = vcombine.low %v8734_v45, %v8738_v32  ;;  %v18056_v62 = vcombine.high %v8742_v48, %v8746_v60  ;;  %v8773_v28 = vld [vmem:[#allocation10 + $0xe50] sm:$0xff]  ;;  %v8774_v32 = vld [vmem:[#allocation10 + $0xe58] sm:$0xff] }
 0x80c   :  { %15597 = vmatprep.subr.bf16.mxu1 %v18008_v55  ;;  %v18054_v55 = vcombine.high %v8741_v61, %v8745_v40  ;;  %v8777_v45 = vld [vmem:[#allocation10 + $0xe70] sm:$0xff] }
 0x80e   :  { %15270 = vmatpush1.bf16.msra.mxu0 %v18005_v56  ;;  %v8754_v56 = vld [vmem:[#allocation10 + $0xdb8] sm:$0xff] }
 0x80f   :  { %15598 = vmatpush1.bf16.msra.mxu1 %v18007_v33  ;;  %15280 = vmatprep.subr.bf16.mxu0 %v18014_v50  ;;  %v18053_v33 = vcombine.low %v8741_v61, %v8745_v40  ;;  %v18055_v50 = vcombine.low %v8742_v48, %v8746_v60  ;;  %v18064_v29 = vcombine.high %v8750_v13, %v8754_v56  ;;  %v8781_v40 = vld [vmem:[#allocation10 + $0xe90] sm:$0xff]  ;;  %v8782_v60 = vld [vmem:[#allocation10 + $0xe98] sm:$0xff] }
 0x810   :  { %15608 = vmatprep.subr.bf16.mxu1 %v18016_v41  ;;  %v18062_v41 = vcombine.high %v8749_v58, %v8753_v46  ;;  %v8785_v48 = vld [vmem:[#allocation10 + $0xeb0] sm:$0xff] }
 0x811   :  { %15272 = vmatmul.mubr.bf16.vlgmr.msra.gmra.mrb[28].mxu0 %v19727_v4 }
 0x812   :  { %15600 = vmatmul.mubr.bf16.vlgmr.msra.gmra.mrb[28].mxu1 %v19727_v4  ;;  %15281 = vmatpush1.bf16.msra.mxu0 %v18013_v59  ;;  %v18031_v4 = vcombine.low %v8718_v11, %v8722_v18  ;;  %v8757_v59 = vld [vmem:[#allocation10 + $0xdd0] sm:$0xff]  ;;  %v18061_v11 = vcombine.low %v8749_v58, %v8753_v46 }
 0x813   :  { %15312 = vmatprep.mubr.bf16.mxu0 %v19729_v9  ;;  %15609 = vmatpush1.bf16.msra.mxu1 %v18015_v63  ;;  %v8789_v46 = vld [vmem:[#allocation10 + $0xed0] sm:$0xff] }
 0x814   :  { %15640 = vmatprep.mubr.bf16.mxu1 %v19729_v9  ;;  %15282 = vmatprep.subr.bf16.mxu0 %v18022_v38  ;;  %v18037_v9 = vcombine.low %v8725_v34, %v8729_v20  ;;  %v8758_v38 = vld [vmem:[#allocation10 + $0xdd8] sm:$0xff]  ;;  %v8765_v20 = vld [vmem:[#allocation10 + $0xe10] sm:$0xff] }
 0x815   :  { %15610 = vmatprep.subr.bf16.mxu1 %v18024_v35  ;;  %v18072_v34 = vcombine.high %v8758_v38, %v8762_v42 }
 0x816   :  { %15283 = vmatpush1.bf16.msra.mxu0 %v18021_v0 }
 0x817   :  { %15611 = vmatpush1.bf16.msra.mxu1 %v18023_v36  ;;  %15284 = vmatprep.subr.bf16.mxu0 %v18030_v19  ;;  %v18063_v36 = vcombine.low %v8750_v13, %v8754_v56  ;;  %v18070_v19 = vcombine.high %v8757_v59, %v8761_v10  ;;  %v8793_v13 = vld [vmem:[#allocation10 + $0xef0] sm:$0xff]  ;;  %v8790_v56 = vld [vmem:[#allocation10 + $0xed8] sm:$0xff] }
 0x818   :  { %15612 = vmatprep.subr.bf16.mxu1 %v18032_v6 }
 0x81a   :  { %15285 = vmatpush1.bf16.msra.mxu0 %v18029_v22  ;;  %v8770_v22 = vld [vmem:[#allocation10 + $0xe38] sm:$0xff] }
 0x81b   :  { %15613 = vmatpush1.bf16.msra.mxu1 %v18031_v4  ;;  %15286 = vmatprep.subr.bf16.mxu0 %v18038_v54  ;;  %v18069_v4 = vcombine.low %v8757_v59, %v8761_v10  ;;  %v18071_v54 = vcombine.low %v8758_v38, %v8762_v42  ;;  %v18080_v25 = vcombine.high %v8766_v51, %v8770_v22  ;;  %v8797_v10 = vld [vmem:[#allocation10 + $0xf10] sm:$0xff]  ;;  %v8798_v42 = vld [vmem:[#allocation10 + $0xf18] sm:$0xff] }
 0x81c   :  { %15614 = vmatprep.subr.bf16.mxu1 %v18040_v23  ;;  %v18078_v23 = vcombine.high %v8765_v20, %v8769_v14  ;;  %v8801_v38 = vld [vmem:[#allocation10 + $0xf30] sm:$0xff] }
 0x81e   :  { %15287 = vmatpush1.bf16.msra.mxu0 %v18037_v9  ;;  %v8778_v9 = vld [vmem:[#allocation10 + $0xe78] sm:$0xff] }
 0x81f   :  { %15615 = vmatpush1.bf16.msra.mxu1 %v18039_v1  ;;  %15288 = vmatprep.subr.bf16.mxu0 %v18046_v2  ;;  %v18077_v1 = vcombine.low %v8765_v20, %v8769_v14  ;;  %v18079_v2 = vcombine.low %v8766_v51, %v8770_v22  ;;  %v18088_v61 = vcombine.high %v8774_v32, %v8778_v9  ;;  %v8810_v20 = vld [vmem:[#allocation10 + $0xf78] sm:$0xff] }
 0x820   :  { %15616 = vmatprep.subr.bf16.mxu1 %v18048_v39  ;;  %v18086_v39 = vcombine.high %v8773_v28, %v8777_v45  ;;  %v18109_v14 = vcombine.low %v8797_v10, %v8801_v38 }
 0x822   :  { %15289 = vmatpush1.bf16.msra.mxu0 %v18045_v53  ;;  %v8786_v53 = vld [vmem:[#allocation10 + $0xeb8] sm:$0xff] }
 0x823   :  { %15617 = vmatpush1.bf16.msra.mxu1 %v18047_v7  ;;  %15290 = vmatprep.subr.bf16.mxu0 %v18054_v55  ;;  %v18085_v7 = vcombine.low %v8773_v28, %v8777_v45  ;;  %v18087_v55 = vcombine.low %v8774_v32, %v8778_v9  ;;  %v18096_v58 = vcombine.high %v8782_v60, %v8786_v53  ;;  %v8818_v28 = vld [vmem:[#allocation10 + $0xfb8] sm:$0xff] }
 0x824   :  { %v19824_v57 = vpop.f32.mrb[24].mxu0  ;;  %15618 = vmatprep.subr.bf16.mxu1 %v18056_v62  ;;  %v18094_v62 = vcombine.high %v8781_v40, %v8785_v48 }
 0x825   :  { %v19826_v49 = vpop.f32.mrb[24].mxu1  ;;  %v19828_v63 = vpop.f32.mrb[25].mxu0 }
 0x826   :  { %v19830_v8 = vpop.f32.mrb[25].mxu1  ;;  %v14826_v35 = vpop.f32.mrb[26].mxu0  ;;  %15291 = vmatpush1.bf16.msra.mxu0 %v18053_v33  ;;  %v8794_v33 = vld [vmem:[#allocation10 + $0xef8] sm:$0xff] }
 0x827   :  { %v15154_v18 = vpop.f32.mrb[26].mxu1  ;;  %15619 = vmatpush1.bf16.msra.mxu1 %v18055_v50  ;;  %v14827_v0 = vpop.f32.mrb[27].mxu0  ;;  %15292 = vmatprep.subr.bf16.mxu0 %v18062_v41  ;;  %v18093_v50 = vcombine.low %v8781_v40, %v8785_v48  ;;  %v18095_v41 = vcombine.low %v8782_v60, %v8786_v53  ;;  %v18104_v59 = vcombine.high %v8790_v56, %v8794_v33  ;;  %v8802_v35 = vld [vmem:[#allocation10 + $0xf38] sm:$0xff] }
 0x828   :  { %v15155_v6 = vpop.f32.mrb[27].mxu1  ;;  %15620 = vmatprep.subr.bf16.mxu1 %v18064_v29  ;;  %v18102_v29 = vcombine.high %v8789_v46, %v8793_v13  ;;  %v18103_v18 = vcombine.low %v8790_v56, %v8794_v33  ;;  %v18110_v0 = vcombine.high %v8797_v10, %v8801_v38  ;;  %v18111_v51 = vcombine.low %v8798_v42, %v8802_v35  ;;  %v8826_v40 = vld [vmem:[#allocation10 + $0xff8] sm:$0xff] }
 0x829   :  { %v8809_v6 = vld [vmem:[#allocation10 + $0xf70] sm:$0xff]  ;;  %v8838_v10 = vld [vmem:[#allocation10 + $0x1058] sm:$0xff] }
 0x82a   :  { %15293 = vmatpush1.bf16.msra.mxu0 %v18061_v11  ;;  %v18101_v11 = vcombine.low %v8789_v46, %v8793_v13  ;;  %v8834_v46 = vld [vmem:[#allocation10 + $0x1038] sm:$0xff] }
 0x82b   :  { %15621 = vmatpush1.bf16.msra.mxu1 %v18063_v36  ;;  %15294 = vmatprep.subr.bf16.mxu0 %v18070_v19  ;;  %v18112_v36 = vcombine.high %v8798_v42, %v8802_v35  ;;  %v8805_v19 = vld [vmem:[#allocation10 + $0xf50] sm:$0xff]  ;;  %v8842_v38 = vld [vmem:[#allocation10 + $0x1078] sm:$0xff] }
 0x82c   :  { %15622 = vmatprep.subr.bf16.mxu1 %v18072_v34  ;;  %v8806_v34 = vld [vmem:[#allocation10 + $0xf58] sm:$0xff]  ;;  %v18118_v22 = vcombine.high %v8805_v19, %v8809_v6  ;;  %v18117_v45 = vcombine.low %v8805_v19, %v8809_v6 }
 0x82d   :  { %v18119_v32 = vcombine.low %v8806_v34, %v8810_v20  ;;  %v8850_v19 = vld [vmem:[#allocation10 + $0x10b8] sm:$0xff] }
 0x82e   :  { %15295 = vmatpush1.bf16.msra.mxu0 %v18069_v4  ;;  %v18120_v4 = vcombine.high %v8806_v34, %v8810_v20  ;;  %v18151_v34 = vcombine.low %v8838_v10, %v8842_v38 }
 0x82f   :  { %15623 = vmatpush1.bf16.msra.mxu1 %v18071_v54  ;;  %15296 = vmatprep.subr.bf16.mxu0 %v18078_v23  ;;  %v8813_v54 = vld [vmem:[#allocation10 + $0xf90] sm:$0xff] }
 0x830   :  { %15624 = vmatprep.subr.bf16.mxu1 %v18080_v25  ;;  %v8817_v23 = vld [vmem:[#allocation10 + $0xfb0] sm:$0xff]  ;;  %v8814_v25 = vld [vmem:[#allocation10 + $0xf98] sm:$0xff] }
 0x831   :  { %v18126_v9 = vcombine.high %v8813_v54, %v8817_v23  ;;  %v18125_v48 = vcombine.low %v8813_v54, %v8817_v23  ;;  %v18127_v60 = vcombine.low %v8814_v25, %v8818_v28  ;;  %v8858_v54 = vld [vmem:[#allocation10 + $0x10f8] sm:$0xff] }
 0x832   :  { %15297 = vmatpush1.bf16.msra.mxu0 %v18077_v1  ;;  %v18128_v1 = vcombine.high %v8814_v25, %v8818_v28 }
 0x833   :  { %15625 = vmatpush1.bf16.msra.mxu1 %v18079_v2  ;;  %15298 = vmatprep.subr.bf16.mxu0 %v18086_v39  ;;  %v8821_v2 = vld [vmem:[#allocation10 + $0xfd0] sm:$0xff] }
 0x834   :  { %15626 = vmatprep.subr.bf16.mxu1 %v18088_v61  ;;  %v8825_v39 = vld [vmem:[#allocation10 + $0xff0] sm:$0xff]  ;;  %v8822_v61 = vld [vmem:[#allocation10 + $0xfd8] sm:$0xff] }
 0x835   :  { %v18134_v53 = vcombine.high %v8821_v2, %v8825_v39  ;;  %v18133_v13 = vcombine.low %v8821_v2, %v8825_v39  ;;  %v18135_v56 = vcombine.low %v8822_v61, %v8826_v40 }
 0x836   :  { %15299 = vmatpush1.bf16.msra.mxu0 %v18085_v7  ;;  %v18136_v7 = vcombine.high %v8822_v61, %v8826_v40  ;;  %v8869_v40 = vld [vmem:[#allocation10 + $0x1150] sm:$0xff] }
 0x837   :  { %15627 = vmatpush1.bf16.msra.mxu1 %v18087_v55  ;;  %15300 = vmatprep.subr.bf16.mxu0 %v18094_v62  ;;  %v8829_v55 = vld [vmem:[#allocation10 + $0x1010] sm:$0xff] }
 0x838   :  { %15628 = vmatprep.subr.bf16.mxu1 %v18096_v58  ;;  %v8833_v62 = vld [vmem:[#allocation10 + $0x1030] sm:$0xff]  ;;  %v8830_v58 = vld [vmem:[#allocation10 + $0x1018] sm:$0xff] }
 0x839   :  { %v18142_v33 = vcombine.high %v8829_v55, %v8833_v62  ;;  %v18143_v42 = vcombine.low %v8830_v58, %v8834_v46 }
 0x83a   :  { %15301 = vmatpush1.bf16.msra.mxu0 %v18093_v50  ;;  %v18144_v50 = vcombine.high %v8830_v58, %v8834_v46  ;;  %v8877_v46 = vld [vmem:[#allocation10 + $0x1190] sm:$0xff] }
 0x83b   :  { %15629 = vmatpush1.bf16.msra.mxu1 %v18095_v41  ;;  %15302 = vmatprep.subr.bf16.mxu0 %v18102_v29  ;;  %v8837_v41 = vld [vmem:[#allocation10 + $0x1050] sm:$0xff] }
 0x83c   :  { %15630 = vmatprep.subr.bf16.mxu1 %v18104_v59  ;;  %v8841_v29 = vld [vmem:[#allocation10 + $0x1070] sm:$0xff]  ;;  %v18141_v59 = vcombine.low %v8829_v55, %v8833_v62 }
 0x83d   :  { %v18150_v35 = vcombine.high %v8837_v41, %v8841_v29  ;;  %v18149_v6 = vcombine.low %v8837_v41, %v8841_v29 }
 0x83e   :  { %15303 = vmatpush1.bf16.msra.mxu0 %v18101_v11  ;;  %v8845_v11 = vld [vmem:[#allocation10 + $0x1090] sm:$0xff] }
 0x83f   :  { %15631 = vmatpush1.bf16.msra.mxu1 %v18103_v18  ;;  %15304 = vmatprep.subr.bf16.mxu0 %v18110_v0  ;;  %v8849_v18 = vld [vmem:[#allocation10 + $0x10b0] sm:$0xff]  ;;  %v18152_v0 = vcombine.high %v8838_v10, %v8842_v38 }
 0x840   :  { %15632 = vmatprep.subr.bf16.mxu1 %v18112_v36  ;;  %v8846_v36 = vld [vmem:[#allocation10 + $0x1098] sm:$0xff]  ;;  %v18158_v20 = vcombine.high %v8845_v11, %v8849_v18  ;;  %v18157_v23 = vcombine.low %v8845_v11, %v8849_v18  ;;  %v8885_v10 = vld [vmem:[#allocation10 + $0x11d0] sm:$0xff] }
 0x841   :  { %v8889_v38 = vld [vmem:[#allocation10 + $0x11f0] sm:$0xff] }
 0x842   :  { %15305 = vmatpush1.bf16.msra.mxu0 %v18109_v14  ;;  %v18160_v14 = vcombine.high %v8846_v36, %v8850_v19 }
 0x843   :  { %15633 = vmatpush1.bf16.msra.mxu1 %v18111_v51  ;;  %15306 = vmatprep.subr.bf16.mxu0 %v18118_v22  ;;  %v8853_v51 = vld [vmem:[#allocation10 + $0x10d0] sm:$0xff] }
 0x844   :  { %15634 = vmatprep.subr.bf16.mxu1 %v18120_v4  ;;  %v8857_v22 = vld [vmem:[#allocation10 + $0x10f0] sm:$0xff]  ;;  %v8854_v4 = vld [vmem:[#allocation10 + $0x10d8] sm:$0xff] }
 0x845   :  { %v18166_v25 = vcombine.high %v8853_v51, %v8857_v22  ;;  %v18168_v28 = vcombine.high %v8854_v4, %v8858_v54  ;;  %v18167_v2 = vcombine.low %v8854_v4, %v8858_v54  ;;  %v8901_v54 = vld [vmem:[#allocation10 + $0x1250] sm:$0xff] }
 0x846   :  { %15307 = vmatpush1.bf16.msra.mxu0 %v18117_v45  ;;  %v8861_v45 = vld [vmem:[#allocation10 + $0x1110] sm:$0xff] }
 0x847   :  { %15635 = vmatpush1.bf16.msra.mxu1 %v18119_v32  ;;  %15308 = vmatprep.subr.bf16.mxu0 %v18126_v9  ;;  %v8865_v32 = vld [vmem:[#allocation10 + $0x1130] sm:$0xff]  ;;  %v8862_v9 = vld [vmem:[#allocation10 + $0x1118] sm:$0xff] }
 0x848   :  { %15636 = vmatprep.subr.bf16.mxu1 %v18128_v1  ;;  %v8866_v1 = vld [vmem:[#allocation10 + $0x1138] sm:$0xff]  ;;  %v18174_v39 = vcombine.high %v8861_v45, %v8865_v32 }
 0x849   :  { %v18176_v61 = vcombine.high %v8862_v9, %v8866_v1  ;;  %v18175_v55 = vcombine.low %v8862_v9, %v8866_v1  ;;  %v8909_v1 = vld [vmem:[#allocation10 + $0x1290] sm:$0xff] }
 0x84a   :  { %15309 = vmatpush1.bf16.msra.mxu0 %v18125_v48  ;;  %v8873_v48 = vld [vmem:[#allocation10 + $0x1170] sm:$0xff] }
 0x84b   :  { %15637 = vmatpush1.bf16.msra.mxu1 %v18127_v60  ;;  %15310 = vmatprep.subr.bf16.mxu0 %v18134_v53  ;;  %v8870_v60 = vld [vmem:[#allocation10 + $0x1158] sm:$0xff]  ;;  %v18182_v62 = vcombine.high %v8869_v40, %v8873_v48 }
 0x84c   :  { %15638 = vmatprep.subr.bf16.mxu1 %v18136_v7  ;;  %v8874_v53 = vld [vmem:[#allocation10 + $0x1178] sm:$0xff]  ;;  %v18173_v7 = vcombine.low %v8861_v45, %v8865_v32 }
 0x84d   :  { %v18184_v58 = vcombine.high %v8870_v60, %v8874_v53  ;;  %v18183_v41 = vcombine.low %v8870_v60, %v8874_v53  ;;  %v8917_v53 = vld [vmem:[#allocation10 + $0x12d0] sm:$0xff] }
 0x84e   :  { %15311 = vmatpush1.bf16.msra.mxu0 %v18133_v13  ;;  %v8881_v13 = vld [vmem:[#allocation10 + $0x11b0] sm:$0xff] }
 0x84f   :  { %15639 = vmatpush1.bf16.msra.mxu1 %v18135_v56  ;;  %15321 = vmatprep.subr.bf16.mxu0 %v18142_v33  ;;  %v8878_v56 = vld [vmem:[#allocation10 + $0x1198] sm:$0xff]  ;;  %v18190_v29 = vcombine.high %v8877_v46, %v8881_v13  ;;  %v18189_v11 = vcombine.low %v8877_v46, %v8881_v13 }
 0x850   :  { %15649 = vmatprep.subr.bf16.mxu1 %v18144_v50  ;;  %v8882_v33 = vld [vmem:[#allocation10 + $0x11b8] sm:$0xff]  ;;  %v18181_v50 = vcombine.low %v8869_v40, %v8873_v48 }
 0x851   :  { %15313 = vmatmul.mubr.bf16.vlgmr.msra.gmra.mrb[28].mxu0 %v19751_v30  ;;  %v18191_v18 = vcombine.low %v8878_v56, %v8882_v33 }
 0x852   :  { %15641 = vmatmul.mubr.bf16.vlgmr.msra.gmra.mrb[28].mxu1 %v19751_v30  ;;  %15322 = vmatpush1.bf16.msra.mxu0 %v18141_v59  ;;  %v18159_v30 = vcombine.low %v8846_v36, %v8850_v19  ;;  %v18192_v59 = vcombine.high %v8878_v56, %v8882_v33  ;;  %v8893_v19 = vld [vmem:[#allocation10 + $0x1210] sm:$0xff] }
 0x853   :  { %15353 = vmatprep.mubr.bf16.mxu0 %v19753_v43  ;;  %15650 = vmatpush1.bf16.msra.mxu1 %v18143_v42  ;;  %v8886_v42 = vld [vmem:[#allocation10 + $0x11d8] sm:$0xff]  ;;  %v8925_v33 = vld [vmem:[#allocation10 + $0x1310] sm:$0xff] }
 0x854   :  { %15681 = vmatprep.mubr.bf16.mxu1 %v19753_v43  ;;  %15323 = vmatprep.subr.bf16.mxu0 %v18150_v35  ;;  %v18165_v43 = vcombine.low %v8853_v51, %v8857_v22  ;;  %v8890_v35 = vld [vmem:[#allocation10 + $0x11f8] sm:$0xff] }
 0x855   :  { %15651 = vmatprep.subr.bf16.mxu1 %v18152_v0  ;;  %v18198_v0 = vcombine.high %v8885_v10, %v8889_v38  ;;  %v18200_v36 = vcombine.high %v8886_v42, %v8890_v35  ;;  %v18199_v51 = vcombine.low %v8886_v42, %v8890_v35  ;;  %v8933_v35 = vld [vmem:[#allocation10 + $0x1350] sm:$0xff] }
 0x856   :  { %15324 = vmatpush1.bf16.msra.mxu0 %v18149_v6  ;;  %v8897_v6 = vld [vmem:[#allocation10 + $0x1230] sm:$0xff] }
 0x857   :  { %15652 = vmatpush1.bf16.msra.mxu1 %v18151_v34  ;;  %15325 = vmatprep.subr.bf16.mxu0 %v18158_v20  ;;  %v8894_v34 = vld [vmem:[#allocation10 + $0x1218] sm:$0xff]  ;;  %v18206_v22 = vcombine.high %v8893_v19, %v8897_v6 }
 0x858   :  { %15653 = vmatprep.subr.bf16.mxu1 %v18160_v14  ;;  %v8898_v20 = vld [vmem:[#allocation10 + $0x1238] sm:$0xff]  ;;  %v18197_v14 = vcombine.low %v8885_v10, %v8889_v38 }
 0x859   :  { %v18208_v4 = vcombine.high %v8894_v34, %v8898_v20  ;;  %v18207_v45 = vcombine.low %v8894_v34, %v8898_v20  ;;  %v8941_v20 = vld [vmem:[#allocation10 + $0x1390] sm:$0xff] }
 0x85a   :  { %15326 = vmatpush1.bf16.msra.mxu0 %v18157_v23  ;;  %v8905_v23 = vld [vmem:[#allocation10 + $0x1270] sm:$0xff] }
 0x85b   :  { %15654 = vmatpush1.bf16.msra.mxu1 %v18159_v30  ;;  %15327 = vmatprep.subr.bf16.mxu0 %v18166_v25  ;;  %v8902_v30 = vld [vmem:[#allocation10 + $0x1258] sm:$0xff]  ;;  %v18214_v32 = vcombine.high %v8901_v54, %v8905_v23 }
 0x85c   :  { %15655 = vmatprep.subr.bf16.mxu1 %v18168_v28  ;;  %v8906_v25 = vld [vmem:[#allocation10 + $0x1278] sm:$0xff]  ;;  %v18205_v28 = vcombine.low %v8893_v19, %v8897_v6 }
 0x85d   :  { %v18216_v9 = vcombine.high %v8902_v30, %v8906_v25  ;;  %v18215_v40 = vcombine.low %v8902_v30, %v8906_v25  ;;  %v8949_v25 = vld [vmem:[#allocation10 + $0x13d0] sm:$0xff] }
 0x85e   :  { %15328 = vmatpush1.bf16.msra.mxu0 %v18165_v43  ;;  %v8913_v43 = vld [vmem:[#allocation10 + $0x12b0] sm:$0xff] }
 0x85f   :  { %15656 = vmatpush1.bf16.msra.mxu1 %v18167_v2  ;;  %15329 = vmatprep.subr.bf16.mxu0 %v18174_v39  ;;  %v8910_v2 = vld [vmem:[#allocation10 + $0x1298] sm:$0xff]  ;;  %v18222_v48 = vcombine.high %v8909_v1, %v8913_v43 }
 0x860   :  { %15657 = vmatprep.subr.bf16.mxu1 %v18176_v61  ;;  %v8914_v39 = vld [vmem:[#allocation10 + $0x12b8] sm:$0xff]  ;;  %v18213_v61 = vcombine.low %v8901_v54, %v8905_v23 }
 0x861   :  { %v18224_v60 = vcombine.high %v8910_v2, %v8914_v39  ;;  %v18223_v46 = vcombine.low %v8910_v2, %v8914_v39  ;;  %v8957_v39 = vld [vmem:[#allocation10 + $0x1410] sm:$0xff] }
 0x862   :  { %15330 = vmatpush1.bf16.msra.mxu0 %v18173_v7  ;;  %v8921_v7 = vld [vmem:[#allocation10 + $0x12f0] sm:$0xff] }
 0x863   :  { %15658 = vmatpush1.bf16.msra.mxu1 %v18175_v55  ;;  %15331 = vmatprep.subr.bf16.mxu0 %v18182_v62  ;;  %v8918_v55 = vld [vmem:[#allocation10 + $0x12d8] sm:$0xff]  ;;  %v18230_v13 = vcombine.high %v8917_v53, %v8921_v7 }
 0x864   :  { %15659 = vmatprep.subr.bf16.mxu1 %v18184_v58  ;;  %v8922_v62 = vld [vmem:[#allocation10 + $0x12f8] sm:$0xff]  ;;  %v18221_v58 = vcombine.low %v8909_v1, %v8913_v43 }
 0x865   :  { %v18232_v56 = vcombine.high %v8918_v55, %v8922_v62  ;;  %v18231_v10 = vcombine.low %v8918_v55, %v8922_v62  ;;  %v8965_v62 = vld [vmem:[#allocation10 + $0x1450] sm:$0xff] }
 0x866   :  { %15332 = vmatpush1.bf16.msra.mxu0 %v18181_v50  ;;  %v8929_v50 = vld [vmem:[#allocation10 + $0x1330] sm:$0xff] }
 0x867   :  { %15660 = vmatpush1.bf16.msra.mxu1 %v18183_v41  ;;  %15333 = vmatprep.subr.bf16.mxu0 %v18190_v29  ;;  %v8926_v41 = vld [vmem:[#allocation10 + $0x1318] sm:$0xff]  ;;  %v18238_v38 = vcombine.high %v8925_v33, %v8929_v50 }
 0x868   :  { %15661 = vmatprep.subr.bf16.mxu1 %v18192_v59  ;;  %v8930_v29 = vld [vmem:[#allocation10 + $0x1338] sm:$0xff]  ;;  %v18229_v59 = vcombine.low %v8917_v53, %v8921_v7 }
 0x869   :  { %v18240_v42 = vcombine.high %v8926_v41, %v8930_v29  ;;  %v18239_v19 = vcombine.low %v8926_v41, %v8930_v29  ;;  %v8973_v41 = vld [vmem:[#allocation10 + $0x1490] sm:$0xff] }
 0x86a   :  { %15334 = vmatpush1.bf16.msra.mxu0 %v18189_v11  ;;  %v8937_v11 = vld [vmem:[#allocation10 + $0x1370] sm:$0xff] }
 0x86b   :  { %15662 = vmatpush1.bf16.msra.mxu1 %v18191_v18  ;;  %15335 = vmatprep.subr.bf16.mxu0 %v18198_v0  ;;  %v8934_v18 = vld [vmem:[#allocation10 + $0x1358] sm:$0xff]  ;;  %v18246_v6 = vcombine.high %v8933_v35, %v8937_v11  ;;  %v8977_v29 = vld [vmem:[#allocation10 + $0x14b0] sm:$0xff] }
 0x86c   :  { %15663 = vmatprep.subr.bf16.mxu1 %v18200_v36  ;;  %v8938_v0 = vld [vmem:[#allocation10 + $0x1378] sm:$0xff]  ;;  %v18237_v36 = vcombine.low %v8925_v33, %v8929_v50 }
 0x86d   :  { %v18248_v34 = vcombine.high %v8934_v18, %v8938_v0  ;;  %v18247_v54 = vcombine.low %v8934_v18, %v8938_v0  ;;  %v8981_v0 = vld [vmem:[#allocation10 + $0x14d0] sm:$0xff] }
 0x86e   :  { %15336 = vmatpush1.bf16.msra.mxu0 %v18197_v14  ;;  %v8945_v14 = vld [vmem:[#allocation10 + $0x13b0] sm:$0xff] }
 0x86f   :  { %15664 = vmatpush1.bf16.msra.mxu1 %v18199_v51  ;;  %15337 = vmatprep.subr.bf16.mxu0 %v18206_v22  ;;  %v8942_v51 = vld [vmem:[#allocation10 + $0x1398] sm:$0xff]  ;;  %v18254_v23 = vcombine.high %v8941_v20, %v8945_v14 }
 0x870   :  { %15665 = vmatprep.subr.bf16.mxu1 %v18208_v4  ;;  %v8946_v22 = vld [vmem:[#allocation10 + $0x13b8] sm:$0xff]  ;;  %v18245_v4 = vcombine.low %v8933_v35, %v8937_v11  ;;  %v18286_v11 = vcombine.high %v8973_v41, %v8977_v29 }
 0x871   :  { %v18256_v30 = vcombine.high %v8942_v51, %v8946_v22  ;;  %v18255_v1 = vcombine.low %v8942_v51, %v8946_v22  ;;  %v8989_v51 = vld [vmem:[#allocation10 + $0x1510] sm:$0xff] }
 0x872   :  { %15338 = vmatpush1.bf16.msra.mxu0 %v18205_v28  ;;  %v8953_v28 = vld [vmem:[#allocation10 + $0x13f0] sm:$0xff] }
 0x873   :  { %15666 = vmatpush1.bf16.msra.mxu1 %v18207_v45  ;;  %15339 = vmatprep.subr.bf16.mxu0 %v18214_v32  ;;  %v8950_v45 = vld [vmem:[#allocation10 + $0x13d8] sm:$0xff]  ;;  %v18262_v43 = vcombine.high %v8949_v25, %v8953_v28  ;;  %v8993_v22 = vld [vmem:[#allocation10 + $0x1530] sm:$0xff] }
 0x874   :  { %15667 = vmatprep.subr.bf16.mxu1 %v18216_v9  ;;  %v8954_v32 = vld [vmem:[#allocation10 + $0x13f8] sm:$0xff]  ;;  %v18253_v9 = vcombine.low %v8941_v20, %v8945_v14 }
 0x875   :  { %v18264_v2 = vcombine.high %v8950_v45, %v8954_v32  ;;  %v18263_v53 = vcombine.low %v8950_v45, %v8954_v32  ;;  %v9001_v45 = vld [vmem:[#allocation10 + $0x1570] sm:$0xff]  ;;  %v8998_v32 = vld [vmem:[#allocation10 + $0x1558] sm:$0xff] }
 0x876   :  { %15340 = vmatpush1.bf16.msra.mxu0 %v18213_v61  ;;  %v8961_v61 = vld [vmem:[#allocation10 + $0x1430] sm:$0xff] }
 0x877   :  { %15668 = vmatpush1.bf16.msra.mxu1 %v18215_v40  ;;  %15341 = vmatprep.subr.bf16.mxu0 %v18222_v48  ;;  %v8958_v40 = vld [vmem:[#allocation10 + $0x1418] sm:$0xff]  ;;  %v18270_v7 = vcombine.high %v8957_v39, %v8961_v61 }
 0x878   :  { %15669 = vmatprep.subr.bf16.mxu1 %v18224_v60  ;;  %v8962_v48 = vld [vmem:[#allocation10 + $0x1438] sm:$0xff]  ;;  %v18261_v60 = vcombine.low %v8949_v25, %v8953_v28  ;;  %v8997_v28 = vld [vmem:[#allocation10 + $0x1550] sm:$0xff] }
 0x879   :  { %v18272_v55 = vcombine.high %v8958_v40, %v8962_v48  ;;  %v18271_v33 = vcombine.low %v8958_v40, %v8962_v48  ;;  %v9009_v40 = vld [vmem:[#allocation10 + $0x15b0] sm:$0xff]  ;;  %v9006_v48 = vld [vmem:[#allocation10 + $0x1598] sm:$0xff] }
 0x87a   :  { %15342 = vmatpush1.bf16.msra.mxu0 %v18221_v58  ;;  %v8969_v58 = vld [vmem:[#allocation10 + $0x1470] sm:$0xff] }
 0x87b   :  { %15670 = vmatpush1.bf16.msra.mxu1 %v18223_v46  ;;  %15343 = vmatprep.subr.bf16.mxu0 %v18230_v13  ;;  %v18269_v46 = vcombine.low %v8957_v39, %v8961_v61  ;;  %v8966_v13 = vld [vmem:[#allocation10 + $0x1458] sm:$0xff]  ;;  %v18278_v50 = vcombine.high %v8965_v62, %v8969_v58  ;;  %v9005_v61 = vld [vmem:[#allocation10 + $0x1590] sm:$0xff] }
 0x87c   :  { %15671 = vmatprep.subr.bf16.mxu1 %v18232_v56  ;;  %v8970_v56 = vld [vmem:[#allocation10 + $0x1478] sm:$0xff] }
 0x87d   :  { %v18279_v35 = vcombine.low %v8966_v13, %v8970_v56 }
 0x87e   :  { %15344 = vmatpush1.bf16.msra.mxu0 %v18229_v59  ;;  %v18280_v59 = vcombine.high %v8966_v13, %v8970_v56  ;;  %v9014_v13 = vld [vmem:[#allocation10 + $0x15d8] sm:$0xff] }
 0x87f   :  { %15672 = vmatpush1.bf16.msra.mxu1 %v18231_v10  ;;  %15345 = vmatprep.subr.bf16.mxu0 %v18238_v38  ;;  %v8974_v10 = vld [vmem:[#allocation10 + $0x1498] sm:$0xff] }
 0x880   :  { %15673 = vmatprep.subr.bf16.mxu1 %v18240_v42  ;;  %v8978_v38 = vld [vmem:[#allocation10 + $0x14b8] sm:$0xff]  ;;  %v18277_v42 = vcombine.low %v8965_v62, %v8969_v58  ;;  %v9013_v58 = vld [vmem:[#allocation10 + $0x15d0] sm:$0xff] }
 0x881   :  { %v18288_v18 = vcombine.high %v8974_v10, %v8978_v38  ;;  %v9018_v56 = vld [vmem:[#allocation10 + $0x15f8] sm:$0xff] }
 0x882   :  { %15346 = vmatpush1.bf16.msra.mxu0 %v18237_v36  ;;  %v8985_v36 = vld [vmem:[#allocation10 + $0x14f0] sm:$0xff] }
 0x883   :  { %15674 = vmatpush1.bf16.msra.mxu1 %v18239_v19  ;;  %15347 = vmatprep.subr.bf16.mxu0 %v18246_v6  ;;  %v8982_v19 = vld [vmem:[#allocation10 + $0x14d8] sm:$0xff]  ;;  %v18294_v20 = vcombine.high %v8981_v0, %v8985_v36 }
 0x884   :  { %15675 = vmatprep.subr.bf16.mxu1 %v18248_v34  ;;  %v8986_v6 = vld [vmem:[#allocation10 + $0x14f8] sm:$0xff]  ;;  %v18285_v34 = vcombine.low %v8973_v41, %v8977_v29  ;;  %v18328_v29 = vcombine.high %v9014_v13, %v9018_v56 }
 0x885   :  { %v18296_v14 = vcombine.high %v8982_v19, %v8986_v6 }
 0x886   :  { %15348 = vmatpush1.bf16.msra.mxu0 %v18245_v4  ;;  %v8990_v4 = vld [vmem:[#allocation10 + $0x1518] sm:$0xff] }
 0x887   :  { %15676 = vmatpush1.bf16.msra.mxu1 %v18247_v54  ;;  %15349 = vmatprep.subr.bf16.mxu0 %v18254_v23  ;;  %v8994_v54 = vld [vmem:[#allocation10 + $0x1538] sm:$0xff]  ;;  %v18295_v23 = vcombine.low %v8982_v19, %v8986_v6  ;;  %v9033_v19 = vld [vmem:[#allocation10 + $0x1670] sm:$0xff] }
 0x888   :  { %15677 = vmatprep.subr.bf16.mxu1 %v18256_v30  ;;  %v18302_v30 = vcombine.high %v8989_v51, %v8993_v22  ;;  %v18304_v25 = vcombine.high %v8990_v4, %v8994_v54  ;;  %v9030_v6 = vld [vmem:[#allocation10 + $0x1658] sm:$0xff] }
 0x88a   :  { %15350 = vmatpush1.bf16.msra.mxu0 %v18253_v9  ;;  %v9002_v9 = vld [vmem:[#allocation10 + $0x1578] sm:$0xff] }
 0x88b   :  { %15678 = vmatpush1.bf16.msra.mxu1 %v18255_v1  ;;  %15351 = vmatprep.subr.bf16.mxu0 %v18262_v43  ;;  %v18301_v1 = vcombine.low %v8989_v51, %v8993_v22  ;;  %v18303_v43 = vcombine.low %v8990_v4, %v8994_v54  ;;  %v18312_v39 = vcombine.high %v8998_v32, %v9002_v9  ;;  %v9037_v22 = vld [vmem:[#allocation10 + $0x1690] sm:$0xff]  ;;  %v9038_v54 = vld [vmem:[#allocation10 + $0x1698] sm:$0xff] }
 0x88c   :  { %15679 = vmatprep.subr.bf16.mxu1 %v18264_v2  ;;  %v18310_v2 = vcombine.high %v8997_v28, %v9001_v45  ;;  %v9041_v4 = vld [vmem:[#allocation10 + $0x16b0] sm:$0xff] }
 0x88e   :  { %15352 = vmatpush1.bf16.msra.mxu0 %v18261_v60  ;;  %v9010_v60 = vld [vmem:[#allocation10 + $0x15b8] sm:$0xff] }
 0x88f   :  { %15680 = vmatpush1.bf16.msra.mxu1 %v18263_v53  ;;  %15362 = vmatprep.subr.bf16.mxu0 %v18270_v7  ;;  %v18309_v53 = vcombine.low %v8997_v28, %v9001_v45  ;;  %v18311_v7 = vcombine.low %v8998_v32, %v9002_v9  ;;  %v18320_v62 = vcombine.high %v9006_v48, %v9010_v60  ;;  %v9045_v45 = vld [vmem:[#allocation10 + $0x16d0] sm:$0xff]  ;;  %v9046_v9 = vld [vmem:[#allocation10 + $0x16d8] sm:$0xff] }
 0x890   :  { %15690 = vmatprep.subr.bf16.mxu1 %v18272_v55  ;;  %v18318_v55 = vcombine.high %v9005_v61, %v9009_v40  ;;  %v9049_v32 = vld [vmem:[#allocation10 + $0x16f0] sm:$0xff] }
 0x891   :  { %15354 = vmatmul.mubr.bf16.vlgmr.msra.gmra.mrb[28].mxu0 %v19765_v52 }
 0x892   :  { %15682 = vmatmul.mubr.bf16.vlgmr.msra.gmra.mrb[28].mxu1 %v19765_v52  ;;  %15363 = vmatpush1.bf16.msra.mxu0 %v18269_v46  ;;  %v18287_v52 = vcombine.low %v8974_v10, %v8978_v38  ;;  %v9017_v46 = vld [vmem:[#allocation10 + $0x15f0] sm:$0xff]  ;;  %v9022_v38 = vld [vmem:[#allocation10 + $0x1618] sm:$0xff] }
 0x893   :  { %15394 = vmatprep.mubr.bf16.mxu0 %v19767_v27  ;;  %15691 = vmatpush1.bf16.msra.mxu1 %v18271_v33  ;;  %v18317_v33 = vcombine.low %v9005_v61, %v9009_v40  ;;  %v18326_v41 = vcombine.high %v9013_v58, %v9017_v46  ;;  %v9025_v10 = vld [vmem:[#allocation10 + $0x1630] sm:$0xff] }
 0x894   :  { %15722 = vmatprep.mubr.bf16.mxu1 %v19767_v27  ;;  %15364 = vmatprep.subr.bf16.mxu0 %v18278_v50  ;;  %v18293_v27 = vcombine.low %v8981_v0, %v8985_v36  ;;  %v18319_v50 = vcombine.low %v9006_v48, %v9010_v60  ;;  %v9029_v36 = vld [vmem:[#allocation10 + $0x1650] sm:$0xff]  ;;  %v9054_v60 = vld [vmem:[#allocation10 + $0x1718] sm:$0xff] }
 0x895   :  { %15692 = vmatprep.subr.bf16.mxu1 %v18280_v59  ;;  %v9021_v59 = vld [vmem:[#allocation10 + $0x1610] sm:$0xff] }
 0x896   :  { %15365 = vmatpush1.bf16.msra.mxu0 %v18277_v42  ;;  %v9026_v42 = vld [vmem:[#allocation10 + $0x1638] sm:$0xff]  ;;  %v9053_v40 = vld [vmem:[#allocation10 + $0x1710] sm:$0xff] }
 0x897   :  { %15693 = vmatpush1.bf16.msra.mxu1 %v18279_v35  ;;  %15366 = vmatprep.subr.bf16.mxu0 %v18286_v11  ;;  %v18325_v35 = vcombine.low %v9013_v58, %v9017_v46  ;;  %v18327_v11 = vcombine.low %v9014_v13, %v9018_v56  ;;  %v18336_v0 = vcombine.high %v9022_v38, %v9026_v42  ;;  %v9057_v48 = vld [vmem:[#allocation10 + $0x1730] sm:$0xff]  ;;  %v9062_v56 = vld [vmem:[#allocation10 + $0x1758] sm:$0xff] }
 0x898   :  { %15694 = vmatprep.subr.bf16.mxu1 %v18288_v18  ;;  %v18334_v18 = vcombine.high %v9021_v59, %v9025_v10  ;;  %v9061_v46 = vld [vmem:[#allocation10 + $0x1750] sm:$0xff] }
 0x899   :  { %v9065_v13 = vld [vmem:[#allocation10 + $0x1770] sm:$0xff] }
 0x89a   :  { %15367 = vmatpush1.bf16.msra.mxu0 %v18285_v34  ;;  %v9034_v34 = vld [vmem:[#allocation10 + $0x1678] sm:$0xff] }
 0x89b   :  { %15695 = vmatpush1.bf16.msra.mxu1 %v18287_v52  ;;  %15368 = vmatprep.subr.bf16.mxu0 %v18294_v20  ;;  %v18333_v52 = vcombine.low %v9021_v59, %v9025_v10  ;;  %v18335_v20 = vcombine.low %v9022_v38, %v9026_v42  ;;  %v18344_v51 = vcombine.high %v9030_v6, %v9034_v34  ;;  %v9069_v10 = vld [vmem:[#allocation10 + $0x1790] sm:$0xff]  ;;  %v9070_v42 = vld [vmem:[#allocation10 + $0x1798] sm:$0xff] }
 0x89c   :  { %15696 = vmatprep.subr.bf16.mxu1 %v18296_v14  ;;  %v18342_v14 = vcombine.high %v9029_v36, %v9033_v19  ;;  %v9073_v38 = vld [vmem:[#allocation10 + $0x17b0] sm:$0xff] }
 0x89e   :  { %15369 = vmatpush1.bf16.msra.mxu0 %v18293_v27  ;;  %v9042_v27 = vld [vmem:[#allocation10 + $0x16b8] sm:$0xff] }
 0x89f   :  { %15697 = vmatpush1.bf16.msra.mxu1 %v18295_v23  ;;  %15370 = vmatprep.subr.bf16.mxu0 %v18302_v30  ;;  %v18341_v23 = vcombine.low %v9029_v36, %v9033_v19  ;;  %v18343_v30 = vcombine.low %v9030_v6, %v9034_v34  ;;  %v18352_v28 = vcombine.high %v9038_v54, %v9042_v27  ;;  %v9077_v19 = vld [vmem:[#allocation10 + $0x17d0] sm:$0xff]  ;;  %v9078_v34 = vld [vmem:[#allocation10 + $0x17d8] sm:$0xff] }
 0x8a0   :  { %15698 = vmatprep.subr.bf16.mxu1 %v18304_v25  ;;  %v18350_v25 = vcombine.high %v9037_v22, %v9041_v4  ;;  %v9081_v6 = vld [vmem:[#allocation10 + $0x17f0] sm:$0xff] }
 0x8a2   :  { %15371 = vmatpush1.bf16.msra.mxu0 %v18301_v1  ;;  %v9050_v1 = vld [vmem:[#allocation10 + $0x16f8] sm:$0xff] }
 0x8a3   :  { %15699 = vmatpush1.bf16.msra.mxu1 %v18303_v43  ;;  %15372 = vmatprep.subr.bf16.mxu0 %v18310_v2  ;;  %v18349_v43 = vcombine.low %v9037_v22, %v9041_v4  ;;  %v18351_v2 = vcombine.low %v9038_v54, %v9042_v27  ;;  %v18360_v61 = vcombine.high %v9046_v9, %v9050_v1  ;;  %v9085_v4 = vld [vmem:[#allocation10 + $0x1810] sm:$0xff]  ;;  %v9086_v27 = vld [vmem:[#allocation10 + $0x1818] sm:$0xff] }
 0x8a4   :  { %15700 = vmatprep.subr.bf16.mxu1 %v18312_v39  ;;  %v18358_v39 = vcombine.high %v9045_v45, %v9049_v32  ;;  %v9089_v54 = vld [vmem:[#allocation10 + $0x1830] sm:$0xff] }
 0x8a6   :  { %15373 = vmatpush1.bf16.msra.mxu0 %v18309_v53  ;;  %v9058_v53 = vld [vmem:[#allocation10 + $0x1738] sm:$0xff] }
 0x8a7   :  { %15701 = vmatpush1.bf16.msra.mxu1 %v18311_v7  ;;  %15374 = vmatprep.subr.bf16.mxu0 %v18318_v55  ;;  %v18357_v7 = vcombine.low %v9045_v45, %v9049_v32  ;;  %v18359_v55 = vcombine.low %v9046_v9, %v9050_v1  ;;  %v18368_v58 = vcombine.high %v9054_v60, %v9058_v53  ;;  %v9093_v32 = vld [vmem:[#allocation10 + $0x1850] sm:$0xff] }
 0x8a8   :  { %15702 = vmatprep.subr.bf16.mxu1 %v18320_v62  ;;  %v18366_v62 = vcombine.high %v9053_v40, %v9057_v48  ;;  %v9097_v9 = vld [vmem:[#allocation10 + $0x1870] sm:$0xff]  ;;  %v18397_v1 = vcombine.low %v9085_v4, %v9089_v54 }
 0x8aa   :  { %15375 = vmatpush1.bf16.msra.mxu0 %v18317_v33  ;;  %v9066_v33 = vld [vmem:[#allocation10 + $0x1778] sm:$0xff] }
 0x8ab   :  { %15703 = vmatpush1.bf16.msra.mxu1 %v18319_v50  ;;  %15376 = vmatprep.subr.bf16.mxu0 %v18326_v41  ;;  %v18365_v50 = vcombine.low %v9053_v40, %v9057_v48  ;;  %v18367_v41 = vcombine.low %v9054_v60, %v9058_v53  ;;  %v18376_v59 = vcombine.high %v9062_v56, %v9066_v33  ;;  %v9101_v40 = vld [vmem:[#allocation10 + $0x1890] sm:$0xff]  ;;  %v9102_v53 = vld [vmem:[#allocation10 + $0x1898] sm:$0xff] }
 0x8ac   :  { %15704 = vmatprep.subr.bf16.mxu1 %v18328_v29  ;;  %v18374_v29 = vcombine.high %v9061_v46, %v9065_v13  ;;  %v9105_v48 = vld [vmem:[#allocation10 + $0x18b0] sm:$0xff] }
 0x8ae   :  { %15377 = vmatpush1.bf16.msra.mxu0 %v18325_v35  ;;  %v9074_v35 = vld [vmem:[#allocation10 + $0x17b8] sm:$0xff] }
 0x8af   :  { %15705 = vmatpush1.bf16.msra.mxu1 %v18327_v11  ;;  %15378 = vmatprep.subr.bf16.mxu0 %v18334_v18  ;;  %v18373_v11 = vcombine.low %v9061_v46, %v9065_v13  ;;  %v18375_v18 = vcombine.low %v9062_v56, %v9066_v33  ;;  %v18384_v36 = vcombine.high %v9070_v42, %v9074_v35  ;;  %v9109_v13 = vld [vmem:[#allocation10 + $0x18d0] sm:$0xff]  ;;  %v9110_v33 = vld [vmem:[#allocation10 + $0x18d8] sm:$0xff] }
 0x8b0   :  { %15706 = vmatprep.subr.bf16.mxu1 %v18336_v0  ;;  %v18382_v0 = vcombine.high %v9069_v10, %v9073_v38  ;;  %v9113_v56 = vld [vmem:[#allocation10 + $0x18f0] sm:$0xff] }
 0x8b2   :  { %15379 = vmatpush1.bf16.msra.mxu0 %v18333_v52  ;;  %v9082_v52 = vld [vmem:[#allocation10 + $0x17f8] sm:$0xff] }
 0x8b3   :  { %15707 = vmatpush1.bf16.msra.mxu1 %v18335_v20  ;;  %15380 = vmatprep.subr.bf16.mxu0 %v18342_v14  ;;  %v18381_v20 = vcombine.low %v9069_v10, %v9073_v38  ;;  %v18383_v14 = vcombine.low %v9070_v42, %v9074_v35  ;;  %v18392_v22 = vcombine.high %v9078_v34, %v9082_v52  ;;  %v9117_v10 = vld [vmem:[#allocation10 + $0x1910] sm:$0xff]  ;;  %v9118_v42 = vld [vmem:[#allocation10 + $0x1918] sm:$0xff] }
 0x8b4   :  { %15708 = vmatprep.subr.bf16.mxu1 %v18344_v51  ;;  %v18390_v51 = vcombine.high %v9077_v19, %v9081_v6  ;;  %v9121_v38 = vld [vmem:[#allocation10 + $0x1930] sm:$0xff]  ;;  %v9122_v35 = vld [vmem:[#allocation10 + $0x1938] sm:$0xff] }
 0x8b6   :  { %15381 = vmatpush1.bf16.msra.mxu0 %v18341_v23  ;;  %v9090_v23 = vld [vmem:[#allocation10 + $0x1838] sm:$0xff] }
 0x8b7   :  { %15709 = vmatpush1.bf16.msra.mxu1 %v18343_v30  ;;  %15382 = vmatprep.subr.bf16.mxu0 %v18350_v25  ;;  %v18389_v30 = vcombine.low %v9077_v19, %v9081_v6  ;;  %v18391_v25 = vcombine.low %v9078_v34, %v9082_v52  ;;  %v18400_v45 = vcombine.high %v9086_v27, %v9090_v23  ;;  %v9129_v19 = vld [vmem:[#allocation10 + $0x1970] sm:$0xff]  ;;  %v9126_v6 = vld [vmem:[#allocation10 + $0x1958] sm:$0xff] }
 0x8b8   :  { %15710 = vmatprep.subr.bf16.mxu1 %v18352_v28  ;;  %v18398_v28 = vcombine.high %v9085_v4, %v9089_v54  ;;  %v9130_v34 = vld [vmem:[#allocation10 + $0x1978] sm:$0xff]  ;;  %v18429_v52 = vcombine.low %v9117_v10, %v9121_v38  ;;  %v9137_v4 = vld [vmem:[#allocation10 + $0x19b0] sm:$0xff] }
 0x8b9   :  { %v9134_v54 = vld [vmem:[#allocation10 + $0x1998] sm:$0xff] }
 0x8ba   :  { %15383 = vmatpush1.bf16.msra.mxu0 %v18349_v43  ;;  %v9094_v43 = vld [vmem:[#allocation10 + $0x1858] sm:$0xff] }
 0x8bb   :  { %15711 = vmatpush1.bf16.msra.mxu1 %v18351_v2  ;;  %15384 = vmatprep.subr.bf16.mxu0 %v18358_v39  ;;  %v9098_v2 = vld [vmem:[#allocation10 + $0x1878] sm:$0xff]  ;;  %v18399_v39 = vcombine.low %v9086_v27, %v9090_v23 }
 0x8bc   :  { %15712 = vmatprep.subr.bf16.mxu1 %v18360_v61  ;;  %v18406_v61 = vcombine.high %v9093_v32, %v9097_v9  ;;  %v18408_v60 = vcombine.high %v9094_v43, %v9098_v2  ;;  %v9138_v27 = vld [vmem:[#allocation10 + $0x19b8] sm:$0xff] }
 0x8be   :  { %15385 = vmatpush1.bf16.msra.mxu0 %v18357_v7  ;;  %v9106_v7 = vld [vmem:[#allocation10 + $0x18b8] sm:$0xff] }
 0x8bf   :  { %15713 = vmatpush1.bf16.msra.mxu1 %v18359_v55  ;;  %15386 = vmatprep.subr.bf16.mxu0 %v18366_v62  ;;  %v18405_v55 = vcombine.low %v9093_v32, %v9097_v9  ;;  %v18407_v62 = vcombine.low %v9094_v43, %v9098_v2  ;;  %v18416_v46 = vcombine.high %v9102_v53, %v9106_v7  ;;  %v9145_v32 = vld [vmem:[#allocation10 + $0x19f0] sm:$0xff]  ;;  %v9142_v9 = vld [vmem:[#allocation10 + $0x19d8] sm:$0xff] }
 0x8c0   :  { %15714 = vmatprep.subr.bf16.mxu1 %v18368_v58  ;;  %v18414_v58 = vcombine.high %v9101_v40, %v9105_v48  ;;  %v18447_v2 = vcombine.low %v9134_v54, %v9138_v27 }
 0x8c2   :  { %15387 = vmatpush1.bf16.msra.mxu0 %v18365_v50  ;;  %v9114_v50 = vld [vmem:[#allocation10 + $0x18f8] sm:$0xff] }
 0x8c3   :  { %15715 = vmatpush1.bf16.msra.mxu1 %v18367_v41  ;;  %15388 = vmatprep.subr.bf16.mxu0 %v18374_v29  ;;  %v18413_v41 = vcombine.low %v9101_v40, %v9105_v48  ;;  %v18422_v29 = vcombine.high %v9109_v13, %v9113_v56  ;;  %v9149_v40 = vld [vmem:[#allocation10 + $0x1a10] sm:$0xff] }
 0x8c4   :  { %15716 = vmatprep.subr.bf16.mxu1 %v18376_v59  ;;  %v18424_v59 = vcombine.high %v9110_v33, %v9114_v50  ;;  %v9153_v48 = vld [vmem:[#allocation10 + $0x1a30] sm:$0xff] }
 0x8c6   :  { %15389 = vmatpush1.bf16.msra.mxu0 %v18373_v11  ;;  %v18423_v11 = vcombine.low %v9110_v33, %v9114_v50  ;;  %v9162_v33 = vld [vmem:[#allocation10 + $0x1a78] sm:$0xff]  ;;  %v18461_v50 = vcombine.low %v9149_v40, %v9153_v48 }
 0x8c7   :  { %15717 = vmatpush1.bf16.msra.mxu1 %v18375_v18  ;;  %15390 = vmatprep.subr.bf16.mxu0 %v18382_v0  ;;  %v18430_v18 = vcombine.high %v9117_v10, %v9121_v38  ;;  %v18432_v0 = vcombine.high %v9118_v42, %v9122_v35  ;;  %v9169_v10 = vld [vmem:[#allocation10 + $0x1ab0] sm:$0xff]  ;;  %v9166_v38 = vld [vmem:[#allocation10 + $0x1a98] sm:$0xff] }
 0x8c8   :  { %15718 = vmatprep.subr.bf16.mxu1 %v18384_v36  ;;  %v9125_v36 = vld [vmem:[#allocation10 + $0x1950] sm:$0xff] }
 0x8c9   :  { %v18437_v23 = vcombine.low %v9125_v36, %v9129_v19 }
 0x8ca   :  { %15391 = vmatpush1.bf16.msra.mxu0 %v18381_v20  ;;  %v18431_v20 = vcombine.low %v9118_v42, %v9122_v35  ;;  %v9170_v42 = vld [vmem:[#allocation10 + $0x1ab8] sm:$0xff] }
 0x8cb   :  { %15719 = vmatpush1.bf16.msra.mxu1 %v18383_v14  ;;  %15392 = vmatprep.subr.bf16.mxu0 %v18390_v51  ;;  %v18438_v14 = vcombine.high %v9125_v36, %v9129_v19  ;;  %v18440_v51 = vcombine.high %v9126_v6, %v9130_v34  ;;  %v9177_v36 = vld [vmem:[#allocation10 + $0x1af0] sm:$0xff]  ;;  %v9174_v19 = vld [vmem:[#allocation10 + $0x1ad8] sm:$0xff] }
 0x8cc   :  { %15720 = vmatprep.subr.bf16.mxu1 %v18392_v22  ;;  %v9133_v22 = vld [vmem:[#allocation10 + $0x1990] sm:$0xff] }
 0x8cd   :  { %v18445_v43 = vcombine.low %v9133_v22, %v9137_v4 }
 0x8ce   :  { %15393 = vmatpush1.bf16.msra.mxu0 %v18389_v30  ;;  %v18439_v30 = vcombine.low %v9126_v6, %v9130_v34  ;;  %v9178_v6 = vld [vmem:[#allocation10 + $0x1af8] sm:$0xff] }
 0x8cf   :  { %15721 = vmatpush1.bf16.msra.mxu1 %v18391_v25  ;;  %15403 = vmatprep.subr.bf16.mxu0 %v18398_v28  ;;  %v18446_v25 = vcombine.high %v9133_v22, %v9137_v4  ;;  %v18448_v28 = vcombine.high %v9134_v54, %v9138_v27  ;;  %v9185_v22 = vld [vmem:[#allocation10 + $0x1b30] sm:$0xff]  ;;  %v9182_v4 = vld [vmem:[#allocation10 + $0x1b18] sm:$0xff] }
 0x8d0   :  { %15731 = vmatprep.subr.bf16.mxu1 %v18400_v45  ;;  %v9141_v45 = vld [vmem:[#allocation10 + $0x19d0] sm:$0xff]  ;;  %v9186_v54 = vld [vmem:[#allocation10 + $0x1b38] sm:$0xff] }
 0x8d1   :  { %15395 = vmatmul.mubr.bf16.vlgmr.msra.gmra.mrb[28].mxu0 %v19779_v37 }
 0x8d2   :  { %15723 = vmatmul.mubr.bf16.vlgmr.msra.gmra.mrb[28].mxu1 %v19779_v37  ;;  %15404 = vmatpush1.bf16.msra.mxu0 %v18397_v1  ;;  %v18415_v37 = vcombine.low %v9102_v53, %v9106_v7  ;;  %v9146_v1 = vld [vmem:[#allocation10 + $0x19f8] sm:$0xff]  ;;  %v18453_v7 = vcombine.low %v9141_v45, %v9145_v32 }
 0x8d3   :  { %15435 = vmatprep.mubr.bf16.mxu0 %v19781_v24  ;;  %15732 = vmatpush1.bf16.msra.mxu1 %v18399_v39  ;;  %v18454_v39 = vcombine.high %v9141_v45, %v9145_v32  ;;  %v9154_v53 = vld [vmem:[#allocation10 + $0x1a38] sm:$0xff]  ;;  %v9193_v45 = vld [vmem:[#allocation10 + $0x1b70] sm:$0xff] }
 0x8d4   :  { %15763 = vmatprep.mubr.bf16.mxu1 %v19781_v24  ;;  %15405 = vmatprep.subr.bf16.mxu0 %v18406_v61  ;;  %v18421_v24 = vcombine.low %v9109_v13, %v9113_v56  ;;  %v18456_v61 = vcombine.high %v9142_v9, %v9146_v1  ;;  %v9161_v13 = vld [vmem:[#allocation10 + $0x1a70] sm:$0xff]  ;;  %v9158_v56 = vld [vmem:[#allocation10 + $0x1a58] sm:$0xff] }
 0x8d5   :  { %15733 = vmatprep.subr.bf16.mxu1 %v18408_v60  ;;  %v9150_v60 = vld [vmem:[#allocation10 + $0x1a18] sm:$0xff] }
 0x8d6   :  { %15406 = vmatpush1.bf16.msra.mxu0 %v18405_v55  ;;  %v18455_v55 = vcombine.low %v9142_v9, %v9146_v1  ;;  %v9190_v32 = vld [vmem:[#allocation10 + $0x1b58] sm:$0xff] }
 0x8d7   :  { %15734 = vmatpush1.bf16.msra.mxu1 %v18407_v62  ;;  %15407 = vmatprep.subr.bf16.mxu0 %v18414_v58  ;;  %v18462_v62 = vcombine.high %v9149_v40, %v9153_v48  ;;  %v18464_v58 = vcombine.high %v9150_v60, %v9154_v53  ;;  %v9194_v9 = vld [vmem:[#allocation10 + $0x1b78] sm:$0xff]  ;;  %v9201_v40 = vld [vmem:[#allocation10 + $0x1bb0] sm:$0xff] }
 0x8d8   :  { %15735 = vmatprep.subr.bf16.mxu1 %v18416_v46  ;;  %v9157_v46 = vld [vmem:[#allocation10 + $0x1a50] sm:$0xff]  ;;  %v9198_v48 = vld [vmem:[#allocation10 + $0x1b98] sm:$0xff] }
 0x8d9   :  { %v18469_v35 = vcombine.low %v9157_v46, %v9161_v13 }
 0x8da   :  { %15408 = vmatpush1.bf16.msra.mxu0 %v18413_v41  ;;  %v18463_v41 = vcombine.low %v9150_v60, %v9154_v53  ;;  %v9202_v60 = vld [vmem:[#allocation10 + $0x1bb8] sm:$0xff] }
 0x8db   :  { %15736 = vmatpush1.bf16.msra.mxu1 %v18415_v37  ;;  %15409 = vmatprep.subr.bf16.mxu0 %v18422_v29  ;;  %v18470_v37 = vcombine.high %v9157_v46, %v9161_v13  ;;  %v18472_v29 = vcombine.high %v9158_v56, %v9162_v33  ;;  %v9209_v46 = vld [vmem:[#allocation10 + $0x1bf0] sm:$0xff]  ;;  %v9206_v13 = vld [vmem:[#allocation10 + $0x1bd8] sm:$0xff] }
 0x8dc   :  { %15737 = vmatprep.subr.bf16.mxu1 %v18424_v59  ;;  %v9165_v59 = vld [vmem:[#allocation10 + $0x1a90] sm:$0xff] }
 0x8dd   :  { %v18477_v34 = vcombine.low %v9165_v59, %v9169_v10 }
 0x8de   :  { %15410 = vmatpush1.bf16.msra.mxu0 %v18421_v24  ;;  %v18471_v24 = vcombine.low %v9158_v56, %v9162_v33  ;;  %v9210_v56 = vld [vmem:[#allocation10 + $0x1bf8] sm:$0xff] }
 0x8df   :  { %15738 = vmatpush1.bf16.msra.mxu1 %v18423_v11  ;;  %15411 = vmatprep.subr.bf16.mxu0 %v18430_v18  ;;  %v18478_v11 = vcombine.high %v9165_v59, %v9169_v10  ;;  %v18480_v18 = vcombine.high %v9166_v38, %v9170_v42  ;;  %v9217_v59 = vld [vmem:[#allocation10 + $0x1c30] sm:$0xff]  ;;  %v9214_v10 = vld [vmem:[#allocation10 + $0x1c18] sm:$0xff] }
 0x8e0   :  { %15739 = vmatprep.subr.bf16.mxu1 %v18432_v0  ;;  %v9173_v0 = vld [vmem:[#allocation10 + $0x1ad0] sm:$0xff] }
 0x8e1   :  { %v18485_v27 = vcombine.low %v9173_v0, %v9177_v36 }
 0x8e2   :  { %15412 = vmatpush1.bf16.msra.mxu0 %v18429_v52  ;;  %v18479_v52 = vcombine.low %v9166_v38, %v9170_v42  ;;  %v9218_v38 = vld [vmem:[#allocation10 + $0x1c38] sm:$0xff] }
 0x8e3   :  { %15740 = vmatpush1.bf16.msra.mxu1 %v18431_v20  ;;  %15413 = vmatprep.subr.bf16.mxu0 %v18438_v14  ;;  %v18486_v20 = vcombine.high %v9173_v0, %v9177_v36  ;;  %v18488_v14 = vcombine.high %v9174_v19, %v9178_v6  ;;  %v9225_v0 = vld [vmem:[#allocation10 + $0x1c70] sm:$0xff] }
 0x8e4   :  { %15741 = vmatprep.subr.bf16.mxu1 %v18440_v51  ;;  %v9181_v51 = vld [vmem:[#allocation10 + $0x1b10] sm:$0xff] }
 0x8e5   :  { %v18493_v1 = vcombine.low %v9181_v51, %v9185_v22 }
 0x8e6   :  { %15414 = vmatpush1.bf16.msra.mxu0 %v18437_v23  ;;  %v18487_v23 = vcombine.low %v9174_v19, %v9178_v6  ;;  %v9222_v19 = vld [vmem:[#allocation10 + $0x1c58] sm:$0xff] }
 0x8e7   :  { %15742 = vmatpush1.bf16.msra.mxu1 %v18439_v30  ;;  %15415 = vmatprep.subr.bf16.mxu0 %v18446_v25  ;;  %v18494_v30 = vcombine.high %v9181_v51, %v9185_v22  ;;  %v18496_v25 = vcombine.high %v9182_v4, %v9186_v54  ;;  %v9226_v6 = vld [vmem:[#allocation10 + $0x1c78] sm:$0xff] }
 0x8e8   :  { %15743 = vmatprep.subr.bf16.mxu1 %v18448_v28  ;;  %v9189_v28 = vld [vmem:[#allocation10 + $0x1b50] sm:$0xff]  ;;  %v18536_v51 = vcombine.high %v9222_v19, %v9226_v6  ;;  %v9230_v22 = vld [vmem:[#allocation10 + $0x1c98] sm:$0xff] }
 0x8e9   :  { %v18501_v53 = vcombine.low %v9189_v28, %v9193_v45 }
 0x8ea   :  { %15416 = vmatpush1.bf16.msra.mxu0 %v18445_v43  ;;  %v18495_v43 = vcombine.low %v9182_v4, %v9186_v54  ;;  %v9234_v4 = vld [vmem:[#allocation10 + $0x1cb8] sm:$0xff] }
 0x8eb   :  { %15744 = vmatpush1.bf16.msra.mxu1 %v18447_v2  ;;  %15417 = vmatprep.subr.bf16.mxu0 %v18454_v39  ;;  %v18502_v2 = vcombine.high %v9189_v28, %v9193_v45  ;;  %v18504_v39 = vcombine.high %v9190_v32, %v9194_v9  ;;  %v9241_v28 = vld [vmem:[#allocation10 + $0x1cf0] sm:$0xff]  ;;  %v9238_v45 = vld [vmem:[#allocation10 + $0x1cd8] sm:$0xff] }
 0x8ec   :  { %15745 = vmatprep.subr.bf16.mxu1 %v18456_v61  ;;  %v9197_v61 = vld [vmem:[#allocation10 + $0x1b90] sm:$0xff] }
 0x8ed   :  { %v18509_v33 = vcombine.low %v9197_v61, %v9201_v40 }
 0x8ee   :  { %15418 = vmatpush1.bf16.msra.mxu0 %v18453_v7  ;;  %v18503_v7 = vcombine.low %v9190_v32, %v9194_v9  ;;  %v9242_v32 = vld [vmem:[#allocation10 + $0x1cf8] sm:$0xff] }
 0x8ef   :  { %15746 = vmatpush1.bf16.msra.mxu1 %v18455_v55  ;;  %15419 = vmatprep.subr.bf16.mxu0 %v18462_v62  ;;  %v18510_v55 = vcombine.high %v9197_v61, %v9201_v40  ;;  %v18512_v62 = vcombine.high %v9198_v48, %v9202_v60  ;;  %v9246_v61 = vld [vmem:[#allocation10 + $0x1d18] sm:$0xff] }
 0x8f0   :  { %15747 = vmatprep.subr.bf16.mxu1 %v18464_v58  ;;  %v9205_v58 = vld [vmem:[#allocation10 + $0x1bd0] sm:$0xff]  ;;  %v9250_v40 = vld [vmem:[#allocation10 + $0x1d38] sm:$0xff] }
 0x8f1   :  { %v18517_v42 = vcombine.low %v9205_v58, %v9209_v46 }
 0x8f2   :  { %15420 = vmatpush1.bf16.msra.mxu0 %v18461_v50  ;;  %v18511_v50 = vcombine.low %v9198_v48, %v9202_v60  ;;  %v18551_v48 = vcombine.low %v9238_v45, %v9242_v32 }
 0x8f3   :  { %15748 = vmatpush1.bf16.msra.mxu1 %v18463_v41  ;;  %15421 = vmatprep.subr.bf16.mxu0 %v18470_v37  ;;  %v18518_v41 = vcombine.high %v9205_v58, %v9209_v46  ;;  %v18520_v37 = vcombine.high %v9206_v13, %v9210_v56  ;;  %v9258_v58 = vld [vmem:[#allocation10 + $0x1d78] sm:$0xff] }
 0x8f4   :  { %15749 = vmatprep.subr.bf16.mxu1 %v18472_v29  ;;  %v9213_v29 = vld [vmem:[#allocation10 + $0x1c10] sm:$0xff] }
 0x8f5   :  { %v18525_v36 = vcombine.low %v9213_v29, %v9217_v59 }
 0x8f6   :  { %15422 = vmatpush1.bf16.msra.mxu0 %v18469_v35  ;;  %v18519_v35 = vcombine.low %v9206_v13, %v9210_v56  ;;  %v18559_v13 = vcombine.low %v9246_v61, %v9250_v40 }
 0x8f7   :  { %15750 = vmatpush1.bf16.msra.mxu1 %v18471_v24  ;;  %15423 = vmatprep.subr.bf16.mxu0 %v18478_v11  ;;  %v18526_v24 = vcombine.high %v9213_v29, %v9217_v59  ;;  %v18528_v11 = vcombine.high %v9214_v10, %v9218_v38  ;;  %v9266_v29 = vld [vmem:[#allocation10 + $0x1db8] sm:$0xff] }
 0x8f8   :  { %15751 = vmatprep.subr.bf16.mxu1 %v18480_v18  ;;  %v9221_v18 = vld [vmem:[#allocation10 + $0x1c50] sm:$0xff] }
 0x8f9   :  { %v18533_v54 = vcombine.low %v9221_v18, %v9225_v0 }
 0x8fa   :  { %15424 = vmatpush1.bf16.msra.mxu0 %v18477_v34  ;;  %v18527_v34 = vcombine.low %v9214_v10, %v9218_v38 }
 0x8fb   :  { %15752 = vmatpush1.bf16.msra.mxu1 %v18479_v52  ;;  %15425 = vmatprep.subr.bf16.mxu0 %v18486_v20  ;;  %v18534_v52 = vcombine.high %v9221_v18, %v9225_v0  ;;  %v9229_v20 = vld [vmem:[#allocation10 + $0x1c90] sm:$0xff]  ;;  %v9274_v18 = vld [vmem:[#allocation10 + $0x1df8] sm:$0xff] }
 0x8fc   :  { %15753 = vmatprep.subr.bf16.mxu1 %v18488_v14  ;;  %v9233_v14 = vld [vmem:[#allocation10 + $0x1cb0] sm:$0xff] }
 0x8fd   :  { %v18541_v9 = vcombine.low %v9229_v20, %v9233_v14 }
 0x8fe   :  { %15426 = vmatpush1.bf16.msra.mxu0 %v18485_v27  ;;  %v18535_v27 = vcombine.low %v9222_v19, %v9226_v6 }
 0x8ff   :  { %15754 = vmatpush1.bf16.msra.mxu1 %v18487_v23  ;;  %15427 = vmatprep.subr.bf16.mxu0 %v18494_v30  ;;  %v18542_v23 = vcombine.high %v9229_v20, %v9233_v14  ;;  %v18544_v30 = vcombine.high %v9230_v22, %v9234_v4  ;;  %v9278_v20 = vld [vmem:[#allocation10 + $0x1e18] sm:$0xff] }
 0x900   :  { %15755 = vmatprep.subr.bf16.mxu1 %v18496_v25  ;;  %v9237_v25 = vld [vmem:[#allocation10 + $0x1cd0] sm:$0xff]  ;;  %v9282_v14 = vld [vmem:[#allocation10 + $0x1e38] sm:$0xff] }
 0x902   :  { %15428 = vmatpush1.bf16.msra.mxu0 %v18493_v1  ;;  %v18550_v1 = vcombine.high %v9237_v25, %v9241_v28 }
 0x903   :  { %15756 = vmatpush1.bf16.msra.mxu1 %v18495_v43  ;;  %15429 = vmatprep.subr.bf16.mxu0 %v18502_v2  ;;  %v18552_v43 = vcombine.high %v9238_v45, %v9242_v32  ;;  %v9245_v2 = vld [vmem:[#allocation10 + $0x1d10] sm:$0xff]  ;;  %v18591_v45 = vcombine.low %v9278_v20, %v9282_v14 }
 0x904   :  { %15757 = vmatprep.subr.bf16.mxu1 %v18504_v39  ;;  %v9249_v39 = vld [vmem:[#allocation10 + $0x1d30] sm:$0xff] }
 0x905   :  { %v18558_v60 = vcombine.high %v9245_v2, %v9249_v39  ;;  %v18557_v46 = vcombine.low %v9245_v2, %v9249_v39  ;;  %v9298_v2 = vld [vmem:[#allocation10 + $0x1eb8] sm:$0xff] }
 0x906   :  { %15430 = vmatpush1.bf16.msra.mxu0 %v18501_v53  ;;  %v18560_v53 = vcombine.high %v9246_v61, %v9250_v40 }
 0x907   :  { %15758 = vmatpush1.bf16.msra.mxu1 %v18503_v7  ;;  %15431 = vmatprep.subr.bf16.mxu0 %v18510_v55  ;;  %v9253_v7 = vld [vmem:[#allocation10 + $0x1d50] sm:$0xff] }
 0x908   :  { %15759 = vmatprep.subr.bf16.mxu1 %v18512_v62  ;;  %v9257_v55 = vld [vmem:[#allocation10 + $0x1d70] sm:$0xff]  ;;  %v9254_v62 = vld [vmem:[#allocation10 + $0x1d58] sm:$0xff] }
 0x909   :  { %v18566_v56 = vcombine.high %v9253_v7, %v9257_v55  ;;  %v18565_v59 = vcombine.low %v9253_v7, %v9257_v55  ;;  %v18567_v10 = vcombine.low %v9254_v62, %v9258_v58  ;;  %v9306_v7 = vld [vmem:[#allocation10 + $0x1ef8] sm:$0xff] }
 0x90a   :  { %15432 = vmatpush1.bf16.msra.mxu0 %v18509_v33  ;;  %v18568_v33 = vcombine.high %v9254_v62, %v9258_v58 }
 0x90b   :  { %15760 = vmatpush1.bf16.msra.mxu1 %v18511_v50  ;;  %15433 = vmatprep.subr.bf16.mxu0 %v18518_v41  ;;  %v9261_v50 = vld [vmem:[#allocation10 + $0x1d90] sm:$0xff] }
 0x90c   :  { %15761 = vmatprep.subr.bf16.mxu1 %v18520_v37  ;;  %v9265_v41 = vld [vmem:[#allocation10 + $0x1db0] sm:$0xff]  ;;  %v9262_v37 = vld [vmem:[#allocation10 + $0x1d98] sm:$0xff] }
 0x90d   :  { %v18574_v38 = vcombine.high %v9261_v50, %v9265_v41  ;;  %v18573_v0 = vcombine.low %v9261_v50, %v9265_v41  ;;  %v9314_v50 = vld [vmem:[#allocation10 + $0x1f38] sm:$0xff] }
 0x90e   :  { %15434 = vmatpush1.bf16.msra.mxu0 %v18517_v42  ;;  %v18576_v42 = vcombine.high %v9262_v37, %v9266_v29 }
 0x90f   :  { %15762 = vmatpush1.bf16.msra.mxu1 %v18519_v35  ;;  %15444 = vmatprep.subr.bf16.mxu0 %v18526_v24  ;;  %v9269_v35 = vld [vmem:[#allocation10 + $0x1dd0] sm:$0xff] }
 0x910   :  { %15772 = vmatprep.subr.bf16.mxu1 %v18528_v11  ;;  %v9273_v24 = vld [vmem:[#allocation10 + $0x1df0] sm:$0xff]  ;;  %v9270_v11 = vld [vmem:[#allocation10 + $0x1dd8] sm:$0xff] }
 0x911   :  { %15436 = vmatmul.mubr.bf16.vlgmr.msra.gmra.mrb[28].mxu0 %v19795_v16  ;;  %v18582_v19 = vcombine.high %v9269_v35, %v9273_v24  ;;  %v18584_v6 = vcombine.high %v9270_v11, %v9274_v18 }
 0x912   :  { %15764 = vmatmul.mubr.bf16.vlgmr.msra.gmra.mrb[28].mxu1 %v19795_v16  ;;  %15445 = vmatpush1.bf16.msra.mxu0 %v18525_v36  ;;  %v18543_v16 = vcombine.low %v9230_v22, %v9234_v4  ;;  %v18575_v36 = vcombine.low %v9262_v37, %v9266_v29  ;;  %v18583_v22 = vcombine.low %v9270_v11, %v9274_v18 }
 0x913   :  { %15476 = vmatprep.mubr.bf16.mxu0 %v19797_v47  ;;  %15773 = vmatpush1.bf16.msra.mxu1 %v18527_v34  ;;  %v9277_v34 = vld [vmem:[#allocation10 + $0x1e10] sm:$0xff] }
 0x914   :  { %15804 = vmatprep.mubr.bf16.mxu1 %v19797_v47  ;;  %15446 = vmatprep.subr.bf16.mxu0 %v18534_v52  ;;  %v18549_v47 = vcombine.low %v9237_v25, %v9241_v28  ;;  %v9281_v52 = vld [vmem:[#allocation10 + $0x1e30] sm:$0xff]  ;;  %v9290_v25 = vld [vmem:[#allocation10 + $0x1e78] sm:$0xff] }
 0x915   :  { %15774 = vmatprep.subr.bf16.mxu1 %v18536_v51  ;;  %v18581_v51 = vcombine.low %v9269_v35, %v9273_v24  ;;  %v18590_v4 = vcombine.high %v9277_v34, %v9281_v52  ;;  %v18589_v28 = vcombine.low %v9277_v34, %v9281_v52  ;;  %v9322_v35 = vld [vmem:[#allocation10 + $0x1f78] sm:$0xff]  ;;  %v19848_v52 = vld [vmem:[#allocation11] sm:$0xff] }
 0x916   :  { %15447 = vmatpush1.bf16.msra.mxu0 %v18533_v54  ;;  %v18592_v54 = vcombine.high %v9278_v20, %v9282_v14  ;;  %v9330_v34 = vld [vmem:[#allocation10 + $0x1fb8] sm:$0xff] }
 0x917   :  { %15775 = vmatpush1.bf16.msra.mxu1 %v18535_v27  ;;  %15448 = vmatprep.subr.bf16.mxu0 %v18542_v23  ;;  %v9285_v27 = vld [vmem:[#allocation10 + $0x1e50] sm:$0xff] }
 0x918   :  { %15776 = vmatprep.subr.bf16.mxu1 %v18544_v30  ;;  %v9289_v23 = vld [vmem:[#allocation10 + $0x1e70] sm:$0xff]  ;;  %v9286_v30 = vld [vmem:[#allocation10 + $0x1e58] sm:$0xff] }
 0x919   :  { %v18598_v32 = vcombine.high %v9285_v27, %v9289_v23  ;;  %v18597_v39 = vcombine.low %v9285_v27, %v9289_v23  ;;  %v18599_v61 = vcombine.low %v9286_v30, %v9290_v25  ;;  %v9348_v27 = vrot.slane %v19848_v52, %v19528_v17  ;;  %v9334_v23 = vld [vmem:[#allocation10 + $0x1fd8] sm:$0xff] }
 0x91a   :  { %15449 = vmatpush1.bf16.msra.mxu0 %v18541_v9  ;;  %v18600_v9 = vcombine.high %v9286_v30, %v9290_v25  ;;  %v9338_v30 = vld [vmem:[#allocation10 + $0x1ff8] sm:$0xff]  ;;  %v9356_v25 = vrot.slane %v19848_v52, %v19535_v21  ;;  %v19050_v21 = vld [vmem:[#allocation13 + $0xc0] sm:$0xff]  }
 0x91b   :  { %15777 = vmatpush1.bf16.msra.mxu1 %v18543_v16  ;;  %15450 = vmatprep.subr.bf16.mxu0 %v18550_v1  ;;  %v9293_v16 = vld [vmem:[#allocation10 + $0x1e90] sm:$0xff]  ;;  %v18647_v17 = vcombine.low %v9334_v23, %v9338_v30 }
 0x91c   :  { %15778 = vmatprep.subr.bf16.mxu1 %v18552_v43  ;;  %v9297_v1 = vld [vmem:[#allocation10 + $0x1eb0] sm:$0xff]  ;;  %v9294_v43 = vld [vmem:[#allocation10 + $0x1e98] sm:$0xff] }
 0x91d   :  { %v18606_v40 = vcombine.high %v9293_v16, %v9297_v1  ;;  %v18605_v55 = vcombine.low %v9293_v16, %v9297_v1  ;;  %v18607_v62 = vcombine.low %v9294_v43, %v9298_v2  ;;  %v18819_v16 = vadd.f32 %v19828_v63, %v9348_v27  ;;  %v19084_v27 = vld [vmem:[#allocation13 + $0x180] sm:$0xff]  }
 0x91e   :  { %15451 = vmatpush1.bf16.msra.mxu0 %v18549_v47  ;;  %v18608_v47 = vcombine.high %v9294_v43, %v9298_v2  ;;  %v18821_v1 = vadd.f32 %v19830_v8, %v9356_v25  ;;  %v19049_v2 = vld [vmem:[#allocation13 + $0x40] sm:$0xff]   ;;  %v19054_v8 = vld [vmem:[#allocation13 + $0xc8] sm:$0xff]  }
 0x91f   :  { %15779 = vmatpush1.bf16.msra.mxu1 %v18551_v48  ;;  %15452 = vmatprep.subr.bf16.mxu0 %v18558_v60  ;;  %v9301_v48 = vld [vmem:[#allocation10 + $0x1ed0] sm:$0xff] }
 0x920   :  { %15780 = vmatprep.subr.bf16.mxu1 %v18560_v53  ;;  %v9305_v60 = vld [vmem:[#allocation10 + $0x1ef0] sm:$0xff]  ;;  %v9302_v53 = vld [vmem:[#allocation10 + $0x1ed8] sm:$0xff] }
 0x921   :  { %v18614_v58 = vcombine.high %v9301_v48, %v9305_v60  ;;  %v18613_v41 = vcombine.low %v9301_v48, %v9305_v60  ;;  %v18615_v37 = vcombine.low %v9302_v53, %v9306_v7  ;;  %v19053_v48 = vld [vmem:[#allocation13 + $0x48] sm:$0xff]  }
 0x922   :  { %15453 = vmatpush1.bf16.msra.mxu0 %v18557_v46  ;;  %v18616_v46 = vcombine.high %v9302_v53, %v9306_v7  ;;  %v19055_v53 = vld [vmem:[#allocation13 + $0x8] sm:$0xff]  }
 0x923   :  { %15781 = vmatpush1.bf16.msra.mxu1 %v18559_v13  ;;  %15454 = vmatprep.subr.bf16.mxu0 %v18566_v56  ;;  %v9309_v13 = vld [vmem:[#allocation10 + $0x1f10] sm:$0xff] }
 0x924   :  { %15782 = vmatprep.subr.bf16.mxu1 %v18568_v33  ;;  %v9313_v56 = vld [vmem:[#allocation10 + $0x1f30] sm:$0xff]  ;;  %v9310_v33 = vld [vmem:[#allocation10 + $0x1f18] sm:$0xff] }
 0x925   :  { %v18622_v29 = vcombine.high %v9309_v13, %v9313_v56  ;;  %v18621_v24 = vcombine.low %v9309_v13, %v9313_v56  ;;  %v18623_v11 = vcombine.low %v9310_v33, %v9314_v50  ;;  %v19056_v7 = vld [vmem:[#allocation13 + $0x88] sm:$0xff]   ;;  %v19061_v13 = vld [vmem:[#allocation13 + $0x58] sm:$0xff]  }
 0x926   :  { %15455 = vmatpush1.bf16.msra.mxu0 %v18565_v59  ;;  %v18624_v59 = vcombine.high %v9310_v33, %v9314_v50  ;;  %v19062_v56 = vld [vmem:[#allocation13 + $0xd8] sm:$0xff]   ;;  %v19065_v50 = vld [vmem:[#allocation13 + $0x60] sm:$0xff]   ;;  %v19087_v25 = vld [vmem:[#allocation13 + $0x108] sm:$0xff]  }
 0x927   :  { %15783 = vmatpush1.bf16.msra.mxu1 %v18567_v10  ;;  %15456 = vmatprep.subr.bf16.mxu0 %v18574_v38  ;;  %v9317_v10 = vld [vmem:[#allocation10 + $0x1f50] sm:$0xff]  ;;  %v19064_v33 = vld [vmem:[#allocation13 + $0x98] sm:$0xff]  }
 0x928   :  { %15784 = vmatprep.subr.bf16.mxu1 %v18576_v42  ;;  %v9321_v38 = vld [vmem:[#allocation10 + $0x1f70] sm:$0xff]  ;;  %v9318_v42 = vld [vmem:[#allocation10 + $0x1f58] sm:$0xff] }
 0x929   :  { %v18630_v18 = vcombine.high %v9317_v10, %v9321_v38  ;;  %v18629_v20 = vcombine.low %v9317_v10, %v9321_v38  ;;  %v18631_v14 = vcombine.low %v9318_v42, %v9322_v35  ;;  %v19070_v10 = vld [vmem:[#allocation13 + $0xe8] sm:$0xff]  }
 0x92a   :  { %15457 = vmatpush1.bf16.msra.mxu0 %v18573_v0  ;;  %v18632_v0 = vcombine.high %v9318_v42, %v9322_v35  ;;  %v19071_v38 = vld [vmem:[#allocation13 + $0x28] sm:$0xff]   ;;  %v9344_v42 = vrot.slane %v19848_v52, %v19523_v15  ;;  %v19078_v15 = vld [vmem:[#allocation13 + $0xf8] sm:$0xff]  }
 0x92b   :  { %15785 = vmatpush1.bf16.msra.mxu1 %v18575_v36  ;;  %15458 = vmatprep.subr.bf16.mxu0 %v18582_v19  ;;  %v9325_v36 = vld [vmem:[#allocation10 + $0x1f90] sm:$0xff] }
 0x92c   :  { %15786 = vmatprep.subr.bf16.mxu1 %v18584_v6  ;;  %v9329_v19 = vld [vmem:[#allocation10 + $0x1fb0] sm:$0xff]  ;;  %v9326_v6 = vld [vmem:[#allocation10 + $0x1f98] sm:$0xff] }
 0x92d   :  { %v19072_v35 = vld [vmem:[#allocation13 + $0xa8] sm:$0xff]  }
 0x92e   :  { %15459 = vmatpush1.bf16.msra.mxu0 %v18581_v51  ;;  %v18638_v51 = vcombine.high %v9325_v36, %v9329_v19 }
 0x92f   :  { %15787 = vmatpush1.bf16.msra.mxu1 %v18583_v22  ;;  %15460 = vmatprep.subr.bf16.mxu0 %v18590_v4  ;;  %v18640_v22 = vcombine.high %v9326_v6, %v9330_v34  ;;  %v9333_v4 = vld [vmem:[#allocation10 + $0x1fd0] sm:$0xff] }
 0x930   :  { %15788 = vmatprep.subr.bf16.mxu1 %v18592_v54  ;;  %v9337_v54 = vld [vmem:[#allocation10 + $0x1ff0] sm:$0xff] }
 0x931   :  { %v18645_v43 = vcombine.low %v9333_v4, %v9337_v54 }
 0x932   :  { %15461 = vmatpush1.bf16.msra.mxu0 %v18589_v28  ;;  %v18637_v28 = vcombine.low %v9325_v36, %v9329_v19  ;;  %v18818_v36 = vadd.f32 %v19824_v57, %v9344_v42  ;;  %v19076_v19 = vld [vmem:[#allocation13 + $0xb0] sm:$0xff]   ;;  %v19083_v57 = vld [vmem:[#allocation13 + $0x100] sm:$0xff]  }
 0x933   :  { %15789 = vmatpush1.bf16.msra.mxu1 %v18591_v45  ;;  %15462 = vmatprep.subr.bf16.mxu0 %v18598_v32  ;;  %v18639_v45 = vcombine.low %v9326_v6, %v9330_v34  ;;  %v18646_v32 = vcombine.high %v9333_v4, %v9337_v54  ;;  %v19077_v6 = vld [vmem:[#allocation13 + $0x78] sm:$0xff]   ;;  %v19082_v4 = vld [vmem:[#allocation13 + $0x1c0] sm:$0xff]  }
 0x934   :  { %15790 = vmatprep.subr.bf16.mxu1 %v18600_v9  ;;  %v18648_v9 = vcombine.high %v9334_v23, %v9338_v30  ;;  %v19085_v23 = vld [vmem:[#allocation13 + $0x148] sm:$0xff]  }
 0x935   :  { %v19086_v30 = vld [vmem:[#allocation13 + $0x1c8] sm:$0xff]  }
 0x936   :  { %15463 = vmatpush1.bf16.msra.mxu0 %v18597_v39  ;;  %v15814_v39 = vmax.f32 %v18819_v16, 0.0  ;;  %v19092_v16 = vld [vmem:[#allocation13 + $0x190] sm:$0xff]  }
 0x937   :  { %15791 = vmatpush1.bf16.msra.mxu1 %v18599_v61  ;;  %15464 = vmatprep.subr.bf16.mxu0 %v18606_v40  ;;  %v15816_v61 = vmax.f32 %v18821_v1, 0.0  ;;  %v19051_v40 = vld [vmem:[#allocation13] sm:$0xff]   ;;  %v19093_v1 = vld [vmem:[#allocation13 + $0x158] sm:$0xff]  }
 0x938   :  { %15792 = vmatprep.subr.bf16.mxu1 %v18608_v47  ;;  %v19052_v47 = vld [vmem:[#allocation13 + $0x80] sm:$0xff]   ;;  %v15822_v63 = vpack.c.bf16 %v15814_v39, %v15814_v39 }
 0x939   :  { %v15824_v60 = vpack.c.bf16 %v15816_v61, %v15816_v61  ;;  %v19098_v39 = vld [vmem:[#allocation13 + $0x1e0] sm:$0xff]  }
 0x93a   :  { %15465 = vmatpush1.bf16.msra.mxu0 %v18605_v55  ;;  %v19057_v55 = vld [vmem:[#allocation13 + $0x50] sm:$0xff]   ;;  %v19099_v61 = vld [vmem:[#allocation13 + $0x120] sm:$0xff]  }
 0x93b   :  { %15793 = vmatpush1.bf16.msra.mxu1 %v18607_v62  ;;  %15466 = vmatprep.subr.bf16.mxu0 %v18614_v58  ;;  %v19058_v62 = vld [vmem:[#allocation13 + $0xd0] sm:$0xff]  }
 0x93c   :  { %15794 = vmatprep.subr.bf16.mxu1 %v18616_v46  ;;  %v19059_v58 = vld [vmem:[#allocation13 + $0x10] sm:$0xff]  }
 0x93d   :  { %v19060_v46 = vld [vmem:[#allocation13 + $0x90] sm:$0xff]  }
 0x93e   :  { %15467 = vmatpush1.bf16.msra.mxu0 %v18613_v41  ;;  %v19066_v41 = vld [vmem:[#allocation13 + $0xe0] sm:$0xff]  }
 0x93f   :  { %15795 = vmatpush1.bf16.msra.mxu1 %v18615_v37  ;;  %15468 = vmatprep.subr.bf16.mxu0 %v18622_v29  ;;  %v19067_v37 = vld [vmem:[#allocation13 + $0x20] sm:$0xff]  }
 0x940   :  { %15796 = vmatprep.subr.bf16.mxu1 %v18624_v59  ;;  %v19068_v29 = vld [vmem:[#allocation13 + $0xa0] sm:$0xff]   ;;  %v19069_v59 = vld [vmem:[#allocation13 + $0x68] sm:$0xff]  }
 0x942   :  { %15469 = vmatpush1.bf16.msra.mxu0 %v18621_v24  ;;  %v19073_v24 = vld [vmem:[#allocation13 + $0x70] sm:$0xff]  }
 0x943   :  { %15797 = vmatpush1.bf16.msra.mxu1 %v18623_v11  ;;  %15470 = vmatprep.subr.bf16.mxu0 %v18630_v18  ;;  %v9352_v11 = vrot.slane %v19848_v52, %v19562_v31  ;;  %v19074_v18 = vld [vmem:[#allocation13 + $0xf0] sm:$0xff]   ;;  %v19080_v31 = vld [vmem:[#allocation13 + $0xb8] sm:$0xff]  }
 0x944   :  { %15798 = vmatprep.subr.bf16.mxu1 %v18632_v0  ;;  %v19075_v0 = vld [vmem:[#allocation13 + $0x30] sm:$0xff]  }
 0x945   :  { %v18820_v34 = vadd.f32 %v19826_v49, %v9352_v11 }
 0x946   :  { %15471 = vmatpush1.bf16.msra.mxu0 %v18629_v20  ;;  %v19079_v20 = vld [vmem:[#allocation13 + $0x38] sm:$0xff]  }
 0x947   :  { %15799 = vmatpush1.bf16.msra.mxu1 %v18631_v14  ;;  %15472 = vmatprep.subr.bf16.mxu0 %v18638_v51  ;;  %v15813_v14 = vmax.f32 %v18818_v36, 0.0  ;;  %v19081_v51 = vld [vmem:[#allocation13 + $0x140] sm:$0xff]  }
 0x948   :  { %15800 = vmatprep.subr.bf16.mxu1 %v18640_v22  ;;  %v15815_v22 = vmax.f32 %v18820_v34, 0.0 }
 0x949   :  { %v15821_v54 = vpack.c.bf16 %v15813_v14, %v15813_v14 }
 0x94a   :  { %15473 = vmatpush1.bf16.msra.mxu0 %v18637_v28  ;;  %v15823_v49 = vpack.c.bf16 %v15815_v22, %v15815_v22  ;;  %v19088_v28 = vld [vmem:[#allocation13 + $0x188] sm:$0xff]  }
 0x94b   :  { %15801 = vmatpush1.bf16.msra.mxu1 %v18639_v45  ;;  %15474 = vmatprep.subr.bf16.mxu0 %v18646_v32  ;;  %v19089_v45 = vld [vmem:[#allocation13 + $0x150] sm:$0xff]  }
 0x94c   :  { %15802 = vmatprep.subr.bf16.mxu1 %v18648_v9  ;;  %v19090_v32 = vld [vmem:[#allocation13 + $0x1d0] sm:$0xff]  }
 0x94d   :  { %v19091_v9 = vld [vmem:[#allocation13 + $0x110] sm:$0xff]  }
 0x94e   :  { %15475 = vmatpush1.bf16.msra.mxu0 %v18645_v43  ;;  %v19094_v43 = vld [vmem:[#allocation13 + $0x1d8] sm:$0xff]  }
 0x94f   :  { %15803 = vmatpush1.bf16.msra.mxu1 %v18647_v17  ;;  %18714 = vmatprep.subr.bf16.mxu0 %v19049_v2  ;;  %v19095_v17 = vld [vmem:[#allocation13 + $0x118] sm:$0xff]  }
 0x950   :  { %18736 = vmatprep.subr.bf16.mxu1 %v19050_v21  ;;  %v19096_v2 = vld [vmem:[#allocation13 + $0x198] sm:$0xff]   ;;  %v19097_v21 = vld [vmem:[#allocation13 + $0x160] sm:$0xff]  }
 0x951   :  { %15477 = vmatmul.mubr.bf16.vlgmr.msra.gmra.mrb[28].mxu0 %v19806_v5 }
 0x952   :  { %15805 = vmatmul.mubr.bf16.vlgmr.msra.gmra.mrb[28].mxu1 %v19806_v5  ;;  %18715 = vmatpush3.bf16.msra.mxu0 %v19051_v40  ;;  %v19063_v5 = vld [vmem:[#allocation13 + $0x18] sm:$0xff]   ;;  %v19100_v40 = vld [vmem:[#allocation13 + $0x1a0] sm:$0xff]  }
 0x953   :  { %16380 = vmatprep.mubr.bf16.mxu0 %v15822_v63  ;;  %18737 = vmatpush3.bf16.msra.mxu1 %v19052_v47  ;;  %v19101_v47 = vld [vmem:[#allocation13 + $0x168] sm:$0xff]  }
 0x954   :  { %16420 = vmatprep.mubr.bf16.mxu1 %v15824_v60  ;;  %18716 = vmatprep.subr.bf16.mxu0 %v19053_v48  ;;  %v19102_v48 = vld [vmem:[#allocation13 + $0x1e8] sm:$0xff]   ;;  %v19105_v60 = vld [vmem:[#allocation13 + $0x170] sm:$0xff]  }
 0x955   :  { %18738 = vmatprep.subr.bf16.mxu1 %v19054_v8  ;;  %v19103_v63 = vld [vmem:[#allocation13 + $0x128] sm:$0xff]  }
 0x956   :  { %18717 = vmatpush3.bf16.msra.mxu0 %v19055_v53  ;;  %v19104_v8 = vld [vmem:[#allocation13 + $0x1a8] sm:$0xff]   ;;  %v19106_v53 = vld [vmem:[#allocation13 + $0x1f0] sm:$0xff]  }
 0x957   :  { %18739 = vmatpush3.bf16.msra.mxu1 %v19056_v7  ;;  %18718 = vmatprep.subr.bf16.mxu0 %v19057_v55  ;;  %v19107_v7 = vld [vmem:[#allocation13 + $0x130] sm:$0xff]  }
 0x958   :  { %18740 = vmatprep.subr.bf16.mxu1 %v19058_v62  ;;  %v19108_v55 = vld [vmem:[#allocation13 + $0x1b0] sm:$0xff]   ;;  %v19109_v62 = vld [vmem:[#allocation13 + $0x178] sm:$0xff]  }
 0x95a   :  { %18719 = vmatpush3.bf16.msra.mxu0 %v19059_v58  ;;  %v19110_v58 = vld [vmem:[#allocation13 + $0x1f8] sm:$0xff]  }
 0x95b   :  { %18741 = vmatpush3.bf16.msra.mxu1 %v19060_v46  ;;  %18720 = vmatprep.subr.bf16.mxu0 %v19061_v13  ;;  %v19111_v46 = vld [vmem:[#allocation13 + $0x138] sm:$0xff]  }
 0x95c   :  { %18742 = vmatprep.subr.bf16.mxu1 %v19062_v56  ;;  %v19112_v13 = vld [vmem:[#allocation13 + $0x1b8] sm:$0xff]   ;;  %v9360_v56 = vrot.slane %v19848_v52, %v19582_v12 }
 0x95e   :  { %18721 = vmatpush3.bf16.msra.mxu0 %v19063_v5  ;;  %v9368_v5 = vrot.slane %v19848_v52, %v19602_v3 }
 0x95f   :  { %18743 = vmatpush3.bf16.msra.mxu1 %v19064_v33  ;;  %18722 = vmatprep.subr.bf16.mxu0 %v19065_v50  ;;  %v9364_v33 = vrot.slane %v19848_v52, %v19565_v44  ;;  %v9372_v50 = vrot.slane %v19848_v52, %v19585_v26 }
 0x960   :  { %18744 = vmatprep.subr.bf16.mxu1 %v19066_v41 }
 0x962   :  { %18723 = vmatpush3.bf16.msra.mxu0 %v19067_v37 }
 0x963   :  { %18745 = vmatpush3.bf16.msra.mxu1 %v19068_v29  ;;  %18724 = vmatprep.subr.bf16.mxu0 %v19069_v59 }
 0x964   :  { %18746 = vmatprep.subr.bf16.mxu1 %v19070_v10 }
 0x966   :  { %18725 = vmatpush3.bf16.msra.mxu0 %v19071_v38 }
 0x967   :  { %18747 = vmatpush3.bf16.msra.mxu1 %v19072_v35  ;;  %18726 = vmatprep.subr.bf16.mxu0 %v19073_v24 }
 0x968   :  { %18748 = vmatprep.subr.bf16.mxu1 %v19074_v18 }
 0x96a   :  { %18727 = vmatpush3.bf16.msra.mxu0 %v19075_v0 }
 0x96b   :  { %18749 = vmatpush3.bf16.msra.mxu1 %v19076_v19  ;;  %18728 = vmatprep.subr.bf16.mxu0 %v19077_v6 }
 0x96c   :  { %18750 = vmatprep.subr.bf16.mxu1 %v19078_v15 }
 0x96e   :  { %18729 = vmatpush3.bf16.msra.mxu0 %v19079_v20  ;;  %v18649_v20 = vld [vmem:[#allocation14] ss:$0 sm:$0xff] }
 0x96f   :  { %18751 = vmatpush3.bf16.msra.mxu1 %v19080_v31  ;;  %18758 = vmatprep.subr.bf16.mxu0 %v19081_v51 }
 0x970   :  { %18780 = vmatprep.subr.bf16.mxu1 %v19082_v4 }
 0x971   :  { %16381 = vmatmul.mubr.bf16.vlgmr.msra.gmra.mrb[32].mxu0 %v15821_v54 }
 0x972   :  { %16421 = vmatmul.mubr.bf16.vlgmr.msra.gmra.mrb[32].mxu1 %v15823_v49  ;;  %18759 = vmatpush3.bf16.msra.mxu0 %v19083_v57 }
 0x973   :  { %18781 = vmatpush3.bf16.msra.mxu1 %v19084_v27  ;;  %18760 = vmatprep.subr.bf16.mxu0 %v19085_v23 }
 0x974   :  { %18782 = vmatprep.subr.bf16.mxu1 %v19086_v30 }
 0x976   :  { %18761 = vmatpush3.bf16.msra.mxu0 %v19087_v25 }
 0x977   :  { %18783 = vmatpush3.bf16.msra.mxu1 %v19088_v28  ;;  %18762 = vmatprep.subr.bf16.mxu0 %v19089_v45 }
 0x978   :  { %18784 = vmatprep.subr.bf16.mxu1 %v19090_v32 }
 0x97a   :  { %18763 = vmatpush3.bf16.msra.mxu0 %v19091_v9 }
 0x97b   :  { %18785 = vmatpush3.bf16.msra.mxu1 %v19092_v16  ;;  %18764 = vmatprep.subr.bf16.mxu0 %v19093_v1 }
 0x97c   :  { %18786 = vmatprep.subr.bf16.mxu1 %v19094_v43 }
 0x97e   :  { %18765 = vmatpush3.bf16.msra.mxu0 %v19095_v17 }
 0x97f   :  { %18787 = vmatpush3.bf16.msra.mxu1 %v19096_v2  ;;  %18766 = vmatprep.subr.bf16.mxu0 %v19097_v21 }
 0x980   :  { %18788 = vmatprep.subr.bf16.mxu1 %v19098_v39 }
 0x982   :  { %18767 = vmatpush3.bf16.msra.mxu0 %v19099_v61 }
 0x983   :  { %18789 = vmatpush3.bf16.msra.mxu1 %v19100_v40  ;;  %18768 = vmatprep.subr.bf16.mxu0 %v19101_v47 }
 0x984   :  { %18790 = vmatprep.subr.bf16.mxu1 %v19102_v48 }
 0x986   :  { %18769 = vmatpush3.bf16.msra.mxu0 %v19103_v63 }
 0x987   :  { %18791 = vmatpush3.bf16.msra.mxu1 %v19104_v8  ;;  %18770 = vmatprep.subr.bf16.mxu0 %v19105_v60 }
 0x988   :  { %18792 = vmatprep.subr.bf16.mxu1 %v19106_v53 }
 0x98a   :  { %18771 = vmatpush3.bf16.msra.mxu0 %v19107_v7 }
 0x98b   :  { %18793 = vmatpush3.bf16.msra.mxu1 %v19108_v55  ;;  %18772 = vmatprep.subr.bf16.mxu0 %v19109_v62 }
 0x98c   :  { %18794 = vmatprep.subr.bf16.mxu1 %v19110_v58 }
 0x98e   :  { %18773 = vmatpush3.bf16.msra.mxu0 %v19111_v46 }
 0x98f   :  { %18795 = vmatpush3.bf16.msra.mxu1 %v19112_v13 }
 0xa24   :  { %v15478_v41 = vpop.f32.mrb[28].mxu0 }
 0xa25   :  { %v18822_v37 = vadd.f32 %v15478_v41, %v9360_v56  ;;  %v15806_v29 = vpop.f32.mrb[28].mxu1  ;;  %v15480_v59 = vpop.f32.mrb[29].mxu0 }
 0xa26   :  { %v18824_v10 = vadd.f32 %v15806_v29, %v9368_v5  ;;  %v18823_v38 = vadd.f32 %v15480_v59, %v9364_v33  ;;  %v15808_v42 = vpop.f32.mrb[29].mxu1  ;;  %v15482_v35 = vpop.f32.mrb[30].mxu0 }
 0xa27   :  { %v15817_v24 = vmax.f32 %v18822_v37, 0.0  ;;  %v18825_v11 = vadd.f32 %v15808_v42, %v9372_v50  ;;  %v15810_v12 = vpop.f32.mrb[30].mxu1  ;;  %v15483_v18 = vpop.f32.mrb[31].mxu0 }
 0xa28   :  { %v15819_v0 = vmax.f32 %v18824_v10, 0.0  ;;  %v15818_v3 = vmax.f32 %v18823_v38, 0.0  ;;  %v15811_v36 = vpop.f32.mrb[31].mxu1 }
 0xa29   :  { %v15820_v19 = vmax.f32 %v18825_v11, 0.0  ;;  %v15825_v6 = vpack.c.bf16 %v15817_v24, %v15817_v24 }
 0xa2a   :  { %v15826_v44 = vpack.c.bf16 %v15818_v3, %v15818_v3  ;;  %v15827_v26 = vpack.c.bf16 %v15819_v0, %v15819_v0 }
 0xa2b   :  { %v15828_v34 = vpack.c.bf16 %v15820_v19, %v15820_v19 }
 0xa2c   :  { %16460 = vmatprep.mubr.bf16.mxu0 %v15826_v44 }
 0xa2d   :  { %16500 = vmatprep.mubr.bf16.mxu1 %v15828_v34  ;;  %16461 = vmatmul.mubr.bf16.vlgmr.msra.gmra.mrb[36].mxu0 %v15825_v6 }
 0xa2e   :  { %16501 = vmatmul.mubr.bf16.vlgmr.msra.gmra.mrb[36].mxu1 %v15827_v26 }
 0xa44   :  { %v18730_v52 = vpop.f32.mrb[32].mxu0 }
 0xa45   :  { %v18752_v15 = vpop.f32.mrb[32].mxu1  ;;  %v18731_v14 = vpop.f32.mrb[33].mxu0 }
 0xa46   :  { %v18732_v31 = vadd.f32 %v18731_v14, %v18730_v52  ;;  %v18753_v51 = vpop.f32.mrb[33].mxu1  ;;  %v18733_v22 = vpop.f32.mrb[34].mxu0 }
 0xa47   :  { %v18754_v4 = vadd.f32 %v18753_v51, %v18752_v15  ;;  %v18755_v57 = vpop.f32.mrb[34].mxu1  ;;  %v18734_v54 = vpop.f32.mrb[35].mxu0 }
 0xa48   :  { %v16383_v27 = vadd.f32 %v18732_v31, %v18649_v20  ;;  %v18756_v23 = vpop.f32.mrb[35].mxu1 }
 0xa4a   :  { %v16423_v49 = vadd.f32 %v18754_v4, %v16383_v27 }
 0xb00   :  { %v18774_v30 = vpop.f32.mrb[36].mxu0 }
 0xb01   :  { %v18796_v25 = vpop.f32.mrb[36].mxu1  ;;  %v18775_v28 = vpop.f32.mrb[37].mxu0 }
 0xb02   :  { %v18776_v45 = vadd.f32 %v18775_v28, %v18774_v30  ;;  %v18797_v32 = vpop.f32.mrb[37].mxu1  ;;  %v18777_v9 = vpop.f32.mrb[38].mxu0 }
 0xb03   :  { %v18798_v16 = vadd.f32 %v18797_v32, %v18796_v25  ;;  %v18799_v1 = vpop.f32.mrb[38].mxu1  ;;  %v18778_v43 = vpop.f32.mrb[39].mxu0 }
 0xb04   :  { %v16463_v17 = vadd.f32 %v18776_v45, %v16423_v49  ;;  %v18800_v2 = vpop.f32.mrb[39].mxu1 }
 0xb06   :  { %v16503_v21 = vadd.f32 %v18798_v16, %v16463_v17 }
 0xb08   :  { %16508 = vmax.xlane.f32.xlu0 %v16503_v21 }
 0xb95   :  { %v16509_v39 = vpop.xlane.xlu0 %16508 }
 0xb96   :  { %v16510_v61 = vsub.f32 %v16503_v21, %v16509_v39 }
 0xb98   :  { %v16511_v40 = vmul.f32 1.442695, %v16510_v61 }
 0xb9a   :  { %19113 = vpow2.f32 %v16511_v40 }
 0xba4   :  { %v19114_v47 = vpop.eup %19113 }
 0xba5   :  { %16513 = vadd.xlane.f32.xlu0 %v19114_v47 }
 0xc32   :  { %v16514_v48 = vpop.xlane.xlu0 %16513 }
 0xc33   :  { %19115 = vrcp.f32 %v16514_v48 }
 0xc3d   :  { %v19116_v63 = vpop.eup %19115 }
 0xc3e   :  { %v16516_v8 = vmul.f32 %v19116_v63, %v19114_v47 }
 0xc40   :  { %16517 = vst [vmem:[#allocation16] sm:$0xff] %v16516_v8 }
 0xc41   :  { %19307 = shalt.err (!%p19304_p12)
}
 0xc42   :  { %s19308_s20 = scalar_lea.hbm %s19893_s9, 128 }
 0xc43   :  { %p19309_p13 = scmp.ne.s32.totalorder %s19893_s9, %s19308_s20  ;;  %p19312_p0 = scmp.lt.u32.totalorder %s19308_s20, %s19893_s9 }
 0xc45   :  { %p19314_p1 = pnand %p19312_p0, %p19309_p13 }
 0xc47   :  { %19317 = shalt.err (!%p19314_p1)
}
 0xc48   :  { %16527 = dma.vmem_to_hbm [thread:$0]  %s16525_s3, 128, %s19893_s9, [#allocation4]  }
 0xc49   :  { %19328 = dma.done.wait [#allocation4], 128  }
 0xc4a   :  { %19329 = vsyncadd [#allocation4], 4294967168 }
 0xc4b   :  { %16531 = vsyncpa [#allocation3], 1 }
 0xc4c   :  { %16532 = vsyncpa [#allocation6], 1 }
 0xc4d   :  { %16533 = vsyncpa [#allocation9], 1 }
 0xc4e   :  { %16534 = vsyncpa [#allocation12], 1 }
 0xc4f   :  { %16535 = vsyncpa [#allocation15], 1 }
 0xc50   :  { %16536 = vsyncpa [#allocation4], 1 }

</bundles_post_ra>
